<compile_context>
chip_gen: v7x
topology: tpu7x:2x2x1
jax: 0.10.0
libtpu: 0.0.40
codegen_flags: <defaults>
</compile_context>

<pallas_src>
import functools
import math

import jax
import jax.numpy as jnp
from jax import lax
from jax.experimental import pallas as pl
from jax.experimental.pallas import tpu as pltpu

NUM_GROUPS = 8        # GroupNorm groups (fixed by the module)
NUM_HEADS = 4         # MHA heads (fixed by the module)
EPS = 1e-5            # GroupNorm eps (PyTorch default)
MAX_BATCH_UNROLL = 8  # cap on batch elements per grid step (static unroll bound)


def attention_block_kernel(x_ref, gn_w_ref, gn_b_ref, wqkv_ref, bqkv_ref,
                           wo_ref, bo_ref, o_ref, head_acc_ref, *, exp_dtype):
    """One grid step handles a (Bblk, C, S) channel-major slice of the batch."""
    x = x_ref[...].astype(jnp.float32)               # (Bblk, C, S)
    Bblk, C, S = x.shape
    G = NUM_GROUPS
    cg = C // G
    hd = C // NUM_HEADS
    inv_n = 1.0 / float(cg * S)

    # ---------------- GroupNorm (stats per (b, group) via tile-aligned reshape) ---
    # cg == 8 == one f32 sublane tile, so the (Bblk, C, S) -> (Bblk, G, cg, S)
    # split is layout-free; reductions stay on the trailing (sublane, lane) dims.
    xg = x.reshape(Bblk, G, cg, S)
    s1 = jnp.sum(xg, axis=3, keepdims=True)                       # (Bblk, G, cg, 1)
    g_mean = jnp.sum(s1, axis=2, keepdims=True) * inv_n           # (Bblk, G, 1, 1)
    xc = xg - g_mean
    v1 = jnp.sum(xc * xc, axis=3, keepdims=True)                  # (Bblk, G, cg, 1)
    g_var = jnp.sum(v1, axis=2, keepdims=True) * inv_n            # (Bblk, G, 1, 1)
    g_inv = lax.rsqrt(g_var + EPS)
    h = (xc * g_inv).reshape(Bblk, C, S)
    gn_w = gn_w_ref[...]                                          # (C, 1)
    gn_b = gn_b_ref[...]                                          # (C, 1)
    h = h * gn_w[None, :, :] + gn_b[None, :, :]                   # (Bblk, C, S)
    h_bf = h.astype(jnp.bfloat16)

    wqkv = wqkv_ref[...]          # (3C, C) bf16, Q rows pre-scaled by 1/sqrt(hd)
    bqkv = bqkv_ref[...]          # (3C, 1) f32, Q rows pre-scaled
    wo = wo_ref[...]              # (C, C) bf16
    bo = bo_ref[...]              # (C, 1) f32
    ones_row = jnp.ones((1, S), jnp.bfloat16)   # hoisted: softmax-denominator lhs

    for b in range(Bblk):         # static unroll (Bblk <= MAX_BATCH_UNROLL)
        # ---- QKV projection: weight-stationary 2-D matmul (3C, C) @ (C, S) ----
        qkv = jnp.dot(wqkv, h_bf[b],
                      preferred_element_type=jnp.float32) + bqkv   # (3C, S)
        # Q goes token-major once (small XLU transpose); K/V stay channel-major.
        q_t = jnp.swapaxes(qkv[:C, :], 0, 1).astype(jnp.bfloat16)  # (S, C), pre-scaled
        k_bf = qkv[C:2 * C, :].astype(jnp.bfloat16)                # (C, S)
        v_bf = qkv[2 * C:, :].astype(jnp.bfloat16)                 # (C, S)

        for hh in range(NUM_HEADS):                                # static unroll (4)
            lo = hh * hd
            qh = q_t[:, lo:lo + hd]                                # (S, hd)
            kh = k_bf[lo:lo + hd, :]                               # (hd, S)
            vh = v_bf[lo:lo + hd, :]                               # (hd, S)

            s = jnp.dot(qh, kh, preferred_element_type=jnp.float32)   # (S, S)
            s = s - jnp.max(s, axis=-1, keepdims=True)
            # unnormalized probabilities; bf16 exp on bf16-EUP chips
            p = jnp.exp(s.astype(exp_dtype)).astype(jnp.bfloat16)     # (S, S)

            # o_h[d, i] = sum_j v[d, j] * p[i, j]   (rhs-transposed contraction)
            oh_un = lax.dot_general(vh, p, (((1,), (1,)), ((), ())),
                                    preferred_element_type=jnp.float32)   # (hd, S)
            # softmax denominator directly in (1, S) layout via a ones-row matmul
            den = lax.dot_general(ones_row, p, (((1,), (1,)), ((), ())),
                                  preferred_element_type=jnp.float32)     # (1, S)
            inv_den = pl.reciprocal(den, approx=True)                     # (1, S)
            oh = oh_un * inv_den                                          # (hd, S)

            # concat-into-scratch: tile-aligned sublane write (hd = 16)
            head_acc_ref[b, lo:lo + hd, :] = oh.astype(jnp.bfloat16)

        # ---- merged out-projection: ONE (C, C) @ (C, S) matmul, K = C ----
        attn = jnp.dot(wo, head_acc_ref[b],
                       preferred_element_type=jnp.float32) + bo           # (C, S)
        o_ref[b] = (x[b] + attn).astype(o_ref.dtype)                      # residual


def _device_info():
    """Generation-aware (vmem budget, vmem_limit_bytes, exp dtype, multi-TC flag)."""
    try:
        kind = jax.devices()[0].device_kind.lower()
    except Exception:
        kind = ""
    is_v7 = "7" in kind                                  # v7x: 64 MiB VMEM, 2 TCs
    if is_v7:
        budget, limit = 32 << 20, 44 << 20
    elif ("v6" in kind) or ("v5" in kind) or ("v4" in kind):
        budget, limit = 48 << 20, 64 << 20               # 128 MiB physical VMEM
    else:
        budget, limit = 12 << 20, None                   # unknown: default scoped VMEM
    exp_dtype = jnp.bfloat16 if (("v6" in kind) or is_v7) else jnp.float32
    return budget, limit, exp_dtype, is_v7


def _pick_batch_block(B, C, S, budget, multi_tc):
    """Batch elements per grid step, bounded by a generation-aware VMEM budget."""
    per_elem = (2 * 2 * C * S * 4        # double-buffered in + out blocks
                + 10 * C * S * 4         # x, h, attn, residual staging (f32)
                + 18 * C * S             # qkv f32 + bf16 q/k/v copies
                + 2 * S * S * 4          # scores + probs (f32 upper bound)
                + 2 * C * S)             # bf16 head-output scratch
    bblk = max(1, min(B, budget // per_elem, MAX_BATCH_UNROLL))
    if multi_tc and B >= 2:
        bblk = min(bblk, max(1, B // 2))   # keep >= 2 grid steps so both TCs get work
    while B % bblk:
        bblk -= 1
    return bblk


@jax.jit
def attention_block(x_nchw, gn_w, gn_b, wqkv, bqkv, wo, bo):
    """NCHW in, NCHW out.  Channel-major kernel: no wrapper transposes or casts."""
    B, C, H, W = x_nchw.shape
    S = H * W
    assert C % NUM_GROUPS == 0 and C % NUM_HEADS == 0
    hd = C // NUM_HEADS

    x_bcs = x_nchw.reshape(B, C, S)                       # free reshape, keeps dtype

    # fold the 1/sqrt(head_dim) attention scale into the Q rows of in_proj
    qscale = jnp.concatenate([jnp.full((C,), 1.0 / math.sqrt(hd), jnp.float32),
                              jnp.ones((2 * C,), jnp.float32)])
    wqkv_s = (wqkv.astype(jnp.float32) * qscale[:, None]).astype(jnp.bfloat16)  # (3C, C)
    bqkv_s = (bqkv.astype(jnp.float32) * qscale).reshape(3 * C, 1)              # (3C, 1)
    wo_bf = wo.astype(jnp.bfloat16)                                             # (C, C)
    bo_2d = bo.astype(jnp.float32).reshape(C, 1)                                # (C, 1)
    gn_w2 = gn_w.astype(jnp.float32).reshape(C, 1)
    gn_b2 = gn_b.astype(jnp.float32).reshape(C, 1)

    budget, vmem_limit, exp_dtype, multi_tc = _device_info()
    bblk = _pick_batch_block(B, C, S, budget, multi_tc)
    grid = (B // bblk,)
    # TODO(synk): for B == 1 on 2-TensorCore parts (v7x), add a second parallel grid
    #             axis (heads / query blocks) so both cores get work.
    # TODO(synk): for large S, switch the inner loop to a KV-blocked online-softmax
    #             (flash) formulation so the (S, S) score tensor never materializes.

    cp_kwargs = dict(dimension_semantics=("parallel",))
    if vmem_limit is not None:
        cp_kwargs["vmem_limit_bytes"] = int(vmem_limit)

    out_bcs = pl.pallas_call(
        functools.partial(attention_block_kernel, exp_dtype=exp_dtype),
        out_shape=jax.ShapeDtypeStruct((B, C, S), x_nchw.dtype),
        grid_spec=pltpu.PrefetchScalarGridSpec(
            num_scalar_prefetch=0,
            grid=grid,
            in_specs=[
                pl.BlockSpec((bblk, C, S), lambda b: (b, 0, 0)),   # x (channel-major)
                pl.BlockSpec((C, 1), lambda b: (0, 0)),            # GroupNorm weight
                pl.BlockSpec((C, 1), lambda b: (0, 0)),            # GroupNorm bias
                pl.BlockSpec((3 * C, C), lambda b: (0, 0)),        # in_proj W (scaled, bf16)
                pl.BlockSpec((3 * C, 1), lambda b: (0, 0)),        # in_proj bias (scaled)
                pl.BlockSpec((C, C), lambda b: (0, 0)),            # out_proj W (bf16)
                pl.BlockSpec((C, 1), lambda b: (0, 0)),            # out_proj bias
            ],
            out_specs=pl.BlockSpec((bblk, C, S), lambda b: (b, 0, 0)),
            scratch_shapes=[pltpu.VMEM((bblk, C, S), jnp.bfloat16)],   # head concat buf
        ),
        compiler_params=pltpu.CompilerParams(**cp_kwargs),
    )(x_bcs, gn_w2, gn_b2, wqkv_s, bqkv_s, wo_bf, bo_2d)

    return out_bcs.reshape(B, C, H, W)


def reference(x_nchw, gn_w, gn_b, wqkv, bqkv, wo, bo):
    """Pure-JAX reference mirroring the PyTorch forward (sanity check)."""
    B, C, H, W = x_nchw.shape
    xg = x_nchw.reshape(B, NUM_GROUPS, C // NUM_GROUPS, H, W)
    mean = xg.mean(axis=(2, 3, 4), keepdims=True)
    var = xg.var(axis=(2, 3, 4), keepdims=True)
    hn = (xg - mean) / jnp.sqrt(var + EPS)
    hn = hn.reshape(B, C, H, W) * gn_w.reshape(1, C, 1, 1) + gn_b.reshape(1, C, 1, 1)
    h = jnp.transpose(hn.reshape(B, C, H * W), (0, 2, 1))          # (B, S, C)
    qkv = h @ wqkv.T + bqkv
    q, k, v = jnp.split(qkv, 3, axis=-1)
    hd = C // NUM_HEADS

    def heads(t):
        return jnp.transpose(t.reshape(B, -1, NUM_HEADS, hd), (0, 2, 1, 3))

    qh, kh, vh = heads(q), heads(k), heads(v)
    s = jnp.einsum('bhqd,bhkd->bhqk', qh, kh) / math.sqrt(hd)
    p = jax.nn.softmax(s, axis=-1)
    o = jnp.einsum('bhqk,bhkd->bhqd', p, vh)
    o = jnp.transpose(o, (0, 2, 1, 3)).reshape(B, -1, C)
    o = o @ wo.T + bo
    o = jnp.transpose(o, (0, 2, 1)).reshape(B, C, H, W)
    return x_nchw + o


if __name__ == "__main__":
    key = jax.random.PRNGKey(0)
    k_x, k_gw, k_gb, k_w, k_b, k_ow, k_ob = jax.random.split(key, 7)

    B, C, H, W = 2, 64, 16, 16          # channels=64 (module default), S = 256
    x = jax.random.normal(k_x, (B, C, H, W), dtype=jnp.float32)

    # Deterministic synthetic parameters (shapes match nn.GroupNorm / nn.MultiheadAttention)
    gn_w = 1.0 + 0.1 * jax.random.normal(k_gw, (C,), dtype=jnp.float32)
    gn_b = 0.1 * jax.random.normal(k_gb, (C,), dtype=jnp.float32)
    wqkv = 0.05 * jax.random.normal(k_w, (3 * C, C), dtype=jnp.float32)   # in_proj_weight
    bqkv = 0.01 * jax.random.normal(k_b, (3 * C,), dtype=jnp.float32)     # in_proj_bias
    wo = 0.05 * jax.random.normal(k_ow, (C, C), dtype=jnp.float32)        # out_proj.weight
    bo = 0.01 * jax.random.normal(k_ob, (C,), dtype=jnp.float32)          # out_proj.bias

    out = attention_block(x, gn_w, gn_b, wqkv, bqkv, wo, bo)
    out = jax.block_until_ready(out)

    ref = reference(x, gn_w, gn_b, wqkv, bqkv, wo, bo)
    assert out.shape == (B, C, H, W)
    max_err = float(jnp.max(jnp.abs(out - ref)))
    assert jnp.allclose(out, ref, rtol=2e-2, atol=2e-2), (
        f"kernel mismatch vs reference (max abs err {max_err})")

    print("KERNEL_OK")
</pallas_src>

<mosaic_0001>
module attributes {stable_mosaic.version = 11 : i64} {
  func.func @attention_block_kernel(%arg0: i32, %arg1: memref<2x64x256xf32, #tpu.memory_space<vmem>>, %arg2: memref<64x1xf32, #tpu.memory_space<vmem>>, %arg3: memref<64x1xf32, #tpu.memory_space<vmem>>, %arg4: memref<192x64xbf16, #tpu.memory_space<vmem>>, %arg5: memref<192x1xf32, #tpu.memory_space<vmem>>, %arg6: memref<64x64xbf16, #tpu.memory_space<vmem>>, %arg7: memref<64x1xf32, #tpu.memory_space<vmem>>, %arg8: memref<2x64x256xf32, #tpu.memory_space<vmem>>, %arg9: memref<2x64x256xbf16, #tpu.memory_space<vmem>>) attributes {dimension_semantics = [#tpu.dimension_semantics<parallel>], iteration_bounds = array<i64: 1>, scalar_prefetch = 0 : i64, scratch_operands = 1 : i64, tpu.core_type = #tpu.core_type<tc>, window_params = [{transform_indices = @transform_0, window_bounds = array<i64: 2, 64, 256>}, {pipeline_mode = #tpu.pipeline_mode<synchronous>, transform_indices = @transform_1, window_bounds = array<i64: 64, 1>}, {pipeline_mode = #tpu.pipeline_mode<synchronous>, transform_indices = @transform_2, window_bounds = array<i64: 64, 1>}, {pipeline_mode = #tpu.pipeline_mode<synchronous>, transform_indices = @transform_3, window_bounds = array<i64: 192, 64>}, {pipeline_mode = #tpu.pipeline_mode<synchronous>, transform_indices = @transform_4, window_bounds = array<i64: 192, 1>}, {pipeline_mode = #tpu.pipeline_mode<synchronous>, transform_indices = @transform_5, window_bounds = array<i64: 64, 64>}, {pipeline_mode = #tpu.pipeline_mode<synchronous>, transform_indices = @transform_6, window_bounds = array<i64: 64, 1>}, {transform_indices = @transform_7, window_bounds = array<i64: 2, 64, 256>}]} {
    %c0 = arith.constant 0 : index
    %c0_0 = arith.constant 0 : index
    %c0_1 = arith.constant 0 : index
    %0 = vector.load %arg1[%c0, %c0_0, %c0_1] : memref<2x64x256xf32, #tpu.memory_space<vmem>>, vector<2x64x256xf32>
    %1 = vector.shape_cast %0 : vector<2x64x256xf32> to vector<2x8x8x256xf32>
    %cst = arith.constant dense<0.000000e+00> : vector<2x8x8xf32>
    %2 = vector.multi_reduction <add>, %1, %cst [3] : vector<2x8x8x256xf32> to vector<2x8x8xf32>
    %3 = vector.shape_cast %2 : vector<2x8x8xf32> to vector<2x8x8x1xf32>
    %cst_2 = arith.constant dense<0.000000e+00> : vector<2x8x1xf32>
    %4 = vector.multi_reduction <add>, %3, %cst_2 [2] : vector<2x8x8x1xf32> to vector<2x8x1xf32>
    %5 = vector.shape_cast %4 : vector<2x8x1xf32> to vector<2x8x1x1xf32>
    %cst_3 = arith.constant 4.8828125E-4 : f32
    %6 = vector.broadcast %cst_3 : f32 to vector<2x8x1x1xf32>
    %7 = arith.mulf %5, %6 : vector<2x8x1x1xf32>
    %8 = vector.broadcast %7 : vector<2x8x1x1xf32> to vector<2x8x8x256xf32>
    %9 = arith.subf %1, %8 : vector<2x8x8x256xf32>
    %10 = arith.mulf %9, %9 : vector<2x8x8x256xf32>
    %cst_4 = arith.constant dense<0.000000e+00> : vector<2x8x8xf32>
    %11 = vector.multi_reduction <add>, %10, %cst_4 [3] : vector<2x8x8x256xf32> to vector<2x8x8xf32>
    %12 = vector.shape_cast %11 : vector<2x8x8xf32> to vector<2x8x8x1xf32>
    %cst_5 = arith.constant dense<0.000000e+00> : vector<2x8x1xf32>
    %13 = vector.multi_reduction <add>, %12, %cst_5 [2] : vector<2x8x8x1xf32> to vector<2x8x1xf32>
    %14 = vector.shape_cast %13 : vector<2x8x1xf32> to vector<2x8x1x1xf32>
    %cst_6 = arith.constant 4.8828125E-4 : f32
    %15 = vector.broadcast %cst_6 : f32 to vector<2x8x1x1xf32>
    %16 = arith.mulf %14, %15 : vector<2x8x1x1xf32>
    %cst_7 = arith.constant 9.99999974E-6 : f32
    %17 = vector.broadcast %cst_7 : f32 to vector<2x8x1x1xf32>
    %18 = arith.addf %16, %17 : vector<2x8x1x1xf32>
    %19 = math.rsqrt %18 : vector<2x8x1x1xf32>
    %20 = vector.broadcast %19 : vector<2x8x1x1xf32> to vector<2x8x8x256xf32>
    %21 = arith.mulf %9, %20 : vector<2x8x8x256xf32>
    %22 = vector.shape_cast %21 : vector<2x8x8x256xf32> to vector<2x64x256xf32>
    %c0_8 = arith.constant 0 : index
    %c0_9 = arith.constant 0 : index
    %23 = vector.load %arg2[%c0_8, %c0_9] : memref<64x1xf32, #tpu.memory_space<vmem>>, vector<64x1xf32>
    %c0_10 = arith.constant 0 : index
    %c0_11 = arith.constant 0 : index
    %24 = vector.load %arg3[%c0_10, %c0_11] : memref<64x1xf32, #tpu.memory_space<vmem>>, vector<64x1xf32>
    %25 = vector.shape_cast %23 : vector<64x1xf32> to vector<1x64x1xf32>
    %26 = vector.broadcast %25 : vector<1x64x1xf32> to vector<2x64x256xf32>
    %27 = arith.mulf %22, %26 : vector<2x64x256xf32>
    %28 = vector.shape_cast %24 : vector<64x1xf32> to vector<1x64x1xf32>
    %29 = vector.broadcast %28 : vector<1x64x1xf32> to vector<2x64x256xf32>
    %30 = arith.addf %27, %29 : vector<2x64x256xf32>
    %31 = arith.truncf %30 : vector<2x64x256xf32> to vector<2x64x256xbf16>
    %c0_12 = arith.constant 0 : index
    %c0_13 = arith.constant 0 : index
    %32 = vector.load %arg4[%c0_12, %c0_13] : memref<192x64xbf16, #tpu.memory_space<vmem>>, vector<192x64xbf16>
    %c0_14 = arith.constant 0 : index
    %c0_15 = arith.constant 0 : index
    %33 = vector.load %arg5[%c0_14, %c0_15] : memref<192x1xf32, #tpu.memory_space<vmem>>, vector<192x1xf32>
    %c0_16 = arith.constant 0 : index
    %c0_17 = arith.constant 0 : index
    %34 = vector.load %arg6[%c0_16, %c0_17] : memref<64x64xbf16, #tpu.memory_space<vmem>>, vector<64x64xbf16>
    %c0_18 = arith.constant 0 : index
    %c0_19 = arith.constant 0 : index
    %35 = vector.load %arg7[%c0_18, %c0_19] : memref<64x1xf32, #tpu.memory_space<vmem>>, vector<64x1xf32>
    %cst_20 = arith.constant 1.000000e+00 : bf16
    %36 = vector.broadcast %cst_20 : bf16 to vector<1x256xbf16>
    %37 = vector.extract_strided_slice %31 {offsets = [0, 0, 0], sizes = [1, 64, 256], strides = [1, 1, 1]} : vector<2x64x256xbf16> to vector<1x64x256xbf16>
    %38 = vector.shape_cast %37 : vector<1x64x256xbf16> to vector<64x256xbf16>
    %cst_21 = arith.constant dense<0.000000e+00> : vector<192x256xf32>
    %39 = tpu.matmul %32, %38, %cst_21 {dimension_numbers = #tpu.dot_dimension_numbers<[1], [0], [0], [1], [0, 0, 1, 1], [], []>} : vector<192x64xbf16>, vector<64x256xbf16>, vector<192x256xf32> -> vector<192x256xf32>
    %40 = vector.broadcast %33 : vector<192x1xf32> to vector<192x256xf32>
    %41 = arith.addf %39, %40 : vector<192x256xf32>
    %42 = vector.extract_strided_slice %41 {offsets = [0, 0], sizes = [64, 256], strides = [1, 1]} : vector<192x256xf32> to vector<64x256xf32>
    %43 = tpu.transpose %42, [1, 0] : vector<64x256xf32> -> vector<256x64xf32>
    %44 = arith.truncf %43 : vector<256x64xf32> to vector<256x64xbf16>
    %45 = vector.extract_strided_slice %41 {offsets = [64, 0], sizes = [64, 256], strides = [1, 1]} : vector<192x256xf32> to vector<64x256xf32>
    %46 = arith.truncf %45 : vector<64x256xf32> to vector<64x256xbf16>
    %47 = vector.extract_strided_slice %41 {offsets = [128, 0], sizes = [64, 256], strides = [1, 1]} : vector<192x256xf32> to vector<64x256xf32>
    %48 = arith.truncf %47 : vector<64x256xf32> to vector<64x256xbf16>
    %49 = vector.extract_strided_slice %44 {offsets = [0, 0], sizes = [256, 16], strides = [1, 1]} : vector<256x64xbf16> to vector<256x16xbf16>
    %50 = vector.extract_strided_slice %46 {offsets = [0, 0], sizes = [16, 256], strides = [1, 1]} : vector<64x256xbf16> to vector<16x256xbf16>
    %51 = vector.extract_strided_slice %48 {offsets = [0, 0], sizes = [16, 256], strides = [1, 1]} : vector<64x256xbf16> to vector<16x256xbf16>
    %cst_22 = arith.constant dense<0.000000e+00> : vector<256x256xf32>
    %52 = tpu.matmul %49, %50, %cst_22 {dimension_numbers = #tpu.dot_dimension_numbers<[1], [0], [0], [1], [0, 0, 1, 1], [], []>} : vector<256x16xbf16>, vector<16x256xbf16>, vector<256x256xf32> -> vector<256x256xf32>
    %cst_23 = arith.constant dense<0xFF800000> : vector<256xf32>
    %53 = vector.multi_reduction <maximumf>, %52, %cst_23 [1] : vector<256x256xf32> to vector<256xf32>
    %54 = vector.shape_cast %53 : vector<256xf32> to vector<256x1xf32>
    %55 = vector.broadcast %54 : vector<256x1xf32> to vector<256x256xf32>
    %56 = arith.subf %52, %55 : vector<256x256xf32>
    %57 = math.exp %56 : vector<256x256xf32>
    %58 = arith.truncf %57 : vector<256x256xf32> to vector<256x256xbf16>
    %cst_24 = arith.constant dense<0.000000e+00> : vector<16x256xf32>
    %59 = tpu.matmul %51, %58, %cst_24 {dimension_numbers = #tpu.dot_dimension_numbers<[1], [1], [0], [0], [0, 0, 1, 0], [], []>} : vector<16x256xbf16>, vector<256x256xbf16>, vector<16x256xf32> -> vector<16x256xf32>
    %cst_25 = arith.constant dense<0.000000e+00> : vector<1x256xf32>
    %60 = tpu.matmul %36, %58, %cst_25 {dimension_numbers = #tpu.dot_dimension_numbers<[1], [1], [0], [0], [0, 0, 1, 0], [], []>} : vector<1x256xbf16>, vector<256x256xbf16>, vector<1x256xf32> -> vector<1x256xf32>
    %61 = tpu.reciprocal %60 {approx = true} : vector<1x256xf32> -> vector<1x256xf32>
    %62 = vector.broadcast %61 : vector<1x256xf32> to vector<16x256xf32>
    %63 = arith.mulf %59, %62 : vector<16x256xf32>
    %64 = arith.truncf %63 : vector<16x256xf32> to vector<16x256xbf16>
    %c0_26 = arith.constant 0 : index
    %c0_27 = arith.constant 0 : index
    %c0_28 = arith.constant 0 : index
    %65 = vector.load %arg9[%c0_26, %c0_27, %c0_28] : memref<2x64x256xbf16, #tpu.memory_space<vmem>>, vector<1x16x256xbf16>
    %66 = vector.shape_cast %65 : vector<1x16x256xbf16> to vector<16x256xbf16>
    %67 = vector.shape_cast %64 : vector<16x256xbf16> to vector<1x16x256xbf16>
    tpu.vector_store %arg9[%c0_26, %c0_27, %c0_28], %67 {strides = array<i32>} : memref<2x64x256xbf16, #tpu.memory_space<vmem>>, vector<1x16x256xbf16>,
    %68 = vector.extract_strided_slice %44 {offsets = [0, 16], sizes = [256, 16], strides = [1, 1]} : vector<256x64xbf16> to vector<256x16xbf16>
    %69 = vector.extract_strided_slice %46 {offsets = [16, 0], sizes = [16, 256], strides = [1, 1]} : vector<64x256xbf16> to vector<16x256xbf16>
    %70 = vector.extract_strided_slice %48 {offsets = [16, 0], sizes = [16, 256], strides = [1, 1]} : vector<64x256xbf16> to vector<16x256xbf16>
    %cst_29 = arith.constant dense<0.000000e+00> : vector<256x256xf32>
    %71 = tpu.matmul %68, %69, %cst_29 {dimension_numbers = #tpu.dot_dimension_numbers<[1], [0], [0], [1], [0, 0, 1, 1], [], []>} : vector<256x16xbf16>, vector<16x256xbf16>, vector<256x256xf32> -> vector<256x256xf32>
    %cst_30 = arith.constant dense<0xFF800000> : vector<256xf32>
    %72 = vector.multi_reduction <maximumf>, %71, %cst_30 [1] : vector<256x256xf32> to vector<256xf32>
    %73 = vector.shape_cast %72 : vector<256xf32> to vector<256x1xf32>
    %74 = vector.broadcast %73 : vector<256x1xf32> to vector<256x256xf32>
    %75 = arith.subf %71, %74 : vector<256x256xf32>
    %76 = math.exp %75 : vector<256x256xf32>
    %77 = arith.truncf %76 : vector<256x256xf32> to vector<256x256xbf16>
    %cst_31 = arith.constant dense<0.000000e+00> : vector<16x256xf32>
    %78 = tpu.matmul %70, %77, %cst_31 {dimension_numbers = #tpu.dot_dimension_numbers<[1], [1], [0], [0], [0, 0, 1, 0], [], []>} : vector<16x256xbf16>, vector<256x256xbf16>, vector<16x256xf32> -> vector<16x256xf32>
    %cst_32 = arith.constant dense<0.000000e+00> : vector<1x256xf32>
    %79 = tpu.matmul %36, %77, %cst_32 {dimension_numbers = #tpu.dot_dimension_numbers<[1], [1], [0], [0], [0, 0, 1, 0], [], []>} : vector<1x256xbf16>, vector<256x256xbf16>, vector<1x256xf32> -> vector<1x256xf32>
    %80 = tpu.reciprocal %79 {approx = true} : vector<1x256xf32> -> vector<1x256xf32>
    %81 = vector.broadcast %80 : vector<1x256xf32> to vector<16x256xf32>
    %82 = arith.mulf %78, %81 : vector<16x256xf32>
    %83 = arith.truncf %82 : vector<16x256xf32> to vector<16x256xbf16>
    %c0_33 = arith.constant 0 : index
    %c16 = arith.constant 16 : index
    %c0_34 = arith.constant 0 : index
    %84 = vector.load %arg9[%c0_33, %c16, %c0_34] : memref<2x64x256xbf16, #tpu.memory_space<vmem>>, vector<1x16x256xbf16>
    %85 = vector.shape_cast %84 : vector<1x16x256xbf16> to vector<16x256xbf16>
    %86 = vector.shape_cast %83 : vector<16x256xbf16> to vector<1x16x256xbf16>
    tpu.vector_store %arg9[%c0_33, %c16, %c0_34], %86 {strides = array<i32>} : memref<2x64x256xbf16, #tpu.memory_space<vmem>>, vector<1x16x256xbf16>,
    %87 = vector.extract_strided_slice %44 {offsets = [0, 32], sizes = [256, 16], strides = [1, 1]} : vector<256x64xbf16> to vector<256x16xbf16>
    %88 = vector.extract_strided_slice %46 {offsets = [32, 0], sizes = [16, 256], strides = [1, 1]} : vector<64x256xbf16> to vector<16x256xbf16>
    %89 = vector.extract_strided_slice %48 {offsets = [32, 0], sizes = [16, 256], strides = [1, 1]} : vector<64x256xbf16> to vector<16x256xbf16>
    %cst_35 = arith.constant dense<0.000000e+00> : vector<256x256xf32>
    %90 = tpu.matmul %87, %88, %cst_35 {dimension_numbers = #tpu.dot_dimension_numbers<[1], [0], [0], [1], [0, 0, 1, 1], [], []>} : vector<256x16xbf16>, vector<16x256xbf16>, vector<256x256xf32> -> vector<256x256xf32>
    %cst_36 = arith.constant dense<0xFF800000> : vector<256xf32>
    %91 = vector.multi_reduction <maximumf>, %90, %cst_36 [1] : vector<256x256xf32> to vector<256xf32>
    %92 = vector.shape_cast %91 : vector<256xf32> to vector<256x1xf32>
    %93 = vector.broadcast %92 : vector<256x1xf32> to vector<256x256xf32>
    %94 = arith.subf %90, %93 : vector<256x256xf32>
    %95 = math.exp %94 : vector<256x256xf32>
    %96 = arith.truncf %95 : vector<256x256xf32> to vector<256x256xbf16>
    %cst_37 = arith.constant dense<0.000000e+00> : vector<16x256xf32>
    %97 = tpu.matmul %89, %96, %cst_37 {dimension_numbers = #tpu.dot_dimension_numbers<[1], [1], [0], [0], [0, 0, 1, 0], [], []>} : vector<16x256xbf16>, vector<256x256xbf16>, vector<16x256xf32> -> vector<16x256xf32>
    %cst_38 = arith.constant dense<0.000000e+00> : vector<1x256xf32>
    %98 = tpu.matmul %36, %96, %cst_38 {dimension_numbers = #tpu.dot_dimension_numbers<[1], [1], [0], [0], [0, 0, 1, 0], [], []>} : vector<1x256xbf16>, vector<256x256xbf16>, vector<1x256xf32> -> vector<1x256xf32>
    %99 = tpu.reciprocal %98 {approx = true} : vector<1x256xf32> -> vector<1x256xf32>
    %100 = vector.broadcast %99 : vector<1x256xf32> to vector<16x256xf32>
    %101 = arith.mulf %97, %100 : vector<16x256xf32>
    %102 = arith.truncf %101 : vector<16x256xf32> to vector<16x256xbf16>
    %c0_39 = arith.constant 0 : index
    %c32 = arith.constant 32 : index
    %c0_40 = arith.constant 0 : index
    %103 = vector.load %arg9[%c0_39, %c32, %c0_40] : memref<2x64x256xbf16, #tpu.memory_space<vmem>>, vector<1x16x256xbf16>
    %104 = vector.shape_cast %103 : vector<1x16x256xbf16> to vector<16x256xbf16>
    %105 = vector.shape_cast %102 : vector<16x256xbf16> to vector<1x16x256xbf16>
    tpu.vector_store %arg9[%c0_39, %c32, %c0_40], %105 {strides = array<i32>} : memref<2x64x256xbf16, #tpu.memory_space<vmem>>, vector<1x16x256xbf16>,
    %106 = vector.extract_strided_slice %44 {offsets = [0, 48], sizes = [256, 16], strides = [1, 1]} : vector<256x64xbf16> to vector<256x16xbf16>
    %107 = vector.extract_strided_slice %46 {offsets = [48, 0], sizes = [16, 256], strides = [1, 1]} : vector<64x256xbf16> to vector<16x256xbf16>
    %108 = vector.extract_strided_slice %48 {offsets = [48, 0], sizes = [16, 256], strides = [1, 1]} : vector<64x256xbf16> to vector<16x256xbf16>
    %cst_41 = arith.constant dense<0.000000e+00> : vector<256x256xf32>
    %109 = tpu.matmul %106, %107, %cst_41 {dimension_numbers = #tpu.dot_dimension_numbers<[1], [0], [0], [1], [0, 0, 1, 1], [], []>} : vector<256x16xbf16>, vector<16x256xbf16>, vector<256x256xf32> -> vector<256x256xf32>
    %cst_42 = arith.constant dense<0xFF800000> : vector<256xf32>
    %110 = vector.multi_reduction <maximumf>, %109, %cst_42 [1] : vector<256x256xf32> to vector<256xf32>
    %111 = vector.shape_cast %110 : vector<256xf32> to vector<256x1xf32>
    %112 = vector.broadcast %111 : vector<256x1xf32> to vector<256x256xf32>
    %113 = arith.subf %109, %112 : vector<256x256xf32>
    %114 = math.exp %113 : vector<256x256xf32>
    %115 = arith.truncf %114 : vector<256x256xf32> to vector<256x256xbf16>
    %cst_43 = arith.constant dense<0.000000e+00> : vector<16x256xf32>
    %116 = tpu.matmul %108, %115, %cst_43 {dimension_numbers = #tpu.dot_dimension_numbers<[1], [1], [0], [0], [0, 0, 1, 0], [], []>} : vector<16x256xbf16>, vector<256x256xbf16>, vector<16x256xf32> -> vector<16x256xf32>
    %cst_44 = arith.constant dense<0.000000e+00> : vector<1x256xf32>
    %117 = tpu.matmul %36, %115, %cst_44 {dimension_numbers = #tpu.dot_dimension_numbers<[1], [1], [0], [0], [0, 0, 1, 0], [], []>} : vector<1x256xbf16>, vector<256x256xbf16>, vector<1x256xf32> -> vector<1x256xf32>
    %118 = tpu.reciprocal %117 {approx = true} : vector<1x256xf32> -> vector<1x256xf32>
    %119 = vector.broadcast %118 : vector<1x256xf32> to vector<16x256xf32>
    %120 = arith.mulf %116, %119 : vector<16x256xf32>
    %121 = arith.truncf %120 : vector<16x256xf32> to vector<16x256xbf16>
    %c0_45 = arith.constant 0 : index
    %c48 = arith.constant 48 : index
    %c0_46 = arith.constant 0 : index
    %122 = vector.load %arg9[%c0_45, %c48, %c0_46] : memref<2x64x256xbf16, #tpu.memory_space<vmem>>, vector<1x16x256xbf16>
    %123 = vector.shape_cast %122 : vector<1x16x256xbf16> to vector<16x256xbf16>
    %124 = vector.shape_cast %121 : vector<16x256xbf16> to vector<1x16x256xbf16>
    tpu.vector_store %arg9[%c0_45, %c48, %c0_46], %124 {strides = array<i32>} : memref<2x64x256xbf16, #tpu.memory_space<vmem>>, vector<1x16x256xbf16>,
    %c0_47 = arith.constant 0 : index
    %c0_48 = arith.constant 0 : index
    %c0_49 = arith.constant 0 : index
    %125 = vector.load %arg9[%c0_47, %c0_48, %c0_49] : memref<2x64x256xbf16, #tpu.memory_space<vmem>>, vector<1x64x256xbf16>
    %126 = vector.shape_cast %125 : vector<1x64x256xbf16> to vector<64x256xbf16>
    %cst_50 = arith.constant dense<0.000000e+00> : vector<64x256xf32>
    %127 = tpu.matmul %34, %126, %cst_50 {dimension_numbers = #tpu.dot_dimension_numbers<[1], [0], [0], [1], [0, 0, 1, 1], [], []>} : vector<64x64xbf16>, vector<64x256xbf16>, vector<64x256xf32> -> vector<64x256xf32>
    %128 = vector.broadcast %35 : vector<64x1xf32> to vector<64x256xf32>
    %129 = arith.addf %127, %128 : vector<64x256xf32>
    %130 = vector.extract_strided_slice %0 {offsets = [0, 0, 0], sizes = [1, 64, 256], strides = [1, 1, 1]} : vector<2x64x256xf32> to vector<1x64x256xf32>
    %131 = vector.shape_cast %130 : vector<1x64x256xf32> to vector<64x256xf32>
    %132 = arith.addf %131, %129 : vector<64x256xf32>
    %c0_51 = arith.constant 0 : index
    %c0_52 = arith.constant 0 : index
    %c0_53 = arith.constant 0 : index
    %133 = vector.load %arg8[%c0_51, %c0_52, %c0_53] : memref<2x64x256xf32, #tpu.memory_space<vmem>>, vector<1x64x256xf32>
    %134 = vector.shape_cast %133 : vector<1x64x256xf32> to vector<64x256xf32>
    %135 = vector.shape_cast %132 : vector<64x256xf32> to vector<1x64x256xf32>
    tpu.vector_store %arg8[%c0_51, %c0_52, %c0_53], %135 {strides = array<i32>} : memref<2x64x256xf32, #tpu.memory_space<vmem>>, vector<1x64x256xf32>,
    %136 = vector.extract_strided_slice %31 {offsets = [1, 0, 0], sizes = [1, 64, 256], strides = [1, 1, 1]} : vector<2x64x256xbf16> to vector<1x64x256xbf16>
    %137 = vector.shape_cast %136 : vector<1x64x256xbf16> to vector<64x256xbf16>
    %cst_54 = arith.constant dense<0.000000e+00> : vector<192x256xf32>
    %138 = tpu.matmul %32, %137, %cst_54 {dimension_numbers = #tpu.dot_dimension_numbers<[1], [0], [0], [1], [0, 0, 1, 1], [], []>} : vector<192x64xbf16>, vector<64x256xbf16>, vector<192x256xf32> -> vector<192x256xf32>
    %139 = vector.broadcast %33 : vector<192x1xf32> to vector<192x256xf32>
    %140 = arith.addf %138, %139 : vector<192x256xf32>
    %141 = vector.extract_strided_slice %140 {offsets = [0, 0], sizes = [64, 256], strides = [1, 1]} : vector<192x256xf32> to vector<64x256xf32>
    %142 = tpu.transpose %141, [1, 0] : vector<64x256xf32> -> vector<256x64xf32>
    %143 = arith.truncf %142 : vector<256x64xf32> to vector<256x64xbf16>
    %144 = vector.extract_strided_slice %140 {offsets = [64, 0], sizes = [64, 256], strides = [1, 1]} : vector<192x256xf32> to vector<64x256xf32>
    %145 = arith.truncf %144 : vector<64x256xf32> to vector<64x256xbf16>
    %146 = vector.extract_strided_slice %140 {offsets = [128, 0], sizes = [64, 256], strides = [1, 1]} : vector<192x256xf32> to vector<64x256xf32>
    %147 = arith.truncf %146 : vector<64x256xf32> to vector<64x256xbf16>
    %148 = vector.extract_strided_slice %143 {offsets = [0, 0], sizes = [256, 16], strides = [1, 1]} : vector<256x64xbf16> to vector<256x16xbf16>
    %149 = vector.extract_strided_slice %145 {offsets = [0, 0], sizes = [16, 256], strides = [1, 1]} : vector<64x256xbf16> to vector<16x256xbf16>
    %150 = vector.extract_strided_slice %147 {offsets = [0, 0], sizes = [16, 256], strides = [1, 1]} : vector<64x256xbf16> to vector<16x256xbf16>
    %cst_55 = arith.constant dense<0.000000e+00> : vector<256x256xf32>
    %151 = tpu.matmul %148, %149, %cst_55 {dimension_numbers = #tpu.dot_dimension_numbers<[1], [0], [0], [1], [0, 0, 1, 1], [], []>} : vector<256x16xbf16>, vector<16x256xbf16>, vector<256x256xf32> -> vector<256x256xf32>
    %cst_56 = arith.constant dense<0xFF800000> : vector<256xf32>
    %152 = vector.multi_reduction <maximumf>, %151, %cst_56 [1] : vector<256x256xf32> to vector<256xf32>
    %153 = vector.shape_cast %152 : vector<256xf32> to vector<256x1xf32>
    %154 = vector.broadcast %153 : vector<256x1xf32> to vector<256x256xf32>
    %155 = arith.subf %151, %154 : vector<256x256xf32>
    %156 = math.exp %155 : vector<256x256xf32>
    %157 = arith.truncf %156 : vector<256x256xf32> to vector<256x256xbf16>
    %cst_57 = arith.constant dense<0.000000e+00> : vector<16x256xf32>
    %158 = tpu.matmul %150, %157, %cst_57 {dimension_numbers = #tpu.dot_dimension_numbers<[1], [1], [0], [0], [0, 0, 1, 0], [], []>} : vector<16x256xbf16>, vector<256x256xbf16>, vector<16x256xf32> -> vector<16x256xf32>
    %cst_58 = arith.constant dense<0.000000e+00> : vector<1x256xf32>
    %159 = tpu.matmul %36, %157, %cst_58 {dimension_numbers = #tpu.dot_dimension_numbers<[1], [1], [0], [0], [0, 0, 1, 0], [], []>} : vector<1x256xbf16>, vector<256x256xbf16>, vector<1x256xf32> -> vector<1x256xf32>
    %160 = tpu.reciprocal %159 {approx = true} : vector<1x256xf32> -> vector<1x256xf32>
    %161 = vector.broadcast %160 : vector<1x256xf32> to vector<16x256xf32>
    %162 = arith.mulf %158, %161 : vector<16x256xf32>
    %163 = arith.truncf %162 : vector<16x256xf32> to vector<16x256xbf16>
    %c1 = arith.constant 1 : index
    %c0_59 = arith.constant 0 : index
    %c0_60 = arith.constant 0 : index
    %164 = vector.load %arg9[%c1, %c0_59, %c0_60] : memref<2x64x256xbf16, #tpu.memory_space<vmem>>, vector<1x16x256xbf16>
    %165 = vector.shape_cast %164 : vector<1x16x256xbf16> to vector<16x256xbf16>
    %166 = vector.shape_cast %163 : vector<16x256xbf16> to vector<1x16x256xbf16>
    tpu.vector_store %arg9[%c1, %c0_59, %c0_60], %166 {strides = array<i32>} : memref<2x64x256xbf16, #tpu.memory_space<vmem>>, vector<1x16x256xbf16>,
    %167 = vector.extract_strided_slice %143 {offsets = [0, 16], sizes = [256, 16], strides = [1, 1]} : vector<256x64xbf16> to vector<256x16xbf16>
    %168 = vector.extract_strided_slice %145 {offsets = [16, 0], sizes = [16, 256], strides = [1, 1]} : vector<64x256xbf16> to vector<16x256xbf16>
    %169 = vector.extract_strided_slice %147 {offsets = [16, 0], sizes = [16, 256], strides = [1, 1]} : vector<64x256xbf16> to vector<16x256xbf16>
    %cst_61 = arith.constant dense<0.000000e+00> : vector<256x256xf32>
    %170 = tpu.matmul %167, %168, %cst_61 {dimension_numbers = #tpu.dot_dimension_numbers<[1], [0], [0], [1], [0, 0, 1, 1], [], []>} : vector<256x16xbf16>, vector<16x256xbf16>, vector<256x256xf32> -> vector<256x256xf32>
    %cst_62 = arith.constant dense<0xFF800000> : vector<256xf32>
    %171 = vector.multi_reduction <maximumf>, %170, %cst_62 [1] : vector<256x256xf32> to vector<256xf32>
    %172 = vector.shape_cast %171 : vector<256xf32> to vector<256x1xf32>
    %173 = vector.broadcast %172 : vector<256x1xf32> to vector<256x256xf32>
    %174 = arith.subf %170, %173 : vector<256x256xf32>
    %175 = math.exp %174 : vector<256x256xf32>
    %176 = arith.truncf %175 : vector<256x256xf32> to vector<256x256xbf16>
    %cst_63 = arith.constant dense<0.000000e+00> : vector<16x256xf32>
    %177 = tpu.matmul %169, %176, %cst_63 {dimension_numbers = #tpu.dot_dimension_numbers<[1], [1], [0], [0], [0, 0, 1, 0], [], []>} : vector<16x256xbf16>, vector<256x256xbf16>, vector<16x256xf32> -> vector<16x256xf32>
    %cst_64 = arith.constant dense<0.000000e+00> : vector<1x256xf32>
    %178 = tpu.matmul %36, %176, %cst_64 {dimension_numbers = #tpu.dot_dimension_numbers<[1], [1], [0], [0], [0, 0, 1, 0], [], []>} : vector<1x256xbf16>, vector<256x256xbf16>, vector<1x256xf32> -> vector<1x256xf32>
    %179 = tpu.reciprocal %178 {approx = true} : vector<1x256xf32> -> vector<1x256xf32>
    %180 = vector.broadcast %179 : vector<1x256xf32> to vector<16x256xf32>
    %181 = arith.mulf %177, %180 : vector<16x256xf32>
    %182 = arith.truncf %181 : vector<16x256xf32> to vector<16x256xbf16>
    %c1_65 = arith.constant 1 : index
    %c16_66 = arith.constant 16 : index
    %c0_67 = arith.constant 0 : index
    %183 = vector.load %arg9[%c1_65, %c16_66, %c0_67] : memref<2x64x256xbf16, #tpu.memory_space<vmem>>, vector<1x16x256xbf16>
    %184 = vector.shape_cast %183 : vector<1x16x256xbf16> to vector<16x256xbf16>
    %185 = vector.shape_cast %182 : vector<16x256xbf16> to vector<1x16x256xbf16>
    tpu.vector_store %arg9[%c1_65, %c16_66, %c0_67], %185 {strides = array<i32>} : memref<2x64x256xbf16, #tpu.memory_space<vmem>>, vector<1x16x256xbf16>,
    %186 = vector.extract_strided_slice %143 {offsets = [0, 32], sizes = [256, 16], strides = [1, 1]} : vector<256x64xbf16> to vector<256x16xbf16>
    %187 = vector.extract_strided_slice %145 {offsets = [32, 0], sizes = [16, 256], strides = [1, 1]} : vector<64x256xbf16> to vector<16x256xbf16>
    %188 = vector.extract_strided_slice %147 {offsets = [32, 0], sizes = [16, 256], strides = [1, 1]} : vector<64x256xbf16> to vector<16x256xbf16>
    %cst_68 = arith.constant dense<0.000000e+00> : vector<256x256xf32>
    %189 = tpu.matmul %186, %187, %cst_68 {dimension_numbers = #tpu.dot_dimension_numbers<[1], [0], [0], [1], [0, 0, 1, 1], [], []>} : vector<256x16xbf16>, vector<16x256xbf16>, vector<256x256xf32> -> vector<256x256xf32>
    %cst_69 = arith.constant dense<0xFF800000> : vector<256xf32>
    %190 = vector.multi_reduction <maximumf>, %189, %cst_69 [1] : vector<256x256xf32> to vector<256xf32>
    %191 = vector.shape_cast %190 : vector<256xf32> to vector<256x1xf32>
    %192 = vector.broadcast %191 : vector<256x1xf32> to vector<256x256xf32>
    %193 = arith.subf %189, %192 : vector<256x256xf32>
    %194 = math.exp %193 : vector<256x256xf32>
    %195 = arith.truncf %194 : vector<256x256xf32> to vector<256x256xbf16>
    %cst_70 = arith.constant dense<0.000000e+00> : vector<16x256xf32>
    %196 = tpu.matmul %188, %195, %cst_70 {dimension_numbers = #tpu.dot_dimension_numbers<[1], [1], [0], [0], [0, 0, 1, 0], [], []>} : vector<16x256xbf16>, vector<256x256xbf16>, vector<16x256xf32> -> vector<16x256xf32>
    %cst_71 = arith.constant dense<0.000000e+00> : vector<1x256xf32>
    %197 = tpu.matmul %36, %195, %cst_71 {dimension_numbers = #tpu.dot_dimension_numbers<[1], [1], [0], [0], [0, 0, 1, 0], [], []>} : vector<1x256xbf16>, vector<256x256xbf16>, vector<1x256xf32> -> vector<1x256xf32>
    %198 = tpu.reciprocal %197 {approx = true} : vector<1x256xf32> -> vector<1x256xf32>
    %199 = vector.broadcast %198 : vector<1x256xf32> to vector<16x256xf32>
    %200 = arith.mulf %196, %199 : vector<16x256xf32>
    %201 = arith.truncf %200 : vector<16x256xf32> to vector<16x256xbf16>
    %c1_72 = arith.constant 1 : index
    %c32_73 = arith.constant 32 : index
    %c0_74 = arith.constant 0 : index
    %202 = vector.load %arg9[%c1_72, %c32_73, %c0_74] : memref<2x64x256xbf16, #tpu.memory_space<vmem>>, vector<1x16x256xbf16>
    %203 = vector.shape_cast %202 : vector<1x16x256xbf16> to vector<16x256xbf16>
    %204 = vector.shape_cast %201 : vector<16x256xbf16> to vector<1x16x256xbf16>
    tpu.vector_store %arg9[%c1_72, %c32_73, %c0_74], %204 {strides = array<i32>} : memref<2x64x256xbf16, #tpu.memory_space<vmem>>, vector<1x16x256xbf16>,
    %205 = vector.extract_strided_slice %143 {offsets = [0, 48], sizes = [256, 16], strides = [1, 1]} : vector<256x64xbf16> to vector<256x16xbf16>
    %206 = vector.extract_strided_slice %145 {offsets = [48, 0], sizes = [16, 256], strides = [1, 1]} : vector<64x256xbf16> to vector<16x256xbf16>
    %207 = vector.extract_strided_slice %147 {offsets = [48, 0], sizes = [16, 256], strides = [1, 1]} : vector<64x256xbf16> to vector<16x256xbf16>
    %cst_75 = arith.constant dense<0.000000e+00> : vector<256x256xf32>
    %208 = tpu.matmul %205, %206, %cst_75 {dimension_numbers = #tpu.dot_dimension_numbers<[1], [0], [0], [1], [0, 0, 1, 1], [], []>} : vector<256x16xbf16>, vector<16x256xbf16>, vector<256x256xf32> -> vector<256x256xf32>
    %cst_76 = arith.constant dense<0xFF800000> : vector<256xf32>
    %209 = vector.multi_reduction <maximumf>, %208, %cst_76 [1] : vector<256x256xf32> to vector<256xf32>
    %210 = vector.shape_cast %209 : vector<256xf32> to vector<256x1xf32>
    %211 = vector.broadcast %210 : vector<256x1xf32> to vector<256x256xf32>
    %212 = arith.subf %208, %211 : vector<256x256xf32>
    %213 = math.exp %212 : vector<256x256xf32>
    %214 = arith.truncf %213 : vector<256x256xf32> to vector<256x256xbf16>
    %cst_77 = arith.constant dense<0.000000e+00> : vector<16x256xf32>
    %215 = tpu.matmul %207, %214, %cst_77 {dimension_numbers = #tpu.dot_dimension_numbers<[1], [1], [0], [0], [0, 0, 1, 0], [], []>} : vector<16x256xbf16>, vector<256x256xbf16>, vector<16x256xf32> -> vector<16x256xf32>
    %cst_78 = arith.constant dense<0.000000e+00> : vector<1x256xf32>
    %216 = tpu.matmul %36, %214, %cst_78 {dimension_numbers = #tpu.dot_dimension_numbers<[1], [1], [0], [0], [0, 0, 1, 0], [], []>} : vector<1x256xbf16>, vector<256x256xbf16>, vector<1x256xf32> -> vector<1x256xf32>
    %217 = tpu.reciprocal %216 {approx = true} : vector<1x256xf32> -> vector<1x256xf32>
    %218 = vector.broadcast %217 : vector<1x256xf32> to vector<16x256xf32>
    %219 = arith.mulf %215, %218 : vector<16x256xf32>
    %220 = arith.truncf %219 : vector<16x256xf32> to vector<16x256xbf16>
    %c1_79 = arith.constant 1 : index
    %c48_80 = arith.constant 48 : index
    %c0_81 = arith.constant 0 : index
    %221 = vector.load %arg9[%c1_79, %c48_80, %c0_81] : memref<2x64x256xbf16, #tpu.memory_space<vmem>>, vector<1x16x256xbf16>
    %222 = vector.shape_cast %221 : vector<1x16x256xbf16> to vector<16x256xbf16>
    %223 = vector.shape_cast %220 : vector<16x256xbf16> to vector<1x16x256xbf16>
    tpu.vector_store %arg9[%c1_79, %c48_80, %c0_81], %223 {strides = array<i32>} : memref<2x64x256xbf16, #tpu.memory_space<vmem>>, vector<1x16x256xbf16>,
    %c1_82 = arith.constant 1 : index
    %c0_83 = arith.constant 0 : index
    %c0_84 = arith.constant 0 : index
    %224 = vector.load %arg9[%c1_82, %c0_83, %c0_84] : memref<2x64x256xbf16, #tpu.memory_space<vmem>>, vector<1x64x256xbf16>
    %225 = vector.shape_cast %224 : vector<1x64x256xbf16> to vector<64x256xbf16>
    %cst_85 = arith.constant dense<0.000000e+00> : vector<64x256xf32>
    %226 = tpu.matmul %34, %225, %cst_85 {dimension_numbers = #tpu.dot_dimension_numbers<[1], [0], [0], [1], [0, 0, 1, 1], [], []>} : vector<64x64xbf16>, vector<64x256xbf16>, vector<64x256xf32> -> vector<64x256xf32>
    %227 = vector.broadcast %35 : vector<64x1xf32> to vector<64x256xf32>
    %228 = arith.addf %226, %227 : vector<64x256xf32>
    %229 = vector.extract_strided_slice %0 {offsets = [1, 0, 0], sizes = [1, 64, 256], strides = [1, 1, 1]} : vector<2x64x256xf32> to vector<1x64x256xf32>
    %230 = vector.shape_cast %229 : vector<1x64x256xf32> to vector<64x256xf32>
    %231 = arith.addf %230, %228 : vector<64x256xf32>
    %c1_86 = arith.constant 1 : index
    %c0_87 = arith.constant 0 : index
    %c0_88 = arith.constant 0 : index
    %232 = vector.load %arg8[%c1_86, %c0_87, %c0_88] : memref<2x64x256xf32, #tpu.memory_space<vmem>>, vector<1x64x256xf32>
    %233 = vector.shape_cast %232 : vector<1x64x256xf32> to vector<64x256xf32>
    %234 = vector.shape_cast %231 : vector<64x256xf32> to vector<1x64x256xf32>
    tpu.vector_store %arg8[%c1_86, %c0_87, %c0_88], %234 {strides = array<i32>} : memref<2x64x256xf32, #tpu.memory_space<vmem>>, vector<1x64x256xf32>,
    return
  }
  func.func @transform_0(%arg0: i32) -> (i32, i32, i32) {
    %c0_i32 = arith.constant 0 : i32
    %c0_i32_0 = arith.constant 0 : i32
    %c0_i32_1 = arith.constant 0 : i32
    return %arg0, %c0_i32, %c0_i32_0 : i32, i32, i32
  }
  func.func @transform_1(%arg0: i32) -> (i32, i32) {
    %c0_i32 = arith.constant 0 : i32
    %c0_i32_0 = arith.constant 0 : i32
    %c0_i32_1 = arith.constant 0 : i32
    return %c0_i32, %c0_i32_0 : i32, i32
  }
  func.func @transform_2(%arg0: i32) -> (i32, i32) {
    %c0_i32 = arith.constant 0 : i32
    %c0_i32_0 = arith.constant 0 : i32
    %c0_i32_1 = arith.constant 0 : i32
    return %c0_i32, %c0_i32_0 : i32, i32
  }
  func.func @transform_3(%arg0: i32) -> (i32, i32) {
    %c0_i32 = arith.constant 0 : i32
    %c0_i32_0 = arith.constant 0 : i32
    %c0_i32_1 = arith.constant 0 : i32
    return %c0_i32, %c0_i32_0 : i32, i32
  }
  func.func @transform_4(%arg0: i32) -> (i32, i32) {
    %c0_i32 = arith.constant 0 : i32
    %c0_i32_0 = arith.constant 0 : i32
    %c0_i32_1 = arith.constant 0 : i32
    return %c0_i32, %c0_i32_0 : i32, i32
  }
  func.func @transform_5(%arg0: i32) -> (i32, i32) {
    %c0_i32 = arith.constant 0 : i32
    %c0_i32_0 = arith.constant 0 : i32
    %c0_i32_1 = arith.constant 0 : i32
    return %c0_i32, %c0_i32_0 : i32, i32
  }
  func.func @transform_6(%arg0: i32) -> (i32, i32) {
    %c0_i32 = arith.constant 0 : i32
    %c0_i32_0 = arith.constant 0 : i32
    %c0_i32_1 = arith.constant 0 : i32
    return %c0_i32, %c0_i32_0 : i32, i32
  }
  func.func @transform_7(%arg0: i32) -> (i32, i32, i32) {
    %c0_i32 = arith.constant 0 : i32
    %c0_i32_0 = arith.constant 0 : i32
    %c0_i32_1 = arith.constant 0 : i32
    return %arg0, %c0_i32, %c0_i32_0 : i32, i32, i32
  }
}

</mosaic_0001>

<bundles_post_ra>
// kernel: mul.9
= control target key start
LH: loop header
LB: loop body
LE: loop exit
PB: predicated region body
PF: predicated region fallthrough
CT: control target
= control target key end

     0   :  { %s34_s0 = inlined_call_operand.vmem [shape: f32[192], index: 0, kind: input, shape index: {}]   ;;  %s35_s1 = inlined_call_operand.vmem [shape: f32[192], index: 1, kind: input, shape index: {}]   ;;  %s36_s2 = inlined_call_operand.vmem [shape: f32[192], index: 2, kind: output, shape index: {}]  }
   0x1   :  { %v3_v0 = vld [vmem:[%s34_s0] sm:$0x3] }
   0x2   :  { %v4_v1 = vld [vmem:[%s35_s1] sm:$0x3] }
   0x3   :  { %v7_v2 = vmul.f32 %v4_v1, %v3_v0 }
   0x5   :  { %9 = vst [vmem:[%s36_s2] sm:$0x3] %v7_v2 }

// kernel: attention_block.1
= control target key start
LH: loop header
LB: loop body
LE: loop exit
PB: predicated region body
PF: predicated region fallthrough
CT: control target
= control target key end

     0   :  { %v12957_v3 = vmov 0   ;;  %vm928_vm0 = vcmask 523264   ;;  %vm1214_vm1 = vcmask 130048   ;;  %s8649_s13 = smov 112   ;;  %s8651_s27 = smov 96   ;;  %s12949_s0 = inlined_call_operand.vmem [shape: f32[2,64,256], index: 0, kind: input, shape index: {}]   ;;  %s12950_s1 = inlined_call_operand.vmem [shape: f32[64,1], index: 1, kind: input, shape index: {}]   ;;  %s12951_s2 = inlined_call_operand.vmem [shape: f32[64,1], index: 2, kind: input, shape index: {}]   ;;  %s12952_s4 = inlined_call_operand.vmem [shape: f32[192,1], index: 4, kind: input, shape index: {}]   ;;  %s12953_s3 = inlined_call_operand.vmem [shape: bf16[192,64], index: 3, kind: input, shape index: {}]   ;;  %s12954_s5 = inlined_call_operand.vmem [shape: bf16[64,64], index: 5, kind: input, shape index: {}]   ;;  %s12955_s6 = inlined_call_operand.vmem [shape: f32[64,1], index: 6, kind: input, shape index: {}]   ;;  %s12956_s7 = inlined_call_operand.vmem [shape: f32[2,64,256], index: 7, kind: output, shape index: {}]  }
   0x1   :  { %v8696_v0 = vld [vmem:[%s12949_s0 + $0x20] sm:$0xff]  ;;  %v8701_v1 = vld [vmem:[%s12949_s0 + $0x28] sm:$0xff]  ;;  %7495 = vset.pattern.permute.xlu1 %v12957_v3  ;;  %7494 = vset.pattern.permute.xlu0 %v12957_v3  ;;  %v8720_v6 = vld [vmem:[%s12949_s0 + $0x30] sm:$0xff]  ;;  %s8652_s10 = smov 80  }
   0x2   :  { %v8706_v2 = vld [vmem:[%s12949_s0] sm:$0xff]  ;;  %v66_v4 = vadd.f32 %v8701_v1, %v8696_v0  ;;  %v8715_v5 = vld [vmem:[%s12949_s0 + $0x8] sm:$0xff]  ;;  %v8725_v7 = vld [vmem:[%s12949_s0 + $0x38] sm:$0xff]  ;;  %997 = vmatprep.mubr.bf16.mxu0 %v12957_v3  ;;  %1295 = vmatprep.mubr.bf16.mxu1 %v12957_v3 }
   0x3   :  { %v60_v8 = vadd.f32 %v8715_v5, %v8706_v2  ;;  %v8734_v9 = vld [vmem:[%s12949_s0 + $0x10] sm:$0xff]  ;;  %v8739_v10 = vld [vmem:[%s12949_s0 + $0x18] sm:$0xff]  ;;  %v69_v11 = vadd.f32 %v8725_v7, %v8720_v6  ;;  %v8758_v15 = vld [vmem:[%s12949_s0 + $0x40] sm:$0xff] }
   0x4   :  { %67 = vadd.xlane.f32.xlu1 %v66_v4  ;;  %v63_v12 = vadd.f32 %v8739_v10, %v8734_v9  ;;  %v8748_v13 = vld [vmem:[%s12949_s0 + $0x50] sm:$0xff]  ;;  %v8753_v14 = vld [vmem:[%s12949_s0 + $0x58] sm:$0xff]  ;;  %v8763_v16 = vld [vmem:[%s12949_s0 + $0x48] sm:$0xff] }
   0x5   :  { %61 = vadd.xlane.f32.xlu0 %v60_v8  ;;  %v75_v17 = vadd.f32 %v8753_v14, %v8748_v13  ;;  %v72_v18 = vadd.f32 %v8763_v16, %v8758_v15  ;;  %v8772_v19 = vld [vmem:[%s12949_s0 + $0x70] sm:$0xff]  ;;  %v8777_v20 = vld [vmem:[%s12949_s0 + $0x78] sm:$0xff]  ;;  %v8782_v21 = vld [vmem:[%s12949_s0 + $0x60] sm:$0xff] }
   0x6   :  { %v8787_v22 = vld [vmem:[%s12949_s0 + $0x68] sm:$0xff]  ;;  %v81_v23 = vadd.f32 %v8777_v20, %v8772_v19  ;;  %v516_v26 = vld [vmem:[%s12951_s2] sm:$0xff]  ;;  %v510_v30 = vld [vmem:[%s12950_s1 + $0x10] sm:$0xff] }
   0x7   :  { %v78_v24 = vadd.f32 %v8787_v22, %v8782_v21  ;;  %v509_v25 = vld [vmem:[%s12950_s1 + $0x8] sm:$0xff]  ;;  %v508_v27 = vld [vmem:[%s12950_s1] sm:$0xff]  ;;  %v511_v31 = vld [vmem:[%s12950_s1 + $0x18] sm:$0xff] }
   0x8   :  { %70 = vadd.xlane.f32.xlu1 %v69_v11  ;;  %v517_v28 = vld [vmem:[%s12951_s2 + $0x8] sm:$0xff]  ;;  %v518_v32 = vld [vmem:[%s12951_s2 + $0x10] sm:$0xff]  ;;  %v519_v33 = vld [vmem:[%s12951_s2 + $0x18] sm:$0xff] }
   0x9   :  { %64 = vadd.xlane.f32.xlu0 %v63_v12  ;;  %v513_v29 = vld [vmem:[%s12950_s1 + $0x28] sm:$0xff]  ;;  %v512_v34 = vld [vmem:[%s12950_s1 + $0x20] sm:$0xff] }
   0xa   :  { %v520_v35 = vld [vmem:[%s12951_s2 + $0x20] sm:$0xff] }
   0xc   :  { %76 = vadd.xlane.f32.xlu1 %v75_v17 }
   0xd   :  { %73 = vadd.xlane.f32.xlu0 %v72_v18 }
  0x10   :  { %82 = vadd.xlane.f32.xlu1 %v81_v23 }
  0x11   :  { %79 = vadd.xlane.f32.xlu0 %v78_v24 }
  0x21   :  { %531 = vperm.xlu1 %7495, %v509_v25  }
  0x25   :  { %598 = vperm.xlu1 %7495, %v516_v26  }
  0x27   :  { %526 = vperm.xlu0 %7494, %v508_v27  }
  0x29   :  { %603 = vperm.xlu1 %7495, %v517_v28  }
  0x2b   :  { %551 = vperm.xlu0 %7494, %v513_v29  }
  0x2d   :  { %536 = vperm.xlu1 %7495, %v510_v30  }
  0x31   :  { %541 = vperm.xlu1 %7495, %v511_v31  }
  0x35   :  { %608 = vperm.xlu1 %7495, %v518_v32  }
  0x39   :  { %613 = vperm.xlu1 %7495, %v519_v33  }
  0x3d   :  { %546 = vperm.xlu1 %7495, %v512_v34  }
  0x41   :  { %618 = vperm.xlu1 %7495, %v520_v35  }
  0x91   :  { %v68_v36 = vpop.xlane.xlu1 %67 }
  0x92   :  { %v120_v37 = vrot.slane %v68_v36, 4  ;;  %v62_v38 = vpop.xlane.xlu0 %61 }
  0x93   :  { %v108_v39 = vrot.slane %v62_v38, 4 }
  0x94   :  { %v121_v40 = vadd.f32 %v120_v37, %v68_v36 }
  0x95   :  { %v109_v41 = vadd.f32 %v108_v39, %v62_v38  ;;  %v71_v42 = vpop.xlane.xlu1 %70 }
  0x96   :  { %v122_v43 = vrot.slane %v121_v40, 2  ;;  %v126_v44 = vrot.slane %v71_v42, 4  ;;  %v65_v45 = vpop.xlane.xlu0 %64 }
  0x97   :  { %v110_v46 = vrot.slane %v109_v41, 2  ;;  %v114_v47 = vrot.slane %v65_v45, 4 }
  0x98   :  { %v123_v48 = vadd.f32 %v122_v43, %v121_v40  ;;  %v127_v49 = vadd.f32 %v126_v44, %v71_v42 }
  0x99   :  { %v111_v50 = vadd.f32 %v110_v46, %v109_v41  ;;  %v115_v51 = vadd.f32 %v114_v47, %v65_v45  ;;  %v77_v52 = vpop.xlane.xlu1 %76 }
  0x9a   :  { %v124_v53 = vrot.slane %v123_v48, 1  ;;  %v128_v54 = vrot.slane %v127_v49, 2  ;;  %v138_v55 = vrot.slane %v77_v52, 4  ;;  %v74_v56 = vpop.xlane.xlu0 %73 }
  0x9b   :  { %v112_v57 = vrot.slane %v111_v50, 1  ;;  %v116_v58 = vrot.slane %v115_v51, 2  ;;  %v132_v59 = vrot.slane %v74_v56, 4 }
  0x9c   :  { %v125_v60 = vadd.f32 %v124_v53, %v123_v48  ;;  %v129_v61 = vadd.f32 %v128_v54, %v127_v49  ;;  %v139_v62 = vadd.f32 %v138_v55, %v77_v52 }
  0x9d   :  { %v113_v63 = vadd.f32 %v112_v57, %v111_v50  ;;  %v117_v4 = vadd.f32 %v116_v58, %v115_v51  ;;  %v133_v8 = vadd.f32 %v132_v59, %v74_v56  ;;  %v83_v11 = vpop.xlane.xlu1 %82 }
  0x9e   :  { %v130_v12 = vrot.slane %v129_v61, 1  ;;  %v140_v17 = vrot.slane %v139_v62, 2  ;;  %v150_v18 = vrot.slane %v83_v11, 4  ;;  %v80_v23 = vpop.xlane.xlu0 %79  ;;  %v206_v24 = vmul.f32 0.00048828125, %v125_v60 }
  0x9f   :  { %v118_v25 = vrot.slane %v117_v4, 1  ;;  %v134_v26 = vrot.slane %v133_v8, 2  ;;  %v144_v27 = vrot.slane %v80_v23, 4  ;;  %v204_v28 = vmul.f32 0.00048828125, %v113_v63 }
  0xa0   :  { %v131_v29 = vadd.f32 %v130_v12, %v129_v61  ;;  %v141_v30 = vadd.f32 %v140_v17, %v139_v62  ;;  %v151_v31 = vadd.f32 %v150_v18, %v83_v11  ;;  %v8827_v32 = vsub.f32 %v8696_v0, %v206_v24 }
  0xa1   :  { %v119_v33 = vadd.f32 %v118_v25, %v117_v4  ;;  %v135_v34 = vadd.f32 %v134_v26, %v133_v8  ;;  %v145_v35 = vadd.f32 %v144_v27, %v80_v23  ;;  %v8830_v36 = vsub.f32 %v8706_v2, %v204_v28 }
  0xa2   :  { %v142_v37 = vrot.slane %v141_v30, 1  ;;  %v152_v38 = vrot.slane %v151_v31, 2  ;;  %v8833_v39 = vsub.f32 %v8715_v5, %v204_v28  ;;  %v8836_v40 = vsub.f32 %v8701_v1, %v206_v24 }
  0xa3   :  { %v136_v41 = vrot.slane %v135_v34, 1  ;;  %v146_v42 = vrot.slane %v145_v35, 2  ;;  %v252_v0 = vmul.f32 %v8830_v36, %v8830_v36  ;;  %v256_v43 = vmul.f32 %v8827_v32, %v8827_v32 }
  0xa4   :  { %v143_v44 = vadd.f32 %v142_v37, %v141_v30  ;;  %v153_v45 = vadd.f32 %v152_v38, %v151_v31  ;;  %v253_v2 = vmul.f32 %v8833_v39, %v8833_v39  ;;  %v257_v5 = vmul.f32 %v8836_v40, %v8836_v40  ;;  %v523_v37 = vld [vmem:[%s12951_s2 + $0x38] sm:$0xff]  ;;  %v710_v38 = vld [vmem:[%s12952_s4 + $0x10] sm:$0xff] }
  0xa5   :  { %v137_v46 = vadd.f32 %v136_v41, %v135_v34  ;;  %v147_v47 = vadd.f32 %v146_v42, %v145_v35  ;;  %v205_v1 = vmul.f32 0.00048828125, %v119_v33  ;;  %v207_v48 = vmul.f32 0.00048828125, %v131_v29  ;;  %v522_v33 = vld [vmem:[%s12951_s2 + $0x30] sm:$0xff]  ;;  %v515_v34 = vld [vmem:[%s12950_s1 + $0x38] sm:$0xff]  ;;  %v708_v35 = vld [vmem:[%s12952_s4] sm:$0xff] }
  0xa6   :  { %v154_v49 = vrot.slane %v153_v45, 1  ;;  %v284_v50 = vadd.f32 %v253_v2, %v252_v0  ;;  %v290_v51 = vadd.f32 %v257_v5, %v256_v43  ;;  %v209_v52 = vmul.f32 0.00048828125, %v143_v44  ;;  %v709_v41 = vld [vmem:[%s12952_s4 + $0x8] sm:$0xff]  ;;  %v712_v42 = vld [vmem:[%s12952_s4 + $0x20] sm:$0xff]  ;;  %v711_v0 = vld [vmem:[%s12952_s4 + $0x18] sm:$0xff] }
  0xa7   :  { %v148_v53 = vrot.slane %v147_v47, 1  ;;  %v8847_v54 = vsub.f32 %v8734_v9, %v205_v1  ;;  %v8850_v55 = vsub.f32 %v8739_v10, %v205_v1  ;;  %v8853_v56 = vsub.f32 %v8720_v6, %v207_v48  ;;  %v714_v43 = vld [vmem:[%s12952_s4 + $0x30] sm:$0xff]  ;;  %v713_v44 = vld [vmem:[%s12952_s4 + $0x28] sm:$0xff]  ;;  %v715_v2 = vld [vmem:[%s12952_s4 + $0x38] sm:$0xff] }
  0xa8   :  { %v155_v57 = vadd.f32 %v154_v49, %v153_v45  ;;  %285 = vadd.xlane.f32.xlu0 %v284_v50  ;;  %v8856_v58 = vsub.f32 %v8725_v7, %v207_v48  ;;  %v208_v59 = vmul.f32 0.00048828125, %v137_v46  ;;  %v8859_v60 = vsub.f32 %v8748_v13, %v209_v52  ;;  %v716_v45 = vld [vmem:[%s12952_s4 + $0x40] sm:$0xff]  ;;  %v717_v5 = vld [vmem:[%s12952_s4 + $0x48] sm:$0xff]  ;;  %v8951_v46 = vpop.permute.xlu1 %531 }
  0xa9   :  { %v149_v61 = vadd.f32 %v148_v53, %v147_v47  ;;  %v254_v9 = vmul.f32 %v8847_v54, %v8847_v54  ;;  %v255_v10 = vmul.f32 %v8850_v55, %v8850_v55  ;;  %v258_v6 = vmul.f32 %v8853_v56, %v8853_v56  ;;  %13307 = vst [vmem:[#allocation3_spill] sm:$0xff] %v8951_v46 }
  0xaa   :  { %v259_v62 = vmul.f32 %v8856_v58, %v8856_v58  ;;  %v8870_v7 = vsub.f32 %v8758_v15, %v208_v59  ;;  %v8873_v63 = vsub.f32 %v8763_v16, %v208_v59  ;;  %v8876_v13 = vsub.f32 %v8753_v14, %v209_v52  ;;  %v8965_v52 = vpop.permute.xlu0 %526 }
  0xab   :  { %v287_v4 = vadd.f32 %v255_v10, %v254_v9  ;;  %v210_v8 = vmul.f32 0.00048828125, %v149_v61  ;;  %v211_v11 = vmul.f32 0.00048828125, %v155_v57  ;;  %v262_v23 = vmul.f32 %v8859_v60, %v8859_v60  ;;  %13314 = vst [vmem:[#allocation10_spill] sm:$0xff] %v8965_v52 }
  0xac   :  { %291 = vadd.xlane.f32.xlu0 %v290_v51  ;;  %v260_v12 = vmul.f32 %v8870_v7, %v8870_v7  ;;  %v261_v17 = vmul.f32 %v8873_v63, %v8873_v63  ;;  %v293_v18 = vadd.f32 %v259_v62, %v258_v6  ;;  %v263_v24 = vmul.f32 %v8876_v13, %v8876_v13  ;;  %v8953_v47 = vpop.permute.xlu1 %598 }
  0xad   :  { %288 = vadd.xlane.f32.xlu1 %v287_v4  ;;  %v8883_v15 = vsub.f32 %v8782_v21, %v210_v8  ;;  %v8886_v16 = vsub.f32 %v8787_v22, %v210_v8  ;;  %v8897_v21 = vsub.f32 %v8772_v19, %v211_v11  ;;  %v8900_v22 = vsub.f32 %v8777_v20, %v211_v11  ;;  %v514_v19 = vld [vmem:[%s12950_s1 + $0x30] sm:$0xff]  ;;  %v521_v20 = vld [vmem:[%s12951_s2 + $0x28] sm:$0xff] }
  0xae   :  { %v296_v14 = vadd.f32 %v261_v17, %v260_v12  ;;  %v299_v28 = vadd.f32 %v263_v24, %v262_v23  ;;  %13308 = vst [vmem:[#allocation4_spill] sm:$0xff] %v8953_v47  ;;  %v8969_v57 = vpop.permute.xlu0 %551 }
  0xaf   :  { %v264_v25 = vmul.f32 %v8883_v15, %v8883_v15  ;;  %v265_v26 = vmul.f32 %v8886_v16, %v8886_v16  ;;  %v266_v29 = vmul.f32 %v8897_v21, %v8897_v21  ;;  %v267_v30 = vmul.f32 %v8900_v22, %v8900_v22  ;;  %13316 = vst [vmem:[#allocation12_spill] sm:$0xff] %v8969_v57 }
  0xb0   :  { %297 = vadd.xlane.f32.xlu0 %v296_v14  ;;  %v8955_v1 = vpop.permute.xlu1 %603 }
  0xb1   :  { %294 = vadd.xlane.f32.xlu1 %v293_v18  ;;  %v302_v27 = vadd.f32 %v265_v26, %v264_v25  ;;  %v305_v31 = vadd.f32 %v267_v30, %v266_v29  ;;  %13309 = vst [vmem:[#allocation5_spill] sm:$0xff] %v8955_v1 }
  0xb4   :  { %303 = vadd.xlane.f32.xlu0 %v302_v27  ;;  %v8957_v48 = vpop.permute.xlu1 %536 }
  0xb5   :  { %300 = vadd.xlane.f32.xlu1 %v299_v28  ;;  %13310 = vst [vmem:[#allocation6_spill] sm:$0xff] %v8957_v48 }
  0xb8   :  { %v8959_v49 = vpop.permute.xlu1 %541 }
  0xb9   :  { %306 = vadd.xlane.f32.xlu1 %v305_v31  ;;  %13311 = vst [vmem:[#allocation7_spill] sm:$0xff] %v8959_v49 }
  0xbc   :  { %v8961_v50 = vpop.permute.xlu1 %608 }
  0xbd   :  { %13312 = vst [vmem:[#allocation8_spill] sm:$0xff] %v8961_v50 }
  0xc0   :  { %v8963_v51 = vpop.permute.xlu1 %613 }
  0xc1   :  { %13313 = vst [vmem:[#allocation9_spill] sm:$0xff] %v8963_v51 }
  0xc4   :  { %v8967_v53 = vpop.permute.xlu1 %546 }
  0xc5   :  { %13315 = vst [vmem:[#allocation11_spill] sm:$0xff] %v8967_v53 }
  0xc8   :  { %v8971_v61 = vpop.permute.xlu1 %618 }
  0xc9   :  { %13317 = vst [vmem:[#allocation13_spill] sm:$0xff] %v8971_v61 }
  0xca   :  { %556 = vperm.xlu1 %7495, %v514_v19   ;;  %623 = vperm.xlu0 %7494, %v521_v20  }
  0xce   :  { %628 = vperm.xlu1 %7495, %v522_v33   ;;  %561 = vperm.xlu0 %7494, %v515_v34  }
  0xd2   :  { %750 = vperm.xlu1 %7495, %v708_v35   ;;  %633 = vperm.xlu0 %7494, %v523_v37  }
  0xd6   :  { %760 = vperm.xlu1 %7495, %v710_v38   ;;  %755 = vperm.xlu0 %7494, %v709_v41  }
  0xda   :  { %770 = vperm.xlu1 %7495, %v712_v42   ;;  %765 = vperm.xlu0 %7494, %v711_v0  }
  0xde   :  { %780 = vperm.xlu1 %7495, %v714_v43   ;;  %775 = vperm.xlu0 %7494, %v713_v44  }
  0xe2   :  { %790 = vperm.xlu1 %7495, %v716_v45   ;;  %785 = vperm.xlu0 %7494, %v715_v2  }
  0xe6   :  { %795 = vperm.xlu0 %7494, %v717_v5  }
 0x135   :  { %v286_v59 = vpop.xlane.xlu0 %285 }
 0x136   :  { %v332_v9 = vrot.slane %v286_v59, 4 }
 0x138   :  { %v333_v10 = vadd.f32 %v332_v9, %v286_v59 }
 0x139   :  { %v292_v6 = vpop.xlane.xlu0 %291 }
 0x13a   :  { %v334_v62 = vrot.slane %v333_v10, 2  ;;  %v289_v4 = vpop.xlane.xlu1 %288  ;;  %v344_v8 = vrot.slane %v292_v6, 4 }
 0x13b   :  { %v338_v11 = vrot.slane %v289_v4, 4 }
 0x13c   :  { %v335_v12 = vadd.f32 %v334_v62, %v333_v10  ;;  %v345_v17 = vadd.f32 %v344_v8, %v292_v6 }
 0x13d   :  { %v339_v18 = vadd.f32 %v338_v11, %v289_v4  ;;  %v298_v14 = vpop.xlane.xlu0 %297 }
 0x13e   :  { %v336_v23 = vrot.slane %v335_v12, 1  ;;  %v346_v24 = vrot.slane %v345_v17, 2  ;;  %v295_v25 = vpop.xlane.xlu1 %294  ;;  %v356_v26 = vrot.slane %v298_v14, 4 }
 0x13f   :  { %v340_v27 = vrot.slane %v339_v18, 2  ;;  %v350_v28 = vrot.slane %v295_v25, 4 }
 0x140   :  { %v337_v29 = vadd.f32 %v336_v23, %v335_v12  ;;  %v347_v30 = vadd.f32 %v346_v24, %v345_v17  ;;  %v357_v31 = vadd.f32 %v356_v26, %v298_v14 }
 0x141   :  { %v341_v19 = vadd.f32 %v340_v27, %v339_v18  ;;  %v351_v20 = vadd.f32 %v350_v28, %v295_v25  ;;  %v304_v33 = vpop.xlane.xlu0 %303 }
 0x142   :  { %v428_v34 = vmul.f32 0.00048828125, %v337_v29  ;;  %v348_v35 = vrot.slane %v347_v30, 1  ;;  %v358_v37 = vrot.slane %v357_v31, 2  ;;  %v301_v38 = vpop.xlane.xlu1 %300  ;;  %v368_v41 = vrot.slane %v304_v33, 4 }
 0x143   :  { %v342_v42 = vrot.slane %v341_v19, 1  ;;  %v352_v0 = vrot.slane %v351_v20, 2  ;;  %v362_v43 = vrot.slane %v301_v38, 4 }
 0x144   :  { %v444_v44 = vadd.f32 1e-05, %v428_v34  ;;  %v349_v45 = vadd.f32 %v348_v35, %v347_v30  ;;  %v359_v2 = vadd.f32 %v358_v37, %v357_v31  ;;  %v369_v5 = vadd.f32 %v368_v41, %v304_v33 }
 0x145   :  { %v343_v59 = vadd.f32 %v342_v42, %v341_v19  ;;  %v353_v9 = vadd.f32 %v352_v0, %v351_v20  ;;  %v363_v10 = vadd.f32 %v362_v43, %v301_v38 }
 0x146   :  { %7512 = vrsqrt.f32 %v444_v44  ;;  %v430_v6 = vmul.f32 0.00048828125, %v349_v45  ;;  %v360_v62 = vrot.slane %v359_v2, 1  ;;  %v370_v4 = vrot.slane %v369_v5, 2  ;;  %v307_v8 = vpop.xlane.xlu1 %306 }
 0x147   :  { %v429_v11 = vmul.f32 0.00048828125, %v343_v59  ;;  %v354_v12 = vrot.slane %v353_v9, 1  ;;  %v364_v17 = vrot.slane %v363_v10, 2  ;;  %v374_v18 = vrot.slane %v307_v8, 4 }
 0x148   :  { %v446_v14 = vadd.f32 1e-05, %v430_v6  ;;  %v361_v23 = vadd.f32 %v360_v62, %v359_v2  ;;  %v371_v24 = vadd.f32 %v370_v4, %v369_v5 }
 0x149   :  { %v445_v25 = vadd.f32 1e-05, %v429_v11  ;;  %v355_v26 = vadd.f32 %v354_v12, %v353_v9  ;;  %v365_v27 = vadd.f32 %v364_v17, %v363_v10  ;;  %v375_v28 = vadd.f32 %v374_v18, %v307_v8 }
 0x14a   :  { %7514 = vrsqrt.f32 %v446_v14  ;;  %v432_v29 = vmul.f32 0.00048828125, %v361_v23  ;;  %v372_v30 = vrot.slane %v371_v24, 1 }
 0x14b   :  { %7516 = vrsqrt.f32 %v445_v25  ;;  %v431_v31 = vmul.f32 0.00048828125, %v355_v26  ;;  %v366_v19 = vrot.slane %v365_v27, 1  ;;  %v376_v20 = vrot.slane %v375_v28, 2  ;;  %v8985_v26 = vpop.permute.xlu0 %623 }
 0x14c   :  { %v448_v33 = vadd.f32 1e-05, %v432_v29  ;;  %v373_v34 = vadd.f32 %v372_v30, %v371_v24  ;;  %13318 = vst [vmem:[#allocation14_spill] sm:$0xff] %v8985_v26 }
 0x14d   :  { %v447_v35 = vadd.f32 1e-05, %v431_v31  ;;  %v367_v37 = vadd.f32 %v366_v19, %v365_v27  ;;  %v377_v38 = vadd.f32 %v376_v20, %v375_v28 }
 0x14e   :  { %7518 = vrsqrt.f32 %v448_v33  ;;  %v434_v41 = vmul.f32 0.00048828125, %v373_v34 }
 0x14f   :  { %7520 = vrsqrt.f32 %v447_v35  ;;  %v433_v42 = vmul.f32 0.00048828125, %v367_v37  ;;  %v378_v0 = vrot.slane %v377_v38, 1 }
 0x150   :  { %v7513_v43 = vpop.eup %7512  ;;  %v450_v44 = vadd.f32 1e-05, %v434_v41 }
 0x151   :  { %v449_v45 = vadd.f32 1e-05, %v433_v42  ;;  %v379_v2 = vadd.f32 %v378_v0, %v377_v38  ;;  %v477_v5 = vmul.f32 %v7513_v43, %v8833_v39  ;;  %v476_v59 = vmul.f32 %v7513_v43, %v8830_v36 }
 0x152   :  { %7522 = vrsqrt.f32 %v450_v44  ;;  %v9007_v44 = vpop.permute.xlu1 %556 }
 0x153   :  { %7524 = vrsqrt.f32 %v449_v45  ;;  %v435_v9 = vmul.f32 0.00048828125, %v379_v2  ;;  %v565_v4 = vmul.f32 %v8965_v52, %v477_v5  ;;  %v564_v8 = vmul.f32 %v8965_v52, %v476_v59  ;;  %13319 = vst [vmem:[#allocation15_spill] sm:$0xff] %v9007_v44  ;;  %v9009_v45 = vpop.permute.xlu0 %561 }
 0x154   :  { %v7515_v10 = vpop.eup %7514  ;;  %13320 = vst [vmem:[#allocation16_spill] sm:$0xff] %v9009_v45 }
 0x155   :  { %v7517_v6 = vpop.eup %7516  ;;  %v451_v62 = vadd.f32 1e-05, %v435_v9  ;;  %v481_v11 = vmul.f32 %v7515_v10, %v8836_v40  ;;  %v480_v39 = vmul.f32 %v7515_v10, %v8827_v32  ;;  %v637_v40 = vadd.f32 %v8953_v47, %v565_v4 }
 0x156   :  { %v479_v12 = vmul.f32 %v7517_v6, %v8850_v55  ;;  %v478_v17 = vmul.f32 %v7517_v6, %v8847_v54  ;;  %v636_v55 = vadd.f32 %v8953_v47, %v564_v8 }
 0x157   :  { %7526 = vrsqrt.f32 %v451_v62  ;;  %v569_v36 = vmul.f32 %v8957_v48, %v481_v11  ;;  %v568_v24 = vmul.f32 %v8957_v48, %v480_v39 }
 0x158   :  { %v7519_v18 = vpop.eup %7518  ;;  %v567_v14 = vmul.f32 %v8951_v46, %v479_v12  ;;  %v566_v23 = vmul.f32 %v8951_v46, %v478_v17 }
 0x159   :  { %v7521_v25 = vpop.eup %7520  ;;  %v485_v54 = vmul.f32 %v7519_v18, %v8873_v63  ;;  %v484_v32 = vmul.f32 %v7519_v18, %v8870_v7  ;;  %v641_v31 = vadd.f32 %v8961_v50, %v569_v36  ;;  %v640_v19 = vadd.f32 %v8961_v50, %v568_v24  ;;  %v9023_v36 = vpop.permute.xlu1 %628 }
 0x15a   :  { %v639_v27 = vadd.f32 %v8955_v1, %v567_v14  ;;  %v638_v28 = vadd.f32 %v8955_v1, %v566_v23  ;;  %v483_v29 = vmul.f32 %v7521_v25, %v8856_v58  ;;  %v482_v30 = vmul.f32 %v7521_v25, %v8853_v56  ;;  %13321 = vst [vmem:[#allocation17_spill] sm:$0xff] %v9023_v36  ;;  %v9025_v18 = vpop.permute.xlu0 %633 }
 0x15b   :  { %v573_v37 = vmul.f32 %v8967_v53, %v485_v54  ;;  %v572_v38 = vmul.f32 %v8967_v53, %v484_v32  ;;  %13322 = vst [vmem:[#allocation18_spill] sm:$0xff] %v9025_v18  ;;  %v7498_v54 = vld [vmem:[%s12953_s3 + $0x10] sm:$0xff]   ;;  %v7499_v32 = vld [vmem:[%s12953_s3 + $0x18] sm:$0xff]  }
 0x15c   :  { %v7523_v20 = vpop.eup %7522  ;;  %v669_v33 = vpack.c.bf16 %v639_v27, %v637_v40  ;;  %v668_v34 = vpack.c.bf16 %v638_v28, %v636_v55  ;;  %v571_v35 = vmul.f32 %v8959_v49, %v483_v29  ;;  %v570_v63 = vmul.f32 %v8959_v49, %v482_v30  ;;  %v7496_v40 = vld [vmem:[%s12953_s3] sm:$0xff]   ;;  %v7497_v55 = vld [vmem:[%s12953_s3 + $0x8] sm:$0xff]  }
 0x15d   :  { %v7525_v7 = vpop.eup %7524  ;;  %v489_v58 = vmul.f32 %v7523_v20, %v8886_v16  ;;  %v488_v56 = vmul.f32 %v7523_v20, %v8883_v15  ;;  %v645_v9 = vadd.f32 %v8971_v61, %v573_v37  ;;  %v644_v10 = vadd.f32 %v8971_v61, %v572_v38  ;;  %v7500_v27 = vld [vmem:[%s12953_s3 + $0x20] sm:$0xff]   ;;  %v9056_v28 = vpop.permute.xlu1 %750 }
 0x15e   :  { %965 = vmatprep.subr.bf16.mxu0 %v669_v33  ;;  %v643_v41 = vadd.f32 %v8963_v51, %v571_v35  ;;  %v642_v42 = vadd.f32 %v8963_v51, %v570_v63  ;;  %v487_v0 = vmul.f32 %v7525_v7, %v8876_v13  ;;  %v486_v43 = vmul.f32 %v7525_v7, %v8859_v60 }
 0x15f   :  { %966 = vmatpush1.bf16.msra.mxu0 %v668_v34  ;;  %v577_v13 = vmul.f32 %v9007_v44, %v489_v58  ;;  %v576_v60 = vmul.f32 %v9007_v44, %v488_v56  ;;  %13323 = vst [vmem:[#allocation19_spill] sm:$0xff] %v9056_v28  ;;  %v9060_v34 = vpop.permute.xlu0 %755 }
 0x160   :  { %v671_v2 = vpack.c.bf16 %v643_v41, %v641_v31  ;;  %v670_v5 = vpack.c.bf16 %v642_v42, %v640_v19  ;;  %v575_v16 = vmul.f32 %v8969_v57, %v487_v0  ;;  %v574_v15 = vmul.f32 %v8969_v57, %v486_v43  ;;  %13324 = vst [vmem:[#allocation20_spill] sm:$0xff] %v9060_v34 }
 0x161   :  { %v7527_v59 = vpop.eup %7526  ;;  %v649_v14 = vadd.f32 %v9023_v36, %v577_v13  ;;  %v9064_v7 = vpop.permute.xlu1 %760 }
 0x162   :  { %967 = vmatprep.subr.bf16.mxu0 %v671_v2  ;;  %v647_v6 = vadd.f32 %v8985_v26, %v575_v16  ;;  %v646_v62 = vadd.f32 %v8985_v26, %v574_v15  ;;  %v491_v4 = vmul.f32 %v7527_v59, %v8900_v22  ;;  %v490_v8 = vmul.f32 %v7527_v59, %v8897_v21 }
 0x163   :  { %968 = vmatpush1.bf16.msra.mxu0 %v670_v5  ;;  %v648_v22 = vadd.f32 %v9023_v36, %v576_v60  ;;  %13325 = vst [vmem:[#allocation21_spill] sm:$0xff] %v9064_v7  ;;  %v9068_v0 = vpop.permute.xlu0 %765 }
 0x164   :  { %v673_v11 = vpack.c.bf16 %v647_v6, %v645_v9  ;;  %v672_v12 = vpack.c.bf16 %v646_v62, %v644_v10  ;;  %v579_v17 = vmul.f32 %v9009_v45, %v491_v4  ;;  %v578_v39 = vmul.f32 %v9009_v45, %v490_v8  ;;  %13326 = vst [vmem:[#allocation22_spill] sm:$0xff] %v9068_v0 }
 0x165   :  { %v9072_v5 = vpop.permute.xlu1 %770 }
 0x166   :  { %969 = vmatprep.subr.bf16.mxu0 %v673_v11  ;;  %v651_v23 = vadd.f32 %v9025_v18, %v579_v17  ;;  %v650_v21 = vadd.f32 %v9025_v18, %v578_v39  ;;  %13327 = vst [vmem:[#allocation23_spill] sm:$0xff] %v9072_v5 }
 0x167   :  { %970 = vmatpush1.bf16.msra.mxu0 %v672_v12  ;;  %v9076_v60 = vpop.permute.xlu0 %775 }
 0x168   :  { %v675_v24 = vpack.c.bf16 %v651_v23, %v649_v14  ;;  %v674_v25 = vpack.c.bf16 %v650_v21, %v648_v22  ;;  %13328 = vst [vmem:[#allocation24_spill] sm:$0xff] %v9076_v60 }
 0x169   :  { %v9080_v4 = vpop.permute.xlu1 %780 }
 0x16a   :  { %971 = vmatprep.subr.bf16.mxu0 %v675_v24  ;;  %13329 = vst [vmem:[#allocation25_spill] sm:$0xff] %v9080_v4 }
 0x16b   :  { %972 = vmatpush1.bf16.msra.mxu0 %v674_v25  ;;  %v9084_v23 = vpop.permute.xlu0 %785 }
 0x16c   :  { %13330 = vst [vmem:[#allocation26_spill] sm:$0xff] %v9084_v23 }
 0x16d   :  { %v9088_v25 = vpop.permute.xlu1 %790 }
 0x16e   :  { %7308 = vmatmul.mubr.msk.bf16.vlgmr.msra.gmra.mrb[0].mxu0 %vm928_vm0, %v7496_v40  ;;  %13331 = vst [vmem:[#allocation27_spill] sm:$0xff] %v9088_v25 }
 0x16f   :  { %1007 = vmatprep.mubr.bf16.mxu0 %v12957_v3 }
 0x176   :  { %7309 = vmatmul.mubr.msk.bf16.gmra.mrb[4].mxu0 %vm928_vm0, %v7497_v55  ;;  %v9090_v55 = vpop.permute.xlu0 %795 }
 0x177   :  { %1017 = vmatprep.mubr.bf16.mxu0 %v12957_v3  ;;  %13332 = vst [vmem:[#allocation28_spill] sm:$0xff] %v9090_v55 }
 0x17e   :  { %7310 = vmatmul.mubr.msk.bf16.gmra.mrb[8].mxu0 %vm928_vm0, %v7498_v54 }
 0x17f   :  { %1027 = vmatprep.mubr.bf16.mxu0 %v12957_v3 }
 0x186   :  { %7311 = vmatmul.mubr.msk.bf16.gmra.mrb[12].mxu0 %vm928_vm0, %v7499_v32 }
 0x187   :  { %1037 = vmatprep.mubr.bf16.mxu0 %v12957_v3 }
 0x18e   :  { %7312 = vmatmul.mubr.msk.bf16.gmra.mrb[16].mxu0 %vm928_vm0, %v7500_v27 }
 0x18f   :  { %1047 = vmatprep.mubr.bf16.mxu0 %v12957_v3 }
 0x241   :  { %v999_v29 = vpop.f32.mrb[0].mxu0 }
 0x242   :  { %v1000_v30 = vadd.f32 %v999_v29, %v9056_v28  ;;  %v1001_v31 = vpop.f32.mrb[1].mxu0 }
 0x243   :  { %v1002_v19 = vadd.f32 %v1001_v31, %v9056_v28  ;;  %v1003_v20 = vpop.f32.mrb[2].mxu0 }
 0x244   :  { %v1005_v33 = vpop.f32.mrb[3].mxu0  ;;  %1118 = vxpose.xlu1.b32.start [1/8] (short) %v1000_v30, 128  ;;  %v1004_v35 = vadd.f32 %v1003_v20, %v9060_v34 }
 0x245   :  { %1150 = vxpose.xlu0.b32.start [1/8] (short) %v1002_v19, 128  ;;  %v1006_v63 = vadd.f32 %v1005_v33, %v9060_v34 }
 0x248   :  { %1119 = vxpose.xlu1.b32.cont [2/8] (short) %v1004_v35, 128 }
 0x249   :  { %v1009_v37 = vpop.f32.mrb[4].mxu0  ;;  %1151 = vxpose.xlu0.b32.cont [2/8] (short) %v1006_v63, 128 }
 0x24a   :  { %v1010_v38 = vadd.f32 %v1009_v37, %v9064_v7  ;;  %v1011_v58 = vpop.f32.mrb[5].mxu0 }
 0x24b   :  { %v1012_v56 = vadd.f32 %v1011_v58, %v9064_v7  ;;  %v1013_v41 = vpop.f32.mrb[6].mxu0 }
 0x24c   :  { %v1015_v42 = vpop.f32.mrb[7].mxu0  ;;  %1120 = vxpose.xlu1.b32.cont [3/8] (short) %v1010_v38, 128  ;;  %v1014_v43 = vadd.f32 %v1013_v41, %v9068_v0 }
 0x24d   :  { %1152 = vxpose.xlu0.b32.cont [3/8] (short) %v1012_v56, 128  ;;  %v1016_v2 = vadd.f32 %v1015_v42, %v9068_v0 }
 0x250   :  { %1121 = vxpose.xlu1.b32.cont [4/8] (short) %v1014_v43, 128 }
 0x251   :  { %v1019_v16 = vpop.f32.mrb[8].mxu0  ;;  %1153 = vxpose.xlu0.b32.cont [4/8] (short) %v1016_v2, 128 }
 0x252   :  { %v1020_v15 = vadd.f32 %v1019_v16, %v9072_v5  ;;  %v1021_v59 = vpop.f32.mrb[9].mxu0 }
 0x253   :  { %v1022_v9 = vadd.f32 %v1021_v59, %v9072_v5  ;;  %v1023_v10 = vpop.f32.mrb[10].mxu0 }
 0x254   :  { %v1025_v13 = vpop.f32.mrb[11].mxu0  ;;  %1122 = vxpose.xlu1.b32.cont [5/8] (short) %v1020_v15, 128  ;;  %v1024_v6 = vadd.f32 %v1023_v10, %v9076_v60 }
 0x255   :  { %1154 = vxpose.xlu0.b32.cont [5/8] (short) %v1022_v9, 128  ;;  %v1026_v62 = vadd.f32 %v1025_v13, %v9076_v60 }
 0x258   :  { %1123 = vxpose.xlu1.b32.cont [6/8] (short) %v1024_v6, 128 }
 0x259   :  { %v1029_v8 = vpop.f32.mrb[12].mxu0  ;;  %1155 = vxpose.xlu0.b32.cont [6/8] (short) %v1026_v62, 128 }
 0x25a   :  { %v1030_v11 = vadd.f32 %v1029_v8, %v9080_v4  ;;  %v1031_v12 = vpop.f32.mrb[13].mxu0 }
 0x25b   :  { %v1032_v17 = vadd.f32 %v1031_v12, %v9080_v4  ;;  %v1033_v39 = vpop.f32.mrb[14].mxu0 }
 0x25c   :  { %v1035_v14 = vpop.f32.mrb[15].mxu0  ;;  %1124 = vxpose.xlu1.b32.cont [7/8] (short) %v1030_v11, 128  ;;  %v1034_v22 = vadd.f32 %v1033_v39, %v9084_v23 }
 0x25d   :  { %1156 = vxpose.xlu0.b32.cont [7/8] (short) %v1032_v17, 128  ;;  %v1036_v21 = vadd.f32 %v1035_v14, %v9084_v23 }
 0x260   :  { %1125 = vxpose.xlu1.b32.end [8/8] (short) %v1034_v22, 128 }
 0x261   :  { %v1039_v24 = vpop.f32.mrb[16].mxu0  ;;  %1157 = vxpose.xlu0.b32.end [8/8] (short) %v1036_v21, 128 }
 0x262   :  { %v1041_v40 = vpop.f32.mrb[17].mxu0  ;;  %v1040_v32 = vadd.f32 %v1039_v24, %v9088_v25 }
 0x263   :  { %v1043_v54 = vpop.f32.mrb[18].mxu0  ;;  %v1042_v30 = vadd.f32 %v1041_v40, %v9088_v25 }
 0x264   :  { %v1044_v27 = vadd.f32 %v1043_v54, %v9090_v55  ;;  %v1045_v29 = vpop.f32.mrb[19].mxu0 }
 0x265   :  { %v1046_v31 = vadd.f32 %v1045_v29, %v9090_v55 }
 0x266   :  { %v1198_v19 = vpack.c.bf16 %v1044_v27, %v1040_v32 }
 0x267   :  { %v1199_v20 = vpack.c.bf16 %v1046_v31, %v1042_v30 }
 0x269   :  { %1263 = vmatprep.subr.bf16.mxu1 %v1199_v20 }
 0x26a   :  { %1264 = vmatpush1.bf16.msra.mxu1 %v1198_v19 }
 0x2c4   :  { %v1134_v33 = vpop.trf.xlu1 }
 0x2c5   :  { %v1166_v59 = vpop.trf.xlu0 }
 0x2c8   :  { %v1135_v35 = vpop.trf.xlu1 }
 0x2c9   :  { %v9096_v63 = vpack.c.bf16 %v1135_v35, %v1134_v33  ;;  %v1167_v13 = vpop.trf.xlu0 }
 0x2ca   :  { %v9136_v27 = vpack.c.bf16 %v1167_v13, %v1166_v59  ;;  %v7502_v13 = vld [vmem:[%s12953_s3 + $0x30] sm:$0xff]  }
 0x2cb   :  { %7320 = vmatmul.mubr.msk.bf16.vlgmr.msra.gmra.mrb[0].mxu1 %vm1214_vm1, %v9096_v63 }
 0x2cc   :  { %v1136_v37 = vpop.trf.xlu1  ;;  %1305 = vmatprep.mubr.bf16.mxu1 %v12957_v3 }
 0x2cd   :  { %v1168_v8 = vpop.trf.xlu0 }
 0x2d0   :  { %v1137_v38 = vpop.trf.xlu1 }
 0x2d1   :  { %v9101_v58 = vpack.c.bf16 %v1137_v38, %v1136_v37  ;;  %v1169_v17 = vpop.trf.xlu0 }
 0x2d2   :  { %v9141_v30 = vpack.c.bf16 %v1169_v17, %v1168_v8  ;;  %v7504_v8 = vld [vmem:[%s12953_s3 + $0x40] sm:$0xff]  }
 0x2d3   :  { %7321 = vmatmul.mubr.msk.bf16.gmra.mrb[4].mxu1 %vm1214_vm1, %v9101_v58 }
 0x2d4   :  { %v1138_v56 = vpop.trf.xlu1  ;;  %1315 = vmatprep.mubr.bf16.mxu1 %v12957_v3 }
 0x2d5   :  { %v1170_v21 = vpop.trf.xlu0 }
 0x2d8   :  { %v1139_v41 = vpop.trf.xlu1 }
 0x2d9   :  { %v9106_v42 = vpack.c.bf16 %v1139_v41, %v1138_v56  ;;  %v1171_v54 = vpop.trf.xlu0 }
 0x2da   :  { %v9146_v19 = vpack.c.bf16 %v1171_v54, %v1170_v21 }
 0x2db   :  { %7322 = vmatmul.mubr.msk.bf16.gmra.mrb[8].mxu1 %vm1214_vm1, %v9106_v42 }
 0x2dc   :  { %v1140_v43 = vpop.trf.xlu1  ;;  %1325 = vmatprep.mubr.bf16.mxu1 %v12957_v3 }
 0x2dd   :  { %v1172_v32 = vpop.trf.xlu0 }
 0x2e0   :  { %v1141_v2 = vpop.trf.xlu1 }
 0x2e1   :  { %v9111_v16 = vpack.c.bf16 %v1141_v2, %v1140_v43  ;;  %v1173_v29 = vpop.trf.xlu0 }
 0x2e2   :  { %v9151_v35 = vpack.c.bf16 %v1173_v29, %v1172_v32 }
 0x2e3   :  { %7323 = vmatmul.mubr.msk.bf16.gmra.mrb[12].mxu1 %vm1214_vm1, %v9111_v16 }
 0x2e4   :  { %v1142_v15 = vpop.trf.xlu1  ;;  %1335 = vmatprep.mubr.bf16.mxu1 %v12957_v3 }
 0x2e5   :  { %v1174_v31 = vpop.trf.xlu0 }
 0x2e8   :  { %v1143_v9 = vpop.trf.xlu1 }
 0x2e9   :  { %v9116_v10 = vpack.c.bf16 %v1143_v9, %v1142_v15  ;;  %v1175_v20 = vpop.trf.xlu0  ;;  %v7501_v15 = vld [vmem:[%s12953_s3 + $0x28] sm:$0xff]  }
 0x2ea   :  { %v9156_v38 = vpack.c.bf16 %v1175_v20, %v1174_v31  ;;  %7313 = vmatmul.mubr.msk.bf16.gmra.mrb[20].mxu0 %vm928_vm0, %v7501_v15 }
 0x2eb   :  { %7324 = vmatmul.mubr.msk.bf16.gmra.mrb[16].mxu1 %vm1214_vm1, %v9116_v10  ;;  %1057 = vmatprep.mubr.bf16.mxu0 %v12957_v3 }
 0x2ec   :  { %v1144_v6 = vpop.trf.xlu1  ;;  %1345 = vmatprep.mubr.bf16.mxu1 %v12957_v3  ;;  %13333 = vst [vmem:[#allocation29_spill] sm:$0xff] %v9156_v38 }
 0x2ed   :  { %v1176_v33 = vpop.trf.xlu0 }
 0x2f0   :  { %v1145_v62 = vpop.trf.xlu1 }
 0x2f1   :  { %v9121_v11 = vpack.c.bf16 %v1145_v62, %v1144_v6  ;;  %v1177_v37 = vpop.trf.xlu0  ;;  %v7503_v62 = vld [vmem:[%s12953_s3 + $0x38] sm:$0xff]  }
 0x2f2   :  { %v9161_v41 = vpack.c.bf16 %v1177_v37, %v1176_v33  ;;  %7314 = vmatmul.mubr.msk.bf16.gmra.mrb[24].mxu0 %vm928_vm0, %v7502_v13 }
 0x2f3   :  { %7325 = vmatmul.mubr.msk.bf16.gmra.mrb[20].mxu1 %vm1214_vm1, %v9121_v11  ;;  %1067 = vmatprep.mubr.bf16.mxu0 %v12957_v3 }
 0x2f4   :  { %v1146_v12 = vpop.trf.xlu1  ;;  %1355 = vmatprep.mubr.bf16.mxu1 %v12957_v3 }
 0x2f5   :  { %v1178_v56 = vpop.trf.xlu0 }
 0x2f8   :  { %v1147_v39 = vpop.trf.xlu1 }
 0x2f9   :  { %v9126_v14 = vpack.c.bf16 %v1147_v39, %v1146_v12  ;;  %v1179_v43 = vpop.trf.xlu0 }
 0x2fa   :  { %v9170_v59 = vpack.c.bf16 %v1179_v43, %v1178_v56  ;;  %7315 = vmatmul.mubr.msk.bf16.gmra.mrb[28].mxu0 %vm928_vm0, %v7503_v62 }
 0x2fb   :  { %7326 = vmatmul.mubr.msk.bf16.gmra.mrb[24].mxu1 %vm1214_vm1, %v9126_v14  ;;  %1077 = vmatprep.mubr.bf16.mxu0 %v12957_v3 }
 0x2fc   :  { %v1148_v22 = vpop.trf.xlu1  ;;  %1365 = vmatprep.mubr.bf16.mxu1 %v12957_v3  ;;  %13334 = vst [vmem:[#allocation30_spill] sm:$0xff] %v9170_v59 }
 0x2fd   :  { %v1180_v2 = vpop.trf.xlu0 }
 0x300   :  { %v1149_v24 = vpop.trf.xlu1 }
 0x301   :  { %v9131_v40 = vpack.c.bf16 %v1149_v24, %v1148_v22  ;;  %v1181_v9 = vpop.trf.xlu0 }
 0x302   :  { %v9179_v6 = vpack.c.bf16 %v1181_v9, %v1180_v2  ;;  %7316 = vmatmul.mubr.msk.bf16.gmra.mrb[32].mxu0 %vm928_vm0, %v7504_v8 }
 0x303   :  { %7327 = vmatmul.mubr.msk.bf16.gmra.mrb[28].mxu1 %vm1214_vm1, %v9131_v40  ;;  %1087 = vmatprep.mubr.bf16.mxu0 %v12957_v3 }
 0x304   :  { %1375 = vmatprep.mubr.bf16.mxu1 %v12957_v3 }
 0x30b   :  { %7328 = vmatmul.mubr.msk.bf16.gmra.mrb[32].mxu1 %vm1214_vm1, %v9136_v27 }
 0x30c   :  { %1385 = vmatprep.mubr.bf16.mxu1 %v12957_v3 }
 0x313   :  { %7329 = vmatmul.mubr.msk.bf16.gmra.mrb[36].mxu1 %vm1214_vm1, %v9141_v30 }
 0x314   :  { %1395 = vmatprep.mubr.bf16.mxu1 %v12957_v3 }
 0x31b   :  { %7330 = vmatmul.mubr.msk.bf16.gmra.mrb[40].mxu1 %vm1214_vm1, %v9146_v19 }
 0x31c   :  { %1405 = vmatprep.mubr.bf16.mxu1 %v12957_v3 }
 0x323   :  { %7331 = vmatmul.mubr.msk.bf16.gmra.mrb[44].mxu1 %vm1214_vm1, %v9151_v35 }
 0x324   :  { %1415 = vmatprep.mubr.bf16.mxu1 %v12957_v3 }
 0x32b   :  { %7332 = vmatmul.mubr.msk.bf16.gmra.mrb[48].mxu1 %vm1214_vm1, %v9156_v38 }
 0x32c   :  { %1425 = vmatprep.mubr.bf16.mxu1 %v12957_v3 }
 0x333   :  { %7333 = vmatmul.mubr.msk.bf16.gmra.mrb[52].mxu1 %vm1214_vm1, %v9161_v41 }
 0x334   :  { %1435 = vmatprep.mubr.bf16.mxu1 %v12957_v3 }
 0x33b   :  { %7334 = vmatmul.mubr.msk.bf16.gmra.mrb[56].mxu1 %vm1214_vm1, %v9170_v59 }
 0x33c   :  { %1445 = vmatprep.mubr.bf16.mxu1 %v12957_v3 }
 0x343   :  { %7335 = vmatmul.mubr.msk.bf16.gmra.mrb[60].mxu1 %vm1214_vm1, %v9179_v6 }
 0x39e   :  { %v9195_v12 = vpop.f32.mrb[0].mxu1 }
 0x39f   :  { %v9197_v17 = vpop.f32.mrb[1].mxu1 }
 0x3a0   :  { %v9199_v39 = vpop.f32.mrb[2].mxu1  ;;  %v1456_v22 = vmax.f32 %v9195_v12, %v9197_v17 }
 0x3a1   :  { %v9203_v21 = vpop.f32.mrb[3].mxu1 }
 0x3a2   :  { %1457 = vmax.xlane.f32.xlu0 %v1456_v22  ;;  %v1459_v24 = vmax.f32 %v9199_v39, %v9203_v21 }
 0x3a4   :  { %1460 = vmax.xlane.f32.xlu1 %v1459_v24 }
 0x3a6   :  { %v9207_v54 = vpop.f32.mrb[4].mxu1 }
 0x3a7   :  { %v9209_v32 = vpop.f32.mrb[5].mxu1 }
 0x3a8   :  { %v9211_v29 = vpop.f32.mrb[6].mxu1  ;;  %v1462_v31 = vmax.f32 %v9207_v54, %v9209_v32 }
 0x3a9   :  { %v9215_v20 = vpop.f32.mrb[7].mxu1 }
 0x3aa   :  { %1463 = vmax.xlane.f32.xlu0 %v1462_v31  ;;  %v1465_v33 = vmax.f32 %v9211_v29, %v9215_v20 }
 0x3ac   :  { %1466 = vmax.xlane.f32.xlu1 %v1465_v33 }
 0x3ae   :  { %v9219_v37 = vpop.f32.mrb[8].mxu1 }
 0x3af   :  { %v9221_v56 = vpop.f32.mrb[9].mxu1 }
 0x3b0   :  { %v9223_v43 = vpop.f32.mrb[10].mxu1  ;;  %v1468_v2 = vmax.f32 %v9219_v37, %v9221_v56 }
 0x3b1   :  { %v9227_v15 = vpop.f32.mrb[11].mxu1 }
 0x3b2   :  { %1469 = vmax.xlane.f32.xlu0 %v1468_v2  ;;  %v1471_v9 = vmax.f32 %v9223_v43, %v9227_v15 }
 0x3b4   :  { %1472 = vmax.xlane.f32.xlu1 %v1471_v9 }
 0x3b6   :  { %v9231_v13 = vpop.f32.mrb[12].mxu1 }
 0x3b7   :  { %v9233_v62 = vpop.f32.mrb[13].mxu1 }
 0x3b8   :  { %v9235_v8 = vpop.f32.mrb[14].mxu1  ;;  %v1474_v22 = vmax.f32 %v9231_v13, %v9233_v62 }
 0x3b9   :  { %v9239_v24 = vpop.f32.mrb[15].mxu1 }
 0x3ba   :  { %1475 = vmax.xlane.f32.xlu0 %v1474_v22  ;;  %v1477_v31 = vmax.f32 %v9235_v8, %v9239_v24 }
 0x3bc   :  { %1478 = vmax.xlane.f32.xlu1 %v1477_v31 }
 0x3be   :  { %v9243_v33 = vpop.f32.mrb[16].mxu1 }
 0x3bf   :  { %v9245_v2 = vpop.f32.mrb[17].mxu1 }
 0x3c0   :  { %v9247_v9 = vpop.f32.mrb[18].mxu1  ;;  %v1480_v3 = vmax.f32 %v9243_v33, %v9245_v2 }
 0x3c1   :  { %v9251_v55 = vpop.f32.mrb[19].mxu1 }
 0x3c2   :  { %1481 = vmax.xlane.f32.xlu0 %v1480_v3  ;;  %v1483_v25 = vmax.f32 %v9247_v9, %v9251_v55 }
 0x3c4   :  { %1484 = vmax.xlane.f32.xlu1 %v1483_v25 }
 0x3c6   :  { %v9255_v22 = vpop.f32.mrb[20].mxu1 }
 0x3c7   :  { %v9257_v23 = vpop.f32.mrb[21].mxu1 }
 0x3c8   :  { %v9259_v31 = vpop.f32.mrb[22].mxu1  ;;  %v1486_v4 = vmax.f32 %v9255_v22, %v9257_v23 }
 0x3c9   :  { %v9263_v60 = vpop.f32.mrb[23].mxu1 }
 0x3ca   :  { %1487 = vmax.xlane.f32.xlu0 %v1486_v4  ;;  %v1489_v5 = vmax.f32 %v9259_v31, %v9263_v60 }
 0x3cc   :  { %1490 = vmax.xlane.f32.xlu1 %v1489_v5 }
 0x3ce   :  { %v9267_v3 = vpop.f32.mrb[24].mxu1 }
 0x3cf   :  { %v9269_v0 = vpop.f32.mrb[25].mxu1 }
 0x3d0   :  { %v9271_v25 = vpop.f32.mrb[26].mxu1  ;;  %v1492_v7 = vmax.f32 %v9267_v3, %v9269_v0 }
 0x3d1   :  { %v9275_v34 = vpop.f32.mrb[27].mxu1 }
 0x3d2   :  { %1493 = vmax.xlane.f32.xlu0 %v1492_v7  ;;  %v1495_v28 = vmax.f32 %v9271_v25, %v9275_v34 }
 0x3d4   :  { %1496 = vmax.xlane.f32.xlu1 %v1495_v28 }
 0x3d6   :  { %v9279_v4 = vpop.f32.mrb[28].mxu1 }
 0x3d7   :  { %v9281_v36 = vpop.f32.mrb[29].mxu1 }
 0x3d8   :  { %v9283_v5 = vpop.f32.mrb[30].mxu1  ;;  %v1498_v18 = vmax.f32 %v9279_v4, %v9281_v36 }
 0x3d9   :  { %v9287_v44 = vpop.f32.mrb[31].mxu1 }
 0x3da   :  { %1499 = vmax.xlane.f32.xlu0 %v1498_v18  ;;  %v1501_v45 = vmax.f32 %v9283_v5, %v9287_v44 }
 0x3dc   :  { %1502 = vmax.xlane.f32.xlu1 %v1501_v45 }
 0x3de   :  { %v9291_v7 = vpop.f32.mrb[32].mxu1 }
 0x3df   :  { %v9293_v61 = vpop.f32.mrb[33].mxu1 }
 0x3e0   :  { %v9295_v28 = vpop.f32.mrb[34].mxu1  ;;  %v1504_v26 = vmax.f32 %v9291_v7, %v9293_v61 }
 0x3e1   :  { %v9299_v53 = vpop.f32.mrb[35].mxu1 }
 0x3e2   :  { %1505 = vmax.xlane.f32.xlu0 %v1504_v26  ;;  %v1507_v50 = vmax.f32 %v9295_v28, %v9299_v53 }
 0x3e4   :  { %1508 = vmax.xlane.f32.xlu1 %v1507_v50 }
 0x3e6   :  { %v9303_v18 = vpop.f32.mrb[36].mxu1 }
 0x3e7   :  { %13335 = vst [vmem:[#allocation31_spill] sm:$0xff] %v9303_v18  ;;  %v9305_v57 = vpop.f32.mrb[37].mxu1 }
 0x3e8   :  { %13336 = vst [vmem:[#allocation32_spill] sm:$0xff] %v9305_v57  ;;  %v9307_v45 = vpop.f32.mrb[38].mxu1  ;;  %v1510_v51 = vmax.f32 %v9303_v18, %v9305_v57 }
 0x3e9   :  { %13337 = vst [vmem:[#allocation33_spill] sm:$0xff] %v9307_v45  ;;  %v9311_v48 = vpop.f32.mrb[39].mxu1 }
 0x3ea   :  { %13338 = vst [vmem:[#allocation34_spill] sm:$0xff] %v9311_v48  ;;  %1511 = vmax.xlane.f32.xlu0 %v1510_v51  ;;  %v1513_v49 = vmax.f32 %v9307_v45, %v9311_v48 }
 0x3ec   :  { %1514 = vmax.xlane.f32.xlu1 %v1513_v49 }
 0x3ee   :  { %v9315_v26 = vpop.f32.mrb[40].mxu1 }
 0x3ef   :  { %13339 = vst [vmem:[#allocation35_spill] sm:$0xff] %v9315_v26  ;;  %v9317_v1 = vpop.f32.mrb[41].mxu1 }
 0x3f0   :  { %13340 = vst [vmem:[#allocation36_spill] sm:$0xff] %v9317_v1  ;;  %v9319_v50 = vpop.f32.mrb[42].mxu1  ;;  %v1516_v47 = vmax.f32 %v9315_v26, %v9317_v1 }
 0x3f1   :  { %13341 = vst [vmem:[#allocation37_spill] sm:$0xff] %v9319_v50  ;;  %v9323_v46 = vpop.f32.mrb[43].mxu1 }
 0x3f2   :  { %13342 = vst [vmem:[#allocation38_spill] sm:$0xff] %v9323_v46  ;;  %1517 = vmax.xlane.f32.xlu0 %v1516_v47  ;;  %v1519_v52 = vmax.f32 %v9319_v50, %v9323_v46 }
 0x3f4   :  { %1520 = vmax.xlane.f32.xlu1 %v1519_v52 }
 0x3f6   :  { %v9327_v51 = vpop.f32.mrb[44].mxu1 }
 0x3f7   :  { %13343 = vst [vmem:[#allocation39_spill] sm:$0xff] %v9327_v51  ;;  %v9329_v59 = vpop.f32.mrb[45].mxu1 }
 0x3f8   :  { %13344 = vst [vmem:[#allocation40_spill] sm:$0xff] %v9329_v59  ;;  %v9331_v49 = vpop.f32.mrb[46].mxu1  ;;  %v1522_v48 = vmax.f32 %v9327_v51, %v9329_v59 }
 0x3f9   :  { %13345 = vst [vmem:[#allocation41_spill] sm:$0xff] %v9331_v49  ;;  %v9335_v45 = vpop.f32.mrb[47].mxu1 }
 0x3fa   :  { %13346 = vst [vmem:[#allocation42_spill] sm:$0xff] %v9335_v45  ;;  %1523 = vmax.xlane.f32.xlu0 %v1522_v48  ;;  %v1525_v1 = vmax.f32 %v9331_v49, %v9335_v45 }
 0x3fc   :  { %1526 = vmax.xlane.f32.xlu1 %v1525_v1 }
 0x3fe   :  { %v9339_v47 = vpop.f32.mrb[48].mxu1 }
 0x3ff   :  { %13347 = vst [vmem:[#allocation43_spill] sm:$0xff] %v9339_v47  ;;  %v9341_v46 = vpop.f32.mrb[49].mxu1 }
 0x400   :  { %13348 = vst [vmem:[#allocation44_spill] sm:$0xff] %v9341_v46  ;;  %v9343_v52 = vpop.f32.mrb[50].mxu1  ;;  %v1528_v50 = vmax.f32 %v9339_v47, %v9341_v46 }
 0x401   :  { %13349 = vst [vmem:[#allocation45_spill] sm:$0xff] %v9343_v52  ;;  %v9347_v26 = vpop.f32.mrb[51].mxu1 }
 0x402   :  { %13350 = vst [vmem:[#allocation46_spill] sm:$0xff] %v9347_v26  ;;  %1529 = vmax.xlane.f32.xlu0 %v1528_v50  ;;  %v1531_v59 = vmax.f32 %v9343_v52, %v9347_v26 }
 0x404   :  { %1532 = vmax.xlane.f32.xlu1 %v1531_v59 }
 0x406   :  { %v9351_v48 = vpop.f32.mrb[52].mxu1 }
 0x407   :  { %13351 = vst [vmem:[#allocation47_spill] sm:$0xff] %v9351_v48  ;;  %v9353_v45 = vpop.f32.mrb[53].mxu1 }
 0x408   :  { %13352 = vst [vmem:[#allocation48_spill] sm:$0xff] %v9353_v45  ;;  %v9355_v1 = vpop.f32.mrb[54].mxu1  ;;  %v1534_v49 = vmax.f32 %v9351_v48, %v9353_v45 }
 0x409   :  { %13353 = vst [vmem:[#allocation49_spill] sm:$0xff] %v9355_v1  ;;  %v9359_v51 = vpop.f32.mrb[55].mxu1 }
 0x40a   :  { %13354 = vst [vmem:[#allocation50_spill] sm:$0xff] %v9359_v51  ;;  %1535 = vmax.xlane.f32.xlu0 %v1534_v49  ;;  %v1537_v46 = vmax.f32 %v9355_v1, %v9359_v51 }
 0x40c   :  { %1538 = vmax.xlane.f32.xlu1 %v1537_v46  ;;  %v9379_v46 = vpop.f32.mrb[20].mxu0 }
 0x40d   :  { %13361 = vst [vmem:[#allocation57_spill] sm:$0xff] %v9379_v46  ;;  %v9385_v57 = vpop.f32.mrb[21].mxu0 }
 0x40e   :  { %v9363_v50 = vpop.f32.mrb[56].mxu1  ;;  %13362 = vst [vmem:[#allocation58_spill] sm:$0xff] %v9385_v57 }
 0x40f   :  { %13355 = vst [vmem:[#allocation51_spill] sm:$0xff] %v9363_v50  ;;  %v9365_v26 = vpop.f32.mrb[57].mxu1 }
 0x410   :  { %13356 = vst [vmem:[#allocation52_spill] sm:$0xff] %v9365_v26  ;;  %v9367_v59 = vpop.f32.mrb[58].mxu1  ;;  %v1540_v52 = vmax.f32 %v9363_v50, %v9365_v26 }
 0x411   :  { %13357 = vst [vmem:[#allocation53_spill] sm:$0xff] %v9367_v59  ;;  %v9371_v47 = vpop.f32.mrb[59].mxu1 }
 0x412   :  { %13358 = vst [vmem:[#allocation54_spill] sm:$0xff] %v9371_v47  ;;  %1541 = vmax.xlane.f32.xlu0 %v1540_v52  ;;  %v1543_v45 = vmax.f32 %v9367_v59, %v9371_v47 }
 0x414   :  { %1544 = vmax.xlane.f32.xlu1 %v1543_v45  ;;  %v9391_v45 = vpop.f32.mrb[22].mxu0 }
 0x415   :  { %13363 = vst [vmem:[#allocation59_spill] sm:$0xff] %v9391_v45  ;;  %v9393_v47 = vpop.f32.mrb[23].mxu0 }
 0x416   :  { %v9375_v49 = vpop.f32.mrb[60].mxu1  ;;  %13364 = vst [vmem:[#allocation60_spill] sm:$0xff] %v9393_v47  ;;  %v9395_v59 = vpop.f32.mrb[24].mxu0 }
 0x417   :  { %13359 = vst [vmem:[#allocation55_spill] sm:$0xff] %v9375_v49  ;;  %v9377_v51 = vpop.f32.mrb[61].mxu1  ;;  %13365 = vst [vmem:[#allocation61_spill] sm:$0xff] %v9395_v59  ;;  %v9397_v46 = vpop.f32.mrb[25].mxu0 }
 0x418   :  { %13360 = vst [vmem:[#allocation56_spill] sm:$0xff] %v9377_v51  ;;  %v1546_v1 = vmax.f32 %v9375_v49, %v9377_v51  ;;  %v9383_v48 = vpop.f32.mrb[62].mxu1  ;;  %13366 = vst [vmem:[#allocation62_spill] sm:$0xff] %v9397_v46  ;;  %v9399_v50 = vpop.f32.mrb[26].mxu0 }
 0x419   :  { %v9387_v26 = vpop.f32.mrb[63].mxu1  ;;  %13367 = vst [vmem:[#allocation63_spill] sm:$0xff] %v9399_v50  ;;  %v9401_v51 = vpop.f32.mrb[27].mxu0 }
 0x41a   :  { %1547 = vmax.xlane.f32.xlu0 %v1546_v1  ;;  %13368 = vst [vmem:[#allocation64_spill] sm:$0xff] %v9401_v51  ;;  %v9403_v49 = vpop.f32.mrb[28].mxu0  ;;  %v725_v1 = vld [vmem:[%s12952_s4 + $0x88] sm:$0xff] }
 0x41b   :  { %13369 = vst [vmem:[#allocation65_spill] sm:$0xff] %v9403_v49  ;;  %v9405_v57 = vpop.f32.mrb[29].mxu0 }
 0x41c   :  { %13370 = vst [vmem:[#allocation66_spill] sm:$0xff] %v9405_v57  ;;  %v9410_v52 = vpop.f32.mrb[30].mxu0  ;;  %v724_v57 = vld [vmem:[%s12952_s4 + $0x80] sm:$0xff] }
 0x41d   :  { %13371 = vst [vmem:[#allocation67_spill] sm:$0xff] %v9410_v52  ;;  %v9412_v45 = vpop.f32.mrb[31].mxu0 }
 0x41e   :  { %13372 = vst [vmem:[#allocation68_spill] sm:$0xff] %v9412_v45  ;;  %v9414_v47 = vpop.f32.mrb[32].mxu0 }
 0x41f   :  { %13373 = vst [vmem:[#allocation69_spill] sm:$0xff] %v9414_v47  ;;  %v9416_v46 = vpop.f32.mrb[33].mxu0 }
 0x420   :  { %13374 = vst [vmem:[#allocation70_spill] sm:$0xff] %v9416_v46  ;;  %v9418_v59 = vpop.f32.mrb[34].mxu0 }
 0x421   :  { %13375 = vst [vmem:[#allocation71_spill] sm:$0xff] %v9418_v59  ;;  %v9420_v51 = vpop.f32.mrb[35].mxu0 }
 0x422   :  { %13376 = vst [vmem:[#allocation72_spill] sm:$0xff] %v9420_v51 }
 0x425   :  { %835 = vperm.xlu1 %7495, %v725_v1   ;;  %v719_v1 = vld [vmem:[%s12952_s4 + $0x58] sm:$0xff] }
 0x42f   :  { %v1458_v49 = vpop.xlane.xlu0 %1457 }
 0x430   :  { %v1552_v50 = vsub.f32 %v9195_v12, %v1458_v49  ;;  %v1553_v52 = vsub.f32 %v9197_v17, %v1458_v49  ;;  %830 = vperm.xlu0 %7494, %v724_v57  }
 0x431   :  { %v1461_v45 = vpop.xlane.xlu1 %1460 }
 0x432   :  { %v1616_v46 = vmul.f32 1.442695, %v1552_v50  ;;  %v1554_v47 = vsub.f32 %v9199_v39, %v1461_v45  ;;  %v1555_v51 = vsub.f32 %v9203_v21, %v1461_v45  ;;  %v1618_v59 = vmul.f32 1.442695, %v1553_v52 }
 0x434   :  { %v1620_v18 = vmul.f32 1.442695, %v1554_v47  ;;  %v1622_v38 = vmul.f32 1.442695, %v1555_v51  ;;  %805 = vperm.xlu0 %7494, %v719_v1   ;;  %7528 = vpow2.f32 %v1616_v46 }
 0x436   :  { %7530 = vpow2.f32 %v1620_v18 }
 0x437   :  { %7532 = vpow2.f32 %v1622_v38  ;;  %v1464_v12 = vpop.xlane.xlu0 %1463 }
 0x438   :  { %7534 = vpow2.f32 %v1618_v59  ;;  %v1556_v57 = vsub.f32 %v9207_v54, %v1464_v12  ;;  %v1557_v17 = vsub.f32 %v9209_v32, %v1464_v12  ;;  %1896 = vrot.lane.b32.xlu0 %v9101_v58, %s8649_s13 }
 0x439   :  { %v1467_v39 = vpop.xlane.xlu1 %1466 }
 0x43a   :  { %v1624_v50 = vmul.f32 1.442695, %v1556_v57  ;;  %v1558_v21 = vsub.f32 %v9211_v29, %v1467_v39  ;;  %v1559_v51 = vsub.f32 %v9215_v20, %v1467_v39  ;;  %v1626_v47 = vmul.f32 1.442695, %v1557_v17 }
 0x43c   :  { %v1628_v49 = vmul.f32 1.442695, %v1558_v21  ;;  %v1630_v18 = vmul.f32 1.442695, %v1559_v51  ;;  %1900 = vrot.lane.b32.xlu0 %v9111_v16, %s8649_s13  ;;  %7536 = vpow2.f32 %v1624_v50 }
 0x43e   :  { %7538 = vpow2.f32 %v1628_v49  ;;  %v7529_v38 = vpop.eup %7528 }
 0x43f   :  { %7540 = vpow2.f32 %v1630_v18  ;;  %v1470_v54 = vpop.xlane.xlu0 %1469  ;;  %v13377_v18 = vmax.f32 %v9383_v48, %v9387_v26 }
 0x440   :  { %v7531_v32 = vpop.eup %7530  ;;  %7542 = vpow2.f32 %v1626_v47  ;;  %v1560_v59 = vsub.f32 %v9219_v37, %v1470_v54  ;;  %v1561_v46 = vsub.f32 %v9221_v56, %v1470_v54  ;;  %1904 = vrot.lane.b32.xlu0 %v9121_v11, %s8649_s13 }
 0x441   :  { %v7533_v29 = vpop.eup %7532  ;;  %v1473_v20 = vpop.xlane.xlu1 %1472  ;;  %v1744_v52 = vpack.c.bf16 %v7531_v32, %v7529_v38 }
 0x442   :  { %v7535_v45 = vpop.eup %7534  ;;  %v1632_v1 = vmul.f32 1.442695, %v1560_v59  ;;  %v1562_v12 = vsub.f32 %v9223_v43, %v1473_v20  ;;  %v1563_v57 = vsub.f32 %v9227_v15, %v1473_v20  ;;  %v1634_v39 = vmul.f32 1.442695, %v1561_v46 }
 0x443   :  { %v1745_v17 = vpack.c.bf16 %v7533_v29, %v7535_v45 }
 0x444   :  { %v1636_v50 = vmul.f32 1.442695, %v1562_v12  ;;  %v1638_v21 = vmul.f32 1.442695, %v1563_v57  ;;  %1908 = vrot.lane.b32.xlu0 %v9131_v40, %s8649_s13  ;;  %7544 = vpow2.f32 %v1632_v1 }
 0x445   :  { %1776 = vmatprep.subr.bf16.mxu1 %v1745_v17  ;;  %1819 = vmatprep.subr.bf16.mxu0 %v1745_v17 }
 0x446   :  { %7546 = vpow2.f32 %v1636_v50  ;;  %1777 = vmatpush1.bf16.xpose.msra.mxu1 %v1744_v52  ;;  %1820 = vmatpush1.bf16.xpose.msra.mxu0 %v1744_v52  ;;  %v7537_v37 = vpop.eup %7536 }
 0x447   :  { %7548 = vpow2.f32 %v1638_v21  ;;  %v1476_v56 = vpop.xlane.xlu0 %1475 }
 0x448   :  { %v7539_v51 = vpop.eup %7538  ;;  %7550 = vpow2.f32 %v1634_v39  ;;  %v1564_v43 = vsub.f32 %v9231_v13, %v1476_v56  ;;  %v1565_v15 = vsub.f32 %v9233_v62, %v1476_v56  ;;  %1912 = vrot.lane.b32.xlu0 %v9141_v30, %s8649_s13 }
 0x449   :  { %v7541_v47 = vpop.eup %7540  ;;  %v1479_v49 = vpop.xlane.xlu1 %1478  ;;  %1550 = vmax.xlane.f32.xlu1 %v13377_v18  ;;  %v1746_v38 = vpack.c.bf16 %v7539_v51, %v7537_v37  ;;  %v7505_v18 = vld [vmem:[%s12953_s3 + $0x48] sm:$0xff]  }
 0x44a   :  { %v7543_v54 = vpop.eup %7542  ;;  %v1640_v32 = vmul.f32 1.442695, %v1564_v43  ;;  %v1566_v59 = vsub.f32 %v9235_v8, %v1479_v49  ;;  %v1567_v46 = vsub.f32 %v9239_v24, %v1479_v49  ;;  %v1642_v13 = vmul.f32 1.442695, %v1565_v15  ;;  %7317 = vmatmul.mubr.msk.bf16.gmra.mrb[36].mxu0 %vm928_vm0, %v7505_v18 }
 0x44b   :  { %v1747_v29 = vpack.c.bf16 %v7541_v47, %v7543_v54 }
 0x44c   :  { %v1644_v20 = vmul.f32 1.442695, %v1566_v59  ;;  %v1646_v62 = vmul.f32 1.442695, %v1567_v46  ;;  %1916 = vrot.lane.b32.xlu0 %v9151_v35, %s8649_s13  ;;  %7552 = vpow2.f32 %v1640_v32 }
 0x44d   :  { %1778 = vmatprep.subr.bf16.mxu1 %v1747_v29  ;;  %1821 = vmatprep.subr.bf16.mxu0 %v1747_v29 }
 0x44e   :  { %7554 = vpow2.f32 %v1644_v20  ;;  %1779 = vmatpush1.bf16.xpose.msra.mxu1 %v1746_v38  ;;  %1822 = vmatpush1.bf16.xpose.msra.mxu0 %v1746_v38  ;;  %v7545_v52 = vpop.eup %7544 }
 0x44f   :  { %7556 = vpow2.f32 %v1646_v62  ;;  %v1482_v45 = vpop.xlane.xlu0 %1481 }
 0x450   :  { %v7547_v1 = vpop.eup %7546  ;;  %7558 = vpow2.f32 %v1642_v13  ;;  %v1568_v8 = vsub.f32 %v9243_v33, %v1482_v45  ;;  %v1569_v24 = vsub.f32 %v9245_v2, %v1482_v45  ;;  %1920 = vrot.lane.b32.xlu0 %v9161_v41, %s8649_s13 }
 0x451   :  { %v7549_v12 = vpop.eup %7548  ;;  %v1485_v57 = vpop.xlane.xlu1 %1484  ;;  %v1748_v17 = vpack.c.bf16 %v7547_v1, %v7545_v52 }
 0x452   :  { %v7551_v39 = vpop.eup %7550  ;;  %v1648_v50 = vmul.f32 1.442695, %v1568_v8  ;;  %v1570_v21 = vsub.f32 %v9247_v9, %v1485_v57  ;;  %v1571_v37 = vsub.f32 %v9251_v55, %v1485_v57  ;;  %v1650_v51 = vmul.f32 1.442695, %v1569_v24  ;;  %v718_v55 = vld [vmem:[%s12952_s4 + $0x50] sm:$0xff] }
 0x453   :  { %v1749_v56 = vpack.c.bf16 %v7549_v12, %v7551_v39 }
 0x454   :  { %v1652_v43 = vmul.f32 1.442695, %v1570_v21  ;;  %v1654_v15 = vmul.f32 1.442695, %v1571_v37  ;;  %1924 = vrot.lane.b32.xlu0 %v9179_v6, %s8649_s13  ;;  %7560 = vpow2.f32 %v1648_v50 }
 0x455   :  { %1780 = vmatprep.subr.bf16.mxu1 %v1749_v56  ;;  %1823 = vmatprep.subr.bf16.mxu0 %v1749_v56 }
 0x456   :  { %7562 = vpow2.f32 %v1652_v43  ;;  %1781 = vmatpush1.bf16.xpose.msra.mxu1 %v1748_v17  ;;  %1824 = vmatpush1.bf16.xpose.msra.mxu0 %v1748_v17  ;;  %v7553_v33 = vpop.eup %7552 }
 0x457   :  { %7564 = vpow2.f32 %v1654_v15  ;;  %v1488_v2 = vpop.xlane.xlu0 %1487 }
 0x458   :  { %v7555_v9 = vpop.eup %7554  ;;  %7566 = vpow2.f32 %v1650_v51  ;;  %v1572_v47 = vsub.f32 %v9255_v22, %v1488_v2  ;;  %v1573_v49 = vsub.f32 %v9257_v23, %v1488_v2  ;;  %v13378_v22 = vmov 0  }
 0x459   :  { %v7557_v38 = vpop.eup %7556  ;;  %v1491_v54 = vpop.xlane.xlu1 %1490  ;;  %v1750_v32 = vpack.c.bf16 %v7555_v9, %v7553_v33  ;;  %1097 = vmatprep.mubr.bf16.mxu0 %v13378_v22 }
 0x45a   :  { %v7559_v59 = vpop.eup %7558  ;;  %v1656_v46 = vmul.f32 1.442695, %v1572_v47  ;;  %v1574_v29 = vsub.f32 %v9259_v31, %v1491_v54  ;;  %v1575_v13 = vsub.f32 %v9263_v60, %v1491_v54  ;;  %800 = vperm.xlu1 %7495, %v718_v55   ;;  %v1658_v23 = vmul.f32 1.442695, %v1573_v49  ;;  %v7506_v31 = vld [vmem:[%s12953_s3 + $0x50] sm:$0xff]  }
 0x45b   :  { %v1751_v20 = vpack.c.bf16 %v7557_v38, %v7559_v59  ;;  %7318 = vmatmul.mubr.msk.bf16.gmra.mrb[40].mxu0 %vm928_vm0, %v7506_v31 }
 0x45c   :  { %v1660_v62 = vmul.f32 1.442695, %v1574_v29  ;;  %v1662_v52 = vmul.f32 1.442695, %v1575_v13  ;;  %7568 = vpow2.f32 %v1656_v46  ;;  %1107 = vmatprep.mubr.bf16.mxu0 %v13378_v22 }
 0x45d   :  { %1782 = vmatprep.subr.bf16.mxu1 %v1751_v20  ;;  %1825 = vmatprep.subr.bf16.mxu0 %v1751_v20 }
 0x45e   :  { %7570 = vpow2.f32 %v1660_v62  ;;  %1783 = vmatpush1.bf16.xpose.msra.mxu1 %v1750_v32  ;;  %1826 = vmatpush1.bf16.xpose.msra.mxu0 %v1750_v32  ;;  %v7561_v60 = vpop.eup %7560 }
 0x45f   :  { %7572 = vpow2.f32 %v1662_v52  ;;  %1894 = vrot.lane.b32.xlu1 %v9096_v63, %s8649_s13  ;;  %v1494_v45 = vpop.xlane.xlu0 %1493 }
 0x460   :  { %v7563_v1 = vpop.eup %7562  ;;  %7574 = vpow2.f32 %v1658_v23  ;;  %v1576_v8 = vsub.f32 %v9267_v3, %v1494_v45  ;;  %v1577_v24 = vsub.f32 %v9269_v0, %v1494_v45 }
 0x461   :  { %v7565_v12 = vpop.eup %7564  ;;  %v1497_v57 = vpop.xlane.xlu1 %1496  ;;  %v1752_v17 = vpack.c.bf16 %v7563_v1, %v7561_v60 }
 0x462   :  { %v7567_v39 = vpop.eup %7566  ;;  %v1664_v50 = vmul.f32 1.442695, %v1576_v8  ;;  %v1578_v21 = vsub.f32 %v9271_v25, %v1497_v57  ;;  %v1579_v37 = vsub.f32 %v9275_v34, %v1497_v57  ;;  %v1666_v3 = vmul.f32 1.442695, %v1577_v24  ;;  %v7507_v34 = vld [vmem:[%s12953_s3 + $0x58] sm:$0xff]  }
 0x463   :  { %1898 = vrot.lane.b32.xlu1 %v9106_v42, %s8649_s13  ;;  %v1753_v56 = vpack.c.bf16 %v7565_v12, %v7567_v39  ;;  %7319 = vmatmul.mubr.msk.bf16.gmra.mrb[44].mxu0 %vm928_vm0, %v7507_v34  ;;  %v13382_v34 = vld [vmem:[#allocation33_spill] sm:$0xff] }
 0x464   :  { %v1668_v51 = vmul.f32 1.442695, %v1578_v21  ;;  %v1670_v0 = vmul.f32 1.442695, %v1579_v37  ;;  %7576 = vpow2.f32 %v1664_v50  ;;  %v13381_v50 = vld [vmem:[#allocation32_spill] sm:$0xff] }
 0x465   :  { %1784 = vmatprep.subr.bf16.mxu1 %v1753_v56  ;;  %1827 = vmatprep.subr.bf16.mxu0 %v1753_v56 }
 0x466   :  { %7578 = vpow2.f32 %v1668_v51  ;;  %1785 = vmatpush1.bf16.xpose.msra.mxu1 %v1752_v17  ;;  %1828 = vmatpush1.bf16.xpose.msra.mxu0 %v1752_v17  ;;  %v7569_v25 = vpop.eup %7568  ;;  %v13380_v17 = vld [vmem:[#allocation31_spill] sm:$0xff] }
 0x467   :  { %7580 = vpow2.f32 %v1670_v0  ;;  %1902 = vrot.lane.b32.xlu1 %v9116_v10, %s8649_s13  ;;  %v1500_v43 = vpop.xlane.xlu0 %1499 }
 0x468   :  { %v7571_v15 = vpop.eup %7570  ;;  %7582 = vpow2.f32 %v1666_v3  ;;  %v1580_v33 = vsub.f32 %v9279_v4, %v1500_v43  ;;  %v1581_v2 = vsub.f32 %v9281_v36, %v1500_v43  ;;  %v13383_v43 = vld [vmem:[#allocation34_spill] sm:$0xff] }
 0x469   :  { %v7573_v55 = vpop.eup %7572  ;;  %v1503_v9 = vpop.xlane.xlu1 %1502  ;;  %v1754_v47 = vpack.c.bf16 %v7571_v15, %v7569_v25 }
 0x46a   :  { %v7575_v49 = vpop.eup %7574  ;;  %v1672_v18 = vmul.f32 1.442695, %v1580_v33  ;;  %v1582_v38 = vsub.f32 %v9283_v5, %v1503_v9  ;;  %v1583_v54 = vsub.f32 %v9287_v44, %v1503_v9  ;;  %v1674_v59 = vmul.f32 1.442695, %v1581_v2  ;;  %v13384_v33 = vld [vmem:[#allocation30_spill] sm:$0xff] }
 0x46b   :  { %1906 = vrot.lane.b32.xlu1 %v9126_v14, %s8649_s13  ;;  %v1755_v32 = vpack.c.bf16 %v7573_v55, %v7575_v49  ;;  %v13041_v5 = vmov 1065369472  }
 0x46c   :  { %v1676_v46 = vmul.f32 1.442695, %v1582_v38  ;;  %v1678_v4 = vmul.f32 1.442695, %v1583_v54  ;;  %7584 = vpow2.f32 %v1672_v18  ;;  %1851 = vmatprep.mubr.bf16.mxu0 %v13041_v5  ;;  %v13385_v54 = vld [vmem:[#allocation35_spill] sm:$0xff] }
 0x46d   :  { %1786 = vmatprep.subr.bf16.mxu1 %v1755_v32  ;;  %1829 = vmatprep.subr.bf16.mxu0 %v1755_v32 }
 0x46e   :  { %7586 = vpow2.f32 %v1676_v46  ;;  %1787 = vmatpush1.bf16.xpose.msra.mxu1 %v1754_v47  ;;  %1830 = vmatpush1.bf16.xpose.msra.mxu0 %v1754_v47  ;;  %v7577_v36 = vpop.eup %7576 }
 0x46f   :  { %7588 = vpow2.f32 %v1678_v4  ;;  %1910 = vrot.lane.b32.xlu1 %v9136_v27, %s8649_s13  ;;  %v1506_v44 = vpop.xlane.xlu0 %1505 }
 0x470   :  { %v7579_v29 = vpop.eup %7578  ;;  %7590 = vpow2.f32 %v1674_v59  ;;  %v1584_v13 = vsub.f32 %v9291_v7, %v1506_v44  ;;  %v1585_v20 = vsub.f32 %v9293_v61, %v1506_v44  ;;  %v13379_v7 = vld [vmem:[#allocation29_spill] sm:$0xff]  ;;  %v13386_v59 = vld [vmem:[#allocation36_spill] sm:$0xff] }
 0x471   :  { %v7581_v23 = vpop.eup %7580  ;;  %v1509_v62 = vpop.xlane.xlu1 %1508  ;;  %v1756_v52 = vpack.c.bf16 %v7579_v29, %v7577_v36 }
 0x472   :  { %v7583_v31 = vpop.eup %7582  ;;  %v1680_v60 = vmul.f32 1.442695, %v1584_v13  ;;  %v1586_v45 = vsub.f32 %v9295_v28, %v1509_v62  ;;  %v1587_v1 = vsub.f32 %v9299_v53, %v1509_v62  ;;  %v1682_v24 = vmul.f32 1.442695, %v1585_v20  ;;  %v13387_v20 = vld [vmem:[#allocation37_spill] sm:$0xff]  ;;  %v13388_v62 = vld [vmem:[#allocation38_spill] sm:$0xff] }
 0x473   :  { %1914 = vrot.lane.b32.xlu1 %v9146_v19, %s8649_s13  ;;  %v1757_v8 = vpack.c.bf16 %v7581_v23, %v7583_v31 }
 0x474   :  { %v1684_v12 = vmul.f32 1.442695, %v1586_v45  ;;  %v1686_v57 = vmul.f32 1.442695, %v1587_v1  ;;  %7592 = vpow2.f32 %v1680_v60 }
 0x475   :  { %1788 = vmatprep.subr.bf16.mxu1 %v1757_v8  ;;  %1831 = vmatprep.subr.bf16.mxu0 %v1757_v8 }
 0x476   :  { %7594 = vpow2.f32 %v1684_v12  ;;  %1789 = vmatpush1.bf16.xpose.msra.mxu1 %v1756_v52  ;;  %1832 = vmatpush1.bf16.xpose.msra.mxu0 %v1756_v52  ;;  %v7585_v61 = vpop.eup %7584 }
 0x477   :  { %7596 = vpow2.f32 %v1686_v57  ;;  %1918 = vrot.lane.b32.xlu1 %v13379_v7, %s8649_s13  ;;  %v1512_v28 = vpop.xlane.xlu0 %1511  ;;  %v13389_v57 = vld [vmem:[#allocation39_spill] sm:$0xff] }
 0x478   :  { %v7587_v53 = vpop.eup %7586  ;;  %7598 = vpow2.f32 %v1682_v24  ;;  %v1588_v39 = vsub.f32 %v13380_v17, %v1512_v28  ;;  %v1589_v21 = vsub.f32 %v13381_v50, %v1512_v28  ;;  %v13390_v28 = vld [vmem:[#allocation40_spill] sm:$0xff] }
 0x479   :  { %v7589_v37 = vpop.eup %7588  ;;  %v1515_v56 = vpop.xlane.xlu1 %1514  ;;  %v1758_v3 = vpack.c.bf16 %v7587_v53, %v7585_v61 }
 0x47a   :  { %v7591_v51 = vpop.eup %7590  ;;  %v1688_v0 = vmul.f32 1.442695, %v1588_v39  ;;  %v1590_v25 = vsub.f32 %v13382_v34, %v1515_v56  ;;  %v1591_v15 = vsub.f32 %v13383_v43, %v1515_v56  ;;  %v1690_v55 = vmul.f32 1.442695, %v1589_v21  ;;  %v13391_v56 = vld [vmem:[#allocation41_spill] sm:$0xff] }
 0x47b   :  { %1922 = vrot.lane.b32.xlu1 %v13384_v33, %s8649_s13  ;;  %v1759_v2 = vpack.c.bf16 %v7589_v37, %v7591_v51  ;;  %v13392_v51 = vld [vmem:[#allocation42_spill] sm:$0xff] }
 0x47c   :  { %v1692_v9 = vmul.f32 1.442695, %v1590_v25  ;;  %v1694_v47 = vmul.f32 1.442695, %v1591_v15  ;;  %7600 = vpow2.f32 %v1688_v0 }
 0x47d   :  { %1790 = vmatprep.subr.bf16.mxu1 %v1759_v2  ;;  %1833 = vmatprep.subr.bf16.mxu0 %v1759_v2 }
 0x47e   :  { %7602 = vpow2.f32 %v1692_v9  ;;  %1791 = vmatpush1.bf16.xpose.msra.mxu1 %v1758_v3  ;;  %1834 = vmatpush1.bf16.xpose.msra.mxu0 %v1758_v3  ;;  %v7593_v49 = vpop.eup %7592 }
 0x47f   :  { %7604 = vpow2.f32 %v1694_v47  ;;  %v1518_v18 = vpop.xlane.xlu0 %1517  ;;  %v13393_v47 = vld [vmem:[#allocation43_spill] sm:$0xff] }
 0x480   :  { %v7595_v38 = vpop.eup %7594  ;;  %7606 = vpow2.f32 %v1690_v55  ;;  %v1592_v32 = vsub.f32 %v13385_v54, %v1518_v18  ;;  %v1593_v46 = vsub.f32 %v13386_v59, %v1518_v18  ;;  %v13394_v18 = vld [vmem:[#allocation44_spill] sm:$0xff] }
 0x481   :  { %v7597_v4 = vpop.eup %7596  ;;  %v1521_v36 = vpop.xlane.xlu1 %1520  ;;  %v1760_v44 = vpack.c.bf16 %v7595_v38, %v7593_v49 }
 0x482   :  { %v7599_v29 = vpop.eup %7598  ;;  %v1696_v13 = vmul.f32 1.442695, %v1592_v32  ;;  %v1594_v23 = vsub.f32 %v13387_v20, %v1521_v36  ;;  %v1595_v52 = vsub.f32 %v13388_v62, %v1521_v36  ;;  %v1698_v60 = vmul.f32 1.442695, %v1593_v46  ;;  %v13395_v36 = vld [vmem:[#allocation45_spill] sm:$0xff] }
 0x483   :  { %v1761_v31 = vpack.c.bf16 %v7597_v4, %v7599_v29  ;;  %v13396_v29 = vld [vmem:[#allocation46_spill] sm:$0xff] }
 0x484   :  { %v1700_v45 = vmul.f32 1.442695, %v1594_v23  ;;  %v1702_v1 = vmul.f32 1.442695, %v1595_v52  ;;  %7608 = vpow2.f32 %v1696_v13 }
 0x485   :  { %1792 = vmatprep.subr.bf16.mxu1 %v1761_v31  ;;  %1835 = vmatprep.subr.bf16.mxu0 %v1761_v31 }
 0x486   :  { %7610 = vpow2.f32 %v1700_v45  ;;  %1793 = vmatpush1.bf16.xpose.msra.mxu1 %v1760_v44  ;;  %1836 = vmatpush1.bf16.xpose.msra.mxu0 %v1760_v44  ;;  %v7601_v8 = vpop.eup %7600 }
 0x487   :  { %7612 = vpow2.f32 %v1702_v1  ;;  %v1524_v24 = vpop.xlane.xlu0 %1523  ;;  %v13397_v1 = vld [vmem:[#allocation47_spill] sm:$0xff] }
 0x488   :  { %v7603_v12 = vpop.eup %7602  ;;  %7614 = vpow2.f32 %v1698_v60  ;;  %v1596_v61 = vsub.f32 %v13389_v57, %v1524_v24  ;;  %v1597_v53 = vsub.f32 %v13390_v28, %v1524_v24  ;;  %v13398_v24 = vld [vmem:[#allocation48_spill] sm:$0xff] }
 0x489   :  { %v7605_v17 = vpop.eup %7604  ;;  %v1527_v39 = vpop.xlane.xlu1 %1526  ;;  %v1762_v50 = vpack.c.bf16 %v7603_v12, %v7601_v8 }
 0x48a   :  { %v7607_v21 = vpop.eup %7606  ;;  %v1704_v37 = vmul.f32 1.442695, %v1596_v61  ;;  %v1598_v3 = vsub.f32 %v13391_v56, %v1527_v39  ;;  %v1599_v0 = vsub.f32 %v13392_v51, %v1527_v39  ;;  %v1706_v25 = vmul.f32 1.442695, %v1597_v53 }
 0x48b   :  { %v1763_v34 = vpack.c.bf16 %v7605_v17, %v7607_v21 }
 0x48c   :  { %v1708_v43 = vmul.f32 1.442695, %v1598_v3  ;;  %v1710_v15 = vmul.f32 1.442695, %v1599_v0  ;;  %7616 = vpow2.f32 %v1704_v37  ;;  %v13400_v37 = vld [vmem:[#allocation50_spill] sm:$0xff] }
 0x48d   :  { %1794 = vmatprep.subr.bf16.mxu1 %v1763_v34  ;;  %1837 = vmatprep.subr.bf16.mxu0 %v1763_v34 }
 0x48e   :  { %7618 = vpow2.f32 %v1708_v43  ;;  %1795 = vmatpush1.bf16.xpose.msra.mxu1 %v1762_v50  ;;  %1838 = vmatpush1.bf16.xpose.msra.mxu0 %v1762_v50  ;;  %v7609_v2 = vpop.eup %7608  ;;  %v13399_v50 = vld [vmem:[#allocation49_spill] sm:$0xff] }
 0x48f   :  { %7620 = vpow2.f32 %v1710_v15  ;;  %v1530_v55 = vpop.xlane.xlu0 %1529  ;;  %v13401_v15 = vld [vmem:[#allocation51_spill] sm:$0xff] }
 0x490   :  { %v7611_v9 = vpop.eup %7610  ;;  %7622 = vpow2.f32 %v1706_v25  ;;  %v1600_v49 = vsub.f32 %v13393_v47, %v1530_v55  ;;  %v1601_v38 = vsub.f32 %v13394_v18, %v1530_v55  ;;  %v13402_v55 = vld [vmem:[#allocation52_spill] sm:$0xff] }
 0x491   :  { %v7613_v54 = vpop.eup %7612  ;;  %v1533_v32 = vpop.xlane.xlu1 %1532  ;;  %v1764_v59 = vpack.c.bf16 %v7611_v9, %v7609_v2 }
 0x492   :  { %v7615_v46 = vpop.eup %7614  ;;  %v1712_v4 = vmul.f32 1.442695, %v1600_v49  ;;  %v1602_v44 = vsub.f32 %v13395_v36, %v1533_v32  ;;  %v1603_v13 = vsub.f32 %v13396_v29, %v1533_v32  ;;  %v1714_v23 = vmul.f32 1.442695, %v1601_v38 }
 0x493   :  { %v1765_v20 = vpack.c.bf16 %v7613_v54, %v7615_v46 }
 0x494   :  { %v1716_v62 = vmul.f32 1.442695, %v1602_v44  ;;  %v1718_v52 = vmul.f32 1.442695, %v1603_v13  ;;  %7624 = vpow2.f32 %v1712_v4  ;;  %v13404_v4 = vld [vmem:[#allocation54_spill] sm:$0xff] }
 0x495   :  { %1796 = vmatprep.subr.bf16.mxu1 %v1765_v20  ;;  %1839 = vmatprep.subr.bf16.mxu0 %v1765_v20 }
 0x496   :  { %7626 = vpow2.f32 %v1716_v62  ;;  %1797 = vmatpush1.bf16.xpose.msra.mxu1 %v1764_v59  ;;  %1840 = vmatpush1.bf16.xpose.msra.mxu0 %v1764_v59  ;;  %v7617_v31 = vpop.eup %7616  ;;  %v13403_v59 = vld [vmem:[#allocation53_spill] sm:$0xff] }
 0x497   :  { %7628 = vpow2.f32 %v1718_v52  ;;  %v1536_v60 = vpop.xlane.xlu0 %1535 }
 0x498   :  { %v7619_v45 = vpop.eup %7618  ;;  %7630 = vpow2.f32 %v1714_v23  ;;  %v1604_v8 = vsub.f32 %v13397_v1, %v1536_v60  ;;  %v1605_v12 = vsub.f32 %v13398_v24, %v1536_v60 }
 0x499   :  { %v7621_v57 = vpop.eup %7620  ;;  %v1539_v61 = vpop.xlane.xlu1 %1538  ;;  %v1766_v28 = vpack.c.bf16 %v7619_v45, %v7617_v31 }
 0x49a   :  { %v7623_v53 = vpop.eup %7622  ;;  %v1720_v17 = vmul.f32 1.442695, %v1604_v8  ;;  %v1722_v39 = vmul.f32 1.442695, %v1605_v12  ;;  %v1606_v21 = vsub.f32 %v13399_v50, %v1539_v61  ;;  %v1607_v56 = vsub.f32 %v13400_v37, %v1539_v61  ;;  %v13407_v61 = vld [vmem:[#allocation71_spill] sm:$0xff] }
 0x49b   :  { %v1767_v3 = vpack.c.bf16 %v7621_v57, %v7623_v53  ;;  %v13408_v53 = vld [vmem:[#allocation69_spill] sm:$0xff] }
 0x49c   :  { %7632 = vpow2.f32 %v1720_v17  ;;  %v1724_v51 = vmul.f32 1.442695, %v1606_v21  ;;  %v1726_v0 = vmul.f32 1.442695, %v1607_v56  ;;  %v13410_v21 = vld [vmem:[#allocation72_spill] sm:$0xff] }
 0x49d   :  { %7634 = vpow2.f32 %v1722_v39  ;;  %1798 = vmatprep.subr.bf16.mxu1 %v1767_v3  ;;  %1841 = vmatprep.subr.bf16.mxu0 %v1767_v3  ;;  %v13409_v39 = vld [vmem:[#allocation70_spill] sm:$0xff] }
 0x49e   :  { %7636 = vpow2.f32 %v1724_v51  ;;  %1799 = vmatpush1.bf16.xpose.msra.mxu1 %v1766_v28  ;;  %1842 = vmatpush1.bf16.xpose.msra.mxu0 %v1766_v28  ;;  %v7625_v34 = vpop.eup %7624 }
 0x49f   :  { %7638 = vpow2.f32 %v1726_v0  ;;  %v1542_v25 = vpop.xlane.xlu0 %1541 }
 0x4a0   :  { %v7627_v43 = vpop.eup %7626  ;;  %v1608_v2 = vsub.f32 %v13401_v15, %v1542_v25  ;;  %v1609_v9 = vsub.f32 %v13402_v55, %v1542_v25  ;;  %v13411_v25 = vld [vmem:[#allocation55_spill] sm:$0xff]  ;;  %v13412_v15 = vld [vmem:[#allocation56_spill] sm:$0xff] }
 0x4a1   :  { %v7629_v47 = vpop.eup %7628  ;;  %v1545_v49 = vpop.xlane.xlu1 %1544  ;;  %v1768_v18 = vpack.c.bf16 %v7627_v43, %v7625_v34 }
 0x4a2   :  { %v7631_v38 = vpop.eup %7630  ;;  %v1728_v54 = vmul.f32 1.442695, %v1608_v2  ;;  %v1730_v32 = vmul.f32 1.442695, %v1609_v9  ;;  %v1610_v46 = vsub.f32 %v13403_v59, %v1545_v49  ;;  %v1611_v36 = vsub.f32 %v13404_v4, %v1545_v49  ;;  %v13414_v59 = vld [vmem:[#allocation59_spill] sm:$0xff] }
 0x4a3   :  { %v1769_v44 = vpack.c.bf16 %v7629_v47, %v7631_v38 }
 0x4a4   :  { %7640 = vpow2.f32 %v1728_v54  ;;  %v1732_v29 = vmul.f32 1.442695, %v1610_v46  ;;  %v1734_v13 = vmul.f32 1.442695, %v1611_v36  ;;  %v13416_v36 = vld [vmem:[#allocation57_spill] sm:$0xff] }
 0x4a5   :  { %7642 = vpow2.f32 %v1730_v32  ;;  %1800 = vmatprep.subr.bf16.mxu1 %v1769_v44  ;;  %1843 = vmatprep.subr.bf16.mxu0 %v1769_v44  ;;  %v9541_v1 = vpop.permute.xlu1 %835 }
 0x4a6   :  { %v7633_v20 = vpop.eup %7632  ;;  %7644 = vpow2.f32 %v1732_v29  ;;  %1801 = vmatpush1.bf16.xpose.msra.mxu1 %v1768_v18  ;;  %1844 = vmatpush1.bf16.xpose.msra.mxu0 %v1768_v18  ;;  %13405 = vst [vmem:[#allocation31_spill] sm:$0xff] %v9541_v1  ;;  %v1084_v28 = vadd.f32 %v13407_v61, %v9541_v1  ;;  %v1086_v37 = vadd.f32 %v13410_v21, %v9541_v1  ;;  %v13417_v29 = vld [vmem:[#allocation58_spill] sm:$0xff] }
 0x4a7   :  { %v7635_v23 = vpop.eup %7634  ;;  %7646 = vpow2.f32 %v1734_v13  ;;  %v1548_v45 = vpop.xlane.xlu0 %1547 }
 0x4a8   :  { %v7637_v62 = vpop.eup %7636  ;;  %v1612_v43 = vsub.f32 %v13411_v25, %v1548_v45  ;;  %v1613_v2 = vsub.f32 %v13412_v15, %v1548_v45 }
 0x4a9   :  { %v7639_v52 = vpop.eup %7638  ;;  %v1770_v31 = vpack.c.bf16 %v7637_v62, %v7633_v20 }
 0x4aa   :  { %v1771_v60 = vpack.c.bf16 %v7639_v52, %v7635_v23  ;;  %v1736_v55 = vmul.f32 1.442695, %v1612_v43  ;;  %v1738_v9 = vmul.f32 1.442695, %v1613_v2 }
 0x4ac   :  { %1802 = vmatprep.subr.bf16.mxu1 %v1771_v60  ;;  %1845 = vmatprep.subr.bf16.mxu0 %v1771_v60  ;;  %7648 = vpow2.f32 %v1736_v55 }
 0x4ad   :  { %7650 = vpow2.f32 %v1738_v9 }
 0x4ae   :  { %v7641_v8 = vpop.eup %7640  ;;  %1803 = vmatpush1.bf16.xpose.msra.mxu1 %v1770_v31  ;;  %1846 = vmatpush1.bf16.xpose.msra.mxu0 %v1770_v31 }
 0x4af   :  { %v7643_v24 = vpop.eup %7642  ;;  %v9543_v12 = vpop.permute.xlu0 %830 }
 0x4b0   :  { %13406 = vst [vmem:[#allocation32_spill] sm:$0xff] %v9543_v12  ;;  %v7645_v57 = vpop.eup %7644  ;;  %v1080_v17 = vadd.f32 %v13408_v53, %v9543_v12  ;;  %v1082_v50 = vadd.f32 %v13409_v39, %v9543_v12 }
 0x4b1   :  { %v7647_v56 = vpop.eup %7646  ;;  %v1772_v3 = vpack.c.bf16 %v7645_v57, %v7641_v8 }
 0x4b2   :  { %v1206_v51 = vpack.c.bf16 %v1084_v28, %v1080_v17  ;;  %v1773_v0 = vpack.c.bf16 %v7647_v56, %v7643_v24  ;;  %v1207_v34 = vpack.c.bf16 %v1086_v37, %v1082_v50 }
 0x4b3   :  { %v9555_v49 = vpop.permute.xlu0 %805 }
 0x4b4   :  { %1804 = vmatprep.subr.bf16.mxu1 %v1773_v0  ;;  %1847 = vmatprep.subr.bf16.mxu0 %v1773_v0  ;;  %13413 = vst [vmem:[#allocation33_spill] sm:$0xff] %v9555_v49  ;;  %v1054_v46 = vadd.f32 %v13414_v59, %v9555_v49 }
 0x4b5   :  { %1808 = vmatprep.mubr.bf16.mxu1 %v1207_v34 }
 0x4b6   :  { %1805 = vmatpush1.bf16.xpose.msra.mxu1 %v1772_v3  ;;  %1848 = vmatpush1.bf16.xpose.msra.mxu0 %v1772_v3  ;;  %v7649_v62 = vpop.eup %7648 }
 0x4b7   :  { %v7651_v52 = vpop.eup %7650  ;;  %v1897_v57 = vpop.permute.xlu0 %1896 }
 0x4bb   :  { %v1901_v28 = vpop.permute.xlu0 %1900 }
 0x4bf   :  { %v1905_v17 = vpop.permute.xlu0 %1904 }
 0x4c3   :  { %v1909_v56 = vpop.permute.xlu0 %1908 }
 0x4c7   :  { %v1913_v9 = vpop.permute.xlu0 %1912 }
 0x4d6   :  { %v1551_v47 = vpop.xlane.xlu1 %1550 }
 0x4d7   :  { %v1614_v18 = vsub.f32 %v9383_v48, %v1551_v47  ;;  %v1615_v38 = vsub.f32 %v9387_v26, %v1551_v47  ;;  %v13418_v48 = vld [vmem:[#allocation60_spill] sm:$0xff] }
 0x4d8   :  { %v1056_v20 = vadd.f32 %v13418_v48, %v9555_v49 }
 0x4d9   :  { %v1740_v54 = vmul.f32 1.442695, %v1614_v18  ;;  %v1742_v32 = vmul.f32 1.442695, %v1615_v38  ;;  %v1917_v38 = vpop.permute.xlu0 %1916 }
 0x4da   :  { %v9561_v4 = vpop.permute.xlu1 %800 }
 0x4db   :  { %13415 = vst [vmem:[#allocation34_spill] sm:$0xff] %v9561_v4  ;;  %7652 = vpow2.f32 %v1740_v54  ;;  %v1050_v44 = vadd.f32 %v13416_v36, %v9561_v4  ;;  %v1052_v13 = vadd.f32 %v13417_v29, %v9561_v4  ;;  %v1862_v29 = vlaneseq }
 0x4dc   :  { %7654 = vpow2.f32 %v1742_v32 }
 0x4dd   :  { %v1201_v26 = vpack.c.bf16 %v1056_v20, %v1052_v13  ;;  %v1200_v23 = vpack.c.bf16 %v1054_v46, %v1050_v44  ;;  %v1921_v32 = vpop.permute.xlu0 %1920 }
 0x4de   :  { %v1895_v24 = vpop.permute.xlu1 %1894 }
 0x4e1   :  { %v1925_v46 = vpop.permute.xlu0 %1924 }
 0x4e2   :  { %v1899_v61 = vpop.permute.xlu1 %1898 }
 0x4e5   :  { %v7653_v31 = vpop.eup %7652 }
 0x4e6   :  { %v7655_v60 = vpop.eup %7654  ;;  %v1774_v45 = vpack.c.bf16 %v7653_v31, %v7649_v62  ;;  %v1903_v53 = vpop.permute.xlu1 %1902 }
 0x4e7   :  { %v1775_v8 = vpack.c.bf16 %v7655_v60, %v7651_v52  ;;  %v1863_v52 = vshrl.u32 %v1862_v29, 7 }
 0x4e9   :  { %1806 = vmatprep.subr.bf16.mxu1 %v1775_v8  ;;  %1849 = vmatprep.subr.bf16.mxu0 %v1775_v8  ;;  %v9627_v31 = vsub.s32 0, %v1863_v52 }
 0x4ea   :  { %1807 = vmatpush1.bf16.xpose.msra.mxu1 %v1774_v45  ;;  %1850 = vmatpush1.bf16.xpose.msra.mxu0 %v1774_v45  ;;  %v1907_v39 = vpop.permute.xlu1 %1906 }
 0x4eb   :  { %1974 = vmatprep.subr.bf16.mxu1 %v1201_v26  ;;  %13431 = vst [vmem:[#allocation47_spill] sm:$0xff] %v9627_v31 }
 0x4ee   :  { %v1911_v25 = vpop.permute.xlu1 %1910 }
 0x4f1   :  { %1809 = vmatmul.mubr.bf16.vlgmr.msra.gmra.mrb[64].mxu1 %v1206_v51  ;;  %1852 = vmatmul.mubr.bf16.vlgmr.msra.gmra.mrb[48].mxu0 %v13041_v5 }
 0x4f2   :  { %1975 = vmatpush1.bf16.msra.mxu1 %v1200_v23  ;;  %2006 = vmatprep.mubr.bf16.mxu1 %v13378_v22  ;;  %v1915_v18 = vpop.permute.xlu1 %1914 }
 0x4f3   :  { %2562 = vmatprep.mubr.bf16.mxu0 %v13041_v5 }
 0x4f6   :  { %v1919_v54 = vpop.permute.xlu1 %1918 }
 0x4f9   :  { %7336 = vmatmul.mubr.msk.bf16.vlgmr.msra.gmra.mrb[68].mxu1 %vm1214_vm1, %v1895_v24 }
 0x4fa   :  { %2016 = vmatprep.mubr.bf16.mxu1 %v13378_v22  ;;  %v1923_v59 = vpop.permute.xlu1 %1922 }
 0x501   :  { %7337 = vmatmul.mubr.msk.bf16.gmra.mrb[72].mxu1 %vm1214_vm1, %v1897_v57 }
 0x502   :  { %2026 = vmatprep.mubr.bf16.mxu1 %v13378_v22 }
 0x509   :  { %7338 = vmatmul.mubr.msk.bf16.gmra.mrb[76].mxu1 %vm1214_vm1, %v1899_v61 }
 0x50a   :  { %2036 = vmatprep.mubr.bf16.mxu1 %v13378_v22 }
 0x511   :  { %7339 = vmatmul.mubr.msk.bf16.gmra.mrb[80].mxu1 %vm1214_vm1, %v1901_v28 }
 0x512   :  { %2046 = vmatprep.mubr.bf16.mxu1 %v13378_v22 }
 0x519   :  { %7340 = vmatmul.mubr.msk.bf16.gmra.mrb[84].mxu1 %vm1214_vm1, %v1903_v53 }
 0x51a   :  { %2056 = vmatprep.mubr.bf16.mxu1 %v13378_v22 }
 0x51d   :  { %v9586_v50 = vpop.f32.mrb[36].mxu0 }
 0x51e   :  { %13419 = vst [vmem:[#allocation35_spill] sm:$0xff] %v9586_v50  ;;  %v9588_v21 = vpop.f32.mrb[37].mxu0 }
 0x51f   :  { %13420 = vst [vmem:[#allocation36_spill] sm:$0xff] %v9588_v21  ;;  %v9590_v37 = vpop.f32.mrb[38].mxu0 }
 0x520   :  { %13421 = vst [vmem:[#allocation37_spill] sm:$0xff] %v9590_v37  ;;  %v9592_v3 = vpop.f32.mrb[39].mxu0 }
 0x521   :  { %7341 = vmatmul.mubr.msk.bf16.gmra.mrb[88].mxu1 %vm1214_vm1, %v1905_v17  ;;  %13422 = vst [vmem:[#allocation38_spill] sm:$0xff] %v9592_v3 }
 0x522   :  { %2066 = vmatprep.mubr.bf16.mxu1 %v13378_v22 }
 0x529   :  { %7342 = vmatmul.mubr.msk.bf16.gmra.mrb[92].mxu1 %vm1214_vm1, %v1907_v39 }
 0x52a   :  { %2076 = vmatprep.mubr.bf16.mxu1 %v13378_v22 }
 0x52e   :  { %v9596_v51 = vpop.f32.mrb[40].mxu0 }
 0x52f   :  { %13423 = vst [vmem:[#allocation39_spill] sm:$0xff] %v9596_v51  ;;  %v9598_v0 = vpop.f32.mrb[41].mxu0 }
 0x530   :  { %13424 = vst [vmem:[#allocation40_spill] sm:$0xff] %v9598_v0  ;;  %v9600_v34 = vpop.f32.mrb[42].mxu0 }
 0x531   :  { %7343 = vmatmul.mubr.msk.bf16.gmra.mrb[96].mxu1 %vm1214_vm1, %v1909_v56  ;;  %13425 = vst [vmem:[#allocation41_spill] sm:$0xff] %v9600_v34  ;;  %v9602_v43 = vpop.f32.mrb[43].mxu0 }
 0x532   :  { %2086 = vmatprep.mubr.bf16.mxu1 %v13378_v22  ;;  %13426 = vst [vmem:[#allocation42_spill] sm:$0xff] %v9602_v43 }
 0x536   :  { %v9606_v15 = vpop.f32.mrb[44].mxu0 }
 0x537   :  { %13427 = vst [vmem:[#allocation43_spill] sm:$0xff] %v9606_v15  ;;  %v9608_v2 = vpop.f32.mrb[45].mxu0 }
 0x538   :  { %13428 = vst [vmem:[#allocation44_spill] sm:$0xff] %v9608_v2  ;;  %v9610_v55 = vpop.f32.mrb[46].mxu0 }
 0x539   :  { %7344 = vmatmul.mubr.msk.bf16.gmra.mrb[100].mxu1 %vm1214_vm1, %v1911_v25  ;;  %13429 = vst [vmem:[#allocation45_spill] sm:$0xff] %v9610_v55  ;;  %v9612_v47 = vpop.f32.mrb[47].mxu0 }
 0x53a   :  { %2096 = vmatprep.mubr.bf16.mxu1 %v13378_v22  ;;  %13430 = vst [vmem:[#allocation46_spill] sm:$0xff] %v9612_v47 }
 0x541   :  { %7345 = vmatmul.mubr.msk.bf16.gmra.mrb[104].mxu1 %vm1214_vm1, %v1913_v9 }
 0x542   :  { %2106 = vmatprep.mubr.bf16.mxu1 %v13378_v22 }
 0x549   :  { %7346 = vmatmul.mubr.msk.bf16.gmra.mrb[108].mxu1 %vm1214_vm1, %v1915_v18 }
 0x54a   :  { %2116 = vmatprep.mubr.bf16.mxu1 %v13378_v22 }
 0x551   :  { %7347 = vmatmul.mubr.msk.bf16.gmra.mrb[112].mxu1 %vm1214_vm1, %v1917_v38 }
 0x552   :  { %2126 = vmatprep.mubr.bf16.mxu1 %v13378_v22 }
 0x559   :  { %7348 = vmatmul.mubr.msk.bf16.gmra.mrb[116].mxu1 %vm1214_vm1, %v1919_v54 }
 0x55a   :  { %2136 = vmatprep.mubr.bf16.mxu1 %v13378_v22 }
 0x561   :  { %7349 = vmatmul.mubr.msk.bf16.gmra.mrb[120].mxu1 %vm1214_vm1, %v1921_v32 }
 0x562   :  { %2146 = vmatprep.mubr.bf16.mxu1 %v13378_v22 }
 0x569   :  { %7350 = vmatmul.mubr.msk.bf16.gmra.mrb[124].mxu1 %vm1214_vm1, %v1923_v59 }
 0x56a   :  { %2156 = vmatprep.mubr.bf16.mxu1 %v13378_v22 }
 0x571   :  { %7351 = vmatmul.mubr.msk.bf16.gmra.mrb[128].mxu1 %vm1214_vm1, %v1925_v46 }
 0x5c4   :  { %v1810_v36 = vpop.f32.mrb[64].mxu1  ;;  %v1853_v44 = vpop.f32.mrb[48].mxu0 }
 0x5c5   :  { %7656 = vrcp.f32 %v1853_v44  ;;  %v1812_v13 = vpop.f32.mrb[65].mxu1  ;;  %v1855_v48 = vpop.f32.mrb[49].mxu0 }
 0x5c6   :  { %7658 = vrcp.f32 %v1855_v48  ;;  %v1814_v20 = vpop.f32.mrb[66].mxu1  ;;  %v1857_v26 = vpop.f32.mrb[50].mxu0 }
 0x5c7   :  { %v1816_v23 = vpop.f32.mrb[67].mxu1  ;;  %v1858_v62 = vpop.f32.mrb[51].mxu0 }
 0x5cc   :  { %v9629_v60 = vpop.f32.mrb[68].mxu1 }
 0x5cd   :  { %v9631_v45 = vpop.f32.mrb[69].mxu1 }
 0x5ce   :  { %v9633_v8 = vpop.f32.mrb[70].mxu1  ;;  %v2167_v24 = vmax.f32 %v9629_v60, %v9631_v45 }
 0x5cf   :  { %v7657_v57 = vpop.eup %7656  ;;  %v9637_v61 = vpop.f32.mrb[71].mxu1 }
 0x5d0   :  { %v7659_v28 = vpop.eup %7658  ;;  %v1865_v53 = vrot.slane %v7657_v57, %v9627_v31  ;;  %2168 = vmax.xlane.f32.xlu1 %v2167_v24  ;;  %v2170_v17 = vmax.f32 %v9633_v8, %v9637_v61 }
 0x5d1   :  { %v1869_v39 = vrot.slane %v7659_v28, %v9627_v31 }
 0x5d2   :  { %v9643_v56 = vmul.f32 %v1865_v53, %v1810_v36  ;;  %v9645_v25 = vmul.f32 %v1865_v53, %v1814_v20  ;;  %2171 = vmax.xlane.f32.xlu0 %v2170_v17 }
 0x5d3   :  { %v9647_v9 = vmul.f32 %v1869_v39, %v1816_v23  ;;  %v9649_v18 = vmul.f32 %v1869_v39, %v1812_v13 }
 0x5d4   :  { %13432 = vst [vmem:[#allocation48_spill] sm:$0xff] %v9643_v56  ;;  %13433 = vst [vmem:[#allocation49_spill] sm:$0xff] %v9645_v25  ;;  %v9653_v54 = vpop.f32.mrb[72].mxu1 }
 0x5d5   :  { %13434 = vst [vmem:[#allocation50_spill] sm:$0xff] %v9647_v9  ;;  %13435 = vst [vmem:[#allocation51_spill] sm:$0xff] %v9649_v18  ;;  %v9655_v32 = vpop.f32.mrb[73].mxu1 }
 0x5d6   :  { %v9659_v46 = vpop.f32.mrb[74].mxu1  ;;  %v2173_v36 = vmax.f32 %v9653_v54, %v9655_v32 }
 0x5d7   :  { %v9663_v44 = vpop.f32.mrb[75].mxu1 }
 0x5d8   :  { %2174 = vmax.xlane.f32.xlu0 %v2173_v36  ;;  %v2176_v29 = vmax.f32 %v9659_v46, %v9663_v44 }
 0x5da   :  { %2177 = vmax.xlane.f32.xlu1 %v2176_v29 }
 0x5dc   :  { %v9667_v13 = vpop.f32.mrb[76].mxu1 }
 0x5dd   :  { %v9669_v48 = vpop.f32.mrb[77].mxu1 }
 0x5de   :  { %v9671_v20 = vpop.f32.mrb[78].mxu1  ;;  %v2179_v26 = vmax.f32 %v9667_v13, %v9669_v48 }
 0x5df   :  { %v9675_v23 = vpop.f32.mrb[79].mxu1 }
 0x5e0   :  { %2180 = vmax.xlane.f32.xlu0 %v2179_v26  ;;  %v2182_v62 = vmax.f32 %v9671_v20, %v9675_v23 }
 0x5e2   :  { %2183 = vmax.xlane.f32.xlu1 %v2182_v62 }
 0x5e4   :  { %v9679_v52 = vpop.f32.mrb[80].mxu1 }
 0x5e5   :  { %v9681_v24 = vpop.f32.mrb[81].mxu1 }
 0x5e6   :  { %v9683_v57 = vpop.f32.mrb[82].mxu1  ;;  %v2185_v28 = vmax.f32 %v9679_v52, %v9681_v24 }
 0x5e7   :  { %v9687_v53 = vpop.f32.mrb[83].mxu1 }
 0x5e8   :  { %2186 = vmax.xlane.f32.xlu0 %v2185_v28  ;;  %v2188_v17 = vmax.f32 %v9683_v57, %v9687_v53 }
 0x5ea   :  { %2189 = vmax.xlane.f32.xlu1 %v2188_v17 }
 0x5ec   :  { %v9691_v39 = vpop.f32.mrb[84].mxu1 }
 0x5ed   :  { %v9693_v36 = vpop.f32.mrb[85].mxu1 }
 0x5ee   :  { %v9695_v29 = vpop.f32.mrb[86].mxu1  ;;  %v2191_v26 = vmax.f32 %v9691_v39, %v9693_v36 }
 0x5ef   :  { %v9699_v62 = vpop.f32.mrb[87].mxu1 }
 0x5f0   :  { %2192 = vmax.xlane.f32.xlu0 %v2191_v26  ;;  %v2194_v38 = vmax.f32 %v9695_v29, %v9699_v62 }
 0x5f2   :  { %2195 = vmax.xlane.f32.xlu1 %v2194_v38 }
 0x5f4   :  { %v9703_v28 = vpop.f32.mrb[88].mxu1 }
 0x5f5   :  { %v9705_v59 = vpop.f32.mrb[89].mxu1 }
 0x5f6   :  { %v9707_v17 = vpop.f32.mrb[90].mxu1  ;;  %v2197_v5 = vmax.f32 %v9703_v28, %v9705_v59 }
 0x5f7   :  { %v9711_v1 = vpop.f32.mrb[91].mxu1 }
 0x5f8   :  { %2198 = vmax.xlane.f32.xlu0 %v2197_v5  ;;  %v2200_v12 = vmax.f32 %v9707_v17, %v9711_v1 }
 0x5fa   :  { %2201 = vmax.xlane.f32.xlu1 %v2200_v12 }
 0x5fc   :  { %v9715_v26 = vpop.f32.mrb[92].mxu1 }
 0x5fd   :  { %v9717_v49 = vpop.f32.mrb[93].mxu1 }
 0x5fe   :  { %v9719_v38 = vpop.f32.mrb[94].mxu1  ;;  %v2203_v4 = vmax.f32 %v9715_v26, %v9717_v49 }
 0x5ff   :  { %v9723_v56 = vpop.f32.mrb[95].mxu1 }
 0x600   :  { %2204 = vmax.xlane.f32.xlu0 %v2203_v4  ;;  %v2206_v25 = vmax.f32 %v9719_v38, %v9723_v56 }
 0x602   :  { %2207 = vmax.xlane.f32.xlu1 %v2206_v25 }
 0x604   :  { %v9727_v5 = vpop.f32.mrb[96].mxu1 }
 0x605   :  { %v9729_v18 = vpop.f32.mrb[97].mxu1 }
 0x606   :  { %v9731_v12 = vpop.f32.mrb[98].mxu1  ;;  %v2209_v9 = vmax.f32 %v9727_v5, %v9729_v18 }
 0x607   :  { %v9735_v2 = vpop.f32.mrb[99].mxu1 }
 0x608   :  { %2210 = vmax.xlane.f32.xlu0 %v2209_v9  ;;  %v2212_v15 = vmax.f32 %v9731_v12, %v9735_v2 }
 0x60a   :  { %2213 = vmax.xlane.f32.xlu1 %v2212_v15 }
 0x60c   :  { %v9739_v4 = vpop.f32.mrb[100].mxu1 }
 0x60d   :  { %v9741_v47 = vpop.f32.mrb[101].mxu1 }
 0x60e   :  { %v9743_v25 = vpop.f32.mrb[102].mxu1  ;;  %v2215_v55 = vmax.f32 %v9739_v4, %v9741_v47 }
 0x60f   :  { %v9747_v43 = vpop.f32.mrb[103].mxu1 }
 0x610   :  { %2216 = vmax.xlane.f32.xlu0 %v2215_v55  ;;  %v2218_v0 = vmax.f32 %v9743_v25, %v9747_v43 }
 0x612   :  { %2219 = vmax.xlane.f32.xlu1 %v2218_v0 }
 0x614   :  { %v9751_v9 = vpop.f32.mrb[104].mxu1 }
 0x615   :  { %13436 = vst [vmem:[#allocation52_spill] sm:$0xff] %v9751_v9  ;;  %v9753_v51 = vpop.f32.mrb[105].mxu1 }
 0x616   :  { %13437 = vst [vmem:[#allocation53_spill] sm:$0xff] %v9753_v51  ;;  %v9755_v15 = vpop.f32.mrb[106].mxu1  ;;  %v2221_v34 = vmax.f32 %v9751_v9, %v9753_v51 }
 0x617   :  { %13438 = vst [vmem:[#allocation54_spill] sm:$0xff] %v9755_v15  ;;  %v9759_v31 = vpop.f32.mrb[107].mxu1 }
 0x618   :  { %13439 = vst [vmem:[#allocation71_spill] sm:$0xff] %v9759_v31  ;;  %2222 = vmax.xlane.f32.xlu0 %v2221_v34  ;;  %v2224_v22 = vmax.f32 %v9755_v15, %v9759_v31 }
 0x61a   :  { %2225 = vmax.xlane.f32.xlu1 %v2224_v22 }
 0x61c   :  { %v9763_v55 = vpop.f32.mrb[108].mxu1 }
 0x61d   :  { %13440 = vst [vmem:[#allocation69_spill] sm:$0xff] %v9763_v55  ;;  %v9765_v3 = vpop.f32.mrb[109].mxu1 }
 0x61e   :  { %13441 = vst [vmem:[#allocation70_spill] sm:$0xff] %v9765_v3  ;;  %v9767_v0 = vpop.f32.mrb[110].mxu1  ;;  %v2227_v21 = vmax.f32 %v9763_v55, %v9765_v3 }
 0x61f   :  { %13442 = vst [vmem:[#allocation72_spill] sm:$0xff] %v9767_v0  ;;  %v9771_v50 = vpop.f32.mrb[111].mxu1 }
 0x620   :  { %13443 = vst [vmem:[#allocation55_spill] sm:$0xff] %v9771_v50  ;;  %2228 = vmax.xlane.f32.xlu0 %v2227_v21  ;;  %v2230_v37 = vmax.f32 %v9767_v0, %v9771_v50 }
 0x622   :  { %2231 = vmax.xlane.f32.xlu1 %v2230_v37 }
 0x624   :  { %v9775_v34 = vpop.f32.mrb[112].mxu1 }
 0x625   :  { %13444 = vst [vmem:[#allocation56_spill] sm:$0xff] %v9775_v34  ;;  %v9777_v33 = vpop.f32.mrb[113].mxu1 }
 0x626   :  { %13445 = vst [vmem:[#allocation59_spill] sm:$0xff] %v9777_v33  ;;  %v9779_v22 = vpop.f32.mrb[114].mxu1  ;;  %v2233_v31 = vmax.f32 %v9775_v34, %v9777_v33 }
 0x627   :  { %13446 = vst [vmem:[#allocation57_spill] sm:$0xff] %v9779_v22  ;;  %v9783_v15 = vpop.f32.mrb[115].mxu1 }
 0x628   :  { %13447 = vst [vmem:[#allocation58_spill] sm:$0xff] %v9783_v15  ;;  %2234 = vmax.xlane.f32.xlu0 %v2233_v31  ;;  %v2236_v3 = vmax.f32 %v9779_v22, %v9783_v15 }
 0x62a   :  { %2237 = vmax.xlane.f32.xlu1 %v2236_v3 }
 0x62c   :  { %v9787_v21 = vpop.f32.mrb[116].mxu1 }
 0x62d   :  { %13448 = vst [vmem:[#allocation60_spill] sm:$0xff] %v9787_v21  ;;  %v9789_v50 = vpop.f32.mrb[117].mxu1 }
 0x62e   :  { %13449 = vst [vmem:[#allocation73_spill] sm:$0xff] %v9789_v50  ;;  %v9791_v37 = vpop.f32.mrb[118].mxu1  ;;  %v2239_v0 = vmax.f32 %v9787_v21, %v9789_v50 }
 0x62f   :  { %13450 = vst [vmem:[#allocation74_spill] sm:$0xff] %v9791_v37  ;;  %v9795_v55 = vpop.f32.mrb[119].mxu1 }
 0x630   :  { %13451 = vst [vmem:[#allocation75_spill] sm:$0xff] %v9795_v55  ;;  %2240 = vmax.xlane.f32.xlu0 %v2239_v0  ;;  %v2242_v33 = vmax.f32 %v9791_v37, %v9795_v55 }
 0x632   :  { %2243 = vmax.xlane.f32.xlu1 %v2242_v33 }
 0x634   :  { %v9799_v31 = vpop.f32.mrb[120].mxu1 }
 0x635   :  { %13452 = vst [vmem:[#allocation76_spill] sm:$0xff] %v9799_v31  ;;  %v9801_v15 = vpop.f32.mrb[121].mxu1 }
 0x636   :  { %13453 = vst [vmem:[#allocation77_spill] sm:$0xff] %v9801_v15  ;;  %v9803_v3 = vpop.f32.mrb[122].mxu1  ;;  %v2245_v22 = vmax.f32 %v9799_v31, %v9801_v15 }
 0x637   :  { %13454 = vst [vmem:[#allocation78_spill] sm:$0xff] %v9803_v3  ;;  %v9807_v34 = vpop.f32.mrb[123].mxu1 }
 0x638   :  { %13455 = vst [vmem:[#allocation79_spill] sm:$0xff] %v9807_v34  ;;  %2246 = vmax.xlane.f32.xlu0 %v2245_v22  ;;  %v2248_v50 = vmax.f32 %v9803_v3, %v9807_v34 }
 0x63a   :  { %2249 = vmax.xlane.f32.xlu1 %v2248_v50 }
 0x63c   :  { %v9811_v0 = vpop.f32.mrb[124].mxu1 }
 0x63d   :  { %13456 = vst [vmem:[#allocation80_spill] sm:$0xff] %v9811_v0  ;;  %v9813_v55 = vpop.f32.mrb[125].mxu1 }
 0x63e   :  { %13457 = vst [vmem:[#allocation81_spill] sm:$0xff] %v9813_v55  ;;  %v9815_v33 = vpop.f32.mrb[126].mxu1  ;;  %v2251_v37 = vmax.f32 %v9811_v0, %v9813_v55 }
 0x63f   :  { %13458 = vst [vmem:[#allocation82_spill] sm:$0xff] %v9815_v33  ;;  %v9819_v21 = vpop.f32.mrb[127].mxu1 }
 0x640   :  { %13459 = vst [vmem:[#allocation83_spill] sm:$0xff] %v9819_v21  ;;  %2252 = vmax.xlane.f32.xlu0 %v2251_v37  ;;  %v2254_v15 = vmax.f32 %v9815_v33, %v9819_v21  ;;  %v727_v37 = vld [vmem:[%s12952_s4 + $0x98] sm:$0xff] }
 0x642   :  { %2255 = vmax.xlane.f32.xlu1 %v2254_v15  ;;  %v726_v15 = vld [vmem:[%s12952_s4 + $0x90] sm:$0xff] }
 0x644   :  { %v9823_v22 = vpop.f32.mrb[128].mxu1 }
 0x645   :  { %13460 = vst [vmem:[#allocation84_spill] sm:$0xff] %v9823_v22  ;;  %v9825_v34 = vpop.f32.mrb[129].mxu1 }
 0x646   :  { %13461 = vst [vmem:[#allocation85_spill] sm:$0xff] %v9825_v34  ;;  %v9827_v50 = vpop.f32.mrb[130].mxu1  ;;  %v2257_v3 = vmax.f32 %v9823_v22, %v9825_v34 }
 0x647   :  { %v9831_v31 = vpop.f32.mrb[131].mxu1 }
 0x648   :  { %2258 = vmax.xlane.f32.xlu0 %v2257_v3  ;;  %v721_v3 = vld [vmem:[%s12952_s4 + $0x68] sm:$0xff] }
 0x653   :  { %845 = vperm.xlu1 %7495, %v727_v37  }
 0x65d   :  { %v2169_v21 = vpop.xlane.xlu1 %2168 }
 0x65e   :  { %v2263_v33 = vsub.f32 %v9629_v60, %v2169_v21  ;;  %v2264_v34 = vsub.f32 %v9631_v45, %v2169_v21  ;;  %840 = vperm.xlu0 %7494, %v726_v15  }
 0x65f   :  { %v2172_v22 = vpop.xlane.xlu0 %2171 }
 0x660   :  { %v2327_v55 = vmul.f32 1.442695, %v2263_v33  ;;  %v2265_v0 = vsub.f32 %v9633_v8, %v2172_v22  ;;  %v2266_v37 = vsub.f32 %v9637_v61, %v2172_v22  ;;  %v2329_v51 = vmul.f32 1.442695, %v2264_v34 }
 0x662   :  { %v2331_v9 = vmul.f32 1.442695, %v2265_v0  ;;  %v2333_v7 = vmul.f32 1.442695, %v2266_v37  ;;  %815 = vperm.xlu0 %7494, %v721_v3   ;;  %7660 = vpow2.f32 %v2327_v55 }
 0x664   :  { %7662 = vpow2.f32 %v2331_v9 }
 0x665   :  { %7664 = vpow2.f32 %v2333_v7  ;;  %v2175_v60 = vpop.xlane.xlu0 %2174 }
 0x666   :  { %7666 = vpow2.f32 %v2329_v51  ;;  %v2267_v45 = vsub.f32 %v9653_v54, %v2175_v60  ;;  %v2268_v21 = vsub.f32 %v9655_v32, %v2175_v60  ;;  %2591 = vrot.lane.b32.xlu0 %v9101_v58, %s8651_s27 }
 0x667   :  { %v2178_v8 = vpop.xlane.xlu1 %2177 }
 0x668   :  { %v2335_v33 = vmul.f32 1.442695, %v2267_v45  ;;  %v2269_v61 = vsub.f32 %v9659_v46, %v2178_v8  ;;  %v2270_v34 = vsub.f32 %v9663_v44, %v2178_v8  ;;  %v2337_v0 = vmul.f32 1.442695, %v2268_v21 }
 0x66a   :  { %v2339_v55 = vmul.f32 1.442695, %v2269_v61  ;;  %v2341_v9 = vmul.f32 1.442695, %v2270_v34  ;;  %2595 = vrot.lane.b32.xlu0 %v9111_v16, %s8651_s27  ;;  %7668 = vpow2.f32 %v2335_v33 }
 0x66c   :  { %7670 = vpow2.f32 %v2339_v55  ;;  %v7661_v7 = vpop.eup %7660 }
 0x66d   :  { %7672 = vpow2.f32 %v2341_v9  ;;  %v2181_v51 = vpop.xlane.xlu0 %2180  ;;  %v13462_v9 = vmax.f32 %v9827_v50, %v9831_v31 }
 0x66e   :  { %v7663_v54 = vpop.eup %7662  ;;  %7674 = vpow2.f32 %v2337_v0  ;;  %v2271_v32 = vsub.f32 %v9667_v13, %v2181_v51  ;;  %v2272_v22 = vsub.f32 %v9669_v48, %v2181_v51  ;;  %2599 = vrot.lane.b32.xlu0 %v9121_v11, %s8651_s27 }
 0x66f   :  { %v7665_v46 = vpop.eup %7664  ;;  %v2184_v44 = vpop.xlane.xlu1 %2183  ;;  %v2455_v15 = vpack.c.bf16 %v7663_v54, %v7661_v7 }
 0x670   :  { %v7667_v3 = vpop.eup %7666  ;;  %v2343_v37 = vmul.f32 1.442695, %v2271_v32  ;;  %v2273_v60 = vsub.f32 %v9671_v20, %v2184_v44  ;;  %v2274_v45 = vsub.f32 %v9675_v23, %v2184_v44  ;;  %v2345_v8 = vmul.f32 1.442695, %v2272_v22 }
 0x671   :  { %v2456_v21 = vpack.c.bf16 %v7665_v46, %v7667_v3 }
 0x672   :  { %v2347_v33 = vmul.f32 1.442695, %v2273_v60  ;;  %v2349_v61 = vmul.f32 1.442695, %v2274_v45  ;;  %2603 = vrot.lane.b32.xlu0 %v9131_v40, %s8651_s27  ;;  %7676 = vpow2.f32 %v2343_v37 }
 0x673   :  { %2487 = vmatprep.subr.bf16.mxu1 %v2456_v21  ;;  %2530 = vmatprep.subr.bf16.mxu0 %v2456_v21 }
 0x674   :  { %7678 = vpow2.f32 %v2347_v33  ;;  %2488 = vmatpush1.bf16.xpose.msra.mxu1 %v2455_v15  ;;  %2531 = vmatpush1.bf16.xpose.msra.mxu0 %v2455_v15  ;;  %v7669_v13 = vpop.eup %7668 }
 0x675   :  { %7680 = vpow2.f32 %v2349_v61  ;;  %v2187_v48 = vpop.xlane.xlu0 %2186 }
 0x676   :  { %v7671_v34 = vpop.eup %7670  ;;  %7682 = vpow2.f32 %v2345_v8  ;;  %v2275_v20 = vsub.f32 %v9679_v52, %v2187_v48  ;;  %v2276_v23 = vsub.f32 %v9681_v24, %v2187_v48  ;;  %2607 = vrot.lane.b32.xlu0 %v9141_v30, %s8651_s27 }
 0x677   :  { %v7673_v0 = vpop.eup %7672  ;;  %v2190_v55 = vpop.xlane.xlu1 %2189  ;;  %2261 = vmax.xlane.f32.xlu1 %v13462_v9  ;;  %v2457_v7 = vpack.c.bf16 %v7671_v34, %v7669_v13 }
 0x678   :  { %v7675_v51 = vpop.eup %7674  ;;  %v2351_v54 = vmul.f32 1.442695, %v2275_v20  ;;  %v2277_v32 = vsub.f32 %v9683_v57, %v2190_v55  ;;  %v2278_v22 = vsub.f32 %v9687_v53, %v2190_v55  ;;  %v2353_v52 = vmul.f32 1.442695, %v2276_v23 }
 0x679   :  { %v2458_v46 = vpack.c.bf16 %v7673_v0, %v7675_v51 }
 0x67a   :  { %v2355_v44 = vmul.f32 1.442695, %v2277_v32  ;;  %v2357_v24 = vmul.f32 1.442695, %v2278_v22  ;;  %2611 = vrot.lane.b32.xlu0 %v9151_v35, %s8651_s27  ;;  %7684 = vpow2.f32 %v2351_v54 }
 0x67b   :  { %2489 = vmatprep.subr.bf16.mxu1 %v2458_v46  ;;  %2532 = vmatprep.subr.bf16.mxu0 %v2458_v46 }
 0x67c   :  { %7686 = vpow2.f32 %v2355_v44  ;;  %2490 = vmatpush1.bf16.xpose.msra.mxu1 %v2457_v7  ;;  %2533 = vmatpush1.bf16.xpose.msra.mxu0 %v2457_v7  ;;  %v7677_v15 = vpop.eup %7676 }
 0x67d   :  { %7688 = vpow2.f32 %v2357_v24  ;;  %v2193_v3 = vpop.xlane.xlu0 %2192 }
 0x67e   :  { %v7679_v37 = vpop.eup %7678  ;;  %7690 = vpow2.f32 %v2353_v52  ;;  %v2279_v57 = vsub.f32 %v9691_v39, %v2193_v3  ;;  %v2280_v53 = vsub.f32 %v9693_v36, %v2193_v3  ;;  %2615 = vrot.lane.b32.xlu0 %v9161_v41, %s8651_s27 }
 0x67f   :  { %v7681_v60 = vpop.eup %7680  ;;  %v2196_v45 = vpop.xlane.xlu1 %2195  ;;  %v2459_v21 = vpack.c.bf16 %v7679_v37, %v7677_v15 }
 0x680   :  { %v7683_v8 = vpop.eup %7682  ;;  %v2359_v33 = vmul.f32 1.442695, %v2279_v57  ;;  %v2281_v61 = vsub.f32 %v9695_v29, %v2196_v45  ;;  %v2282_v13 = vsub.f32 %v9699_v62, %v2196_v45  ;;  %v2361_v34 = vmul.f32 1.442695, %v2280_v53  ;;  %v720_v29 = vld [vmem:[%s12952_s4 + $0x60] sm:$0xff] }
 0x681   :  { %v2460_v48 = vpack.c.bf16 %v7681_v60, %v7683_v8 }
 0x682   :  { %v2363_v20 = vmul.f32 1.442695, %v2281_v61  ;;  %v2365_v23 = vmul.f32 1.442695, %v2282_v13  ;;  %2619 = vrot.lane.b32.xlu0 %v9179_v6, %s8651_s27  ;;  %7692 = vpow2.f32 %v2359_v33 }
 0x683   :  { %2491 = vmatprep.subr.bf16.mxu1 %v2460_v48  ;;  %2534 = vmatprep.subr.bf16.mxu0 %v2460_v48 }
 0x684   :  { %7694 = vpow2.f32 %v2363_v20  ;;  %2492 = vmatpush1.bf16.xpose.msra.mxu1 %v2459_v21  ;;  %2535 = vmatpush1.bf16.xpose.msra.mxu0 %v2459_v21  ;;  %v7685_v39 = vpop.eup %7684 }
 0x685   :  { %7696 = vpow2.f32 %v2365_v23  ;;  %v2199_v36 = vpop.xlane.xlu0 %2198 }
 0x686   :  { %v7687_v62 = vpop.eup %7686  ;;  %7698 = vpow2.f32 %v2361_v34  ;;  %v2283_v0 = vsub.f32 %v9703_v28, %v2199_v36  ;;  %v2284_v55 = vsub.f32 %v9705_v59, %v2199_v36 }
 0x687   :  { %v7689_v9 = vpop.eup %7688  ;;  %v2202_v7 = vpop.xlane.xlu1 %2201  ;;  %v2461_v51 = vpack.c.bf16 %v7687_v62, %v7685_v39 }
 0x688   :  { %v7691_v54 = vpop.eup %7690  ;;  %v2367_v32 = vmul.f32 1.442695, %v2283_v0  ;;  %v2285_v22 = vsub.f32 %v9707_v17, %v2202_v7  ;;  %v2286_v46 = vsub.f32 %v9711_v1, %v2202_v7  ;;  %810 = vperm.xlu1 %7495, %v720_v29   ;;  %v2369_v44 = vmul.f32 1.442695, %v2284_v55 }
 0x689   :  { %v2462_v52 = vpack.c.bf16 %v7689_v9, %v7691_v54 }
 0x68a   :  { %v2371_v24 = vmul.f32 1.442695, %v2285_v22  ;;  %v2373_v15 = vmul.f32 1.442695, %v2286_v46  ;;  %7700 = vpow2.f32 %v2367_v32 }
 0x68b   :  { %2493 = vmatprep.subr.bf16.mxu1 %v2462_v52  ;;  %2536 = vmatprep.subr.bf16.mxu0 %v2462_v52 }
 0x68c   :  { %7702 = vpow2.f32 %v2371_v24  ;;  %2494 = vmatpush1.bf16.xpose.msra.mxu1 %v2461_v51  ;;  %2537 = vmatpush1.bf16.xpose.msra.mxu0 %v2461_v51  ;;  %v7693_v59 = vpop.eup %7692 }
 0x68d   :  { %7704 = vpow2.f32 %v2373_v15  ;;  %2589 = vrot.lane.b32.xlu1 %v9096_v63, %s8651_s27  ;;  %v2205_v28 = vpop.xlane.xlu0 %2204 }
 0x68e   :  { %v7695_v17 = vpop.eup %7694  ;;  %7706 = vpow2.f32 %v2369_v44  ;;  %v2287_v1 = vsub.f32 %v9715_v26, %v2205_v28  ;;  %v2288_v3 = vsub.f32 %v9717_v49, %v2205_v28 }
 0x68f   :  { %v7697_v37 = vpop.eup %7696  ;;  %v2208_v57 = vpop.xlane.xlu1 %2207  ;;  %v2463_v53 = vpack.c.bf16 %v7695_v17, %v7693_v59 }
 0x690   :  { %v7699_v60 = vpop.eup %7698  ;;  %v2375_v45 = vmul.f32 1.442695, %v2287_v1  ;;  %v2289_v21 = vsub.f32 %v9719_v38, %v2208_v57  ;;  %v2290_v8 = vsub.f32 %v9723_v56, %v2208_v57  ;;  %v2377_v61 = vmul.f32 1.442695, %v2288_v3  ;;  %v13464_v3 = vld [vmem:[#allocation52_spill] sm:$0xff]  ;;  %v13465_v57 = vld [vmem:[#allocation53_spill] sm:$0xff] }
 0x691   :  { %2593 = vrot.lane.b32.xlu1 %v9106_v42, %s8651_s27  ;;  %v2464_v33 = vpack.c.bf16 %v7697_v37, %v7699_v60 }
 0x692   :  { %v2379_v13 = vmul.f32 1.442695, %v2289_v21  ;;  %v2381_v48 = vmul.f32 1.442695, %v2290_v8  ;;  %7708 = vpow2.f32 %v2375_v45 }
 0x693   :  { %2495 = vmatprep.subr.bf16.mxu1 %v2464_v33  ;;  %2538 = vmatprep.subr.bf16.mxu0 %v2464_v33 }
 0x694   :  { %7710 = vpow2.f32 %v2379_v13  ;;  %2496 = vmatpush1.bf16.xpose.msra.mxu1 %v2463_v53  ;;  %2539 = vmatpush1.bf16.xpose.msra.mxu0 %v2463_v53  ;;  %v7701_v49 = vpop.eup %7700 }
 0x695   :  { %7712 = vpow2.f32 %v2381_v48  ;;  %2597 = vrot.lane.b32.xlu1 %v9116_v10, %s8651_s27  ;;  %v2211_v26 = vpop.xlane.xlu0 %2210  ;;  %v13467_v48 = vld [vmem:[#allocation71_spill] sm:$0xff] }
 0x696   :  { %v7703_v56 = vpop.eup %7702  ;;  %7714 = vpow2.f32 %v2377_v61  ;;  %v2291_v38 = vsub.f32 %v9727_v5, %v2211_v26  ;;  %v2292_v34 = vsub.f32 %v9729_v18, %v2211_v26  ;;  %v13466_v61 = vld [vmem:[#allocation54_spill] sm:$0xff] }
 0x697   :  { %v7705_v20 = vpop.eup %7704  ;;  %v2214_v23 = vpop.xlane.xlu1 %2213  ;;  %v2465_v39 = vpack.c.bf16 %v7703_v56, %v7701_v49  ;;  %v13468_v26 = vld [vmem:[#allocation30_spill] sm:$0xff] }
 0x698   :  { %v7707_v36 = vpop.eup %7706  ;;  %v2383_v29 = vmul.f32 1.442695, %v2291_v38  ;;  %v2293_v62 = vsub.f32 %v9731_v12, %v2214_v23  ;;  %v2294_v0 = vsub.f32 %v9735_v2, %v2214_v23  ;;  %v2385_v9 = vmul.f32 1.442695, %v2292_v34 }
 0x699   :  { %2601 = vrot.lane.b32.xlu1 %v9126_v14, %s8651_s27  ;;  %v2466_v55 = vpack.c.bf16 %v7705_v20, %v7707_v36 }
 0x69a   :  { %v2387_v7 = vmul.f32 1.442695, %v2293_v62  ;;  %v2389_v51 = vmul.f32 1.442695, %v2294_v0  ;;  %7716 = vpow2.f32 %v2383_v29  ;;  %v13469_v29 = vld [vmem:[#allocation69_spill] sm:$0xff]  ;;  %v13470_v0 = vld [vmem:[#allocation70_spill] sm:$0xff] }
 0x69b   :  { %2497 = vmatprep.subr.bf16.mxu1 %v2466_v55  ;;  %2540 = vmatprep.subr.bf16.mxu0 %v2466_v55 }
 0x69c   :  { %7718 = vpow2.f32 %v2387_v7  ;;  %2498 = vmatpush1.bf16.xpose.msra.mxu1 %v2465_v39  ;;  %2541 = vmatpush1.bf16.xpose.msra.mxu0 %v2465_v39  ;;  %v7709_v18 = vpop.eup %7708 }
 0x69d   :  { %7720 = vpow2.f32 %v2389_v51  ;;  %2605 = vrot.lane.b32.xlu1 %v9136_v27, %s8651_s27  ;;  %v2217_v5 = vpop.xlane.xlu0 %2216 }
 0x69e   :  { %v7711_v2 = vpop.eup %7710  ;;  %7722 = vpow2.f32 %v2385_v9  ;;  %v2295_v12 = vsub.f32 %v9739_v4, %v2217_v5  ;;  %v2296_v54 = vsub.f32 %v9741_v47, %v2217_v5  ;;  %v13463_v4 = vld [vmem:[#allocation29_spill] sm:$0xff] }
 0x69f   :  { %v7713_v32 = vpop.eup %7712  ;;  %v2220_v22 = vpop.xlane.xlu1 %2219  ;;  %v2467_v46 = vpack.c.bf16 %v7711_v2, %v7709_v18  ;;  %v13471_v2 = vld [vmem:[#allocation72_spill] sm:$0xff] }
 0x6a0   :  { %v7715_v52 = vpop.eup %7714  ;;  %v2391_v44 = vmul.f32 1.442695, %v2295_v12  ;;  %v2297_v24 = vsub.f32 %v9743_v25, %v2220_v22  ;;  %v2298_v15 = vsub.f32 %v9747_v43, %v2220_v22  ;;  %v2393_v28 = vmul.f32 1.442695, %v2296_v54  ;;  %v13472_v54 = vld [vmem:[#allocation55_spill] sm:$0xff] }
 0x6a1   :  { %2609 = vrot.lane.b32.xlu1 %v9146_v19, %s8651_s27  ;;  %v2468_v59 = vpack.c.bf16 %v7713_v32, %v7715_v52 }
 0x6a2   :  { %v2395_v17 = vmul.f32 1.442695, %v2297_v24  ;;  %v2397_v1 = vmul.f32 1.442695, %v2298_v15  ;;  %7724 = vpow2.f32 %v2391_v44 }
 0x6a3   :  { %2499 = vmatprep.subr.bf16.mxu1 %v2468_v59  ;;  %2542 = vmatprep.subr.bf16.mxu0 %v2468_v59 }
 0x6a4   :  { %7726 = vpow2.f32 %v2395_v17  ;;  %2500 = vmatpush1.bf16.xpose.msra.mxu1 %v2467_v46  ;;  %2543 = vmatpush1.bf16.xpose.msra.mxu0 %v2467_v46  ;;  %v7717_v47 = vpop.eup %7716 }
 0x6a5   :  { %7728 = vpow2.f32 %v2397_v1  ;;  %2613 = vrot.lane.b32.xlu1 %v13463_v4, %s8651_s27  ;;  %v2223_v25 = vpop.xlane.xlu0 %2222  ;;  %v13474_v1 = vld [vmem:[#allocation59_spill] sm:$0xff] }
 0x6a6   :  { %v7719_v43 = vpop.eup %7718  ;;  %7730 = vpow2.f32 %v2393_v28  ;;  %v2299_v37 = vsub.f32 %v13464_v3, %v2223_v25  ;;  %v2300_v53 = vsub.f32 %v13465_v57, %v2223_v25  ;;  %v13473_v28 = vld [vmem:[#allocation56_spill] sm:$0xff] }
 0x6a7   :  { %v7721_v60 = vpop.eup %7720  ;;  %v2226_v45 = vpop.xlane.xlu1 %2225  ;;  %v2469_v21 = vpack.c.bf16 %v7719_v43, %v7717_v47 }
 0x6a8   :  { %v7723_v8 = vpop.eup %7722  ;;  %v2399_v33 = vmul.f32 1.442695, %v2299_v37  ;;  %v2301_v13 = vsub.f32 %v13466_v61, %v2226_v45  ;;  %v2302_v49 = vsub.f32 %v13467_v48, %v2226_v45  ;;  %v2401_v38 = vmul.f32 1.442695, %v2300_v53  ;;  %v13475_v53 = vld [vmem:[#allocation57_spill] sm:$0xff]  ;;  %v13476_v45 = vld [vmem:[#allocation58_spill] sm:$0xff] }
 0x6a9   :  { %2617 = vrot.lane.b32.xlu1 %v13468_v26, %s8651_s27  ;;  %v2470_v56 = vpack.c.bf16 %v7721_v60, %v7723_v8 }
 0x6aa   :  { %v2403_v34 = vmul.f32 1.442695, %v2301_v13  ;;  %v2405_v20 = vmul.f32 1.442695, %v2302_v49  ;;  %7732 = vpow2.f32 %v2399_v33 }
 0x6ab   :  { %2501 = vmatprep.subr.bf16.mxu1 %v2470_v56  ;;  %2544 = vmatprep.subr.bf16.mxu0 %v2470_v56 }
 0x6ac   :  { %7734 = vpow2.f32 %v2403_v34  ;;  %2502 = vmatpush1.bf16.xpose.msra.mxu1 %v2469_v21  ;;  %2545 = vmatpush1.bf16.xpose.msra.mxu0 %v2469_v21  ;;  %v7725_v23 = vpop.eup %7724 }
 0x6ad   :  { %7736 = vpow2.f32 %v2405_v20  ;;  %v2229_v39 = vpop.xlane.xlu0 %2228  ;;  %v13478_v20 = vld [vmem:[#allocation73_spill] sm:$0xff] }
 0x6ae   :  { %v7727_v36 = vpop.eup %7726  ;;  %7738 = vpow2.f32 %v2401_v38  ;;  %v2303_v62 = vsub.f32 %v13469_v29, %v2229_v39  ;;  %v2304_v55 = vsub.f32 %v13470_v0, %v2229_v39  ;;  %v13477_v38 = vld [vmem:[#allocation60_spill] sm:$0xff] }
 0x6af   :  { %v7729_v9 = vpop.eup %7728  ;;  %v2232_v7 = vpop.xlane.xlu1 %2231  ;;  %v2471_v51 = vpack.c.bf16 %v7727_v36, %v7725_v23 }
 0x6b0   :  { %v7731_v18 = vpop.eup %7730  ;;  %v2407_v5 = vmul.f32 1.442695, %v2303_v62  ;;  %v2305_v12 = vsub.f32 %v13471_v2, %v2232_v7  ;;  %v2306_v32 = vsub.f32 %v13472_v54, %v2232_v7  ;;  %v2409_v46 = vmul.f32 1.442695, %v2304_v55  ;;  %v13479_v55 = vld [vmem:[#allocation74_spill] sm:$0xff]  ;;  %v13480_v7 = vld [vmem:[#allocation75_spill] sm:$0xff] }
 0x6b1   :  { %v2472_v22 = vpack.c.bf16 %v7729_v9, %v7731_v18 }
 0x6b2   :  { %v2411_v52 = vmul.f32 1.442695, %v2305_v12  ;;  %v2413_v44 = vmul.f32 1.442695, %v2306_v32  ;;  %7740 = vpow2.f32 %v2407_v5 }
 0x6b3   :  { %2503 = vmatprep.subr.bf16.mxu1 %v2472_v22  ;;  %2546 = vmatprep.subr.bf16.mxu0 %v2472_v22 }
 0x6b4   :  { %7742 = vpow2.f32 %v2411_v52  ;;  %2504 = vmatpush1.bf16.xpose.msra.mxu1 %v2471_v51  ;;  %2547 = vmatpush1.bf16.xpose.msra.mxu0 %v2471_v51  ;;  %v7733_v24 = vpop.eup %7732 }
 0x6b5   :  { %7744 = vpow2.f32 %v2413_v44  ;;  %v2235_v15 = vpop.xlane.xlu0 %2234  ;;  %v13482_v44 = vld [vmem:[#allocation77_spill] sm:$0xff] }
 0x6b6   :  { %v7735_v59 = vpop.eup %7734  ;;  %7746 = vpow2.f32 %v2409_v46  ;;  %v2307_v17 = vsub.f32 %v13473_v28, %v2235_v15  ;;  %v2308_v47 = vsub.f32 %v13474_v1, %v2235_v15  ;;  %v13481_v46 = vld [vmem:[#allocation76_spill] sm:$0xff] }
 0x6b7   :  { %v7737_v25 = vpop.eup %7736  ;;  %v2238_v43 = vpop.xlane.xlu1 %2237  ;;  %v2473_v3 = vpack.c.bf16 %v7735_v59, %v7733_v24 }
 0x6b8   :  { %v7739_v37 = vpop.eup %7738  ;;  %v2415_v57 = vmul.f32 1.442695, %v2307_v17  ;;  %v2309_v60 = vsub.f32 %v13475_v53, %v2238_v43  ;;  %v2310_v21 = vsub.f32 %v13476_v45, %v2238_v43  ;;  %v2417_v33 = vmul.f32 1.442695, %v2308_v47 }
 0x6b9   :  { %v2474_v8 = vpack.c.bf16 %v7737_v25, %v7739_v37  ;;  %v13483_v25 = vld [vmem:[#allocation78_spill] sm:$0xff] }
 0x6ba   :  { %v2419_v61 = vmul.f32 1.442695, %v2309_v60  ;;  %v2421_v13 = vmul.f32 1.442695, %v2310_v21  ;;  %7748 = vpow2.f32 %v2415_v57 }
 0x6bb   :  { %2505 = vmatprep.subr.bf16.mxu1 %v2474_v8  ;;  %2548 = vmatprep.subr.bf16.mxu0 %v2474_v8 }
 0x6bc   :  { %7750 = vpow2.f32 %v2419_v61  ;;  %2506 = vmatpush1.bf16.xpose.msra.mxu1 %v2473_v3  ;;  %2549 = vmatpush1.bf16.xpose.msra.mxu0 %v2473_v3  ;;  %v7741_v48 = vpop.eup %7740  ;;  %v13484_v3 = vld [vmem:[#allocation79_spill] sm:$0xff] }
 0x6bd   :  { %7752 = vpow2.f32 %v2421_v13  ;;  %v2241_v49 = vpop.xlane.xlu0 %2240  ;;  %v13486_v13 = vld [vmem:[#allocation81_spill] sm:$0xff] }
 0x6be   :  { %v7743_v56 = vpop.eup %7742  ;;  %7754 = vpow2.f32 %v2417_v33  ;;  %v2311_v34 = vsub.f32 %v13477_v38, %v2241_v49  ;;  %v2312_v23 = vsub.f32 %v13478_v20, %v2241_v49  ;;  %v13485_v33 = vld [vmem:[#allocation80_spill] sm:$0xff] }
 0x6bf   :  { %v7745_v39 = vpop.eup %7744  ;;  %v2244_v36 = vpop.xlane.xlu1 %2243  ;;  %v2475_v29 = vpack.c.bf16 %v7743_v56, %v7741_v48 }
 0x6c0   :  { %v7747_v62 = vpop.eup %7746  ;;  %v2423_v0 = vmul.f32 1.442695, %v2311_v34  ;;  %v2313_v9 = vsub.f32 %v13479_v55, %v2244_v36  ;;  %v2314_v51 = vsub.f32 %v13480_v7, %v2244_v36  ;;  %v2425_v5 = vmul.f32 1.442695, %v2312_v23 }
 0x6c1   :  { %v2476_v18 = vpack.c.bf16 %v7745_v39, %v7747_v62  ;;  %v13487_v39 = vld [vmem:[#allocation82_spill] sm:$0xff] }
 0x6c2   :  { %v2427_v2 = vmul.f32 1.442695, %v2313_v9  ;;  %v2429_v12 = vmul.f32 1.442695, %v2314_v51  ;;  %7756 = vpow2.f32 %v2423_v0 }
 0x6c3   :  { %2507 = vmatprep.subr.bf16.mxu1 %v2476_v18  ;;  %2550 = vmatprep.subr.bf16.mxu0 %v2476_v18 }
 0x6c4   :  { %7758 = vpow2.f32 %v2427_v2  ;;  %2508 = vmatpush1.bf16.xpose.msra.mxu1 %v2475_v29  ;;  %2551 = vmatpush1.bf16.xpose.msra.mxu0 %v2475_v29  ;;  %v7749_v54 = vpop.eup %7748  ;;  %v13488_v29 = vld [vmem:[#allocation83_spill] sm:$0xff] }
 0x6c5   :  { %7760 = vpow2.f32 %v2429_v12  ;;  %v2247_v32 = vpop.xlane.xlu0 %2246 }
 0x6c6   :  { %v7751_v22 = vpop.eup %7750  ;;  %7762 = vpow2.f32 %v2425_v5  ;;  %v2315_v52 = vsub.f32 %v13481_v46, %v2247_v32  ;;  %v2316_v24 = vsub.f32 %v13482_v44, %v2247_v32 }
 0x6c7   :  { %v7753_v15 = vpop.eup %7752  ;;  %v2250_v59 = vpop.xlane.xlu1 %2249  ;;  %v2477_v28 = vpack.c.bf16 %v7751_v22, %v7749_v54 }
 0x6c8   :  { %v7755_v17 = vpop.eup %7754  ;;  %v2431_v1 = vmul.f32 1.442695, %v2315_v52  ;;  %v2433_v47 = vmul.f32 1.442695, %v2316_v24  ;;  %v2317_v43 = vsub.f32 %v13483_v25, %v2250_v59  ;;  %v2318_v37 = vsub.f32 %v13484_v3, %v2250_v59  ;;  %v13491_v24 = vld [vmem:[#allocation37_spill] sm:$0xff]  ;;  %v13492_v59 = vld [vmem:[#allocation35_spill] sm:$0xff] }
 0x6c9   :  { %v2478_v57 = vpack.c.bf16 %v7753_v15, %v7755_v17  ;;  %v13493_v17 = vld [vmem:[#allocation36_spill] sm:$0xff] }
 0x6ca   :  { %7764 = vpow2.f32 %v2431_v1  ;;  %v2435_v53 = vmul.f32 1.442695, %v2317_v43  ;;  %v2437_v60 = vmul.f32 1.442695, %v2318_v37 }
 0x6cb   :  { %7766 = vpow2.f32 %v2433_v47  ;;  %2509 = vmatprep.subr.bf16.mxu1 %v2478_v57  ;;  %2552 = vmatprep.subr.bf16.mxu0 %v2478_v57  ;;  %v13494_v47 = vld [vmem:[#allocation38_spill] sm:$0xff] }
 0x6cc   :  { %7768 = vpow2.f32 %v2435_v53  ;;  %2510 = vmatpush1.bf16.xpose.msra.mxu1 %v2477_v28  ;;  %2553 = vmatpush1.bf16.xpose.msra.mxu0 %v2477_v28  ;;  %v7757_v45 = vpop.eup %7756 }
 0x6cd   :  { %7770 = vpow2.f32 %v2437_v60  ;;  %v2253_v21 = vpop.xlane.xlu0 %2252  ;;  %v13495_v60 = vld [vmem:[#allocation84_spill] sm:$0xff] }
 0x6ce   :  { %v7759_v8 = vpop.eup %7758  ;;  %v2319_v61 = vsub.f32 %v13485_v33, %v2253_v21  ;;  %v2320_v48 = vsub.f32 %v13486_v13, %v2253_v21  ;;  %v13496_v21 = vld [vmem:[#allocation85_spill] sm:$0xff] }
 0x6cf   :  { %v7761_v49 = vpop.eup %7760  ;;  %v2256_v56 = vpop.xlane.xlu1 %2255  ;;  %v2479_v38 = vpack.c.bf16 %v7759_v8, %v7757_v45 }
 0x6d0   :  { %v7763_v34 = vpop.eup %7762  ;;  %v2439_v20 = vmul.f32 1.442695, %v2319_v61  ;;  %v2441_v23 = vmul.f32 1.442695, %v2320_v48  ;;  %v2321_v36 = vsub.f32 %v13487_v39, %v2256_v56  ;;  %v2322_v62 = vsub.f32 %v13488_v29, %v2256_v56 }
 0x6d1   :  { %v2480_v0 = vpack.c.bf16 %v7761_v49, %v7763_v34 }
 0x6d2   :  { %7772 = vpow2.f32 %v2439_v20  ;;  %v2443_v55 = vmul.f32 1.442695, %v2321_v36  ;;  %v2445_v9 = vmul.f32 1.442695, %v2322_v62  ;;  %v13498_v20 = vld [vmem:[#allocation63_spill] sm:$0xff]  ;;  %v13500_v36 = vld [vmem:[#allocation61_spill] sm:$0xff] }
 0x6d3   :  { %7774 = vpow2.f32 %v2441_v23  ;;  %2511 = vmatprep.subr.bf16.mxu1 %v2480_v0  ;;  %2554 = vmatprep.subr.bf16.mxu0 %v2480_v0  ;;  %v9942_v32 = vpop.permute.xlu1 %845  ;;  %v13501_v62 = vld [vmem:[#allocation62_spill] sm:$0xff] }
 0x6d4   :  { %v7765_v7 = vpop.eup %7764  ;;  %7776 = vpow2.f32 %v2443_v55  ;;  %2512 = vmatpush1.bf16.xpose.msra.mxu1 %v2479_v38  ;;  %2555 = vmatpush1.bf16.xpose.msra.mxu0 %v2479_v38  ;;  %13489 = vst [vmem:[#allocation29_spill] sm:$0xff] %v9942_v32  ;;  %v1094_v15 = vadd.f32 %v13491_v24, %v9942_v32  ;;  %v1096_v25 = vadd.f32 %v13494_v47, %v9942_v32 }
 0x6d5   :  { %v7767_v51 = vpop.eup %7766  ;;  %7778 = vpow2.f32 %v2445_v9  ;;  %v2259_v54 = vpop.xlane.xlu0 %2258 }
 0x6d6   :  { %v7769_v18 = vpop.eup %7768  ;;  %v2323_v45 = vsub.f32 %v13495_v60, %v2259_v54  ;;  %v2324_v8 = vsub.f32 %v13496_v21, %v2259_v54  ;;  %v13503_v54 = vmov 1065369472  }
 0x6d7   :  { %v7771_v5 = vpop.eup %7770  ;;  %v2481_v2 = vpack.c.bf16 %v7769_v18, %v7765_v7 }
 0x6d8   :  { %v2482_v12 = vpack.c.bf16 %v7771_v5, %v7767_v51  ;;  %v2447_v33 = vmul.f32 1.442695, %v2323_v45  ;;  %v2449_v61 = vmul.f32 1.442695, %v2324_v8 }
 0x6da   :  { %2513 = vmatprep.subr.bf16.mxu1 %v2482_v12  ;;  %2556 = vmatprep.subr.bf16.mxu0 %v2482_v12  ;;  %7780 = vpow2.f32 %v2447_v33 }
 0x6db   :  { %7782 = vpow2.f32 %v2449_v61 }
 0x6dc   :  { %v7773_v22 = vpop.eup %7772  ;;  %2514 = vmatpush1.bf16.xpose.msra.mxu1 %v2481_v2  ;;  %2557 = vmatpush1.bf16.xpose.msra.mxu0 %v2481_v2 }
 0x6dd   :  { %v7775_v46 = vpop.eup %7774  ;;  %v9944_v52 = vpop.permute.xlu0 %840 }
 0x6de   :  { %13490 = vst [vmem:[#allocation52_spill] sm:$0xff] %v9944_v52  ;;  %v7777_v44 = vpop.eup %7776  ;;  %v1090_v28 = vadd.f32 %v13492_v59, %v9944_v52  ;;  %v1092_v1 = vadd.f32 %v13493_v17, %v9944_v52 }
 0x6df   :  { %v7779_v43 = vpop.eup %7778  ;;  %v2483_v3 = vpack.c.bf16 %v7777_v44, %v7773_v22  ;;  %v13504_v22 = vmov 0  }
 0x6e0   :  { %v1208_v37 = vpack.c.bf16 %v1094_v15, %v1090_v28  ;;  %v2484_v57 = vpack.c.bf16 %v7779_v43, %v7775_v46  ;;  %v1209_v53 = vpack.c.bf16 %v1096_v25, %v1092_v1 }
 0x6e1   :  { %v9956_v48 = vpop.permute.xlu0 %815 }
 0x6e2   :  { %2515 = vmatprep.subr.bf16.mxu1 %v2484_v57  ;;  %2558 = vmatprep.subr.bf16.mxu0 %v2484_v57  ;;  %13497 = vst [vmem:[#allocation53_spill] sm:$0xff] %v9956_v48  ;;  %v1064_v23 = vadd.f32 %v13498_v20, %v9956_v48 }
 0x6e3   :  { %2519 = vmatprep.mubr.bf16.mxu1 %v1209_v53 }
 0x6e4   :  { %2516 = vmatpush1.bf16.xpose.msra.mxu1 %v2483_v3  ;;  %2559 = vmatpush1.bf16.xpose.msra.mxu0 %v2483_v3  ;;  %v7781_v7 = vpop.eup %7780 }
 0x6e5   :  { %v7783_v51 = vpop.eup %7782  ;;  %v2592_v44 = vpop.permute.xlu0 %2591 }
 0x6e9   :  { %v2596_v15 = vpop.permute.xlu0 %2595 }
 0x6ed   :  { %v2600_v28 = vpop.permute.xlu0 %2599 }
 0x6f1   :  { %v2604_v1 = vpop.permute.xlu0 %2603 }
 0x6f5   :  { %v2608_v25 = vpop.permute.xlu0 %2607 }
 0x6f9   :  { %v2612_v3 = vpop.permute.xlu0 %2611 }
 0x6fd   :  { %v2616_v57 = vpop.permute.xlu0 %2615 }
 0x701   :  { %v2620_v60 = vpop.permute.xlu0 %2619 }
 0x704   :  { %v2262_v13 = vpop.xlane.xlu1 %2261 }
 0x705   :  { %v2325_v49 = vsub.f32 %v9827_v50, %v2262_v13  ;;  %v2326_v56 = vsub.f32 %v9831_v31, %v2262_v13  ;;  %v13502_v50 = vld [vmem:[#allocation64_spill] sm:$0xff] }
 0x706   :  { %v1066_v55 = vadd.f32 %v13502_v50, %v9956_v48 }
 0x707   :  { %v2451_v38 = vmul.f32 1.442695, %v2325_v49  ;;  %v2453_v34 = vmul.f32 1.442695, %v2326_v56 }
 0x708   :  { %v9962_v39 = vpop.permute.xlu1 %810 }
 0x709   :  { %13499 = vst [vmem:[#allocation54_spill] sm:$0xff] %v9962_v39  ;;  %7784 = vpow2.f32 %v2451_v38  ;;  %v1060_v29 = vadd.f32 %v13500_v36, %v9962_v39  ;;  %v1062_v0 = vadd.f32 %v13501_v62, %v9962_v39 }
 0x70a   :  { %7786 = vpow2.f32 %v2453_v34 }
 0x70b   :  { %v1203_v31 = vpack.c.bf16 %v1066_v55, %v1062_v0  ;;  %v1202_v9 = vpack.c.bf16 %v1064_v23, %v1060_v29  ;;  %v13505_v0 = vld [vmem:[#allocation47_spill] sm:$0xff] }
 0x70c   :  { %v2590_v46 = vpop.permute.xlu1 %2589 }
 0x710   :  { %v2594_v24 = vpop.permute.xlu1 %2593 }
 0x713   :  { %v7785_v18 = vpop.eup %7784 }
 0x714   :  { %v7787_v5 = vpop.eup %7786  ;;  %v2485_v2 = vpack.c.bf16 %v7785_v18, %v7781_v7  ;;  %v2598_v59 = vpop.permute.xlu1 %2597 }
 0x715   :  { %v2486_v12 = vpack.c.bf16 %v7787_v5, %v7783_v51 }
 0x717   :  { %2517 = vmatprep.subr.bf16.mxu1 %v2486_v12  ;;  %2560 = vmatprep.subr.bf16.mxu0 %v2486_v12 }
 0x718   :  { %2518 = vmatpush1.bf16.xpose.msra.mxu1 %v2485_v2  ;;  %2561 = vmatpush1.bf16.xpose.msra.mxu0 %v2485_v2  ;;  %v2602_v17 = vpop.permute.xlu1 %2601 }
 0x719   :  { %2669 = vmatprep.subr.bf16.mxu1 %v1203_v31 }
 0x71c   :  { %v2606_v47 = vpop.permute.xlu1 %2605 }
 0x71f   :  { %2520 = vmatmul.mubr.bf16.vlgmr.msra.gmra.mrb[132].mxu1 %v1208_v37  ;;  %2563 = vmatmul.mubr.bf16.vlgmr.msra.gmra.mrb[52].mxu0 %v13503_v54 }
 0x720   :  { %2670 = vmatpush1.bf16.msra.mxu1 %v1202_v9  ;;  %2701 = vmatprep.mubr.bf16.mxu1 %v13504_v22  ;;  %v2610_v43 = vpop.permute.xlu1 %2609 }
 0x724   :  { %v2614_v37 = vpop.permute.xlu1 %2613 }
 0x727   :  { %7352 = vmatmul.mubr.msk.bf16.vlgmr.msra.gmra.mrb[136].mxu1 %vm1214_vm1, %v2590_v46 }
 0x728   :  { %2711 = vmatprep.mubr.bf16.mxu1 %v13504_v22  ;;  %v2618_v53 = vpop.permute.xlu1 %2617 }
 0x72f   :  { %7353 = vmatmul.mubr.msk.bf16.gmra.mrb[140].mxu1 %vm1214_vm1, %v2592_v44 }
 0x730   :  { %2721 = vmatprep.mubr.bf16.mxu1 %v13504_v22 }
 0x737   :  { %7354 = vmatmul.mubr.msk.bf16.gmra.mrb[144].mxu1 %vm1214_vm1, %v2594_v24 }
 0x738   :  { %2731 = vmatprep.mubr.bf16.mxu1 %v13504_v22 }
 0x73f   :  { %7355 = vmatmul.mubr.msk.bf16.gmra.mrb[148].mxu1 %vm1214_vm1, %v2596_v15 }
 0x740   :  { %2741 = vmatprep.mubr.bf16.mxu1 %v13504_v22 }
 0x747   :  { %7356 = vmatmul.mubr.msk.bf16.gmra.mrb[152].mxu1 %vm1214_vm1, %v2598_v59 }
 0x748   :  { %2751 = vmatprep.mubr.bf16.mxu1 %v13504_v22 }
 0x74f   :  { %7357 = vmatmul.mubr.msk.bf16.gmra.mrb[156].mxu1 %vm1214_vm1, %v2600_v28 }
 0x750   :  { %2761 = vmatprep.mubr.bf16.mxu1 %v13504_v22 }
 0x757   :  { %7358 = vmatmul.mubr.msk.bf16.gmra.mrb[160].mxu1 %vm1214_vm1, %v2602_v17 }
 0x758   :  { %2771 = vmatprep.mubr.bf16.mxu1 %v13504_v22 }
 0x75f   :  { %7359 = vmatmul.mubr.msk.bf16.gmra.mrb[164].mxu1 %vm1214_vm1, %v2604_v1 }
 0x760   :  { %2781 = vmatprep.mubr.bf16.mxu1 %v13504_v22 }
 0x767   :  { %7360 = vmatmul.mubr.msk.bf16.gmra.mrb[168].mxu1 %vm1214_vm1, %v2606_v47 }
 0x768   :  { %2791 = vmatprep.mubr.bf16.mxu1 %v13504_v22 }
 0x76f   :  { %7361 = vmatmul.mubr.msk.bf16.gmra.mrb[172].mxu1 %vm1214_vm1, %v2608_v25 }
 0x770   :  { %2801 = vmatprep.mubr.bf16.mxu1 %v13504_v22 }
 0x777   :  { %7362 = vmatmul.mubr.msk.bf16.gmra.mrb[176].mxu1 %vm1214_vm1, %v2610_v43 }
 0x778   :  { %2811 = vmatprep.mubr.bf16.mxu1 %v13504_v22 }
 0x77f   :  { %7363 = vmatmul.mubr.msk.bf16.gmra.mrb[180].mxu1 %vm1214_vm1, %v2612_v3 }
 0x780   :  { %2821 = vmatprep.mubr.bf16.mxu1 %v13504_v22 }
 0x787   :  { %7364 = vmatmul.mubr.msk.bf16.gmra.mrb[184].mxu1 %vm1214_vm1, %v2614_v37 }
 0x788   :  { %2831 = vmatprep.mubr.bf16.mxu1 %v13504_v22 }
 0x78f   :  { %7365 = vmatmul.mubr.msk.bf16.gmra.mrb[188].mxu1 %vm1214_vm1, %v2616_v57 }
 0x790   :  { %2841 = vmatprep.mubr.bf16.mxu1 %v13504_v22 }
 0x797   :  { %7366 = vmatmul.mubr.msk.bf16.gmra.mrb[192].mxu1 %vm1214_vm1, %v2618_v53 }
 0x798   :  { %2851 = vmatprep.mubr.bf16.mxu1 %v13504_v22 }
 0x79f   :  { %7367 = vmatmul.mubr.msk.bf16.gmra.mrb[196].mxu1 %vm1214_vm1, %v2620_v60 }
 0x7a0   :  { %3257 = vmatprep.mubr.bf16.mxu1 %v13503_v54 }
 0x7f2   :  { %v2521_v45 = vpop.f32.mrb[132].mxu1  ;;  %v2564_v21 = vpop.f32.mrb[52].mxu0 }
 0x7f3   :  { %7788 = vrcp.f32 %v2564_v21  ;;  %v2523_v8 = vpop.f32.mrb[133].mxu1  ;;  %v2566_v33 = vpop.f32.mrb[53].mxu0 }
 0x7f4   :  { %7790 = vrcp.f32 %v2566_v33  ;;  %v2525_v61 = vpop.f32.mrb[134].mxu1  ;;  %v2568_v13 = vpop.f32.mrb[54].mxu0 }
 0x7f5   :  { %v2527_v49 = vpop.f32.mrb[135].mxu1  ;;  %v2569_v56 = vpop.f32.mrb[55].mxu0 }
 0x7fa   :  { %v10004_v38 = vpop.f32.mrb[136].mxu1 }
 0x7fb   :  { %v10006_v34 = vpop.f32.mrb[137].mxu1 }
 0x7fc   :  { %v10008_v20 = vpop.f32.mrb[138].mxu1  ;;  %v2862_v23 = vmax.f32 %v10004_v38, %v10006_v34 }
 0x7fd   :  { %v7789_v36 = vpop.eup %7788  ;;  %v10012_v29 = vpop.f32.mrb[139].mxu1 }
 0x7fe   :  { %v7791_v62 = vpop.eup %7790  ;;  %v2576_v50 = vrot.slane %v7789_v36, %v13505_v0  ;;  %2863 = vmax.xlane.f32.xlu1 %v2862_v23  ;;  %v2865_v55 = vmax.f32 %v10008_v20, %v10012_v29 }
 0x7ff   :  { %v2580_v31 = vrot.slane %v7791_v62, %v13505_v0 }
 0x800   :  { %v10018_v9 = vmul.f32 %v2576_v50, %v2521_v45  ;;  %v10020_v7 = vmul.f32 %v2576_v50, %v2525_v61  ;;  %2866 = vmax.xlane.f32.xlu0 %v2865_v55 }
 0x801   :  { %v10022_v51 = vmul.f32 %v2580_v31, %v2527_v49  ;;  %v10024_v18 = vmul.f32 %v2580_v31, %v2523_v8 }
 0x802   :  { %13506 = vst [vmem:[#allocation71_spill] sm:$0xff] %v10018_v9  ;;  %13507 = vst [vmem:[#allocation30_spill] sm:$0xff] %v10020_v7  ;;  %v10028_v2 = vpop.f32.mrb[140].mxu1 }
 0x803   :  { %13508 = vst [vmem:[#allocation69_spill] sm:$0xff] %v10022_v51  ;;  %13509 = vst [vmem:[#allocation70_spill] sm:$0xff] %v10024_v18  ;;  %v10030_v12 = vpop.f32.mrb[141].mxu1 }
 0x804   :  { %v10034_v44 = vpop.f32.mrb[142].mxu1  ;;  %v2868_v24 = vmax.f32 %v10028_v2, %v10030_v12 }
 0x805   :  { %v10038_v15 = vpop.f32.mrb[143].mxu1 }
 0x806   :  { %2869 = vmax.xlane.f32.xlu0 %v2868_v24  ;;  %v2871_v59 = vmax.f32 %v10034_v44, %v10038_v15 }
 0x808   :  { %2872 = vmax.xlane.f32.xlu1 %v2871_v59 }
 0x80a   :  { %v10042_v28 = vpop.f32.mrb[144].mxu1 }
 0x80b   :  { %v10044_v17 = vpop.f32.mrb[145].mxu1 }
 0x80c   :  { %v10046_v1 = vpop.f32.mrb[146].mxu1  ;;  %v2874_v47 = vmax.f32 %v10042_v28, %v10044_v17 }
 0x80d   :  { %v10050_v25 = vpop.f32.mrb[147].mxu1 }
 0x80e   :  { %2875 = vmax.xlane.f32.xlu0 %v2874_v47  ;;  %v2877_v43 = vmax.f32 %v10046_v1, %v10050_v25 }
 0x810   :  { %2878 = vmax.xlane.f32.xlu1 %v2877_v43 }
 0x812   :  { %v10054_v3 = vpop.f32.mrb[148].mxu1 }
 0x813   :  { %v10056_v37 = vpop.f32.mrb[149].mxu1 }
 0x814   :  { %v10058_v57 = vpop.f32.mrb[150].mxu1  ;;  %v2880_v53 = vmax.f32 %v10054_v3, %v10056_v37 }
 0x815   :  { %v10062_v60 = vpop.f32.mrb[151].mxu1 }
 0x816   :  { %2881 = vmax.xlane.f32.xlu0 %v2880_v53  ;;  %v2883_v45 = vmax.f32 %v10058_v57, %v10062_v60 }
 0x818   :  { %2884 = vmax.xlane.f32.xlu1 %v2883_v45 }
 0x81a   :  { %v10066_v21 = vpop.f32.mrb[152].mxu1 }
 0x81b   :  { %v10068_v8 = vpop.f32.mrb[153].mxu1 }
 0x81c   :  { %v10070_v33 = vpop.f32.mrb[154].mxu1  ;;  %v2886_v61 = vmax.f32 %v10066_v21, %v10068_v8 }
 0x81d   :  { %v10074_v13 = vpop.f32.mrb[155].mxu1 }
 0x81e   :  { %2887 = vmax.xlane.f32.xlu0 %v2886_v61  ;;  %v2889_v49 = vmax.f32 %v10070_v33, %v10074_v13 }
 0x820   :  { %2890 = vmax.xlane.f32.xlu1 %v2889_v49 }
 0x822   :  { %v10078_v56 = vpop.f32.mrb[156].mxu1 }
 0x823   :  { %v10080_v23 = vpop.f32.mrb[157].mxu1 }
 0x824   :  { %v10082_v36 = vpop.f32.mrb[158].mxu1  ;;  %v2892_v62 = vmax.f32 %v10078_v56, %v10080_v23 }
 0x825   :  { %v10086_v50 = vpop.f32.mrb[159].mxu1 }
 0x826   :  { %2893 = vmax.xlane.f32.xlu0 %v2892_v62  ;;  %v2895_v55 = vmax.f32 %v10082_v36, %v10086_v50 }
 0x828   :  { %2896 = vmax.xlane.f32.xlu1 %v2895_v55 }
 0x82a   :  { %v10090_v31 = vpop.f32.mrb[160].mxu1 }
 0x82b   :  { %v10092_v24 = vpop.f32.mrb[161].mxu1 }
 0x82c   :  { %v10094_v59 = vpop.f32.mrb[162].mxu1  ;;  %v2898_v47 = vmax.f32 %v10090_v31, %v10092_v24 }
 0x82d   :  { %v10098_v43 = vpop.f32.mrb[163].mxu1 }
 0x82e   :  { %2899 = vmax.xlane.f32.xlu0 %v2898_v47  ;;  %v2901_v53 = vmax.f32 %v10094_v59, %v10098_v43 }
 0x830   :  { %2902 = vmax.xlane.f32.xlu1 %v2901_v53 }
 0x832   :  { %v10102_v45 = vpop.f32.mrb[164].mxu1 }
 0x833   :  { %v10104_v61 = vpop.f32.mrb[165].mxu1 }
 0x834   :  { %v10106_v49 = vpop.f32.mrb[166].mxu1  ;;  %v2904_v62 = vmax.f32 %v10102_v45, %v10104_v61 }
 0x835   :  { %v10110_v55 = vpop.f32.mrb[167].mxu1 }
 0x836   :  { %2905 = vmax.xlane.f32.xlu0 %v2904_v62  ;;  %v2907_v5 = vmax.f32 %v10106_v49, %v10110_v55 }
 0x838   :  { %2908 = vmax.xlane.f32.xlu1 %v2907_v5 }
 0x83a   :  { %v10114_v47 = vpop.f32.mrb[168].mxu1 }
 0x83b   :  { %v10116_v46 = vpop.f32.mrb[169].mxu1 }
 0x83c   :  { %v10118_v53 = vpop.f32.mrb[170].mxu1  ;;  %v2910_v32 = vmax.f32 %v10114_v47, %v10116_v46 }
 0x83d   :  { %v10122_v52 = vpop.f32.mrb[171].mxu1 }
 0x83e   :  { %2911 = vmax.xlane.f32.xlu0 %v2910_v32  ;;  %v2913_v48 = vmax.f32 %v10118_v53, %v10122_v52 }
 0x840   :  { %2914 = vmax.xlane.f32.xlu1 %v2913_v48 }
 0x842   :  { %v10126_v62 = vpop.f32.mrb[172].mxu1 }
 0x843   :  { %v10128_v39 = vpop.f32.mrb[173].mxu1 }
 0x844   :  { %13510 = vst [vmem:[#allocation72_spill] sm:$0xff] %v10128_v39  ;;  %v10130_v5 = vpop.f32.mrb[174].mxu1  ;;  %v2916_v9 = vmax.f32 %v10126_v62, %v10128_v39 }
 0x845   :  { %13511 = vst [vmem:[#allocation55_spill] sm:$0xff] %v10130_v5  ;;  %v10134_v7 = vpop.f32.mrb[175].mxu1 }
 0x846   :  { %13512 = vst [vmem:[#allocation56_spill] sm:$0xff] %v10134_v7  ;;  %2917 = vmax.xlane.f32.xlu0 %v2916_v9  ;;  %v2919_v18 = vmax.f32 %v10130_v5, %v10134_v7 }
 0x848   :  { %2920 = vmax.xlane.f32.xlu1 %v2919_v18 }
 0x84a   :  { %v10138_v32 = vpop.f32.mrb[176].mxu1 }
 0x84b   :  { %13513 = vst [vmem:[#allocation59_spill] sm:$0xff] %v10138_v32  ;;  %v10140_v51 = vpop.f32.mrb[177].mxu1 }
 0x84c   :  { %13514 = vst [vmem:[#allocation57_spill] sm:$0xff] %v10140_v51  ;;  %v2922_v48 = vmax.f32 %v10138_v32, %v10140_v51  ;;  %v10144_v0 = vpop.f32.mrb[178].mxu1 }
 0x84d   :  { %13515 = vst [vmem:[#allocation58_spill] sm:$0xff] %v10144_v0  ;;  %v10146_v22 = vpop.f32.mrb[179].mxu1 }
 0x84e   :  { %13516 = vst [vmem:[#allocation60_spill] sm:$0xff] %v10146_v22  ;;  %v2925_v54 = vmax.f32 %v10144_v0, %v10146_v22  ;;  %2923 = vmax.xlane.f32.xlu0 %v2922_v48 }
 0x850   :  { %2926 = vmax.xlane.f32.xlu1 %v2925_v54 }
 0x852   :  { %v10150_v9 = vpop.f32.mrb[180].mxu1 }
 0x853   :  { %13517 = vst [vmem:[#allocation73_spill] sm:$0xff] %v10150_v9  ;;  %v10152_v7 = vpop.f32.mrb[181].mxu1 }
 0x854   :  { %13518 = vst [vmem:[#allocation74_spill] sm:$0xff] %v10152_v7  ;;  %v2928_v18 = vmax.f32 %v10150_v9, %v10152_v7  ;;  %v10156_v5 = vpop.f32.mrb[182].mxu1 }
 0x855   :  { %13519 = vst [vmem:[#allocation75_spill] sm:$0xff] %v10156_v5  ;;  %v10158_v39 = vpop.f32.mrb[183].mxu1 }
 0x856   :  { %13520 = vst [vmem:[#allocation76_spill] sm:$0xff] %v10158_v39  ;;  %v2931_v51 = vmax.f32 %v10156_v5, %v10158_v39  ;;  %2929 = vmax.xlane.f32.xlu0 %v2928_v18 }
 0x858   :  { %2932 = vmax.xlane.f32.xlu1 %v2931_v51 }
 0x85a   :  { %v10162_v32 = vpop.f32.mrb[184].mxu1 }
 0x85b   :  { %13521 = vst [vmem:[#allocation77_spill] sm:$0xff] %v10162_v32  ;;  %v10164_v48 = vpop.f32.mrb[185].mxu1 }
 0x85c   :  { %13522 = vst [vmem:[#allocation78_spill] sm:$0xff] %v10164_v48  ;;  %v2934_v54 = vmax.f32 %v10162_v32, %v10164_v48  ;;  %v10168_v22 = vpop.f32.mrb[186].mxu1 }
 0x85d   :  { %13523 = vst [vmem:[#allocation79_spill] sm:$0xff] %v10168_v22  ;;  %v10170_v0 = vpop.f32.mrb[187].mxu1 }
 0x85e   :  { %13524 = vst [vmem:[#allocation80_spill] sm:$0xff] %v10170_v0  ;;  %v2937_v7 = vmax.f32 %v10168_v22, %v10170_v0  ;;  %2935 = vmax.xlane.f32.xlu0 %v2934_v54 }
 0x860   :  { %2938 = vmax.xlane.f32.xlu1 %v2937_v7 }
 0x862   :  { %v10174_v9 = vpop.f32.mrb[188].mxu1 }
 0x863   :  { %13525 = vst [vmem:[#allocation81_spill] sm:$0xff] %v10174_v9  ;;  %v10176_v18 = vpop.f32.mrb[189].mxu1 }
 0x864   :  { %13526 = vst [vmem:[#allocation82_spill] sm:$0xff] %v10176_v18  ;;  %v2940_v51 = vmax.f32 %v10174_v9, %v10176_v18  ;;  %v10180_v39 = vpop.f32.mrb[190].mxu1 }
 0x865   :  { %13527 = vst [vmem:[#allocation83_spill] sm:$0xff] %v10180_v39  ;;  %v10182_v5 = vpop.f32.mrb[191].mxu1 }
 0x866   :  { %13528 = vst [vmem:[#allocation37_spill] sm:$0xff] %v10182_v5  ;;  %v2943_v48 = vmax.f32 %v10180_v39, %v10182_v5  ;;  %2941 = vmax.xlane.f32.xlu0 %v2940_v51 }
 0x868   :  { %2944 = vmax.xlane.f32.xlu1 %v2943_v48 }
 0x86a   :  { %v10186_v32 = vpop.f32.mrb[192].mxu1 }
 0x86b   :  { %13529 = vst [vmem:[#allocation35_spill] sm:$0xff] %v10186_v32  ;;  %v10188_v54 = vpop.f32.mrb[193].mxu1 }
 0x86c   :  { %13530 = vst [vmem:[#allocation36_spill] sm:$0xff] %v10188_v54  ;;  %v2946_v7 = vmax.f32 %v10186_v32, %v10188_v54  ;;  %v10192_v0 = vpop.f32.mrb[194].mxu1 }
 0x86d   :  { %13531 = vst [vmem:[#allocation38_spill] sm:$0xff] %v10192_v0  ;;  %v10194_v22 = vpop.f32.mrb[195].mxu1 }
 0x86e   :  { %13532 = vst [vmem:[#allocation84_spill] sm:$0xff] %v10194_v22  ;;  %v2949_v18 = vmax.f32 %v10192_v0, %v10194_v22  ;;  %2947 = vmax.xlane.f32.xlu0 %v2946_v7  ;;  %v722_v7 = vld [vmem:[%s12952_s4 + $0x70] sm:$0xff] }
 0x870   :  { %2950 = vmax.xlane.f32.xlu1 %v2949_v18  ;;  %v723_v18 = vld [vmem:[%s12952_s4 + $0x78] sm:$0xff] }
 0x872   :  { %v10198_v9 = vpop.f32.mrb[196].mxu1 }
 0x873   :  { %13533 = vst [vmem:[#allocation85_spill] sm:$0xff] %v10198_v9  ;;  %v10200_v51 = vpop.f32.mrb[197].mxu1 }
 0x874   :  { %13534 = vst [vmem:[#allocation63_spill] sm:$0xff] %v10200_v51  ;;  %v2952_v48 = vmax.f32 %v10198_v9, %v10200_v51  ;;  %v10204_v5 = vpop.f32.mrb[198].mxu1 }
 0x875   :  { %13535 = vst [vmem:[#allocation61_spill] sm:$0xff] %v10204_v5  ;;  %v10206_v39 = vpop.f32.mrb[199].mxu1 }
 0x876   :  { %13536 = vst [vmem:[#allocation62_spill] sm:$0xff] %v10206_v39  ;;  %v2955_v54 = vmax.f32 %v10204_v5, %v10206_v39  ;;  %2953 = vmax.xlane.f32.xlu0 %v2952_v48 }
 0x878   :  { %2956 = vmax.xlane.f32.xlu1 %v2955_v54 }
 0x889   :  { %825 = vperm.xlu1 %7495, %v723_v18  }
 0x88b   :  { %v2864_v22 = vpop.xlane.xlu1 %2863 }
 0x88c   :  { %v2958_v51 = vsub.f32 %v10004_v38, %v2864_v22  ;;  %v2959_v9 = vsub.f32 %v10006_v34, %v2864_v22  ;;  %820 = vperm.xlu0 %7494, %v722_v7  }
 0x88d   :  { %3284 = vrot.lane.b32.xlu1 %v9096_v63, %s8652_s10  ;;  %v2867_v54 = vpop.xlane.xlu0 %2866 }
 0x88e   :  { %v3022_v48 = vmul.f32 1.442695, %v2958_v51  ;;  %v2960_v39 = vsub.f32 %v10008_v20, %v2867_v54  ;;  %v2961_v18 = vsub.f32 %v10012_v29, %v2867_v54  ;;  %v3024_v5 = vmul.f32 1.442695, %v2959_v9 }
 0x890   :  { %v3026_v0 = vmul.f32 1.442695, %v2960_v39  ;;  %v3028_v32 = vmul.f32 1.442695, %v2961_v18  ;;  %3286 = vrot.lane.b32.xlu0 %v9101_v58, %s8652_s10  ;;  %7792 = vpow2.f32 %v3022_v48 }
 0x891   :  { %3288 = vrot.lane.b32.xlu1 %v9106_v42, %s8652_s10 }
 0x892   :  { %7794 = vpow2.f32 %v3026_v0 }
 0x893   :  { %7796 = vpow2.f32 %v3028_v32  ;;  %v2870_v22 = vpop.xlane.xlu0 %2869 }
 0x894   :  { %7798 = vpow2.f32 %v3024_v5  ;;  %v2962_v63 = vsub.f32 %v10028_v2, %v2870_v22  ;;  %v2963_v38 = vsub.f32 %v10030_v12, %v2870_v22  ;;  %3290 = vrot.lane.b32.xlu0 %v9111_v16, %s8652_s10 }
 0x895   :  { %v2873_v39 = vpop.xlane.xlu1 %2872  ;;  %3292 = vrot.lane.b32.xlu1 %v9116_v10, %s8652_s10 }
 0x896   :  { %v3030_v58 = vmul.f32 1.442695, %v2962_v63  ;;  %v2964_v34 = vsub.f32 %v10034_v44, %v2873_v39  ;;  %v2965_v42 = vsub.f32 %v10038_v15, %v2873_v39  ;;  %v3032_v20 = vmul.f32 1.442695, %v2963_v38 }
 0x898   :  { %v3034_v29 = vmul.f32 1.442695, %v2964_v34  ;;  %v3036_v0 = vmul.f32 1.442695, %v2965_v42  ;;  %3294 = vrot.lane.b32.xlu0 %v9121_v11, %s8652_s10  ;;  %7800 = vpow2.f32 %v3030_v58 }
 0x899   :  { %3296 = vrot.lane.b32.xlu1 %v9126_v14, %s8652_s10 }
 0x89a   :  { %7802 = vpow2.f32 %v3034_v29  ;;  %v7793_v16 = vpop.eup %7792 }
 0x89b   :  { %7804 = vpow2.f32 %v3036_v0  ;;  %v2876_v2 = vpop.xlane.xlu0 %2875 }
 0x89c   :  { %v7795_v10 = vpop.eup %7794  ;;  %7806 = vpow2.f32 %v3032_v20  ;;  %v2966_v12 = vsub.f32 %v10042_v28, %v2876_v2  ;;  %v2967_v44 = vsub.f32 %v10044_v17, %v2876_v2  ;;  %3298 = vrot.lane.b32.xlu0 %v9131_v40, %s8652_s10 }
 0x89d   :  { %v7797_v15 = vpop.eup %7796  ;;  %v2879_v5 = vpop.xlane.xlu1 %2878  ;;  %3300 = vrot.lane.b32.xlu1 %v9136_v27, %s8652_s10  ;;  %v3150_v11 = vpack.c.bf16 %v7795_v10, %v7793_v16 }
 0x89e   :  { %v7799_v14 = vpop.eup %7798  ;;  %v3038_v32 = vmul.f32 1.442695, %v2966_v12  ;;  %v2968_v9 = vsub.f32 %v10046_v1, %v2879_v5  ;;  %v2969_v51 = vsub.f32 %v10050_v25, %v2879_v5  ;;  %v3040_v54 = vmul.f32 1.442695, %v2967_v44 }
 0x89f   :  { %v3151_v7 = vpack.c.bf16 %v7797_v15, %v7799_v14 }
 0x8a0   :  { %v3042_v28 = vmul.f32 1.442695, %v2968_v9  ;;  %v3044_v48 = vmul.f32 1.442695, %v2969_v51  ;;  %3302 = vrot.lane.b32.xlu0 %v9141_v30, %s8652_s10  ;;  %7808 = vpow2.f32 %v3038_v32 }
 0x8a1   :  { %3182 = vmatprep.subr.bf16.mxu0 %v3151_v7  ;;  %3225 = vmatprep.subr.bf16.mxu1 %v3151_v7 }
 0x8a2   :  { %7810 = vpow2.f32 %v3042_v28  ;;  %3183 = vmatpush1.bf16.xpose.msra.mxu0 %v3150_v11  ;;  %3226 = vmatpush1.bf16.xpose.msra.mxu1 %v3150_v11  ;;  %v7801_v40 = vpop.eup %7800 }
 0x8a3   :  { %7812 = vpow2.f32 %v3044_v48  ;;  %3304 = vrot.lane.b32.xlu1 %v9146_v19, %s8652_s10  ;;  %v2882_v27 = vpop.xlane.xlu0 %2881 }
 0x8a4   :  { %v7803_v17 = vpop.eup %7802  ;;  %7814 = vpow2.f32 %v3040_v54  ;;  %v2970_v1 = vsub.f32 %v10054_v3, %v2882_v27  ;;  %v2971_v25 = vsub.f32 %v10056_v37, %v2882_v27  ;;  %3306 = vrot.lane.b32.xlu0 %v9151_v35, %s8652_s10 }
 0x8a5   :  { %v7805_v30 = vpop.eup %7804  ;;  %v2885_v18 = vpop.xlane.xlu1 %2884  ;;  %v3152_v22 = vpack.c.bf16 %v7803_v17, %v7801_v40 }
 0x8a6   :  { %v7807_v63 = vpop.eup %7806  ;;  %v3046_v38 = vmul.f32 1.442695, %v2970_v1  ;;  %v2972_v39 = vsub.f32 %v10058_v57, %v2885_v18  ;;  %v2973_v58 = vsub.f32 %v10062_v60, %v2885_v18  ;;  %v3048_v34 = vmul.f32 1.442695, %v2971_v25 }
 0x8a7   :  { %3308 = vrot.lane.b32.xlu1 %v13463_v4, %s8652_s10  ;;  %v3153_v19 = vpack.c.bf16 %v7805_v30, %v7807_v63 }
 0x8a8   :  { %v3050_v3 = vmul.f32 1.442695, %v2972_v39  ;;  %v3052_v42 = vmul.f32 1.442695, %v2973_v58  ;;  %3310 = vrot.lane.b32.xlu0 %v9161_v41, %s8652_s10  ;;  %7816 = vpow2.f32 %v3046_v38 }
 0x8a9   :  { %3184 = vmatprep.subr.bf16.mxu0 %v3153_v19  ;;  %3227 = vmatprep.subr.bf16.mxu1 %v3153_v19 }
 0x8aa   :  { %7818 = vpow2.f32 %v3050_v3  ;;  %3185 = vmatpush1.bf16.xpose.msra.mxu0 %v3152_v22  ;;  %3228 = vmatpush1.bf16.xpose.msra.mxu1 %v3152_v22  ;;  %v7809_v35 = vpop.eup %7808 }
 0x8ab   :  { %7820 = vpow2.f32 %v3052_v42  ;;  %3312 = vrot.lane.b32.xlu1 %v13468_v26, %s8652_s10  ;;  %v2888_v37 = vpop.xlane.xlu0 %2887 }
 0x8ac   :  { %v7811_v4 = vpop.eup %7810  ;;  %7822 = vpow2.f32 %v3048_v34  ;;  %v2974_v57 = vsub.f32 %v10066_v21, %v2888_v37  ;;  %v2975_v60 = vsub.f32 %v10068_v8, %v2888_v37  ;;  %3314 = vrot.lane.b32.xlu0 %v9179_v6, %s8652_s10 }
 0x8ad   :  { %v7813_v41 = vpop.eup %7812  ;;  %v2891_v20 = vpop.xlane.xlu1 %2890  ;;  %v3154_v29 = vpack.c.bf16 %v7811_v4, %v7809_v35 }
 0x8ae   :  { %v7815_v0 = vpop.eup %7814  ;;  %v3054_v16 = vmul.f32 1.442695, %v2974_v57  ;;  %v2976_v2 = vsub.f32 %v10070_v33, %v2891_v20  ;;  %v2977_v10 = vsub.f32 %v10074_v13, %v2891_v20  ;;  %v3056_v12 = vmul.f32 1.442695, %v2975_v60 }
 0x8af   :  { %v3155_v26 = vpack.c.bf16 %v7813_v41, %v7815_v0 }
 0x8b0   :  { %v3058_v44 = vmul.f32 1.442695, %v2976_v2  ;;  %v3060_v15 = vmul.f32 1.442695, %v2977_v10  ;;  %7824 = vpow2.f32 %v3054_v16 }
 0x8b1   :  { %3186 = vmatprep.subr.bf16.mxu0 %v3155_v26  ;;  %3229 = vmatprep.subr.bf16.mxu1 %v3155_v26 }
 0x8b2   :  { %7826 = vpow2.f32 %v3058_v44  ;;  %3187 = vmatpush1.bf16.xpose.msra.mxu0 %v3154_v29  ;;  %3230 = vmatpush1.bf16.xpose.msra.mxu1 %v3154_v29  ;;  %v7817_v6 = vpop.eup %7816 }
 0x8b3   :  { %7828 = vpow2.f32 %v3060_v15  ;;  %v2894_v21 = vpop.xlane.xlu0 %2893 }
 0x8b4   :  { %v7819_v8 = vpop.eup %7818  ;;  %7830 = vpow2.f32 %v3056_v12  ;;  %v2978_v5 = vsub.f32 %v10078_v56, %v2894_v21  ;;  %v2979_v33 = vsub.f32 %v10080_v23, %v2894_v21 }
 0x8b5   :  { %v7821_v13 = vpop.eup %7820  ;;  %v2897_v11 = vpop.xlane.xlu1 %2896  ;;  %v3156_v14 = vpack.c.bf16 %v7819_v8, %v7817_v6 }
 0x8b6   :  { %v7823_v32 = vpop.eup %7822  ;;  %v3062_v9 = vmul.f32 1.442695, %v2978_v5  ;;  %v2980_v51 = vsub.f32 %v10082_v36, %v2897_v11  ;;  %v2981_v7 = vsub.f32 %v10086_v50, %v2897_v11  ;;  %v3064_v28 = vmul.f32 1.442695, %v2979_v33 }
 0x8b7   :  { %v3157_v54 = vpack.c.bf16 %v7821_v13, %v7823_v32 }
 0x8b8   :  { %v3066_v48 = vmul.f32 1.442695, %v2980_v51  ;;  %v3068_v40 = vmul.f32 1.442695, %v2981_v7  ;;  %7832 = vpow2.f32 %v3062_v9 }
 0x8b9   :  { %3188 = vmatprep.subr.bf16.mxu0 %v3157_v54  ;;  %3231 = vmatprep.subr.bf16.mxu1 %v3157_v54  ;;  %v13538_v54 = vld [vmem:[#allocation55_spill] sm:$0xff] }
 0x8ba   :  { %7834 = vpow2.f32 %v3066_v48  ;;  %3189 = vmatpush1.bf16.xpose.msra.mxu0 %v3156_v14  ;;  %3232 = vmatpush1.bf16.xpose.msra.mxu1 %v3156_v14  ;;  %v7825_v56 = vpop.eup %7824  ;;  %v13539_v48 = vld [vmem:[#allocation56_spill] sm:$0xff] }
 0x8bb   :  { %7836 = vpow2.f32 %v3068_v40  ;;  %v2900_v23 = vpop.xlane.xlu0 %2899 }
 0x8bc   :  { %v7827_v27 = vpop.eup %7826  ;;  %7838 = vpow2.f32 %v3064_v28  ;;  %v2982_v17 = vsub.f32 %v10090_v31, %v2900_v23  ;;  %v2983_v36 = vsub.f32 %v10092_v24, %v2900_v23 }
 0x8bd   :  { %v7829_v50 = vpop.eup %7828  ;;  %v2903_v1 = vpop.xlane.xlu1 %2902  ;;  %v3158_v25 = vpack.c.bf16 %v7827_v27, %v7825_v56 }
 0x8be   :  { %v7831_v30 = vpop.eup %7830  ;;  %v3070_v18 = vmul.f32 1.442695, %v2982_v17  ;;  %v2984_v22 = vsub.f32 %v10094_v59, %v2903_v1  ;;  %v2985_v63 = vsub.f32 %v10098_v43, %v2903_v1  ;;  %v3072_v39 = vmul.f32 1.442695, %v2983_v36  ;;  %v13540_v1 = vld [vmem:[#allocation59_spill] sm:$0xff] }
 0x8bf   :  { %v3159_v38 = vpack.c.bf16 %v7829_v50, %v7831_v30  ;;  %v13541_v30 = vld [vmem:[#allocation57_spill] sm:$0xff] }
 0x8c0   :  { %v3074_v58 = vmul.f32 1.442695, %v2984_v22  ;;  %v3076_v19 = vmul.f32 1.442695, %v2985_v63  ;;  %7840 = vpow2.f32 %v3070_v18 }
 0x8c1   :  { %3190 = vmatprep.subr.bf16.mxu0 %v3159_v38  ;;  %3233 = vmatprep.subr.bf16.mxu1 %v3159_v38 }
 0x8c2   :  { %7842 = vpow2.f32 %v3074_v58  ;;  %3191 = vmatpush1.bf16.xpose.msra.mxu0 %v3158_v25  ;;  %3234 = vmatpush1.bf16.xpose.msra.mxu1 %v3158_v25  ;;  %v7833_v31 = vpop.eup %7832 }
 0x8c3   :  { %7844 = vpow2.f32 %v3076_v19  ;;  %v2906_v24 = vpop.xlane.xlu0 %2905  ;;  %v13542_v19 = vld [vmem:[#allocation58_spill] sm:$0xff] }
 0x8c4   :  { %v7835_v34 = vpop.eup %7834  ;;  %7846 = vpow2.f32 %v3072_v39  ;;  %v2986_v3 = vsub.f32 %v10102_v45, %v2906_v24  ;;  %v2987_v59 = vsub.f32 %v10104_v61, %v2906_v24  ;;  %v13543_v24 = vld [vmem:[#allocation60_spill] sm:$0xff] }
 0x8c5   :  { %v7837_v43 = vpop.eup %7836  ;;  %v2909_v42 = vpop.xlane.xlu1 %2908  ;;  %v3160_v35 = vpack.c.bf16 %v7835_v34, %v7833_v31 }
 0x8c6   :  { %v7839_v37 = vpop.eup %7838  ;;  %v3078_v4 = vmul.f32 1.442695, %v2986_v3  ;;  %v2988_v57 = vsub.f32 %v10106_v49, %v2909_v42  ;;  %v2989_v60 = vsub.f32 %v10110_v55, %v2909_v42  ;;  %v3080_v20 = vmul.f32 1.442695, %v2987_v59 }
 0x8c7   :  { %v3161_v41 = vpack.c.bf16 %v7837_v43, %v7839_v37 }
 0x8c8   :  { %v3082_v29 = vmul.f32 1.442695, %v2988_v57  ;;  %v3084_v0 = vmul.f32 1.442695, %v2989_v60  ;;  %7848 = vpow2.f32 %v3078_v4  ;;  %v13544_v57 = vld [vmem:[#allocation73_spill] sm:$0xff] }
 0x8c9   :  { %3192 = vmatprep.subr.bf16.mxu0 %v3161_v41  ;;  %3235 = vmatprep.subr.bf16.mxu1 %v3161_v41  ;;  %v13545_v41 = vld [vmem:[#allocation74_spill] sm:$0xff] }
 0x8ca   :  { %7850 = vpow2.f32 %v3082_v29  ;;  %3193 = vmatpush1.bf16.xpose.msra.mxu0 %v3160_v35  ;;  %3236 = vmatpush1.bf16.xpose.msra.mxu1 %v3160_v35  ;;  %v7841_v45 = vpop.eup %7840 }
 0x8cb   :  { %7852 = vpow2.f32 %v3084_v0  ;;  %v2912_v61 = vpop.xlane.xlu0 %2911 }
 0x8cc   :  { %v7843_v16 = vpop.eup %7842  ;;  %7854 = vpow2.f32 %v3080_v20  ;;  %v2990_v2 = vsub.f32 %v10114_v47, %v2912_v61  ;;  %v2991_v49 = vsub.f32 %v10116_v46, %v2912_v61 }
 0x8cd   :  { %v7845_v55 = vpop.eup %7844  ;;  %v2915_v10 = vpop.xlane.xlu1 %2914  ;;  %v3162_v26 = vpack.c.bf16 %v7843_v16, %v7841_v45 }
 0x8ce   :  { %v7847_v12 = vpop.eup %7846  ;;  %v3086_v44 = vmul.f32 1.442695, %v2990_v2  ;;  %v2992_v15 = vsub.f32 %v10118_v53, %v2915_v10  ;;  %v2993_v6 = vsub.f32 %v10122_v52, %v2915_v10  ;;  %v3088_v8 = vmul.f32 1.442695, %v2991_v49  ;;  %v13537_v53 = vld [vmem:[#allocation72_spill] sm:$0xff]  ;;  %v13546_v2 = vld [vmem:[#allocation75_spill] sm:$0xff] }
 0x8cf   :  { %v3163_v21 = vpack.c.bf16 %v7845_v55, %v7847_v12  ;;  %v13547_v55 = vld [vmem:[#allocation76_spill] sm:$0xff] }
 0x8d0   :  { %v3090_v5 = vmul.f32 1.442695, %v2992_v15  ;;  %v3092_v33 = vmul.f32 1.442695, %v2993_v6  ;;  %7856 = vpow2.f32 %v3086_v44 }
 0x8d1   :  { %3194 = vmatprep.subr.bf16.mxu0 %v3163_v21  ;;  %3237 = vmatprep.subr.bf16.mxu1 %v3163_v21 }
 0x8d2   :  { %7858 = vpow2.f32 %v3090_v5  ;;  %3195 = vmatpush1.bf16.xpose.msra.mxu0 %v3162_v26  ;;  %3238 = vmatpush1.bf16.xpose.msra.mxu1 %v3162_v26  ;;  %v7849_v46 = vpop.eup %7848  ;;  %v13548_v5 = vld [vmem:[#allocation77_spill] sm:$0xff] }
 0x8d3   :  { %7860 = vpow2.f32 %v3092_v33  ;;  %v2918_v47 = vpop.xlane.xlu0 %2917 }
 0x8d4   :  { %v7851_v13 = vpop.eup %7850  ;;  %7862 = vpow2.f32 %v3088_v8  ;;  %v2994_v11 = vsub.f32 %v10126_v62, %v2918_v47  ;;  %v2995_v14 = vsub.f32 %v13537_v53, %v2918_v47 }
 0x8d5   :  { %v7853_v52 = vpop.eup %7852  ;;  %v2921_v32 = vpop.xlane.xlu1 %2920  ;;  %v3164_v9 = vpack.c.bf16 %v7851_v13, %v7849_v46  ;;  %v13549_v46 = vld [vmem:[#allocation78_spill] sm:$0xff] }
 0x8d6   :  { %v7855_v51 = vpop.eup %7854  ;;  %v3094_v7 = vmul.f32 1.442695, %v2994_v11  ;;  %v2996_v28 = vsub.f32 %v13538_v54, %v2921_v32  ;;  %v2997_v40 = vsub.f32 %v13539_v48, %v2921_v32  ;;  %v3096_v23 = vmul.f32 1.442695, %v2995_v14  ;;  %v13550_v32 = vld [vmem:[#allocation79_spill] sm:$0xff] }
 0x8d7   :  { %v3165_v56 = vpack.c.bf16 %v7853_v52, %v7855_v51  ;;  %v13551_v51 = vld [vmem:[#allocation80_spill] sm:$0xff] }
 0x8d8   :  { %v3098_v27 = vmul.f32 1.442695, %v2996_v28  ;;  %v3100_v17 = vmul.f32 1.442695, %v2997_v40  ;;  %7864 = vpow2.f32 %v3094_v7 }
 0x8d9   :  { %3196 = vmatprep.subr.bf16.mxu0 %v3165_v56  ;;  %3239 = vmatprep.subr.bf16.mxu1 %v3165_v56 }
 0x8da   :  { %7866 = vpow2.f32 %v3098_v27  ;;  %3197 = vmatpush1.bf16.xpose.msra.mxu0 %v3164_v9  ;;  %3240 = vmatpush1.bf16.xpose.msra.mxu1 %v3164_v9  ;;  %v7857_v62 = vpop.eup %7856 }
 0x8db   :  { %7868 = vpow2.f32 %v3100_v17  ;;  %v2924_v36 = vpop.xlane.xlu0 %2923  ;;  %v13552_v17 = vld [vmem:[#allocation81_spill] sm:$0xff] }
 0x8dc   :  { %v7859_v50 = vpop.eup %7858  ;;  %7870 = vpow2.f32 %v3096_v23  ;;  %v2998_v25 = vsub.f32 %v13540_v1, %v2924_v36  ;;  %v2999_v18 = vsub.f32 %v13541_v30, %v2924_v36  ;;  %v13553_v36 = vld [vmem:[#allocation82_spill] sm:$0xff] }
 0x8dd   :  { %v7861_v22 = vpop.eup %7860  ;;  %v2927_v63 = vpop.xlane.xlu1 %2926  ;;  %v3166_v38 = vpack.c.bf16 %v7859_v50, %v7857_v62 }
 0x8de   :  { %v7863_v39 = vpop.eup %7862  ;;  %v3102_v58 = vmul.f32 1.442695, %v2998_v25  ;;  %v3000_v31 = vsub.f32 %v13542_v19, %v2927_v63  ;;  %v3001_v34 = vsub.f32 %v13543_v24, %v2927_v63  ;;  %v3104_v59 = vmul.f32 1.442695, %v2999_v18  ;;  %v13554_v63 = vld [vmem:[#allocation83_spill] sm:$0xff] }
 0x8df   :  { %v3167_v3 = vpack.c.bf16 %v7861_v22, %v7863_v39  ;;  %v13555_v39 = vld [vmem:[#allocation37_spill] sm:$0xff] }
 0x8e0   :  { %v3106_v43 = vmul.f32 1.442695, %v3000_v31  ;;  %v3108_v42 = vmul.f32 1.442695, %v3001_v34  ;;  %7872 = vpow2.f32 %v3102_v58 }
 0x8e1   :  { %3198 = vmatprep.subr.bf16.mxu0 %v3167_v3  ;;  %3241 = vmatprep.subr.bf16.mxu1 %v3167_v3 }
 0x8e2   :  { %7874 = vpow2.f32 %v3106_v43  ;;  %3199 = vmatpush1.bf16.xpose.msra.mxu0 %v3166_v38  ;;  %3242 = vmatpush1.bf16.xpose.msra.mxu1 %v3166_v38  ;;  %v7865_v35 = vpop.eup %7864 }
 0x8e3   :  { %7876 = vpow2.f32 %v3108_v42  ;;  %v2930_v37 = vpop.xlane.xlu0 %2929  ;;  %v13556_v42 = vld [vmem:[#allocation35_spill] sm:$0xff] }
 0x8e4   :  { %v7867_v4 = vpop.eup %7866  ;;  %7878 = vpow2.f32 %v3104_v59  ;;  %v3002_v60 = vsub.f32 %v13544_v57, %v2930_v37  ;;  %v3003_v20 = vsub.f32 %v13545_v41, %v2930_v37  ;;  %v13557_v37 = vld [vmem:[#allocation36_spill] sm:$0xff] }
 0x8e5   :  { %v7869_v29 = vpop.eup %7868  ;;  %v2933_v0 = vpop.xlane.xlu1 %2932  ;;  %v3168_v45 = vpack.c.bf16 %v7867_v4, %v7865_v35 }
 0x8e6   :  { %v7871_v61 = vpop.eup %7870  ;;  %v3110_v16 = vmul.f32 1.442695, %v3002_v60  ;;  %v3004_v49 = vsub.f32 %v13546_v2, %v2933_v0  ;;  %v3005_v10 = vsub.f32 %v13547_v55, %v2933_v0  ;;  %v3112_v12 = vmul.f32 1.442695, %v3003_v20 }
 0x8e7   :  { %v3169_v26 = vpack.c.bf16 %v7869_v29, %v7871_v61 }
 0x8e8   :  { %v3114_v44 = vmul.f32 1.442695, %v3004_v49  ;;  %v3116_v15 = vmul.f32 1.442695, %v3005_v10  ;;  %7880 = vpow2.f32 %v3110_v16  ;;  %v13559_v16 = vld [vmem:[#allocation84_spill] sm:$0xff] }
 0x8e9   :  { %3200 = vmatprep.subr.bf16.mxu0 %v3169_v26  ;;  %3243 = vmatprep.subr.bf16.mxu1 %v3169_v26 }
 0x8ea   :  { %7882 = vpow2.f32 %v3114_v44  ;;  %3201 = vmatpush1.bf16.xpose.msra.mxu0 %v3168_v45  ;;  %3244 = vmatpush1.bf16.xpose.msra.mxu1 %v3168_v45  ;;  %v7873_v6 = vpop.eup %7872  ;;  %v13558_v45 = vld [vmem:[#allocation38_spill] sm:$0xff] }
 0x8eb   :  { %7884 = vpow2.f32 %v3116_v15  ;;  %v2936_v21 = vpop.xlane.xlu0 %2935  ;;  %v13560_v15 = vld [vmem:[#allocation85_spill] sm:$0xff] }
 0x8ec   :  { %v7875_v8 = vpop.eup %7874  ;;  %7886 = vpow2.f32 %v3112_v12  ;;  %v3006_v33 = vsub.f32 %v13548_v5, %v2936_v21  ;;  %v3007_v47 = vsub.f32 %v13549_v46, %v2936_v21  ;;  %v13561_v21 = vld [vmem:[#allocation63_spill] sm:$0xff] }
 0x8ed   :  { %v7877_v13 = vpop.eup %7876  ;;  %v2939_v11 = vpop.xlane.xlu1 %2938  ;;  %v3170_v53 = vpack.c.bf16 %v7875_v8, %v7873_v6 }
 0x8ee   :  { %v7879_v14 = vpop.eup %7878  ;;  %v3118_v52 = vmul.f32 1.442695, %v3006_v33  ;;  %v3008_v9 = vsub.f32 %v13550_v32, %v2939_v11  ;;  %v3009_v7 = vsub.f32 %v13551_v51, %v2939_v11  ;;  %v3120_v28 = vmul.f32 1.442695, %v3007_v47 }
 0x8ef   :  { %v3171_v54 = vpack.c.bf16 %v7877_v13, %v7879_v14 }
 0x8f0   :  { %v3122_v48 = vmul.f32 1.442695, %v3008_v9  ;;  %v3124_v40 = vmul.f32 1.442695, %v3009_v7  ;;  %7888 = vpow2.f32 %v3118_v52  ;;  %v13563_v52 = vld [vmem:[#allocation62_spill] sm:$0xff] }
 0x8f1   :  { %3202 = vmatprep.subr.bf16.mxu0 %v3171_v54  ;;  %3245 = vmatprep.subr.bf16.mxu1 %v3171_v54 }
 0x8f2   :  { %7890 = vpow2.f32 %v3122_v48  ;;  %3203 = vmatpush1.bf16.xpose.msra.mxu0 %v3170_v53  ;;  %3246 = vmatpush1.bf16.xpose.msra.mxu1 %v3170_v53  ;;  %v7881_v56 = vpop.eup %7880  ;;  %v13562_v53 = vld [vmem:[#allocation61_spill] sm:$0xff] }
 0x8f3   :  { %7892 = vpow2.f32 %v3124_v40  ;;  %v2942_v23 = vpop.xlane.xlu0 %2941 }
 0x8f4   :  { %v7883_v27 = vpop.eup %7882  ;;  %7894 = vpow2.f32 %v3120_v28  ;;  %v3010_v62 = vsub.f32 %v13552_v17, %v2942_v23  ;;  %v3011_v50 = vsub.f32 %v13553_v36, %v2942_v23  ;;  %v13566_v23 = vld [vmem:[#allocation67_spill] sm:$0xff]  ;;  %v13567_v17 = vld [vmem:[#allocation68_spill] sm:$0xff]  ;;  %v13568_v36 = vld [vmem:[#allocation65_spill] sm:$0xff] }
 0x8f5   :  { %v7885_v1 = vpop.eup %7884  ;;  %v2945_v25 = vpop.xlane.xlu1 %2944  ;;  %v3172_v30 = vpack.c.bf16 %v7883_v27, %v7881_v56 }
 0x8f6   :  { %v7887_v18 = vpop.eup %7886  ;;  %v3126_v22 = vmul.f32 1.442695, %v3010_v62  ;;  %v3012_v38 = vsub.f32 %v13554_v63, %v2945_v25  ;;  %v3013_v58 = vsub.f32 %v13555_v39, %v2945_v25  ;;  %v3128_v31 = vmul.f32 1.442695, %v3011_v50 }
 0x8f7   :  { %v3173_v19 = vpack.c.bf16 %v7885_v1, %v7887_v18  ;;  %v13569_v1 = vld [vmem:[#allocation66_spill] sm:$0xff] }
 0x8f8   :  { %v3130_v24 = vmul.f32 1.442695, %v3012_v38  ;;  %v3132_v34 = vmul.f32 1.442695, %v3013_v58  ;;  %7896 = vpow2.f32 %v3126_v22 }
 0x8f9   :  { %3204 = vmatprep.subr.bf16.mxu0 %v3173_v19  ;;  %3247 = vmatprep.subr.bf16.mxu1 %v3173_v19 }
 0x8fa   :  { %7898 = vpow2.f32 %v3130_v24  ;;  %3205 = vmatpush1.bf16.xpose.msra.mxu0 %v3172_v30  ;;  %3248 = vmatpush1.bf16.xpose.msra.mxu1 %v3172_v30  ;;  %v7889_v3 = vpop.eup %7888 }
 0x8fb   :  { %7900 = vpow2.f32 %v3132_v34  ;;  %v2948_v59 = vpop.xlane.xlu0 %2947 }
 0x8fc   :  { %v7891_v43 = vpop.eup %7890  ;;  %7902 = vpow2.f32 %v3128_v31  ;;  %v3014_v35 = vsub.f32 %v13556_v42, %v2948_v59  ;;  %v3015_v4 = vsub.f32 %v13557_v37, %v2948_v59  ;;  %v10328_v59 = vld [vmem:[%s12949_s0 + $0x90] sm:$0xff]  ;;  %v10338_v42 = vld [vmem:[%s12949_s0 + $0x80] sm:$0xff] }
 0x8fd   :  { %v7893_v57 = vpop.eup %7892  ;;  %v2951_v60 = vpop.xlane.xlu1 %2950  ;;  %v3174_v41 = vpack.c.bf16 %v7891_v43, %v7889_v3  ;;  %v13570_v3 = vmov 1065369472   ;;  %v10333_v43 = vld [vmem:[%s12949_s0 + $0x98] sm:$0xff] }
 0x8fe   :  { %v7895_v20 = vpop.eup %7894  ;;  %v3134_v29 = vmul.f32 1.442695, %v3014_v35  ;;  %v3136_v0 = vmul.f32 1.442695, %v3015_v4  ;;  %v3016_v61 = vsub.f32 %v13558_v45, %v2951_v60  ;;  %v3017_v2 = vsub.f32 %v13559_v16, %v2951_v60  ;;  %v10346_v4 = vld [vmem:[%s12949_s0 + $0x88] sm:$0xff] }
 0x8ff   :  { %v3175_v49 = vpack.c.bf16 %v7893_v57, %v7895_v20  ;;  %v13571_v35 = vmov 0   ;;  %v87_v37 = vadd.f32 %v10333_v43, %v10328_v59  ;;  %v84_v57 = vadd.f32 %v10346_v4, %v10338_v42 }
 0x900   :  { %7904 = vpow2.f32 %v3134_v29  ;;  %v3138_v55 = vmul.f32 1.442695, %v3016_v61  ;;  %v3140_v10 = vmul.f32 1.442695, %v3017_v2 }
 0x901   :  { %7906 = vpow2.f32 %v3136_v0  ;;  %3206 = vmatprep.subr.bf16.mxu0 %v3175_v49  ;;  %3249 = vmatprep.subr.bf16.mxu1 %v3175_v49 }
 0x902   :  { %7908 = vpow2.f32 %v3138_v55  ;;  %3207 = vmatpush1.bf16.xpose.msra.mxu0 %v3174_v41  ;;  %3250 = vmatpush1.bf16.xpose.msra.mxu1 %v3174_v41  ;;  %v7897_v26 = vpop.eup %7896 }
 0x903   :  { %7910 = vpow2.f32 %v3140_v10  ;;  %v2954_v12 = vpop.xlane.xlu0 %2953  ;;  %88 = vadd.xlane.f32.xlu1 %v87_v37  ;;  %85 = vadd.xlane.f32.xlu0 %v84_v57 }
 0x904   :  { %v7899_v44 = vpop.eup %7898  ;;  %v3018_v6 = vsub.f32 %v13560_v15, %v2954_v12  ;;  %v3019_v8 = vsub.f32 %v13561_v21, %v2954_v12 }
 0x905   :  { %v7901_v5 = vpop.eup %7900  ;;  %v2957_v33 = vpop.xlane.xlu1 %2956  ;;  %v3176_v46 = vpack.c.bf16 %v7899_v44, %v7897_v26 }
 0x906   :  { %v7903_v47 = vpop.eup %7902  ;;  %v3142_v13 = vmul.f32 1.442695, %v3018_v6  ;;  %v3144_v11 = vmul.f32 1.442695, %v3019_v8  ;;  %v3020_v14 = vsub.f32 %v13562_v53, %v2957_v33  ;;  %v3021_v32 = vsub.f32 %v13563_v52, %v2957_v33 }
 0x907   :  { %v3177_v9 = vpack.c.bf16 %v7901_v5, %v7903_v47 }
 0x908   :  { %7912 = vpow2.f32 %v3142_v13  ;;  %v3146_v51 = vmul.f32 1.442695, %v3020_v14  ;;  %v3148_v7 = vmul.f32 1.442695, %v3021_v32 }
 0x909   :  { %7914 = vpow2.f32 %v3144_v11  ;;  %3208 = vmatprep.subr.bf16.mxu0 %v3177_v9  ;;  %3251 = vmatprep.subr.bf16.mxu1 %v3177_v9  ;;  %v10312_v54 = vpop.permute.xlu1 %825 }
 0x90a   :  { %13564 = vst [vmem:[#allocation64_spill] sm:$0xff] %v10312_v54  ;;  %v7905_v28 = vpop.eup %7904  ;;  %7916 = vpow2.f32 %v3146_v51  ;;  %3209 = vmatpush1.bf16.xpose.msra.mxu0 %v3176_v46  ;;  %3252 = vmatpush1.bf16.xpose.msra.mxu1 %v3176_v46  ;;  %v1074_v27 = vadd.f32 %v13566_v23, %v10312_v54  ;;  %v1076_v62 = vadd.f32 %v13567_v17, %v10312_v54 }
 0x90b   :  { %v7907_v48 = vpop.eup %7906  ;;  %7918 = vpow2.f32 %v3148_v7  ;;  %v10314_v40 = vpop.permute.xlu0 %820 }
 0x90c   :  { %13565 = vst [vmem:[#allocation72_spill] sm:$0xff] %v10314_v40  ;;  %v7909_v56 = vpop.eup %7908  ;;  %v1070_v50 = vadd.f32 %v13568_v36, %v10314_v40  ;;  %v1072_v25 = vadd.f32 %v13569_v1, %v10314_v40  ;;  %v728_v1 = vld [vmem:[%s12952_s4 + $0xa0] sm:$0xff] }
 0x90d   :  { %v7911_v30 = vpop.eup %7910  ;;  %v3178_v18 = vpack.c.bf16 %v7909_v56, %v7905_v28  ;;  %v3285_v60 = vpop.permute.xlu1 %3284 }
 0x90e   :  { %v3179_v22 = vpack.c.bf16 %v7911_v30, %v7907_v48  ;;  %v1205_v63 = vpack.c.bf16 %v1076_v62, %v1072_v25  ;;  %v1204_v38 = vpack.c.bf16 %v1074_v27, %v1070_v50  ;;  %v729_v27 = vld [vmem:[%s12952_s4 + $0xa8] sm:$0xff] }
 0x90f   :  { %v3287_v41 = vpop.permute.xlu0 %3286 }
 0x910   :  { %3210 = vmatprep.subr.bf16.mxu0 %v3179_v22  ;;  %3253 = vmatprep.subr.bf16.mxu1 %v3179_v22 }
 0x911   :  { %v3289_v20 = vpop.permute.xlu1 %3288 }
 0x912   :  { %v7913_v39 = vpop.eup %7912  ;;  %3211 = vmatpush1.bf16.xpose.msra.mxu0 %v3178_v18  ;;  %3254 = vmatpush1.bf16.xpose.msra.mxu1 %v3178_v18 }
 0x913   :  { %v7915_v58 = vpop.eup %7914  ;;  %v3291_v29 = vpop.permute.xlu0 %3290 }
 0x914   :  { %v7917_v19 = vpop.eup %7916 }
 0x915   :  { %v7919_v31 = vpop.eup %7918  ;;  %v3180_v24 = vpack.c.bf16 %v7917_v19, %v7913_v39  ;;  %v3293_v0 = vpop.permute.xlu1 %3292  ;;  %v10562_v39 = vld [vmem:[%s12949_s0 + $0xe0] sm:$0xff] }
 0x916   :  { %v3181_v34 = vpack.c.bf16 %v7919_v31, %v7915_v58  ;;  %13583 = vst [vmem:[#allocation78_spill] sm:$0xff] %v10562_v39 }
 0x917   :  { %v3295_v45 = vpop.permute.xlu0 %3294 }
 0x918   :  { %3212 = vmatprep.subr.bf16.mxu0 %v3181_v34  ;;  %3255 = vmatprep.subr.bf16.mxu1 %v3181_v34 }
 0x919   :  { %v3297_v61 = vpop.permute.xlu1 %3296 }
 0x91a   :  { %3213 = vmatpush1.bf16.xpose.msra.mxu0 %v3180_v24  ;;  %3256 = vmatpush1.bf16.xpose.msra.mxu1 %v3180_v24 }
 0x91b   :  { %3364 = vmatprep.subr.bf16.mxu1 %v1205_v63  ;;  %v3299_v16 = vpop.permute.xlu0 %3298 }
 0x91d   :  { %v3301_v2 = vpop.permute.xlu1 %3300 }
 0x91f   :  { %v3303_v49 = vpop.permute.xlu0 %3302 }
 0x921   :  { %3258 = vmatmul.mubr.bf16.vlgmr.msra.gmra.mrb[200].mxu1 %v13570_v3  ;;  %v3305_v55 = vpop.permute.xlu1 %3304 }
 0x922   :  { %3365 = vmatpush1.bf16.msra.mxu1 %v1204_v38  ;;  %3396 = vmatprep.mubr.bf16.mxu1 %v13571_v35 }
 0x923   :  { %v3307_v10 = vpop.permute.xlu0 %3306 }
 0x925   :  { %v3309_v26 = vpop.permute.xlu1 %3308 }
 0x927   :  { %v3311_v12 = vpop.permute.xlu0 %3310 }
 0x929   :  { %7368 = vmatmul.mubr.msk.bf16.vlgmr.msra.gmra.mrb[204].mxu1 %vm1214_vm1, %v3285_v60  ;;  %v3313_v44 = vpop.permute.xlu1 %3312 }
 0x92a   :  { %3406 = vmatprep.mubr.bf16.mxu1 %v13571_v35 }
 0x92b   :  { %v3315_v15 = vpop.permute.xlu0 %3314 }
 0x931   :  { %7369 = vmatmul.mubr.msk.bf16.gmra.mrb[208].mxu1 %vm1214_vm1, %v3287_v41 }
 0x932   :  { %3416 = vmatprep.mubr.bf16.mxu1 %v13571_v35 }
 0x939   :  { %7370 = vmatmul.mubr.msk.bf16.gmra.mrb[212].mxu1 %vm1214_vm1, %v3289_v20 }
 0x93a   :  { %3426 = vmatprep.mubr.bf16.mxu1 %v13571_v35 }
 0x941   :  { %7371 = vmatmul.mubr.msk.bf16.gmra.mrb[216].mxu1 %vm1214_vm1, %v3291_v29 }
 0x942   :  { %3436 = vmatprep.mubr.bf16.mxu1 %v13571_v35 }
 0x949   :  { %7372 = vmatmul.mubr.msk.bf16.gmra.mrb[220].mxu1 %vm1214_vm1, %v3293_v0 }
 0x94a   :  { %3446 = vmatprep.mubr.bf16.mxu1 %v13571_v35 }
 0x951   :  { %7373 = vmatmul.mubr.msk.bf16.gmra.mrb[224].mxu1 %vm1214_vm1, %v3295_v45 }
 0x952   :  { %3456 = vmatprep.mubr.bf16.mxu1 %v13571_v35 }
 0x959   :  { %7374 = vmatmul.mubr.msk.bf16.gmra.mrb[228].mxu1 %vm1214_vm1, %v3297_v61 }
 0x95a   :  { %3466 = vmatprep.mubr.bf16.mxu1 %v13571_v35 }
 0x961   :  { %7375 = vmatmul.mubr.msk.bf16.gmra.mrb[232].mxu1 %vm1214_vm1, %v3299_v16 }
 0x962   :  { %3476 = vmatprep.mubr.bf16.mxu1 %v13571_v35 }
 0x969   :  { %7376 = vmatmul.mubr.msk.bf16.gmra.mrb[236].mxu1 %vm1214_vm1, %v3301_v2  ;;  %v10478_v2 = vld [vmem:[%s12949_s0 + $0xa0] sm:$0xff] }
 0x96a   :  { %3486 = vmatprep.mubr.bf16.mxu1 %v13571_v35 }
 0x971   :  { %7377 = vmatmul.mubr.msk.bf16.gmra.mrb[240].mxu1 %vm1214_vm1, %v3303_v49  ;;  %v10483_v49 = vld [vmem:[%s12949_s0 + $0xa8] sm:$0xff] }
 0x972   :  { %3496 = vmatprep.mubr.bf16.mxu1 %v13571_v35 }
 0x979   :  { %7378 = vmatmul.mubr.msk.bf16.gmra.mrb[244].mxu1 %vm1214_vm1, %v3305_v55 }
 0x97a   :  { %3506 = vmatprep.mubr.bf16.mxu1 %v13571_v35 }
 0x981   :  { %7379 = vmatmul.mubr.msk.bf16.gmra.mrb[248].mxu1 %vm1214_vm1, %v3307_v10  ;;  %v10490_v10 = vld [vmem:[%s12949_s0 + $0xb0] sm:$0xff] }
 0x982   :  { %3516 = vmatprep.mubr.bf16.mxu1 %v13571_v35 }
 0x989   :  { %7380 = vmatmul.mubr.msk.bf16.gmra.mrb[252].mxu1 %vm1214_vm1, %v3309_v26  ;;  %v10495_v26 = vld [vmem:[%s12949_s0 + $0xb8] sm:$0xff] }
 0x98a   :  { %3526 = vmatprep.mubr.bf16.mxu1 %v13571_v35 }
 0x990   :  { %v89_v40 = vpop.xlane.xlu1 %88 }
 0x991   :  { %7381 = vmatmul.mubr.msk.bf16.gmra.mrb[0].mxu1 %vm1214_vm1, %v3311_v12 }
 0x992   :  { %3536 = vmatprep.mubr.bf16.mxu1 %v13571_v35 }
 0x999   :  { %7382 = vmatmul.mubr.msk.bf16.gmra.mrb[4].mxu1 %vm1214_vm1, %v3313_v44  ;;  %v90_v44 = vadd.f32 %v10483_v49, %v10478_v2 }
 0x99a   :  { %3546 = vmatprep.mubr.bf16.mxu1 %v13571_v35 }
 0x9a1   :  { %7383 = vmatmul.mubr.msk.bf16.gmra.mrb[8].mxu1 %vm1214_vm1, %v3315_v15 }
 0x9f4   :  { %v10381_v6 = vpop.f32.mrb[200].mxu1 }
 0x9f5   :  { %13572 = vst [vmem:[#allocation55_spill] sm:$0xff] %v10381_v6  ;;  %v10383_v21 = vpop.f32.mrb[201].mxu1 }
 0x9f6   :  { %13573 = vst [vmem:[#allocation56_spill] sm:$0xff] %v10383_v21  ;;  %v3263_v8 = vpop.f32.mrb[202].mxu1 }
 0x9f7   :  { %v3264_v5 = vpop.f32.mrb[203].mxu1 }
 0x9fc   :  { %v10385_v33 = vpop.f32.mrb[204].mxu1 }
 0x9fd   :  { %v10387_v46 = vpop.f32.mrb[205].mxu1 }
 0x9fe   :  { %v3557_v47 = vmax.f32 %v10385_v33, %v10387_v46  ;;  %v10391_v13 = vpop.f32.mrb[206].mxu1 }
 0x9ff   :  { %v10393_v11 = vpop.f32.mrb[207].mxu1 }
 0xa00   :  { %v3560_v53 = vmax.f32 %v10391_v13, %v10393_v11  ;;  %3558 = vmax.xlane.f32.xlu1 %v3557_v47  ;;  %v93_v47 = vadd.f32 %v10495_v26, %v10490_v10 }
 0xa02   :  { %3561 = vmax.xlane.f32.xlu0 %v3560_v53 }
 0xa04   :  { %v10397_v14 = vpop.f32.mrb[208].mxu1 }
 0xa05   :  { %v10399_v52 = vpop.f32.mrb[209].mxu1 }
 0xa06   :  { %v3563_v32 = vmax.f32 %v10397_v14, %v10399_v52  ;;  %v10403_v9 = vpop.f32.mrb[210].mxu1 }
 0xa07   :  { %v10405_v51 = vpop.f32.mrb[211].mxu1 }
 0xa08   :  { %v3566_v7 = vmax.f32 %v10403_v9, %v10405_v51 }
 0xa0c   :  { %v10409_v28 = vpop.f32.mrb[212].mxu1 }
 0xa0d   :  { %v10411_v48 = vpop.f32.mrb[213].mxu1 }
 0xa0e   :  { %v3569_v56 = vmax.f32 %v10409_v28, %v10411_v48  ;;  %v10415_v23 = vpop.f32.mrb[214].mxu1 }
 0xa0f   :  { %v10420_v17 = vpop.f32.mrb[215].mxu1 }
 0xa10   :  { %v3572_v62 = vmax.f32 %v10415_v23, %v10420_v17 }
 0xa11   :  { %855 = vperm.xlu1 %7495, %v729_v27   ;;  %v10519_v27 = vld [vmem:[%s12949_s0 + $0xd8] sm:$0xff] }
 0xa12   :  { %13575 = vst [vmem:[#allocation57_spill] sm:$0xff] %v10519_v27 }
 0xa14   :  { %v10424_v36 = vpop.f32.mrb[216].mxu1 }
 0xa15   :  { %v10426_v50 = vpop.f32.mrb[217].mxu1 }
 0xa16   :  { %v10433_v30 = vpop.f32.mrb[218].mxu1  ;;  %v13587_v35 = vmax.f32 %v10424_v36, %v10426_v50 }
 0xa17   :  { %v10435_v18 = vpop.f32.mrb[219].mxu1 }
 0xa18   :  { %v3578_v22 = vmax.f32 %v10433_v30, %v10435_v18  ;;  %850 = vperm.xlu0 %7494, %v728_v1   ;;  %v10526_v1 = vld [vmem:[%s12949_s0 + $0xc0] sm:$0xff] }
 0xa19   :  { %13576 = vst [vmem:[#allocation58_spill] sm:$0xff] %v10526_v1 }
 0xa1c   :  { %v10439_v63 = vpop.f32.mrb[220].mxu1 }
 0xa1d   :  { %v10441_v38 = vpop.f32.mrb[221].mxu1 }
 0xa1e   :  { %v10445_v58 = vpop.f32.mrb[222].mxu1 }
 0xa1f   :  { %v10447_v19 = vpop.f32.mrb[223].mxu1 }
 0xa24   :  { %v10451_v24 = vpop.f32.mrb[224].mxu1 }
 0xa25   :  { %v10453_v34 = vpop.f32.mrb[225].mxu1 }
 0xa26   :  { %v10457_v57 = vpop.f32.mrb[226].mxu1 }
 0xa27   :  { %v10459_v60 = vpop.f32.mrb[227].mxu1 }
 0xa2c   :  { %v10463_v20 = vpop.f32.mrb[228].mxu1 }
 0xa2d   :  { %v10465_v29 = vpop.f32.mrb[229].mxu1 }
 0xa2e   :  { %v10469_v45 = vpop.f32.mrb[230].mxu1 }
 0xa2f   :  { %v10471_v61 = vpop.f32.mrb[231].mxu1 }
 0xa34   :  { %v10485_v55 = vpop.f32.mrb[232].mxu1 }
 0xa35   :  { %3567 = vmax.xlane.f32.xlu1 %v3566_v7  ;;  %v10497_v12 = vpop.f32.mrb[233].mxu1  ;;  %v10514_v7 = vld [vmem:[%s12949_s0 + $0xd0] sm:$0xff] }
 0xa36   :  { %13574 = vst [vmem:[#allocation59_spill] sm:$0xff] %v10497_v12  ;;  %v10503_v8 = vpop.f32.mrb[234].mxu1  ;;  %v99_v53 = vadd.f32 %v10519_v27, %v10514_v7 }
 0xa37   :  { %3564 = vmax.xlane.f32.xlu0 %v3563_v32  ;;  %v10505_v5 = vpop.f32.mrb[235].mxu1 }
 0xa39   :  { %91 = vadd.xlane.f32.xlu1 %v90_v44  ;;  %v10531_v44 = vld [vmem:[%s12949_s0 + $0xc8] sm:$0xff] }
 0xa3a   :  { %13577 = vst [vmem:[#allocation60_spill] sm:$0xff] %v10531_v44  ;;  %v96_v37 = vadd.f32 %v10531_v44, %v10526_v1 }
 0xa3b   :  { %94 = vadd.xlane.f32.xlu0 %v93_v47  ;;  %v10555_v47 = vld [vmem:[%s12949_s0 + $0xf8] sm:$0xff] }
 0xa3c   :  { %v10521_v32 = vpop.f32.mrb[236].mxu1  ;;  %13581 = vst [vmem:[#allocation76_spill] sm:$0xff] %v10555_v47 }
 0xa3d   :  { %3573 = vmax.xlane.f32.xlu1 %v3572_v62  ;;  %v10533_v15 = vpop.f32.mrb[237].mxu1  ;;  %v10550_v62 = vld [vmem:[%s12949_s0 + $0xf0] sm:$0xff] }
 0xa3e   :  { %v10539_v0 = vpop.f32.mrb[238].mxu1  ;;  %13580 = vst [vmem:[#allocation75_spill] sm:$0xff] %v10550_v62  ;;  %v105_v25 = vadd.f32 %v10555_v47, %v10550_v62  ;;  %v162_v47 = vrot.slane %v89_v40, 4  ;;  %v13590_v62 = vmax.f32 %v10445_v58, %v10447_v19 }
 0xa3f   :  { %13578 = vst [vmem:[#allocation73_spill] sm:$0xff] %v10539_v0  ;;  %3570 = vmax.xlane.f32.xlu0 %v3569_v56  ;;  %v10541_v16 = vpop.f32.mrb[239].mxu1 }
 0xa40   :  { %13579 = vst [vmem:[#allocation74_spill] sm:$0xff] %v10541_v16  ;;  %v3608_v41 = vmax.f32 %v10539_v0, %v10541_v16  ;;  %v86_v16 = vpop.xlane.xlu0 %85  ;;  %v163_v0 = vadd.f32 %v162_v47, %v89_v40  ;;  %v13596_v47 = vmax.f32 %v10451_v24, %v10453_v34 }
 0xa41   :  { %100 = vadd.xlane.f32.xlu1 %v99_v53  ;;  %v10567_v53 = vld [vmem:[%s12949_s0 + $0xe8] sm:$0xff] }
 0xa42   :  { %13584 = vst [vmem:[#allocation79_spill] sm:$0xff] %v10567_v53  ;;  %v164_v40 = vrot.slane %v163_v0, 2 }
 0xa43   :  { %97 = vadd.xlane.f32.xlu0 %v96_v37 }
 0xa44   :  { %v10557_v56 = vpop.f32.mrb[240].mxu1 }
 0xa45   :  { %13582 = vst [vmem:[#allocation77_spill] sm:$0xff] %v10557_v56  ;;  %3579 = vmax.xlane.f32.xlu1 %v3578_v22  ;;  %v10569_v31 = vpop.f32.mrb[241].mxu1  ;;  %v102_v22 = vadd.f32 %v10567_v53, %v10562_v39 }
 0xa46   :  { %13585 = vst [vmem:[#allocation80_spill] sm:$0xff] %v10569_v31  ;;  %v3611_v37 = vmax.f32 %v10557_v56, %v10569_v31  ;;  %v10575_v54 = vpop.f32.mrb[242].mxu1  ;;  %v156_v31 = vrot.slane %v86_v16, 4 }
 0xa47   :  { %13586 = vst [vmem:[#allocation81_spill] sm:$0xff] %v10575_v54  ;;  %3576 = vmax.xlane.f32.xlu0 %v13587_v35  ;;  %v10580_v21 = vpop.f32.mrb[243].mxu1 }
 0xa48   :  { %13588 = vst [vmem:[#allocation82_spill] sm:$0xff] %v10580_v21  ;;  %v3614_v6 = vmax.f32 %v10575_v54, %v10580_v21  ;;  %v157_v21 = vadd.f32 %v156_v31, %v86_v16  ;;  %v165_v16 = vadd.f32 %v164_v40, %v163_v0  ;;  %v13604_v40 = vmax.f32 %v10485_v55, %v10497_v12 }
 0xa49   :  { %106 = vadd.xlane.f32.xlu1 %v105_v25  ;;  %v13593_v25 = vmax.f32 %v10439_v63, %v10441_v38 }
 0xa4a   :  { %v166_v0 = vrot.slane %v165_v16, 1 }
 0xa4b   :  { %103 = vadd.xlane.f32.xlu0 %v102_v22 }
 0xa4c   :  { %v10586_v56 = vpop.f32.mrb[244].mxu1  ;;  %v167_v27 = vadd.f32 %v166_v0, %v165_v16 }
 0xa4d   :  { %13589 = vst [vmem:[#allocation83_spill] sm:$0xff] %v10586_v56  ;;  %3585 = vmax.xlane.f32.xlu1 %v13590_v62  ;;  %v10591_v35 = vpop.f32.mrb[245].mxu1  ;;  %v13595_v62 = vmax.f32 %v10457_v57, %v10459_v60 }
 0xa4e   :  { %13591 = vst [vmem:[#allocation37_spill] sm:$0xff] %v10591_v35  ;;  %v3617_v53 = vmax.f32 %v10586_v56, %v10591_v35  ;;  %v10595_v39 = vpop.f32.mrb[246].mxu1  ;;  %v158_v35 = vrot.slane %v157_v21, 2  ;;  %v213_v12 = vmul.f32 0.00048828125, %v167_v27 }
 0xa4f   :  { %13592 = vst [vmem:[#allocation35_spill] sm:$0xff] %v10595_v39  ;;  %3582 = vmax.xlane.f32.xlu0 %v13593_v25  ;;  %v10600_v22 = vpop.f32.mrb[247].mxu1  ;;  %v13598_v25 = vmax.f32 %v10469_v45, %v10471_v61 }
 0xa50   :  { %13594 = vst [vmem:[#allocation36_spill] sm:$0xff] %v10600_v22  ;;  %v3620_v54 = vmax.f32 %v10595_v39, %v10600_v22  ;;  %v159_v44 = vadd.f32 %v158_v35, %v157_v21 }
 0xa51   :  { %3591 = vmax.xlane.f32.xlu1 %v13595_v62  ;;  %v13601_v62 = vmax.f32 %v10463_v20, %v10465_v29 }
 0xa53   :  { %3588 = vmax.xlane.f32.xlu0 %v13596_v47 }
 0xa54   :  { %v10610_v56 = vpop.f32.mrb[248].mxu1 }
 0xa55   :  { %13597 = vst [vmem:[#allocation38_spill] sm:$0xff] %v10610_v56  ;;  %3597 = vmax.xlane.f32.xlu1 %v13598_v25  ;;  %v10615_v31 = vpop.f32.mrb[249].mxu1  ;;  %v13603_v25 = vmax.f32 %v10503_v8, %v10505_v5 }
 0xa56   :  { %13599 = vst [vmem:[#allocation84_spill] sm:$0xff] %v10615_v31  ;;  %v3623_v22 = vmax.f32 %v10610_v56, %v10615_v31  ;;  %v10619_v39 = vpop.f32.mrb[250].mxu1  ;;  %v160_v31 = vrot.slane %v159_v44, 1 }
 0xa57   :  { %13600 = vst [vmem:[#allocation85_spill] sm:$0xff] %v10619_v39  ;;  %3594 = vmax.xlane.f32.xlu0 %v13601_v62  ;;  %v10624_v47 = vpop.f32.mrb[251].mxu1 }
 0xa58   :  { %13602 = vst [vmem:[#allocation63_spill] sm:$0xff] %v10624_v47  ;;  %v3626_v1 = vmax.f32 %v10619_v39, %v10624_v47  ;;  %v161_v47 = vadd.f32 %v160_v31, %v159_v44  ;;  %v10654_v44 = vsub.f32 %v10328_v59, %v213_v12  ;;  %v10657_v31 = vsub.f32 %v10333_v43, %v213_v12 }
 0xa59   :  { %3603 = vmax.xlane.f32.xlu1 %v13603_v25  ;;  %v13606_v25 = vmax.f32 %v10521_v32, %v10533_v15 }
 0xa5a   :  { %13609 = vst [vmem:[#allocation68_spill] sm:$0xff] %v10654_v44  ;;  %13610 = vst [vmem:[#allocation65_spill] sm:$0xff] %v10657_v31  ;;  %v270_v43 = vmul.f32 %v10654_v44, %v10654_v44  ;;  %v271_v12 = vmul.f32 %v10657_v31, %v10657_v31 }
 0xa5b   :  { %3600 = vmax.xlane.f32.xlu0 %v13604_v40 }
 0xa5c   :  { %v10634_v56 = vpop.f32.mrb[252].mxu1 }
 0xa5d   :  { %3609 = vmax.xlane.f32.xlu1 %v3608_v41  ;;  %v10636_v62 = vpop.f32.mrb[253].mxu1  ;;  %v212_v41 = vmul.f32 0.00048828125, %v161_v47  ;;  %v311_v47 = vadd.f32 %v271_v12, %v270_v43 }
 0xa5e   :  { %13605 = vst [vmem:[#allocation61_spill] sm:$0xff] %v10636_v62  ;;  %v3629_v21 = vmax.f32 %v10634_v56, %v10636_v62  ;;  %v10640_v35 = vpop.f32.mrb[254].mxu1 }
 0xa5f   :  { %3606 = vmax.xlane.f32.xlu0 %v13606_v25  ;;  %v10645_v39 = vpop.f32.mrb[255].mxu1  ;;  %v10666_v27 = vsub.f32 %v10338_v42, %v212_v41 }
 0xa60   :  { %v3632_v40 = vmax.f32 %v10640_v35, %v10645_v39 }
 0xa61   :  { %3615 = vmax.xlane.f32.xlu1 %v3614_v6  ;;  %13613 = vst [vmem:[#allocation87_spill] sm:$0xff] %v10666_v27 }
 0xa63   :  { %3612 = vmax.xlane.f32.xlu0 %v3611_v37 }
 0xa64   :  { %v10649_v16 = vpop.f32.mrb[0].mxu1 }
 0xa65   :  { %13607 = vst [vmem:[#allocation62_spill] sm:$0xff] %v10649_v16  ;;  %3621 = vmax.xlane.f32.xlu1 %v3620_v54  ;;  %v10651_v0 = vpop.f32.mrb[1].mxu1  ;;  %v10669_v54 = vsub.f32 %v10346_v4, %v212_v41 }
 0xa66   :  { %13608 = vst [vmem:[#allocation67_spill] sm:$0xff] %v10651_v0  ;;  %v3635_v25 = vmax.f32 %v10649_v16, %v10651_v0  ;;  %v10661_v62 = vpop.f32.mrb[2].mxu1 }
 0xa67   :  { %13611 = vst [vmem:[#allocation66_spill] sm:$0xff] %v10661_v62  ;;  %3618 = vmax.xlane.f32.xlu0 %v3617_v53  ;;  %v10663_v6 = vpop.f32.mrb[3].mxu1  ;;  %13614 = vst [vmem:[#allocation88_spill] sm:$0xff] %v10669_v54  ;;  %v268_v53 = vmul.f32 %v10666_v27, %v10666_v27  ;;  %v269_v42 = vmul.f32 %v10669_v54, %v10669_v54 }
 0xa68   :  { %13612 = vst [vmem:[#allocation86_spill] sm:$0xff] %v10663_v6  ;;  %v3638_v59 = vmax.f32 %v10661_v62, %v10663_v6 }
 0xa69   :  { %3627 = vmax.xlane.f32.xlu1 %v3626_v1 }
 0xa6b   :  { %3624 = vmax.xlane.f32.xlu0 %v3623_v22  ;;  %v308_v22 = vadd.f32 %v269_v42, %v268_v53 }
 0xa6c   :  { %v10681_v37 = vpop.f32.mrb[4].mxu1 }
 0xa6d   :  { %3633 = vmax.xlane.f32.xlu1 %v3632_v40  ;;  %v10683_v4 = vpop.f32.mrb[5].mxu1 }
 0xa6e   :  { %v10687_v41 = vpop.f32.mrb[6].mxu1 }
 0xa6f   :  { %3630 = vmax.xlane.f32.xlu0 %v3629_v21  ;;  %v10689_v44 = vpop.f32.mrb[7].mxu1 }
 0xa71   :  { %312 = vadd.xlane.f32.xlu1 %v311_v47 }
 0xa73   :  { %309 = vadd.xlane.f32.xlu0 %v308_v22 }
 0xa74   :  { %v10693_v31 = vpop.f32.mrb[8].mxu1 }
 0xa75   :  { %3639 = vmax.xlane.f32.xlu1 %v3638_v59  ;;  %v10695_v40 = vpop.f32.mrb[9].mxu1 }
 0xa76   :  { %v10699_v12 = vpop.f32.mrb[10].mxu1 }
 0xa77   :  { %v10701_v1 = vpop.f32.mrb[11].mxu1  ;;  %3636 = vmax.xlane.f32.xlu0 %v3635_v25 }
 0xa8d   :  { %v3559_v53 = vpop.xlane.xlu1 %3558 }
 0xa8e   :  { %v3653_v42 = vsub.f32 %v10385_v33, %v3559_v53  ;;  %v3654_v47 = vsub.f32 %v10387_v46, %v3559_v53  ;;  %v13617_v33 = vld [vmem:[#allocation41_spill] sm:$0xff]  ;;  %v13618_v53 = vld [vmem:[#allocation39_spill] sm:$0xff] }
 0xa8f   :  { %v3562_v22 = vpop.xlane.xlu0 %3561 }
 0xa90   :  { %v3717_v59 = vmul.f32 1.442695, %v3653_v42  ;;  %v3719_v27 = vmul.f32 1.442695, %v3654_v47  ;;  %v3655_v54 = vsub.f32 %v10391_v13, %v3562_v22  ;;  %v3656_v43 = vsub.f32 %v10393_v11, %v3562_v22  ;;  %v13619_v13 = vld [vmem:[#allocation40_spill] sm:$0xff]  ;;  %v13620_v11 = vld [vmem:[#allocation42_spill] sm:$0xff] }
 0xa91   :  { %v10709_v25 = vpop.permute.xlu1 %855 }
 0xa92   :  { %7920 = vpow2.f32 %v3717_v59  ;;  %v3721_v0 = vmul.f32 1.442695, %v3655_v54  ;;  %v3723_v16 = vmul.f32 1.442695, %v3656_v43  ;;  %13615 = vst [vmem:[#allocation89_spill] sm:$0xff] %v10709_v25  ;;  %v1104_v46 = vadd.f32 %v13617_v33, %v10709_v25 }
 0xa93   :  { %7922 = vpow2.f32 %v3719_v27  ;;  %v1106_v54 = vadd.f32 %v13620_v11, %v10709_v25 }
 0xa94   :  { %7924 = vpow2.f32 %v3721_v0 }
 0xa95   :  { %7926 = vpow2.f32 %v3723_v16 }
 0xa97   :  { %v10711_v21 = vpop.permute.xlu0 %850 }
 0xa98   :  { %13616 = vst [vmem:[#allocation90_spill] sm:$0xff] %v10711_v21  ;;  %v1100_v42 = vadd.f32 %v13618_v53, %v10711_v21  ;;  %v1102_v47 = vadd.f32 %v13619_v13, %v10711_v21 }
 0xa9a   :  { %v1211_v43 = vpack.c.bf16 %v1106_v54, %v1102_v47  ;;  %v1210_v27 = vpack.c.bf16 %v1104_v46, %v1100_v42 }
 0xa9c   :  { %v7921_v0 = vpop.eup %7920  ;;  %3214 = vmatprep.mubr.bf16.mxu0 %v1211_v43 }
 0xa9d   :  { %v7923_v16 = vpop.eup %7922  ;;  %3215 = vmatmul.mubr.bf16.vlgmr.msra.gmra.mrb[56].mxu0 %v1210_v27 }
 0xa9e   :  { %v7925_v22 = vpop.eup %7924  ;;  %3952 = vmatprep.mubr.bf16.mxu0 %v13570_v3 }
 0xa9f   :  { %v7927_v59 = vpop.eup %7926  ;;  %v3845_v33 = vpack.c.bf16 %v7925_v22, %v7921_v0 }
 0xaa0   :  { %v3846_v6 = vpack.c.bf16 %v7927_v59, %v7923_v16 }
 0xaa2   :  { %3877 = vmatprep.subr.bf16.mxu1 %v3846_v6  ;;  %3920 = vmatprep.subr.bf16.mxu0 %v3846_v6 }
 0xaa3   :  { %3878 = vmatpush1.bf16.xpose.msra.mxu1 %v3845_v33  ;;  %3921 = vmatpush1.bf16.xpose.msra.mxu0 %v3845_v33 }
 0xac2   :  { %v3568_v53 = vpop.xlane.xlu1 %3567 }
 0xac3   :  { %v3659_v13 = vsub.f32 %v10403_v9, %v3568_v53  ;;  %v3660_v47 = vsub.f32 %v10405_v51, %v3568_v53 }
 0xac4   :  { %v3565_v46 = vpop.xlane.xlu0 %3564 }
 0xac5   :  { %v3729_v42 = vmul.f32 1.442695, %v3659_v13  ;;  %v3731_v11 = vmul.f32 1.442695, %v3660_v47  ;;  %v3657_v54 = vsub.f32 %v10397_v14, %v3565_v46  ;;  %v3658_v43 = vsub.f32 %v10399_v52, %v3565_v46 }
 0xac6   :  { %v92_v27 = vpop.xlane.xlu1 %91 }
 0xac7   :  { %7928 = vpow2.f32 %v3729_v42  ;;  %v3725_v0 = vmul.f32 1.442695, %v3657_v54  ;;  %v3727_v16 = vmul.f32 1.442695, %v3658_v43  ;;  %v168_v22 = vrot.slane %v92_v27, 4 }
 0xac8   :  { %7930 = vpow2.f32 %v3731_v11  ;;  %v95_v6 = vpop.xlane.xlu0 %94 }
 0xac9   :  { %7932 = vpow2.f32 %v3725_v0  ;;  %v169_v59 = vadd.f32 %v168_v22, %v92_v27  ;;  %v174_v33 = vrot.slane %v95_v6, 4 }
 0xaca   :  { %7934 = vpow2.f32 %v3727_v16  ;;  %v3574_v9 = vpop.xlane.xlu1 %3573 }
 0xacb   :  { %v170_v51 = vrot.slane %v169_v59, 2  ;;  %v175_v53 = vadd.f32 %v174_v33, %v95_v6  ;;  %v3663_v13 = vsub.f32 %v10415_v23, %v3574_v9  ;;  %v3664_v14 = vsub.f32 %v10420_v17, %v3574_v9 }
 0xacc   :  { %v3571_v47 = vpop.xlane.xlu0 %3570 }
 0xacd   :  { %v171_v52 = vadd.f32 %v170_v51, %v169_v59  ;;  %v176_v46 = vrot.slane %v175_v53, 2  ;;  %v3737_v42 = vmul.f32 1.442695, %v3663_v13  ;;  %v3739_v54 = vmul.f32 1.442695, %v3664_v14 }
 0xace   :  { %v3661_v43 = vsub.f32 %v10409_v28, %v3571_v47  ;;  %v3662_v11 = vsub.f32 %v10411_v48, %v3571_v47  ;;  %v101_v0 = vpop.xlane.xlu1 %100 }
 0xacf   :  { %v172_v27 = vrot.slane %v171_v52, 1  ;;  %v177_v22 = vadd.f32 %v176_v46, %v175_v53  ;;  %7936 = vpow2.f32 %v3737_v42  ;;  %v186_v16 = vrot.slane %v101_v0, 4 }
 0xad0   :  { %7938 = vpow2.f32 %v3739_v54  ;;  %v3733_v6 = vmul.f32 1.442695, %v3661_v43  ;;  %v3735_v33 = vmul.f32 1.442695, %v3662_v11  ;;  %v98_v23 = vpop.xlane.xlu0 %97 }
 0xad1   :  { %v7929_v25 = vpop.eup %7928  ;;  %v173_v17 = vadd.f32 %v172_v27, %v171_v52  ;;  %v178_v9 = vrot.slane %v177_v22, 1  ;;  %v187_v59 = vadd.f32 %v186_v16, %v101_v0  ;;  %v180_v51 = vrot.slane %v98_v23, 4 }
 0xad2   :  { %v7931_v13 = vpop.eup %7930  ;;  %7940 = vpow2.f32 %v3733_v6  ;;  %v3580_v14 = vpop.xlane.xlu1 %3579 }
 0xad3   :  { %v7933_v28 = vpop.eup %7932  ;;  %v214_v21 = vmul.f32 0.00048828125, %v173_v17  ;;  %v179_v48 = vadd.f32 %v178_v9, %v177_v22  ;;  %7942 = vpow2.f32 %v3735_v33  ;;  %v188_v47 = vrot.slane %v187_v59, 2 }
 0xad4   :  { %v7935_v53 = vpop.eup %7934  ;;  %v181_v46 = vadd.f32 %v180_v51, %v98_v23  ;;  %v3667_v42 = vsub.f32 %v10433_v30, %v3580_v14  ;;  %v3668_v54 = vsub.f32 %v10435_v18, %v3580_v14  ;;  %v3577_v43 = vpop.xlane.xlu0 %3576  ;;  %v3847_v11 = vpack.c.bf16 %v7929_v25, %v7933_v28 }
 0xad5   :  { %v215_v52 = vmul.f32 0.00048828125, %v179_v48  ;;  %v189_v27 = vadd.f32 %v188_v47, %v187_v59  ;;  %v3665_v0 = vsub.f32 %v10424_v36, %v3577_v43  ;;  %v3666_v16 = vsub.f32 %v10426_v50, %v3577_v43 }
 0xad6   :  { %v182_v6 = vrot.slane %v181_v46, 2  ;;  %v3745_v3 = vmul.f32 1.442695, %v3667_v42  ;;  %v3747_v17 = vmul.f32 1.442695, %v3668_v54  ;;  %v107_v22 = vpop.xlane.xlu1 %106  ;;  %v3848_v33 = vpack.c.bf16 %v7931_v13, %v7935_v53 }
 0xad7   :  { %v190_v9 = vrot.slane %v189_v27, 1  ;;  %v3741_v62 = vmul.f32 1.442695, %v3665_v0  ;;  %v3743_v23 = vmul.f32 1.442695, %v3666_v16  ;;  %v198_v51 = vrot.slane %v107_v22, 4 }
 0xad8   :  { %v183_v30 = vadd.f32 %v182_v6, %v181_v46  ;;  %7944 = vpow2.f32 %v3745_v3  ;;  %3879 = vmatprep.subr.bf16.mxu1 %v3848_v33  ;;  %3922 = vmatprep.subr.bf16.mxu0 %v3848_v33  ;;  %v104_v18 = vpop.xlane.xlu0 %103  ;;  %v10735_v25 = vsub.f32 %v10478_v2, %v214_v21  ;;  %v10738_v36 = vsub.f32 %v10483_v49, %v214_v21 }
 0xad9   :  { %v10740_v50 = vpop.eup %7936  ;;  %v191_v59 = vadd.f32 %v190_v9, %v189_v27  ;;  %7946 = vpow2.f32 %v3747_v17  ;;  %v199_v13 = vadd.f32 %v198_v51, %v107_v22  ;;  %3880 = vmatpush1.bf16.xpose.msra.mxu1 %v3847_v11  ;;  %3923 = vmatpush1.bf16.xpose.msra.mxu0 %v3847_v11  ;;  %v192_v14 = vrot.slane %v104_v18, 4 }
 0xada   :  { %v7939_v28 = vpop.eup %7938  ;;  %v184_v48 = vrot.slane %v183_v30, 1  ;;  %7948 = vpow2.f32 %v3741_v62  ;;  %v3586_v3 = vpop.xlane.xlu1 %3585  ;;  %v272_v47 = vmul.f32 %v10735_v25, %v10735_v25  ;;  %v273_v2 = vmul.f32 %v10738_v36, %v10738_v36 }
 0xadb   :  { %v10746_v49 = vmul.f32 0.00048828125, %v191_v59  ;;  %7950 = vpow2.f32 %v3743_v23  ;;  %v200_v21 = vrot.slane %v199_v13, 2  ;;  %v193_v53 = vadd.f32 %v192_v14, %v104_v18 }
 0xadc   :  { %v7941_v46 = vpop.eup %7940  ;;  %v185_v42 = vadd.f32 %v184_v48, %v183_v30  ;;  %v3671_v54 = vsub.f32 %v10445_v58, %v3586_v3  ;;  %v3672_v43 = vsub.f32 %v10447_v19, %v3586_v3  ;;  %v314_v11 = vadd.f32 %v273_v2, %v272_v47  ;;  %v3583_v62 = vpop.xlane.xlu0 %3582 }
 0xadd   :  { %v7943_v27 = vpop.eup %7942  ;;  %v201_v0 = vadd.f32 %v200_v21, %v199_v13  ;;  %v194_v16 = vrot.slane %v193_v53, 2  ;;  %v3669_v6 = vsub.f32 %v10439_v63, %v3583_v62  ;;  %v3670_v17 = vsub.f32 %v10441_v38, %v3583_v62 }
 0xade   :  { %v10752_v22 = vmul.f32 0.00048828125, %v185_v42  ;;  %v3753_v33 = vmul.f32 1.442695, %v3671_v54  ;;  %v3755_v9 = vmul.f32 1.442695, %v3672_v43  ;;  %315 = vadd.xlane.f32.xlu0 %v314_v11  ;;  %v10755_v23 = vsub.f32 %v10490_v10, %v215_v52  ;;  %v3592_v58 = vpop.xlane.xlu1 %3591 }
 0xadf   :  { %v202_v51 = vrot.slane %v201_v0, 1  ;;  %v195_v19 = vadd.f32 %v194_v16, %v193_v53  ;;  %v3749_v30 = vmul.f32 1.442695, %v3669_v6  ;;  %v3751_v18 = vmul.f32 1.442695, %v3670_v17 }
 0xae0   :  { %7952 = vpow2.f32 %v3753_v33  ;;  %v10758_v59 = vsub.f32 %v10495_v26, %v215_v52  ;;  %v274_v63 = vmul.f32 %v10755_v23, %v10755_v23  ;;  %v3675_v38 = vsub.f32 %v10457_v57, %v3592_v58  ;;  %v3589_v13 = vpop.xlane.xlu0 %3588 }
 0xae1   :  { %v203_v14 = vadd.f32 %v202_v51, %v201_v0  ;;  %v196_v48 = vrot.slane %v195_v19, 1  ;;  %7954 = vpow2.f32 %v3755_v9  ;;  %v3676_v10 = vsub.f32 %v10459_v60, %v3592_v58 }
 0xae2   :  { %v10764_v3 = vpop.eup %7944  ;;  %7956 = vpow2.f32 %v3749_v30  ;;  %v275_v47 = vmul.f32 %v10758_v59, %v10758_v59  ;;  %v3761_v2 = vmul.f32 1.442695, %v3675_v38  ;;  %v3850_v26 = vpack.c.bf16 %v7939_v28, %v7943_v27  ;;  %v3598_v21 = vpop.xlane.xlu1 %3597 }
 0xae3   :  { %v13621_v52 = vmax.f32 %v10681_v37, %v10683_v4  ;;  %v7947_v57 = vpop.eup %7946  ;;  %v10771_v53 = vmul.f32 0.00048828125, %v203_v14  ;;  %v197_v42 = vadd.f32 %v196_v48, %v195_v19  ;;  %7958 = vpow2.f32 %v3751_v18 }
 0xae4   :  { %v3763_v54 = vmul.f32 1.442695, %v3676_v10  ;;  %v7949_v60 = vpop.eup %7948  ;;  %v317_v43 = vadd.f32 %v275_v47, %v274_v63  ;;  %7960 = vpow2.f32 %v3761_v2  ;;  %3881 = vmatprep.subr.bf16.mxu1 %v3850_v26  ;;  %3924 = vmatprep.subr.bf16.mxu0 %v3850_v26  ;;  %v3849_v11 = vpack.c.bf16 %v10740_v50, %v7941_v46  ;;  %v3595_v62 = vpop.xlane.xlu0 %3594  ;;  %v13623_v63 = vld [vmem:[#allocation58_spill] sm:$0xff] }
 0xae5   :  { %3642 = vmax.xlane.f32.xlu0 %v13621_v52  ;;  %v3673_v28 = vsub.f32 %v10451_v24, %v3589_v13  ;;  %v7951_v27 = vpop.eup %7950  ;;  %v10775_v0 = vmul.f32 0.00048828125, %v197_v42  ;;  %v3674_v16 = vsub.f32 %v10453_v34, %v3589_v13  ;;  %v3679_v6 = vsub.f32 %v10469_v45, %v3598_v21  ;;  %v13622_v34 = vld [vmem:[#allocation57_spill] sm:$0xff]  ;;  %v13625_v13 = vld [vmem:[#allocation60_spill] sm:$0xff] }
 0xae6   :  { %7962 = vpow2.f32 %v3763_v54  ;;  %318 = vadd.xlane.f32.xlu1 %v317_v43  ;;  %3882 = vmatpush1.bf16.xpose.msra.mxu1 %v3849_v11  ;;  %v3680_v33 = vsub.f32 %v10471_v61, %v3598_v21  ;;  %v3677_v9 = vsub.f32 %v10463_v20, %v3595_v62  ;;  %v3678_v50 = vsub.f32 %v10465_v29, %v3595_v62  ;;  %v3604_v46 = vpop.xlane.xlu1 %3603  ;;  %v13626_v62 = vld [vmem:[#allocation59_spill] sm:$0xff] }
 0xae7   :  { %v3757_v17 = vmul.f32 1.442695, %v3673_v28  ;;  %3925 = vmatpush1.bf16.xpose.msra.mxu0 %v3849_v11  ;;  %v3759_v24 = vmul.f32 1.442695, %v3674_v16  ;;  %v3769_v58 = vmul.f32 1.442695, %v3679_v6  ;;  %v10784_v51 = vsub.f32 %v10514_v7, %v10746_v49 }
 0xae8   :  { %v10788_v45 = vsub.f32 %v13622_v34, %v10746_v49  ;;  %v3771_v19 = vmul.f32 1.442695, %v3680_v33  ;;  %v3765_v30 = vmul.f32 1.442695, %v3677_v9  ;;  %v3767_v61 = vmul.f32 1.442695, %v3678_v50  ;;  %v3601_v18 = vpop.xlane.xlu0 %3600 }
 0xae9   :  { %7964 = vpow2.f32 %v3757_v17  ;;  %v278_v20 = vmul.f32 %v10784_v51, %v10784_v51  ;;  %v10796_v7 = vsub.f32 %v13623_v63, %v10752_v22  ;;  %v13624_v49 = vmax.f32 %v10687_v41, %v10689_v44  ;;  %v13628_v33 = vld [vmem:[#allocation74_spill] sm:$0xff] }
 0xaea   :  { %7966 = vpow2.f32 %v3759_v24  ;;  %v279_v29 = vmul.f32 %v10788_v45, %v10788_v45  ;;  %v10798_v38 = vpop.eup %7952  ;;  %v10805_v14 = vsub.f32 %v13625_v13, %v10752_v22  ;;  %v3683_v48 = vsub.f32 %v10503_v8, %v3604_v46  ;;  %v3610_v47 = vpop.xlane.xlu1 %3609  ;;  %v13631_v63 = vld [vmem:[#allocation78_spill] sm:$0xff] }
 0xaeb   :  { %3645 = vmax.xlane.f32.xlu1 %v13624_v49  ;;  %7968 = vpow2.f32 %v3769_v58  ;;  %v3684_v10 = vsub.f32 %v10505_v5, %v3604_v46  ;;  %v7955_v2 = vpop.eup %7954  ;;  %v276_v52 = vmul.f32 %v10796_v7, %v10796_v7  ;;  %v3852_v21 = vpack.c.bf16 %v7947_v57, %v7951_v27  ;;  %v13627_v27 = vld [vmem:[#allocation73_spill] sm:$0xff] }
 0xaec   :  { %7970 = vpow2.f32 %v3771_v19  ;;  %v323_v26 = vadd.f32 %v279_v29, %v278_v20  ;;  %v7957_v42 = vpop.eup %7956  ;;  %v277_v54 = vmul.f32 %v10805_v14, %v10805_v14  ;;  %v3777_v43 = vmul.f32 1.442695, %v3683_v48  ;;  %v3607_v11 = vpop.xlane.xlu0 %3606  ;;  %v13629_v19 = vld [vmem:[#allocation75_spill] sm:$0xff]  ;;  %v13630_v20 = vld [vmem:[#allocation76_spill] sm:$0xff] }
 0xaed   :  { %7972 = vpow2.f32 %v3765_v30  ;;  %v3779_v22 = vmul.f32 1.442695, %v3684_v10  ;;  %v7959_v28 = vpop.eup %7958  ;;  %3883 = vmatprep.subr.bf16.mxu1 %v3852_v21  ;;  %3926 = vmatprep.subr.bf16.mxu0 %v3852_v21  ;;  %v3851_v8 = vpack.c.bf16 %v10764_v3, %v7949_v60  ;;  %v3681_v5 = vsub.f32 %v10485_v55, %v3601_v18  ;;  %v13633_v10 = vld [vmem:[#allocation79_spill] sm:$0xff] }
 0xaee   :  { %7974 = vpow2.f32 %v3767_v61  ;;  %v3682_v16 = vsub.f32 %v13626_v62, %v3601_v18  ;;  %v10816_v6 = vpop.eup %7960  ;;  %v320_v57 = vadd.f32 %v277_v54, %v276_v52  ;;  %v3687_v17 = vsub.f32 %v13627_v27, %v3610_v47  ;;  %v3616_v50 = vpop.xlane.xlu1 %3615  ;;  %v13634_v54 = vld [vmem:[#allocation81_spill] sm:$0xff] }
 0xaef   :  { %324 = vadd.xlane.f32.xlu1 %v323_v26  ;;  %7976 = vpow2.f32 %v3777_v43  ;;  %v3688_v9 = vsub.f32 %v13628_v33, %v3610_v47  ;;  %3884 = vmatpush1.bf16.xpose.msra.mxu1 %v3851_v8  ;;  %v3773_v24 = vmul.f32 1.442695, %v3681_v5  ;;  %v3685_v55 = vsub.f32 %v10521_v32, %v3607_v11 }
 0xaf0   :  { %v7963_v46 = vpop.eup %7962  ;;  %7978 = vpow2.f32 %v3779_v22  ;;  %3927 = vmatpush1.bf16.xpose.msra.mxu0 %v3851_v8  ;;  %v3775_v3 = vmul.f32 1.442695, %v3682_v16  ;;  %321 = vadd.xlane.f32.xlu0 %v320_v57  ;;  %v3785_v60 = vmul.f32 1.442695, %v3687_v17  ;;  %v3686_v34 = vsub.f32 %v10533_v15, %v3607_v11  ;;  %v3613_v61 = vpop.xlane.xlu0 %3612  ;;  %v13636_v8 = vld [vmem:[#allocation82_spill] sm:$0xff] }
 0xaf1   :  { %v3787_v58 = vmul.f32 1.442695, %v3688_v9  ;;  %v10824_v30 = vsub.f32 %v13629_v19, %v10771_v53  ;;  %7980 = vpow2.f32 %v3773_v24  ;;  %v3781_v18 = vmul.f32 1.442695, %v3685_v55  ;;  %v13637_v55 = vld [vmem:[#allocation77_spill] sm:$0xff] }
 0xaf2   :  { %v10828_v29 = vsub.f32 %v13630_v20, %v10771_v53  ;;  %v10832_v49 = vsub.f32 %v13631_v63, %v10775_v0  ;;  %7982 = vpow2.f32 %v3775_v3  ;;  %v13632_v15 = vmax.f32 %v10699_v12, %v10701_v1  ;;  %v3622_v53 = vpop.xlane.xlu1 %3621 }
 0xaf3   :  { %v7965_v32 = vpop.eup %7964  ;;  %v3783_v13 = vmul.f32 1.442695, %v3686_v34  ;;  %v282_v48 = vmul.f32 %v10824_v30, %v10824_v30  ;;  %v10841_v47 = vsub.f32 %v13633_v10, %v10775_v0  ;;  %7984 = vpow2.f32 %v3785_v60 }
 0xaf4   :  { %3651 = vmax.xlane.f32.xlu1 %v13632_v15  ;;  %v7967_v26 = vpop.eup %7966  ;;  %v283_v52 = vmul.f32 %v10828_v29, %v10828_v29  ;;  %v280_v21 = vmul.f32 %v10832_v49, %v10832_v49  ;;  %v3691_v43 = vsub.f32 %v13634_v54, %v3616_v50  ;;  %v13635_v11 = vmax.f32 %v10693_v31, %v10695_v40  ;;  %v3619_v16 = vpop.xlane.xlu0 %3618  ;;  %v13641_v15 = vld [vmem:[#allocation83_spill] sm:$0xff] }
 0xaf5   :  { %v10848_v22 = vpop.eup %7968  ;;  %7986 = vpow2.f32 %v3787_v58  ;;  %v281_v0 = vmul.f32 %v10841_v47, %v10841_v47  ;;  %v3692_v5 = vsub.f32 %v13636_v8, %v3616_v50  ;;  %v3854_v62 = vpack.c.bf16 %v7955_v2, %v7959_v28  ;;  %v13638_v2 = vld [vmem:[#allocation80_spill] sm:$0xff]  ;;  %v13639_v50 = vld [vmem:[#allocation35_spill] sm:$0xff] }
 0xaf6   :  { %3648 = vmax.xlane.f32.xlu0 %v13635_v11  ;;  %v7971_v57 = vpop.eup %7970  ;;  %7988 = vpow2.f32 %v3781_v18  ;;  %v329_v27 = vadd.f32 %v283_v52, %v282_v48  ;;  %v3793_v17 = vmul.f32 1.442695, %v3691_v43  ;;  %v3853_v33 = vpack.c.bf16 %v10798_v38, %v7957_v42  ;;  %v3628_v58 = vpop.xlane.xlu1 %3627  ;;  %v13640_v18 = vld [vmem:[#allocation36_spill] sm:$0xff]  ;;  %v13642_v43 = vld [vmem:[#allocation37_spill] sm:$0xff]  ;;  %v13644_v8 = vld [vmem:[#allocation63_spill] sm:$0xff] }
 0xaf7   :  { %v10857_v9 = vpop.eup %7972  ;;  %7990 = vpow2.f32 %v3783_v13  ;;  %v326_v24 = vadd.f32 %v281_v0, %v280_v21  ;;  %v3795_v3 = vmul.f32 1.442695, %v3692_v5  ;;  %3885 = vmatprep.subr.bf16.mxu1 %v3854_v62  ;;  %3928 = vmatprep.subr.bf16.mxu0 %v3854_v62  ;;  %v3689_v60 = vsub.f32 %v13637_v55, %v3613_v61 }
 0xaf8   :  { %v7975_v34 = vpop.eup %7974  ;;  %330 = vadd.xlane.f32.xlu1 %v329_v27  ;;  %7992 = vpow2.f32 %v3793_v17  ;;  %3886 = vmatpush1.bf16.xpose.msra.mxu1 %v3853_v33  ;;  %v3690_v28 = vsub.f32 %v13638_v2, %v3613_v61  ;;  %v3695_v19 = vsub.f32 %v13639_v50, %v3622_v53  ;;  %v3696_v38 = vsub.f32 %v13640_v18, %v3622_v53  ;;  %v3625_v48 = vpop.xlane.xlu0 %3624  ;;  %v13643_v53 = vld [vmem:[#allocation85_spill] sm:$0xff] }
 0xaf9   :  { %v7977_v42 = vpop.eup %7976  ;;  %7994 = vpow2.f32 %v3795_v3  ;;  %3929 = vmatpush1.bf16.xpose.msra.mxu0 %v3853_v33  ;;  %v3789_v20 = vmul.f32 1.442695, %v3689_v60  ;;  %v3856_v63 = vpack.c.bf16 %v7963_v46, %v7967_v26  ;;  %v3693_v13 = vsub.f32 %v13641_v15, %v3619_v16 }
 0xafa   :  { %327 = vadd.xlane.f32.xlu0 %v326_v24  ;;  %v7979_v10 = vpop.eup %7978  ;;  %v3791_v52 = vmul.f32 1.442695, %v3690_v28  ;;  %v3801_v21 = vmul.f32 1.442695, %v3695_v19  ;;  %v3803_v54 = vmul.f32 1.442695, %v3696_v38  ;;  %v3694_v11 = vsub.f32 %v13642_v43, %v3619_v16  ;;  %v3634_v62 = vpop.xlane.xlu1 %3633 }
 0xafb   :  { %7996 = vpow2.f32 %v3789_v20  ;;  %3887 = vmatprep.subr.bf16.mxu1 %v3856_v63  ;;  %3930 = vmatprep.subr.bf16.mxu0 %v3856_v63  ;;  %v3797_v61 = vmul.f32 1.442695, %v3693_v13  ;;  %v3699_v0 = vsub.f32 %v13643_v53, %v3628_v58  ;;  %v3700_v5 = vsub.f32 %v13644_v8, %v3628_v58  ;;  %v7981_v27 = vpop.eup %7980  ;;  %v13645_v16 = vld [vmem:[#allocation38_spill] sm:$0xff]  ;;  %v13646_v28 = vld [vmem:[#allocation84_spill] sm:$0xff]  ;;  %v13647_v20 = vld [vmem:[#allocation61_spill] sm:$0xff] }
 0xafc   :  { %7998 = vpow2.f32 %v3791_v52  ;;  %v3799_v46 = vmul.f32 1.442695, %v3694_v11  ;;  %v3855_v26 = vpack.c.bf16 %v10816_v6, %v7965_v32  ;;  %v3858_v17 = vpack.c.bf16 %v7971_v57, %v7975_v34  ;;  %v7983_v33 = vpop.eup %7982  ;;  %v3631_v60 = vpop.xlane.xlu0 %3630 }
 0xafd   :  { %8000 = vpow2.f32 %v3801_v21  ;;  %v3809_v24 = vmul.f32 1.442695, %v3699_v0  ;;  %v3811_v3 = vmul.f32 1.442695, %v3700_v5  ;;  %v3697_v55 = vsub.f32 %v13645_v16, %v3625_v48  ;;  %v7985_v2 = vpop.eup %7984  ;;  %v13648_v0 = vld [vmem:[#allocation66_spill] sm:$0xff] }
 0xafe   :  { %8002 = vpow2.f32 %v3803_v54  ;;  %v3698_v50 = vsub.f32 %v13646_v28, %v3625_v48  ;;  %v3703_v58 = vsub.f32 %v10640_v35, %v3634_v62  ;;  %v3704_v19 = vsub.f32 %v10645_v39, %v3634_v62  ;;  %v10873_v32 = vpop.xlane.xlu1 %312  ;;  %v13649_v5 = vld [vmem:[#allocation86_spill] sm:$0xff] }
 0xaff   :  { %v7987_v18 = vpop.eup %7986  ;;  %8004 = vpow2.f32 %v3797_v61  ;;  %v3805_v38 = vmul.f32 1.442695, %v3697_v55  ;;  %v3701_v6 = vsub.f32 %v10634_v56, %v3631_v60  ;;  %v3702_v63 = vsub.f32 %v13647_v20, %v3631_v60 }
 0xb00   :  { %v7989_v57 = vpop.eup %7988  ;;  %8006 = vpow2.f32 %v3799_v46  ;;  %3888 = vmatpush1.bf16.xpose.msra.mxu1 %v3855_v26  ;;  %v3807_v34 = vmul.f32 1.442695, %v3698_v50  ;;  %v3817_v35 = vmul.f32 1.442695, %v3703_v58  ;;  %v10876_v13 = vpop.xlane.xlu0 %309  ;;  %v3819_v48 = vmul.f32 1.442695, %v3704_v19 }
 0xb01   :  { %v7991_v15 = vpop.eup %7990  ;;  %8008 = vpow2.f32 %v3809_v24  ;;  %3931 = vmatpush1.bf16.xpose.msra.mxu0 %v3855_v26  ;;  %3889 = vmatprep.subr.bf16.mxu1 %v3858_v17  ;;  %v3857_v56 = vpack.c.bf16 %v10848_v22, %v10857_v9  ;;  %v3860_v52 = vpack.c.bf16 %v7979_v10, %v7983_v33  ;;  %v3813_v54 = vmul.f32 1.442695, %v3701_v6  ;;  %v731_v22 = vld [vmem:[%s12952_s4 + $0xb8] sm:$0xff] }
 0xb02   :  { %v7993_v39 = vpop.eup %7992  ;;  %8010 = vpow2.f32 %v3811_v3  ;;  %3932 = vmatprep.subr.bf16.mxu0 %v3858_v17  ;;  %v3640_v43 = vpop.xlane.xlu1 %3639  ;;  %v3859_v11 = vpack.c.bf16 %v7977_v42, %v7981_v27  ;;  %v3862_v61 = vpack.c.bf16 %v7987_v18, %v7991_v15  ;;  %v3815_v53 = vmul.f32 1.442695, %v3702_v63  ;;  %v13650_v27 = vld [vmem:[#allocation62_spill] sm:$0xff]  ;;  %v13651_v3 = vld [vmem:[#allocation67_spill] sm:$0xff] }
 0xb03   :  { %v7995_v21 = vpop.eup %7994  ;;  %8012 = vpow2.f32 %v3805_v38  ;;  %v3707_v8 = vsub.f32 %v13648_v0, %v3640_v43  ;;  %v3708_v62 = vsub.f32 %v13649_v5, %v3640_v43  ;;  %v3861_v17 = vpack.c.bf16 %v7985_v2, %v7989_v57 }
 0xb04   :  { %8014 = vpow2.f32 %v3807_v34  ;;  %v3637_v26 = vpop.xlane.xlu0 %3636  ;;  %v730_v34 = vld [vmem:[%s12952_s4 + $0xb0] sm:$0xff] }
 0xb05   :  { %v7997_v46 = vpop.eup %7996  ;;  %8016 = vpow2.f32 %v3817_v35  ;;  %v3825_v9 = vmul.f32 1.442695, %v3707_v8  ;;  %v3827_v10 = vmul.f32 1.442695, %v3708_v62  ;;  %v3705_v33 = vsub.f32 %v13650_v27, %v3637_v26 }
 0xb06   :  { %v7999_v24 = vpop.eup %7998  ;;  %8018 = vpow2.f32 %v3819_v48  ;;  %v3706_v16 = vsub.f32 %v13651_v3, %v3637_v26  ;;  %v3863_v28 = vpack.c.bf16 %v7993_v39, %v7997_v46 }
 0xb07   :  { %v8001_v42 = vpop.eup %8000  ;;  %8020 = vpow2.f32 %v3813_v54  ;;  %v3864_v60 = vpack.c.bf16 %v7995_v21, %v7999_v24  ;;  %v3821_v50 = vmul.f32 1.442695, %v3705_v33  ;;  %v13652_v24 = vld [vmem:[#allocation55_spill] sm:$0xff] }
 0xb08   :  { %v8003_v55 = vpop.eup %8002  ;;  %8022 = vpow2.f32 %v3815_v53  ;;  %3890 = vmatpush1.bf16.xpose.msra.mxu1 %v3857_v56  ;;  %v3823_v58 = vmul.f32 1.442695, %v3706_v16 }
 0xb09   :  { %v8005_v2 = vpop.eup %8004  ;;  %865 = vperm.xlu1 %7495, %v731_v22   ;;  %3933 = vmatpush1.bf16.xpose.msra.mxu0 %v3857_v56  ;;  %8024 = vpow2.f32 %v3825_v9  ;;  %v13653_v9 = vld [vmem:[#allocation56_spill] sm:$0xff] }
 0xb0a   :  { %v8007_v19 = vpop.eup %8006  ;;  %3891 = vmatprep.subr.bf16.mxu1 %v3860_v52  ;;  %3934 = vmatprep.subr.bf16.mxu0 %v3860_v52  ;;  %8026 = vpow2.f32 %v3827_v10  ;;  %v3865_v18 = vpack.c.bf16 %v8001_v42, %v8005_v2 }
 0xb0b   :  { %v8009_v38 = vpop.eup %8008  ;;  %8028 = vpow2.f32 %v3821_v50  ;;  %v3866_v6 = vpack.c.bf16 %v8003_v55, %v8007_v19 }
 0xb0c   :  { %v8011_v57 = vpop.eup %8010  ;;  %8030 = vpow2.f32 %v3823_v58 }
 0xb0d   :  { %v8013_v20 = vpop.eup %8012  ;;  %8032 = vrcp.f32 %v13652_v24 }
 0xb0e   :  { %v8015_v63 = vpop.eup %8014  ;;  %v3867_v15 = vpack.c.bf16 %v8009_v38, %v8013_v20  ;;  %8034 = vrcp.f32 %v13653_v9 }
 0xb0f   :  { %v8017_v35 = vpop.eup %8016  ;;  %v3868_v39 = vpack.c.bf16 %v8011_v57, %v8015_v63 }
 0xb10   :  { %860 = vperm.xlu0 %7494, %v730_v34   ;;  %v8019_v48 = vpop.eup %8018  ;;  %3892 = vmatpush1.bf16.xpose.msra.mxu1 %v3859_v11 }
 0xb11   :  { %v8021_v56 = vpop.eup %8020  ;;  %3935 = vmatpush1.bf16.xpose.msra.mxu0 %v3859_v11  ;;  %3893 = vmatprep.subr.bf16.mxu1 %v3862_v61  ;;  %v386_v11 = vrot.slane %v10873_v32, 4 }
 0xb12   :  { %v8023_v52 = vpop.eup %8022  ;;  %3936 = vmatprep.subr.bf16.mxu0 %v3862_v61  ;;  %v3869_v21 = vpack.c.bf16 %v8017_v35, %v8021_v56  ;;  %v380_v61 = vrot.slane %v10876_v13, 4 }
 0xb13   :  { %v8025_v54 = vpop.eup %8024  ;;  %v3870_v43 = vpack.c.bf16 %v8019_v48, %v8023_v52  ;;  %v387_v46 = vadd.f32 %v386_v11, %v10873_v32  ;;  %v13654_v32 = vld [vmem:[#allocation47_spill] sm:$0xff] }
 0xb14   :  { %v8027_v53 = vpop.eup %8026  ;;  %v381_v26 = vadd.f32 %v380_v61, %v10876_v13 }
 0xb15   :  { %v8029_v0 = vpop.eup %8028 }
 0xb16   :  { %v8031_v8 = vpop.eup %8030  ;;  %v3871_v5 = vpack.c.bf16 %v8025_v54, %v8029_v0  ;;  %v382_v22 = vrot.slane %v381_v26, 2 }
 0xb17   :  { %v3872_v62 = vpack.c.bf16 %v8027_v53, %v8031_v8  ;;  %v8033_v16 = vpop.eup %8032 }
 0xb18   :  { %3894 = vmatpush1.bf16.xpose.msra.mxu1 %v3861_v17  ;;  %v383_v42 = vadd.f32 %v382_v22, %v381_v26  ;;  %v3271_v58 = vrot.slane %v8033_v16, %v13654_v32 }
 0xb19   :  { %3937 = vmatpush1.bf16.xpose.msra.mxu0 %v3861_v17  ;;  %3895 = vmatprep.subr.bf16.mxu1 %v3864_v60  ;;  %v388_v17 = vrot.slane %v387_v46, 2 }
 0xb1a   :  { %3938 = vmatprep.subr.bf16.mxu0 %v3864_v60  ;;  %v384_v33 = vrot.slane %v383_v42, 1  ;;  %v8035_v60 = vpop.eup %8034 }
 0xb1b   :  { %v389_v10 = vadd.f32 %v388_v17, %v387_v46  ;;  %v3275_v38 = vrot.slane %v8035_v60, %v13654_v32 }
 0xb1c   :  { %v385_v2 = vadd.f32 %v384_v33, %v383_v42 }
 0xb1d   :  { %v390_v27 = vrot.slane %v389_v10, 1 }
 0xb1e   :  { %v436_v20 = vmul.f32 0.00048828125, %v385_v2 }
 0xb20   :  { %3896 = vmatpush1.bf16.xpose.msra.mxu1 %v3863_v28 }
 0xb21   :  { %3939 = vmatpush1.bf16.xpose.msra.mxu0 %v3863_v28  ;;  %3897 = vmatprep.subr.bf16.mxu1 %v3866_v6  ;;  %v391_v28 = vadd.f32 %v390_v27, %v389_v10 }
 0xb22   :  { %3940 = vmatprep.subr.bf16.mxu0 %v3866_v6 }
 0xb23   :  { %v437_v6 = vmul.f32 0.00048828125, %v391_v28 }
 0xb25   :  { %v453_v0 = vadd.f32 1e-05, %v437_v6 }
 0xb27   :  { %8036 = vrsqrt.f32 %v453_v0 }
 0xb28   :  { %3898 = vmatpush1.bf16.xpose.msra.mxu1 %v3865_v18 }
 0xb29   :  { %3941 = vmatpush1.bf16.xpose.msra.mxu0 %v3865_v18  ;;  %3899 = vmatprep.subr.bf16.mxu1 %v3868_v39 }
 0xb2a   :  { %3942 = vmatprep.subr.bf16.mxu0 %v3868_v39 }
 0xb30   :  { %3900 = vmatpush1.bf16.xpose.msra.mxu1 %v3867_v15 }
 0xb31   :  { %3943 = vmatpush1.bf16.xpose.msra.mxu0 %v3867_v15  ;;  %3901 = vmatprep.subr.bf16.mxu1 %v3870_v43 }
 0xb32   :  { %3944 = vmatprep.subr.bf16.mxu0 %v3870_v43 }
 0xb38   :  { %3902 = vmatpush1.bf16.xpose.msra.mxu1 %v3869_v21 }
 0xb39   :  { %3945 = vmatpush1.bf16.xpose.msra.mxu0 %v3869_v21  ;;  %3903 = vmatprep.subr.bf16.mxu1 %v3872_v62 }
 0xb3a   :  { %3946 = vmatprep.subr.bf16.mxu0 %v3872_v62 }
 0xb40   :  { %3904 = vmatpush1.bf16.xpose.msra.mxu1 %v3871_v5 }
 0xb41   :  { %3947 = vmatpush1.bf16.xpose.msra.mxu0 %v3871_v5  ;;  %v452_v5 = vadd.f32 1e-05, %v436_v20 }
 0xb43   :  { %8038 = vrsqrt.f32 %v452_v5 }
 0xb6b   :  { %v316_v3 = vpop.xlane.xlu0 %315 }
 0xb6c   :  { %v392_v55 = vrot.slane %v316_v3, 4 }
 0xb6e   :  { %v393_v50 = vadd.f32 %v392_v55, %v316_v3 }
 0xb70   :  { %v394_v13 = vrot.slane %v393_v50, 2  ;;  %v3216_v18 = vpop.f32.mrb[56].mxu0 }
 0xb71   :  { %v10898_v57 = vmul.f32 %v3271_v58, %v3216_v18  ;;  %v3218_v34 = vpop.f32.mrb[57].mxu0 }
 0xb72   :  { %v3643_v19 = vpop.xlane.xlu0 %3642  ;;  %v395_v63 = vadd.f32 %v394_v13, %v393_v50  ;;  %v10900_v15 = vmul.f32 %v3275_v38, %v3218_v34  ;;  %v3220_v35 = vpop.f32.mrb[58].mxu0 }
 0xb73   :  { %v319_v39 = vpop.xlane.xlu1 %318  ;;  %v3709_v48 = vsub.f32 %v10681_v37, %v3643_v19  ;;  %v10903_v56 = vmul.f32 %v3271_v58, %v3220_v35  ;;  %v3222_v52 = vpop.f32.mrb[59].mxu0  ;;  %v3710_v43 = vsub.f32 %v10683_v4, %v3643_v19 }
 0xb74   :  { %v396_v21 = vrot.slane %v395_v63, 1  ;;  %v398_v54 = vrot.slane %v319_v39, 4  ;;  %v10906_v53 = vmul.f32 %v3275_v38, %v3222_v52 }
 0xb75   :  { %v3280_v8 = vpack.c.bf16 %v10903_v56, %v10898_v57  ;;  %v3829_v37 = vmul.f32 1.442695, %v3709_v48  ;;  %v3831_v17 = vmul.f32 1.442695, %v3710_v43  ;;  %v8602_v57 = vld [vmem:[%s12953_s3 + $0x10] sm:$0xff]   ;;  %v8603_v56 = vld [vmem:[%s12953_s3 + $0x18] sm:$0xff]  }
 0xb76   :  { %v399_v62 = vadd.f32 %v398_v54, %v319_v39  ;;  %v3281_v11 = vpack.c.bf16 %v10906_v53, %v10900_v15  ;;  %v397_v61 = vadd.f32 %v396_v21, %v395_v63  ;;  %v10916_v63 = vpop.eup %8036 }
 0xb77   :  { %8040 = vpow2.f32 %v3829_v37  ;;  %v8039_v52 = vpop.eup %8038 }
 0xb78   :  { %v3646_v46 = vpop.xlane.xlu1 %3645  ;;  %v400_v26 = vrot.slane %v399_v62, 2  ;;  %v438_v42 = vmul.f32 0.00048828125, %v397_v61  ;;  %8042 = vpow2.f32 %v3831_v17 }
 0xb79   :  { %v3711_v24 = vsub.f32 %v10687_v41, %v3646_v46  ;;  %v3712_v4 = vsub.f32 %v10689_v44, %v3646_v46 }
 0xb7a   :  { %v401_v22 = vadd.f32 %v400_v26, %v399_v62  ;;  %v454_v41 = vadd.f32 1e-05, %v438_v42 }
 0xb7b   :  { %v3833_v9 = vmul.f32 1.442695, %v3711_v24  ;;  %v3835_v10 = vmul.f32 1.442695, %v3712_v4 }
 0xb7c   :  { %v325_v27 = vpop.xlane.xlu1 %324  ;;  %v402_v33 = vrot.slane %v401_v22, 1 }
 0xb7d   :  { %v410_v3 = vrot.slane %v325_v27, 4  ;;  %8044 = vpow2.f32 %v3833_v9  ;;  %v322_v16 = vpop.xlane.xlu0 %321 }
 0xb7e   :  { %v403_v55 = vadd.f32 %v402_v33, %v401_v22  ;;  %8046 = vpow2.f32 %v3835_v10  ;;  %v404_v28 = vrot.slane %v322_v16, 4 }
 0xb7f   :  { %v411_v60 = vadd.f32 %v410_v3, %v325_v27  ;;  %8048 = vrsqrt.f32 %v454_v41  ;;  %v13655_v27 = vld [vmem:[#allocation88_spill] sm:$0xff]  ;;  %v13656_v41 = vld [vmem:[#allocation65_spill] sm:$0xff] }
 0xb80   :  { %v439_v44 = vmul.f32 0.00048828125, %v403_v55  ;;  %v405_v58 = vadd.f32 %v404_v28, %v322_v16  ;;  %v493_v33 = vmul.f32 %v8039_v52, %v13655_v27 }
 0xb81   :  { %v3652_v2 = vpop.xlane.xlu1 %3651  ;;  %v412_v50 = vrot.slane %v411_v60, 2  ;;  %v8041_v43 = vpop.eup %8040 }
 0xb82   :  { %v3715_v13 = vsub.f32 %v10699_v12, %v3652_v2  ;;  %v3716_v19 = vsub.f32 %v10701_v1, %v3652_v2  ;;  %v455_v38 = vadd.f32 1e-05, %v439_v44  ;;  %v406_v34 = vrot.slane %v405_v58, 2  ;;  %v8043_v61 = vpop.eup %8042 }
 0xb83   :  { %v3649_v18 = vpop.xlane.xlu0 %3648  ;;  %v413_v6 = vadd.f32 %v412_v50, %v411_v60  ;;  %v495_v2 = vmul.f32 %v10916_v63, %v13656_v41  ;;  %v13666_v41 = vld [vmem:[#allocation5_spill] sm:$0xff] }
 0xb84   :  { %v3841_v20 = vmul.f32 1.442695, %v3715_v13  ;;  %v3843_v35 = vmul.f32 1.442695, %v3716_v19  ;;  %v3713_v39 = vsub.f32 %v10693_v31, %v3649_v18  ;;  %v3714_v48 = vsub.f32 %v10695_v40, %v3649_v18  ;;  %v13657_v19 = vld [vmem:[#allocation45_spill] sm:$0xff] }
 0xb85   :  { %8050 = vrsqrt.f32 %v455_v38  ;;  %v414_v21 = vrot.slane %v413_v6, 1  ;;  %v407_v54 = vadd.f32 %v406_v34, %v405_v58  ;;  %v331_v12 = vpop.xlane.xlu1 %330 }
 0xb86   :  { %8052 = vpow2.f32 %v3841_v20  ;;  %v3837_v1 = vmul.f32 1.442695, %v3713_v39  ;;  %v3839_v0 = vmul.f32 1.442695, %v3714_v48  ;;  %v422_v5 = vrot.slane %v331_v12, 4  ;;  %v13659_v20 = vld [vmem:[#allocation10_spill] sm:$0xff] }
 0xb87   :  { %v328_v62 = vpop.xlane.xlu0 %327  ;;  %v415_v37 = vadd.f32 %v414_v21, %v413_v6  ;;  %v408_v46 = vrot.slane %v407_v54, 1  ;;  %8054 = vpow2.f32 %v3843_v35  ;;  %v8045_v17 = vpop.eup %8044  ;;  %v13658_v6 = vld [vmem:[#allocation46_spill] sm:$0xff]  ;;  %v581_v35 = vmul.f32 %v13659_v20, %v493_v33  ;;  %v13660_v21 = vld [vmem:[#allocation43_spill] sm:$0xff]  ;;  %v13665_v33 = vld [vmem:[#allocation68_spill] sm:$0xff] }
 0xb88   :  { %v416_v26 = vrot.slane %v328_v62, 4  ;;  %8056 = vpow2.f32 %v3837_v1  ;;  %v423_v31 = vadd.f32 %v422_v5, %v331_v12  ;;  %v8047_v40 = vpop.eup %8046  ;;  %v3873_v42 = vpack.c.bf16 %v8045_v17, %v8041_v43  ;;  %v13661_v12 = vld [vmem:[#allocation44_spill] sm:$0xff]  ;;  %v13662_v5 = vld [vmem:[#allocation3_spill] sm:$0xff] }
 0xb89   :  { %v441_v24 = vmul.f32 0.00048828125, %v415_v37  ;;  %v409_v4 = vadd.f32 %v408_v46, %v407_v54  ;;  %8058 = vpow2.f32 %v3839_v0  ;;  %v3874_v10 = vpack.c.bf16 %v8047_v40, %v8043_v61  ;;  %v10921_v60 = vpop.permute.xlu1 %865  ;;  %v8049_v58 = vpop.eup %8048  ;;  %v13663_v17 = vld [vmem:[#allocation87_spill] sm:$0xff] }
 0xb8a   :  { %v417_v22 = vadd.f32 %v416_v26, %v328_v62  ;;  %v424_v9 = vrot.slane %v423_v31, 2  ;;  %v10927_v18 = vadd.f32 %v13657_v19, %v10921_v60  ;;  %v1116_v34 = vadd.f32 %v13658_v6, %v10921_v60  ;;  %v13667_v19 = vld [vmem:[#allocation7_spill] sm:$0xff]  ;;  %v13668_v6 = vld [vmem:[#allocation6_spill] sm:$0xff] }
 0xb8b   :  { %v457_v3 = vadd.f32 1e-05, %v441_v24  ;;  %v440_v16 = vmul.f32 0.00048828125, %v409_v4  ;;  %3905 = vmatprep.subr.bf16.mxu1 %v3874_v10  ;;  %3948 = vmatprep.subr.bf16.mxu0 %v3874_v10  ;;  %v583_v62 = vmul.f32 %v13662_v5, %v495_v2  ;;  %v13664_v4 = vld [vmem:[#allocation4_spill] sm:$0xff] }
 0xb8c   :  { %v418_v55 = vrot.slane %v417_v22, 2  ;;  %v425_v28 = vadd.f32 %v424_v9, %v423_v31  ;;  %3906 = vmatpush1.bf16.xpose.msra.mxu1 %v3873_v42  ;;  %3949 = vmatpush1.bf16.xpose.msra.mxu0 %v3873_v42  ;;  %v492_v31 = vmul.f32 %v8039_v52, %v13663_v17 }
 0xb8d   :  { %8060 = vrsqrt.f32 %v457_v3  ;;  %v456_v44 = vadd.f32 1e-05, %v440_v16  ;;  %v494_v3 = vmul.f32 %v10916_v63, %v13665_v33  ;;  %v497_v16 = vmul.f32 %v8049_v58, %v10738_v36  ;;  %v13680_v33 = vld [vmem:[#allocation48_spill] sm:$0xff] }
 0xb8e   :  { %v419_v50 = vadd.f32 %v418_v55, %v417_v22  ;;  %v426_v13 = vrot.slane %v425_v28, 1  ;;  %v653_v22 = vadd.f32 %v13664_v4, %v581_v35  ;;  %v655_v2 = vadd.f32 %v13666_v41, %v583_v62  ;;  %v13670_v35 = vld [vmem:[#allocation51_spill] sm:$0xff] }
 0xb8f   :  { %v10929_v38 = vpop.permute.xlu0 %860  ;;  %v8051_v39 = vpop.eup %8050  ;;  %8062 = vrsqrt.f32 %v456_v44  ;;  %v582_v36 = vmul.f32 %v13662_v5, %v494_v3 }
 0xb90   :  { %v420_v48 = vrot.slane %v419_v50, 1  ;;  %v1110_v54 = vadd.f32 %v13660_v21, %v10929_v38  ;;  %v1112_v43 = vadd.f32 %v13661_v12, %v10929_v38  ;;  %v8053_v1 = vpop.eup %8052  ;;  %v427_v0 = vadd.f32 %v426_v13, %v425_v28  ;;  %v13672_v12 = vld [vmem:[#allocation9_spill] sm:$0xff] }
 0xb91   :  { %v8055_v61 = vpop.eup %8054  ;;  %v499_v9 = vmul.f32 %v8051_v39, %v10758_v59  ;;  %v498_v52 = vmul.f32 %v8051_v39, %v10755_v23  ;;  %v496_v59 = vmul.f32 %v8049_v58, %v10735_v25  ;;  %v677_v13 = vpack.c.bf16 %v655_v2, %v653_v22  ;;  %v13669_v23 = vld [vmem:[#allocation50_spill] sm:$0xff] }
 0xb92   :  { %v421_v37 = vadd.f32 %v420_v48, %v419_v50  ;;  %v1212_v46 = vpack.c.bf16 %v10927_v18, %v1110_v54  ;;  %v1213_v26 = vpack.c.bf16 %v1116_v34, %v1112_v43  ;;  %v8057_v40 = vpop.eup %8056  ;;  %v443_v24 = vmul.f32 0.00048828125, %v427_v0  ;;  %v13673_v0 = vld [vmem:[#allocation12_spill] sm:$0xff] }
 0xb93   :  { %v8059_v10 = vpop.eup %8058  ;;  %v3875_v27 = vpack.c.bf16 %v8053_v1, %v8057_v40  ;;  %v580_v50 = vmul.f32 %v13659_v20, %v492_v31  ;;  %v587_v18 = vmul.f32 %v13667_v19, %v499_v9  ;;  %v585_v34 = vmul.f32 %v13668_v6, %v497_v16  ;;  %v13676_v31 = vld [vmem:[#allocation14_spill] sm:$0xff] }
 0xb94   :  { %v442_v42 = vmul.f32 0.00048828125, %v421_v37  ;;  %3909 = vmatprep.mubr.bf16.mxu1 %v1213_v26  ;;  %v459_v55 = vadd.f32 1e-05, %v443_v24  ;;  %v3876_v28 = vpack.c.bf16 %v8055_v61, %v8059_v10  ;;  %v13671_v39 = vpack.c.bf16 %v13669_v23, %v13670_v35  ;;  %v13674_v37 = vld [vmem:[#allocation8_spill] sm:$0xff]  ;;  %v13678_v10 = vld [vmem:[#allocation13_spill] sm:$0xff] }
 0xb95   :  { %v586_v25 = vmul.f32 %v13667_v19, %v498_v52  ;;  %v652_v21 = vadd.f32 %v13664_v4, %v580_v50  ;;  %v584_v54 = vmul.f32 %v13668_v6, %v496_v59  ;;  %v659_v43 = vadd.f32 %v13672_v12, %v587_v18  ;;  %v13687_v6 = vld [vmem:[#allocation71_spill] sm:$0xff]  ;;  %v13689_v23 = vld [vmem:[#allocation16_spill] sm:$0xff] }
 0xb96   :  { %v458_v44 = vadd.f32 1e-05, %v442_v42  ;;  %8064 = vrsqrt.f32 %v459_v55  ;;  %3907 = vmatprep.subr.bf16.mxu1 %v3876_v28  ;;  %3950 = vmatprep.subr.bf16.mxu0 %v3876_v28  ;;  %v654_v61 = vadd.f32 %v13666_v41, %v582_v36  ;;  %v657_v26 = vadd.f32 %v13674_v37, %v585_v34  ;;  %v13682_v55 = vld [vmem:[#allocation69_spill] sm:$0xff]  ;;  %v13683_v28 = vld [vmem:[#allocation70_spill] sm:$0xff] }
 0xb97   :  { %v8061_v63 = vpop.eup %8060  ;;  %3908 = vmatpush1.bf16.xpose.msra.mxu1 %v3875_v27  ;;  %3951 = vmatpush1.bf16.xpose.msra.mxu0 %v3875_v27  ;;  %v13679_v27 = vld [vmem:[#allocation49_spill] sm:$0xff]  ;;  %v13684_v41 = vpack.c.bf16 %v13682_v55, %v13683_v28  ;;  %v13685_v19 = vmov 0   ;;  %v13686_v36 = vld [vmem:[#allocation30_spill] sm:$0xff] }
 0xb98   :  { %8066 = vrsqrt.f32 %v458_v44  ;;  %4059 = vmatprep.subr.bf16.mxu1 %v13671_v39  ;;  %4164 = vmatprep.subr.bf16.mxu0 %v677_v13  ;;  %v503_v58 = vmul.f32 %v8061_v63, %v10788_v45  ;;  %v502_v20 = vmul.f32 %v8061_v63, %v10784_v51  ;;  %v658_v45 = vadd.f32 %v13672_v12, %v586_v25  ;;  %v13675_v51 = vld [vmem:[#allocation11_spill] sm:$0xff]  ;;  %v8601_v12 = vld [vmem:[%s12953_s3 + $0x8] sm:$0xff]  }
 0xb99   :  { %v8063_v48 = vpop.eup %8062  ;;  %v676_v4 = vpack.c.bf16 %v654_v61, %v652_v21  ;;  %v679_v9 = vpack.c.bf16 %v659_v43, %v657_v26  ;;  %v13681_v3 = vpack.c.bf16 %v13679_v27, %v13680_v33  ;;  %v13688_v34 = vpack.c.bf16 %v13686_v36, %v13687_v6  ;;  %v8605_v43 = vld [vmem:[%s12953_s3 + $0x28] sm:$0xff]   ;;  %v8610_v61 = vld [vmem:[%s12953_s3 + $0x50] sm:$0xff]  }
 0xb9a   :  { %v501_v1 = vmul.f32 %v8063_v48, %v10805_v14  ;;  %v591_v5 = vmul.f32 %v13673_v0, %v503_v58  ;;  %v500_v62 = vmul.f32 %v8063_v48, %v10796_v7  ;;  %v590_v24 = vmul.f32 %v13673_v0, %v502_v20  ;;  %v13692_v48 = vld [vmem:[#allocation17_spill] sm:$0xff]  ;;  %v8607_v0 = vld [vmem:[%s12953_s3 + $0x38] sm:$0xff]  }
 0xb9b   :  { %v13677_v14 = vmov 1065369472   ;;  %v656_v7 = vadd.f32 %v13674_v37, %v584_v54  ;;  %v8611_v37 = vld [vmem:[%s12953_s3 + $0x58] sm:$0xff]   ;;  %v13695_v6 = vld [vmem:[#allocation21_spill] sm:$0xff] }
 0xb9c   :  { %v589_v17 = vmul.f32 %v13675_v51, %v501_v1  ;;  %v663_v40 = vadd.f32 %v13676_v31, %v591_v5  ;;  %v588_v22 = vmul.f32 %v13675_v51, %v500_v62  ;;  %v662_v52 = vadd.f32 %v13676_v31, %v590_v24  ;;  %v8606_v1 = vld [vmem:[%s12953_s3 + $0x30] sm:$0xff]   ;;  %v8608_v5 = vld [vmem:[%s12953_s3 + $0x40] sm:$0xff]   ;;  %v8609_v62 = vld [vmem:[%s12953_s3 + $0x48] sm:$0xff]  }
 0xb9d   :  { %v678_v2 = vpack.c.bf16 %v658_v45, %v656_v7 }
 0xb9e   :  { %3910 = vmatmul.mubr.bf16.vlgmr.msra.gmra.mrb[12].mxu1 %v1212_v46  ;;  %3953 = vmatmul.mubr.bf16.vlgmr.msra.gmra.mrb[60].mxu0 %v13677_v14  ;;  %v661_v42 = vadd.f32 %v13678_v10, %v589_v17  ;;  %v660_v50 = vadd.f32 %v13678_v10, %v588_v22 }
 0xb9f   :  { %4060 = vmatpush1.bf16.msra.mxu1 %v13681_v3  ;;  %4165 = vmatpush1.bf16.msra.mxu0 %v676_v4 }
 0xba0   :  { %v8065_v16 = vpop.eup %8064  ;;  %4061 = vmatprep.subr.bf16.mxu1 %v13684_v41  ;;  %4166 = vmatprep.subr.bf16.mxu0 %v679_v9  ;;  %v681_v46 = vpack.c.bf16 %v663_v40, %v661_v42  ;;  %v680_v25 = vpack.c.bf16 %v662_v52, %v660_v50  ;;  %v13693_v41 = vld [vmem:[#allocation19_spill] sm:$0xff] }
 0xba1   :  { %v507_v59 = vmul.f32 %v8065_v16, %v10828_v29  ;;  %v506_v13 = vmul.f32 %v8065_v16, %v10824_v30  ;;  %4196 = vmatprep.mubr.bf16.mxu0 %v13685_v19  ;;  %4091 = vmatprep.mubr.bf16.mxu1 %v13685_v19  ;;  %v13690_v30 = vld [vmem:[#allocation15_spill] sm:$0xff] }
 0xba2   :  { %v8067_v44 = vpop.eup %8066 }
 0xba3   :  { %v505_v18 = vmul.f32 %v8067_v44, %v10841_v47  ;;  %v504_v63 = vmul.f32 %v8067_v44, %v10832_v49  ;;  %4062 = vmatpush1.bf16.msra.mxu1 %v13688_v34  ;;  %4167 = vmatpush1.bf16.msra.mxu0 %v678_v2  ;;  %v595_v35 = vmul.f32 %v13689_v23, %v507_v59  ;;  %v13691_v49 = vld [vmem:[#allocation18_spill] sm:$0xff]  ;;  %v7508_v59 = vld [vmem:[%s12954_s5] sm:$0xff]  }
 0xba4   :  { %v594_v39 = vmul.f32 %v13689_v23, %v506_v13  ;;  %4063 = vmatprep.subr.bf16.mxu1 %v3281_v11  ;;  %4168 = vmatprep.subr.bf16.mxu0 %v681_v46  ;;  %v8600_v11 = vld [vmem:[%s12953_s3] sm:$0xff]   ;;  %v13694_v13 = vld [vmem:[#allocation20_spill] sm:$0xff] }
 0xba5   :  { %v593_v29 = vmul.f32 %v13690_v30, %v505_v18  ;;  %v592_v47 = vmul.f32 %v13690_v30, %v504_v63  ;;  %v667_v58 = vadd.f32 %v13691_v49, %v595_v35 }
 0xba6   :  { %v666_v20 = vadd.f32 %v13691_v49, %v594_v39 }
 0xba7   :  { %v665_v21 = vadd.f32 %v13692_v48, %v593_v29  ;;  %v664_v54 = vadd.f32 %v13692_v48, %v592_v47  ;;  %4064 = vmatpush1.bf16.msra.mxu1 %v3280_v8  ;;  %4169 = vmatpush1.bf16.msra.mxu0 %v680_v25  ;;  %v8604_v8 = vld [vmem:[%s12953_s3 + $0x20] sm:$0xff]   ;;  %v7509_v29 = vld [vmem:[%s12954_s5 + $0x8] sm:$0xff]   ;;  %v13696_v47 = vld [vmem:[#allocation22_spill] sm:$0xff] }
 0xba9   :  { %v683_v15 = vpack.c.bf16 %v667_v58, %v665_v21  ;;  %v682_v53 = vpack.c.bf16 %v666_v20, %v664_v54  ;;  %v13697_v20 = vld [vmem:[#allocation23_spill] sm:$0xff] }
 0xbab   :  { %4170 = vmatprep.subr.bf16.mxu0 %v683_v15 }
 0xbac   :  { %4171 = vmatpush1.bf16.msra.mxu0 %v682_v53 }
 0xbaf   :  { %7392 = vmatmul.mubr.msk.bf16.vlgmr.msra.gmra.mrb[64].mxu0 %vm928_vm0, %v8600_v11  ;;  %v7510_v11 = vld [vmem:[%s12954_s5 + $0x10] sm:$0xff]  }
 0xbb0   :  { %4206 = vmatprep.mubr.bf16.mxu0 %v13685_v19 }
 0xbb7   :  { %7393 = vmatmul.mubr.msk.bf16.gmra.mrb[68].mxu0 %vm928_vm0, %v8601_v12  ;;  %v13698_v12 = vld [vmem:[#allocation24_spill] sm:$0xff] }
 0xbb8   :  { %4216 = vmatprep.mubr.bf16.mxu0 %v13685_v19 }
 0xbbf   :  { %7394 = vmatmul.mubr.msk.bf16.gmra.mrb[72].mxu0 %vm928_vm0, %v8602_v57 }
 0xbc0   :  { %4226 = vmatprep.mubr.bf16.mxu0 %v13685_v19 }
 0xbc7   :  { %7395 = vmatmul.mubr.msk.bf16.gmra.mrb[76].mxu0 %vm928_vm0, %v8603_v56 }
 0xbc8   :  { %4236 = vmatprep.mubr.bf16.mxu0 %v13685_v19 }
 0xbcf   :  { %7396 = vmatmul.mubr.msk.bf16.gmra.mrb[80].mxu0 %vm928_vm0, %v8604_v8 }
 0xbd0   :  { %4246 = vmatprep.mubr.bf16.mxu0 %v13685_v19 }
 0xbd7   :  { %7397 = vmatmul.mubr.msk.bf16.gmra.mrb[84].mxu0 %vm928_vm0, %v8605_v43  ;;  %v13699_v43 = vld [vmem:[#allocation25_spill] sm:$0xff] }
 0xbd8   :  { %4256 = vmatprep.mubr.bf16.mxu0 %v13685_v19 }
 0xbdf   :  { %7398 = vmatmul.mubr.msk.bf16.gmra.mrb[88].mxu0 %vm928_vm0, %v8606_v1 }
 0xbe0   :  { %4266 = vmatprep.mubr.bf16.mxu0 %v13685_v19 }
 0xbe7   :  { %7399 = vmatmul.mubr.msk.bf16.gmra.mrb[92].mxu0 %vm928_vm0, %v8607_v0 }
 0xbe8   :  { %4276 = vmatprep.mubr.bf16.mxu0 %v13685_v19 }
 0xbef   :  { %7400 = vmatmul.mubr.msk.bf16.gmra.mrb[96].mxu0 %vm928_vm0, %v8608_v5 }
 0xbf0   :  { %4286 = vmatprep.mubr.bf16.mxu0 %v13685_v19 }
 0xbf7   :  { %7401 = vmatmul.mubr.msk.bf16.gmra.mrb[100].mxu0 %vm928_vm0, %v8609_v62 }
 0xbf8   :  { %4296 = vmatprep.mubr.bf16.mxu0 %v13685_v19 }
 0xbff   :  { %7402 = vmatmul.mubr.msk.bf16.gmra.mrb[104].mxu0 %vm928_vm0, %v8610_v61 }
 0xc00   :  { %4306 = vmatprep.mubr.bf16.mxu0 %v13685_v19 }
 0xc07   :  { %7403 = vmatmul.mubr.msk.bf16.gmra.mrb[108].mxu0 %vm928_vm0, %v8611_v37  ;;  %v7511_v37 = vld [vmem:[%s12954_s5 + $0x18] sm:$0xff]  }
 0xc71   :  { %v3911_v26 = vpop.f32.mrb[12].mxu1  ;;  %v3954_v45 = vpop.f32.mrb[60].mxu0 }
 0xc72   :  { %8068 = vrcp.f32 %v3954_v45  ;;  %v3913_v51 = vpop.f32.mrb[13].mxu1  ;;  %v3956_v17 = vpop.f32.mrb[61].mxu0 }
 0xc73   :  { %8070 = vrcp.f32 %v3956_v17  ;;  %v3915_v31 = vpop.f32.mrb[14].mxu1  ;;  %v3958_v40 = vpop.f32.mrb[62].mxu0 }
 0xc74   :  { %v3917_v24 = vpop.f32.mrb[15].mxu1  ;;  %v3959_v4 = vpop.f32.mrb[63].mxu0 }
 0xc7c   :  { %v8069_v22 = vpop.eup %8068 }
 0xc7d   :  { %v8071_v9 = vpop.eup %8070  ;;  %v3966_v7 = vrot.slane %v8069_v22, %v13654_v32  ;;  %v13702_v22 = vld [vmem:[#allocation28_spill] sm:$0xff] }
 0xc7e   :  { %v3970_v10 = vrot.slane %v8071_v9, %v13654_v32 }
 0xc7f   :  { %v3971_v42 = vmul.f32 %v3966_v7, %v3911_v26  ;;  %v3973_v27 = vmul.f32 %v3966_v7, %v3915_v31  ;;  %v13700_v26 = vld [vmem:[#allocation26_spill] sm:$0xff] }
 0xc80   :  { %v3972_v33 = vmul.f32 %v3970_v10, %v3913_v51  ;;  %v3974_v3 = vmul.f32 %v3970_v10, %v3917_v24  ;;  %v13701_v24 = vld [vmem:[#allocation27_spill] sm:$0xff] }
 0xc81   :  { %v3975_v16 = vpack.c.bf16 %v3973_v27, %v3971_v42 }
 0xc82   :  { %v4198_v55 = vpop.f32.mrb[64].mxu0  ;;  %v3976_v28 = vpack.c.bf16 %v3974_v3, %v3972_v33 }
 0xc83   :  { %v4199_v2 = vadd.f32 %v4198_v55, %v13693_v41  ;;  %v4200_v46 = vpop.f32.mrb[65].mxu0 }
 0xc84   :  { %v4201_v52 = vadd.f32 %v4200_v46, %v13693_v41  ;;  %v4202_v44 = vpop.f32.mrb[66].mxu0  ;;  %4065 = vmatprep.subr.bf16.mxu1 %v3976_v28  ;;  %v13703_v28 = vld [vmem:[#allocation34_spill] sm:$0xff] }
 0xc85   :  { %v4204_v50 = vpop.f32.mrb[67].mxu0  ;;  %4317 = vxpose.xlu1.b32.start [1/8] (short) %v4199_v2, 128  ;;  %4066 = vmatpush1.bf16.msra.mxu1 %v3975_v16  ;;  %v4203_v18 = vadd.f32 %v4202_v44, %v13694_v13  ;;  %v13705_v2 = vld [vmem:[#allocation33_spill] sm:$0xff] }
 0xc86   :  { %4349 = vxpose.xlu0.b32.start [1/8] (short) %v4201_v52, 128  ;;  %v4205_v63 = vadd.f32 %v4204_v50, %v13694_v13 }
 0xc88   :  { %7388 = vmatmul.mubr.msk.bf16.vlgmr.msra.gmra.mrb[16].mxu1 %vm928_vm0, %v7508_v59 }
 0xc89   :  { %4318 = vxpose.xlu1.b32.cont [2/8] (short) %v4203_v18, 128  ;;  %4101 = vmatprep.mubr.bf16.mxu1 %v13685_v19 }
 0xc8a   :  { %v4208_v36 = vpop.f32.mrb[68].mxu0  ;;  %4350 = vxpose.xlu0.b32.cont [2/8] (short) %v4205_v63, 128 }
 0xc8b   :  { %v4209_v34 = vadd.f32 %v4208_v36, %v13695_v6  ;;  %v4210_v23 = vpop.f32.mrb[69].mxu0 }
 0xc8c   :  { %v4211_v35 = vadd.f32 %v4210_v23, %v13695_v6  ;;  %v4212_v39 = vpop.f32.mrb[70].mxu0  ;;  %v13709_v6 = vld [vmem:[#allocation54_spill] sm:$0xff]  ;;  %v13711_v23 = vld [vmem:[#allocation53_spill] sm:$0xff] }
 0xc8d   :  { %v4214_v30 = vpop.f32.mrb[71].mxu0  ;;  %4319 = vxpose.xlu1.b32.cont [3/8] (short) %v4209_v34, 128  ;;  %v4213_v25 = vadd.f32 %v4212_v39, %v13696_v47 }
 0xc8e   :  { %4351 = vxpose.xlu0.b32.cont [3/8] (short) %v4211_v35, 128  ;;  %v4215_v49 = vadd.f32 %v4214_v30, %v13696_v47 }
 0xc90   :  { %7389 = vmatmul.mubr.msk.bf16.gmra.mrb[20].mxu1 %vm928_vm0, %v7509_v29 }
 0xc91   :  { %4320 = vxpose.xlu1.b32.cont [4/8] (short) %v4213_v25, 128  ;;  %4111 = vmatprep.mubr.bf16.mxu1 %v13685_v19 }
 0xc92   :  { %v4218_v58 = vpop.f32.mrb[72].mxu0  ;;  %4352 = vxpose.xlu0.b32.cont [4/8] (short) %v4215_v49, 128 }
 0xc93   :  { %v4219_v48 = vadd.f32 %v4218_v58, %v13697_v20  ;;  %v4220_v21 = vpop.f32.mrb[73].mxu0 }
 0xc94   :  { %v4221_v54 = vadd.f32 %v4220_v21, %v13697_v20  ;;  %v4222_v15 = vpop.f32.mrb[74].mxu0 }
 0xc95   :  { %v4224_v53 = vpop.f32.mrb[75].mxu0  ;;  %4321 = vxpose.xlu1.b32.cont [5/8] (short) %v4219_v48, 128  ;;  %v4223_v57 = vadd.f32 %v4222_v15, %v13698_v12  ;;  %v13715_v48 = vld [vmem:[#allocation72_spill] sm:$0xff] }
 0xc96   :  { %4353 = vxpose.xlu0.b32.cont [5/8] (short) %v4221_v54, 128  ;;  %v4225_v56 = vadd.f32 %v4224_v53, %v13698_v12  ;;  %v13717_v54 = vld [vmem:[#allocation64_spill] sm:$0xff] }
 0xc98   :  { %7390 = vmatmul.mubr.msk.bf16.gmra.mrb[24].mxu1 %vm928_vm0, %v7510_v11 }
 0xc99   :  { %4322 = vxpose.xlu1.b32.cont [6/8] (short) %v4223_v57, 128  ;;  %4121 = vmatprep.mubr.bf16.mxu1 %v13685_v19 }
 0xc9a   :  { %v4228_v8 = vpop.f32.mrb[76].mxu0  ;;  %4354 = vxpose.xlu0.b32.cont [6/8] (short) %v4225_v56, 128 }
 0xc9b   :  { %v4229_v1 = vadd.f32 %v4228_v8, %v13699_v43  ;;  %v4230_v0 = vpop.f32.mrb[77].mxu0 }
 0xc9c   :  { %v4231_v5 = vadd.f32 %v4230_v0, %v13699_v43  ;;  %v4232_v62 = vpop.f32.mrb[78].mxu0  ;;  %v13721_v0 = vld [vmem:[#allocation32_spill] sm:$0xff] }
 0xc9d   :  { %v4234_v61 = vpop.f32.mrb[79].mxu0  ;;  %4323 = vxpose.xlu1.b32.cont [7/8] (short) %v4229_v1, 128  ;;  %v4233_v45 = vadd.f32 %v4232_v62, %v13700_v26  ;;  %v13723_v62 = vld [vmem:[#allocation31_spill] sm:$0xff] }
 0xc9e   :  { %4355 = vxpose.xlu0.b32.cont [7/8] (short) %v4231_v5, 128  ;;  %v4235_v51 = vadd.f32 %v4234_v61, %v13700_v26 }
 0xca0   :  { %7391 = vmatmul.mubr.msk.bf16.gmra.mrb[28].mxu1 %vm928_vm0, %v7511_v37 }
 0xca1   :  { %4324 = vxpose.xlu1.b32.end [8/8] (short) %v4233_v45, 128  ;;  %4493 = vmatprep.mubr.bf16.mxu1 %v13685_v19 }
 0xca2   :  { %v4238_v17 = vpop.f32.mrb[80].mxu0  ;;  %4356 = vxpose.xlu0.b32.end [8/8] (short) %v4235_v51, 128 }
 0xca3   :  { %v4240_v31 = vpop.f32.mrb[81].mxu0  ;;  %v4239_v4 = vadd.f32 %v4238_v17, %v13701_v24 }
 0xca4   :  { %v4242_v40 = vpop.f32.mrb[82].mxu0  ;;  %v4241_v10 = vadd.f32 %v4240_v31, %v13701_v24 }
 0xca5   :  { %v4243_v9 = vadd.f32 %v4242_v40, %v13702_v22  ;;  %v4244_v7 = vpop.f32.mrb[83].mxu0 }
 0xca6   :  { %v4245_v42 = vadd.f32 %v4244_v7, %v13702_v22 }
 0xca7   :  { %v4397_v27 = vpack.c.bf16 %v4243_v9, %v4239_v4  ;;  %v13725_v4 = vld [vmem:[#allocation52_spill] sm:$0xff]  ;;  %v13727_v9 = vld [vmem:[#allocation29_spill] sm:$0xff] }
 0xca8   :  { %v4398_v33 = vpack.c.bf16 %v4245_v42, %v4241_v10 }
 0xcaa   :  { %v4248_v3 = vpop.f32.mrb[84].mxu0  ;;  %4461 = vmatprep.subr.bf16.mxu1 %v4398_v33 }
 0xcab   :  { %v4250_v16 = vpop.f32.mrb[85].mxu0  ;;  %4462 = vmatpush1.bf16.msra.mxu1 %v4397_v27  ;;  %v11108_v41 = vadd.f32 %v4248_v3, %v13703_v28 }
 0xcac   :  { %v4252_v55 = vpop.f32.mrb[86].mxu0  ;;  %v11114_v44 = vadd.f32 %v4250_v16, %v13703_v28 }
 0xcad   :  { %13704 = vst [vmem:[#allocation41_spill] sm:$0xff] %v11108_v41  ;;  %v11111_v46 = vadd.f32 %v4252_v55, %v13705_v2  ;;  %v4254_v52 = vpop.f32.mrb[87].mxu0 }
 0xcae   :  { %13707 = vst [vmem:[#allocation40_spill] sm:$0xff] %v11114_v44  ;;  %v11117_v50 = vadd.f32 %v4254_v52, %v13705_v2  ;;  %v13731_v2 = vld [vmem:[#allocation90_spill] sm:$0xff] }
 0xcaf   :  { %13706 = vst [vmem:[#allocation39_spill] sm:$0xff] %v11111_v46 }
 0xcb0   :  { %13708 = vst [vmem:[#allocation42_spill] sm:$0xff] %v11117_v50 }
 0xcb2   :  { %v4258_v18 = vpop.f32.mrb[88].mxu0 }
 0xcb3   :  { %v4260_v63 = vpop.f32.mrb[89].mxu0  ;;  %v11124_v34 = vadd.f32 %v4258_v18, %v13709_v6  ;;  %v13733_v18 = vld [vmem:[#allocation89_spill] sm:$0xff] }
 0xcb4   :  { %v4262_v36 = vpop.f32.mrb[90].mxu0  ;;  %v11130_v30 = vadd.f32 %v4260_v63, %v13709_v6 }
 0xcb5   :  { %13710 = vst [vmem:[#allocation57_spill] sm:$0xff] %v11124_v34  ;;  %v11127_v35 = vadd.f32 %v4262_v36, %v13711_v23  ;;  %v4264_v39 = vpop.f32.mrb[91].mxu0 }
 0xcb6   :  { %13713 = vst [vmem:[#allocation60_spill] sm:$0xff] %v11130_v30  ;;  %v11133_v29 = vadd.f32 %v4264_v39, %v13711_v23 }
 0xcb7   :  { %13712 = vst [vmem:[#allocation58_spill] sm:$0xff] %v11127_v35 }
 0xcb8   :  { %13714 = vst [vmem:[#allocation59_spill] sm:$0xff] %v11133_v29 }
 0xcba   :  { %v4268_v49 = vpop.f32.mrb[92].mxu0 }
 0xcbb   :  { %v4270_v58 = vpop.f32.mrb[93].mxu0  ;;  %v11140_v21 = vadd.f32 %v4268_v49, %v13715_v48 }
 0xcbc   :  { %v4272_v20 = vpop.f32.mrb[94].mxu0  ;;  %v11146_v11 = vadd.f32 %v4270_v58, %v13715_v48 }
 0xcbd   :  { %13716 = vst [vmem:[#allocation73_spill] sm:$0xff] %v11140_v21  ;;  %v11143_v15 = vadd.f32 %v4272_v20, %v13717_v54  ;;  %v4274_v53 = vpop.f32.mrb[95].mxu0 }
 0xcbe   :  { %13719 = vst [vmem:[#allocation75_spill] sm:$0xff] %v11146_v11  ;;  %v11149_v12 = vadd.f32 %v4274_v53, %v13717_v54 }
 0xcbf   :  { %13718 = vst [vmem:[#allocation74_spill] sm:$0xff] %v11143_v15 }
 0xcc0   :  { %13720 = vst [vmem:[#allocation76_spill] sm:$0xff] %v11149_v12 }
 0xcc2   :  { %v4278_v8 = vpop.f32.mrb[96].mxu0 }
 0xcc3   :  { %v4280_v43 = vpop.f32.mrb[97].mxu0  ;;  %v11156_v5 = vadd.f32 %v4278_v8, %v13721_v0 }
 0xcc4   :  { %v4282_v1 = vpop.f32.mrb[98].mxu0  ;;  %v4281_v26 = vadd.f32 %v4280_v43, %v13721_v0 }
 0xcc5   :  { %13722 = vst [vmem:[#allocation78_spill] sm:$0xff] %v11156_v5  ;;  %v11159_v61 = vadd.f32 %v4282_v1, %v13723_v62  ;;  %v4284_v37 = vpop.f32.mrb[99].mxu0 }
 0xcc6   :  { %v4285_v45 = vadd.f32 %v4284_v37, %v13723_v62 }
 0xcc7   :  { %13724 = vst [vmem:[#allocation79_spill] sm:$0xff] %v11159_v61 }
 0xcc8   :  { %v4406_v17 = vpack.c.bf16 %v4285_v45, %v4281_v26 }
 0xcca   :  { %v4288_v31 = vpop.f32.mrb[100].mxu0  ;;  %5006 = vmatprep.mubr.bf16.mxu0 %v4406_v17 }
 0xccb   :  { %v4290_v40 = vpop.f32.mrb[101].mxu0  ;;  %v11166_v22 = vadd.f32 %v4288_v31, %v13725_v4 }
 0xccc   :  { %v4292_v24 = vpop.f32.mrb[102].mxu0  ;;  %v11172_v42 = vadd.f32 %v4290_v40, %v13725_v4 }
 0xccd   :  { %13726 = vst [vmem:[#allocation81_spill] sm:$0xff] %v11166_v22  ;;  %v11169_v7 = vadd.f32 %v4292_v24, %v13727_v9  ;;  %v4294_v10 = vpop.f32.mrb[103].mxu0 }
 0xcce   :  { %13729 = vst [vmem:[#allocation77_spill] sm:$0xff] %v11172_v42  ;;  %v11175_v27 = vadd.f32 %v4294_v10, %v13727_v9 }
 0xccf   :  { %13728 = vst [vmem:[#allocation82_spill] sm:$0xff] %v11169_v7 }
 0xcd0   :  { %13730 = vst [vmem:[#allocation80_spill] sm:$0xff] %v11175_v27 }
 0xcd2   :  { %v4298_v16 = vpop.f32.mrb[104].mxu0 }
 0xcd3   :  { %v4300_v55 = vpop.f32.mrb[105].mxu0  ;;  %v11182_v52 = vadd.f32 %v4298_v16, %v13731_v2 }
 0xcd4   :  { %v4302_v28 = vpop.f32.mrb[106].mxu0  ;;  %v11188_v6 = vadd.f32 %v4300_v55, %v13731_v2 }
 0xcd5   :  { %13732 = vst [vmem:[#allocation35_spill] sm:$0xff] %v11182_v52  ;;  %v11185_v63 = vadd.f32 %v4302_v28, %v13733_v18  ;;  %v4304_v36 = vpop.f32.mrb[107].mxu0 }
 0xcd6   :  { %13735 = vst [vmem:[#allocation83_spill] sm:$0xff] %v11188_v6  ;;  %v11191_v23 = vadd.f32 %v4304_v36, %v13733_v18 }
 0xcd7   :  { %13734 = vst [vmem:[#allocation36_spill] sm:$0xff] %v11185_v63 }
 0xcd8   :  { %13736 = vst [vmem:[#allocation37_spill] sm:$0xff] %v11191_v23 }
 0xcda   :  { %v4308_v58 = vpop.f32.mrb[108].mxu0 }
 0xcdb   :  { %v4310_v20 = vpop.f32.mrb[109].mxu0  ;;  %v11198_v54 = vadd.f32 %v4308_v58, %v10929_v38 }
 0xcdc   :  { %v4312_v48 = vpop.f32.mrb[110].mxu0  ;;  %v11204_v43 = vadd.f32 %v4310_v20, %v10929_v38 }
 0xcdd   :  { %13737 = vst [vmem:[#allocation85_spill] sm:$0xff] %v11198_v54  ;;  %v11201_v53 = vadd.f32 %v4312_v48, %v10921_v60  ;;  %v4314_v8 = vpop.f32.mrb[111].mxu0 }
 0xcde   :  { %13739 = vst [vmem:[#allocation38_spill] sm:$0xff] %v11204_v43  ;;  %v11207_v1 = vadd.f32 %v4314_v8, %v10921_v60 }
 0xcdf   :  { %13738 = vst [vmem:[#allocation63_spill] sm:$0xff] %v11201_v53 }
 0xce0   :  { %13740 = vst [vmem:[#allocation84_spill] sm:$0xff] %v11207_v1 }
 0xd05   :  { %v4333_v37 = vpop.trf.xlu1 }
 0xd06   :  { %v4365_v55 = vpop.trf.xlu0 }
 0xd09   :  { %v4334_v26 = vpop.trf.xlu1 }
 0xd0a   :  { %v11213_v45 = vpack.c.bf16 %v4334_v26, %v4333_v37  ;;  %v4366_v18 = vpop.trf.xlu0 }
 0xd0c   :  { %7404 = vmatmul.mubr.msk.bf16.vlgmr.msra.gmra.mrb[32].mxu1 %vm1214_vm1, %v11213_v45 }
 0xd0d   :  { %v4335_v17 = vpop.trf.xlu1  ;;  %4503 = vmatprep.mubr.bf16.mxu1 %v13685_v19 }
 0xd0e   :  { %v4367_v20 = vpop.trf.xlu0 }
 0xd11   :  { %v4336_v38 = vpop.trf.xlu1 }
 0xd12   :  { %v11218_v31 = vpack.c.bf16 %v4336_v38, %v4335_v17  ;;  %v4368_v37 = vpop.trf.xlu0 }
 0xd14   :  { %13741 = vst [vmem:[#allocation61_spill] sm:$0xff] %v11218_v31  ;;  %7405 = vmatmul.mubr.msk.bf16.gmra.mrb[36].mxu1 %vm1214_vm1, %v11218_v31 }
 0xd15   :  { %v4337_v60 = vpop.trf.xlu1  ;;  %4513 = vmatprep.mubr.bf16.mxu1 %v13685_v19 }
 0xd19   :  { %v4338_v40 = vpop.trf.xlu1 }
 0xd1a   :  { %v11223_v24 = vpack.c.bf16 %v4338_v40, %v4337_v60  ;;  %v4369_v60 = vpop.trf.xlu0 }
 0xd1c   :  { %7406 = vmatmul.mubr.msk.bf16.gmra.mrb[40].mxu1 %vm1214_vm1, %v11223_v24 }
 0xd1d   :  { %v4339_v4 = vpop.trf.xlu1  ;;  %4523 = vmatprep.mubr.bf16.mxu1 %v13685_v19 }
 0xd21   :  { %v4340_v9 = vpop.trf.xlu1 }
 0xd22   :  { %v11228_v10 = vpack.c.bf16 %v4340_v9, %v4339_v4  ;;  %v4370_v9 = vpop.trf.xlu0 }
 0xd24   :  { %7407 = vmatmul.mubr.msk.bf16.gmra.mrb[44].mxu1 %vm1214_vm1, %v11228_v10 }
 0xd25   :  { %v4341_v16 = vpop.trf.xlu1  ;;  %4533 = vmatprep.mubr.bf16.mxu1 %v13685_v19 }
 0xd29   :  { %v4342_v28 = vpop.trf.xlu1 }
 0xd2a   :  { %v11233_v2 = vpack.c.bf16 %v4342_v28, %v4341_v16  ;;  %v4371_v16 = vpop.trf.xlu0  ;;  %v11253_v28 = vpack.c.bf16 %v4366_v18, %v4365_v55 }
 0xd2c   :  { %7408 = vmatmul.mubr.msk.bf16.gmra.mrb[48].mxu1 %vm1214_vm1, %v11233_v2 }
 0xd2d   :  { %v4343_v36 = vpop.trf.xlu1  ;;  %4543 = vmatprep.mubr.bf16.mxu1 %v13685_v19 }
 0xd31   :  { %v4344_v58 = vpop.trf.xlu1 }
 0xd32   :  { %v11238_v48 = vpack.c.bf16 %v4344_v58, %v4343_v36  ;;  %v4372_v36 = vpop.trf.xlu0  ;;  %v11258_v58 = vpack.c.bf16 %v4368_v37, %v4367_v20 }
 0xd33   :  { %v11276_v0 = vpack.c.bf16 %v4372_v36, %v4371_v16 }
 0xd34   :  { %7409 = vmatmul.mubr.msk.bf16.gmra.mrb[52].mxu1 %vm1214_vm1, %v11238_v48 }
 0xd35   :  { %v4345_v8 = vpop.trf.xlu1  ;;  %4553 = vmatprep.mubr.bf16.mxu1 %v13685_v19 }
 0xd39   :  { %v4346_v26 = vpop.trf.xlu1 }
 0xd3a   :  { %v11243_v17 = vpack.c.bf16 %v4346_v26, %v4345_v8  ;;  %v4373_v8 = vpop.trf.xlu0  ;;  %v11263_v26 = vpack.c.bf16 %v4370_v9, %v4369_v60 }
 0xd3c   :  { %7410 = vmatmul.mubr.msk.bf16.gmra.mrb[56].mxu1 %vm1214_vm1, %v11243_v17 }
 0xd3d   :  { %v4347_v38 = vpop.trf.xlu1  ;;  %4563 = vmatprep.mubr.bf16.mxu1 %v13685_v19 }
 0xd41   :  { %v4348_v40 = vpop.trf.xlu1 }
 0xd42   :  { %v11248_v4 = vpack.c.bf16 %v4348_v40, %v4347_v38  ;;  %v4374_v38 = vpop.trf.xlu0 }
 0xd43   :  { %v11289_v56 = vpack.c.bf16 %v4374_v38, %v4373_v8 }
 0xd44   :  { %7411 = vmatmul.mubr.msk.bf16.gmra.mrb[60].mxu1 %vm1214_vm1, %v11248_v4 }
 0xd45   :  { %4573 = vmatprep.mubr.bf16.mxu1 %v13685_v19 }
 0xd46   :  { %v4375_v40 = vpop.trf.xlu0 }
 0xd4a   :  { %v4376_v57 = vpop.trf.xlu0 }
 0xd4b   :  { %v11302_v25 = vpack.c.bf16 %v4376_v57, %v4375_v40 }
 0xd4c   :  { %7412 = vmatmul.mubr.msk.bf16.gmra.mrb[64].mxu1 %vm1214_vm1, %v11253_v28 }
 0xd4d   :  { %4583 = vmatprep.mubr.bf16.mxu1 %v13685_v19 }
 0xd4e   :  { %v4377_v36 = vpop.trf.xlu0 }
 0xd52   :  { %v4378_v3 = vpop.trf.xlu0 }
 0xd53   :  { %v11315_v54 = vpack.c.bf16 %v4378_v3, %v4377_v36 }
 0xd54   :  { %7413 = vmatmul.mubr.msk.bf16.gmra.mrb[68].mxu1 %vm1214_vm1, %v11258_v58 }
 0xd55   :  { %4593 = vmatprep.mubr.bf16.mxu1 %v13685_v19 }
 0xd56   :  { %v4379_v13 = vpop.trf.xlu0 }
 0xd5a   :  { %v4380_v57 = vpop.trf.xlu0 }
 0xd5b   :  { %v11267_v55 = vpop.f32.mrb[16].mxu1  ;;  %v11320_v40 = vpack.c.bf16 %v4380_v57, %v4379_v13 }
 0xd5c   :  { %7414 = vmatmul.mubr.msk.bf16.gmra.mrb[72].mxu1 %vm1214_vm1, %v11263_v26  ;;  %13742 = vst [vmem:[#allocation66_spill] sm:$0xff] %v11267_v55  ;;  %v11270_v18 = vpop.f32.mrb[17].mxu1 }
 0xd5d   :  { %4603 = vmatprep.mubr.bf16.mxu1 %v13685_v19  ;;  %13743 = vst [vmem:[#allocation86_spill] sm:$0xff] %v11270_v18  ;;  %v11272_v20 = vpop.f32.mrb[18].mxu1 }
 0xd5e   :  { %13744 = vst [vmem:[#allocation62_spill] sm:$0xff] %v11272_v20  ;;  %v11274_v37 = vpop.f32.mrb[19].mxu1 }
 0xd5f   :  { %13745 = vst [vmem:[#allocation67_spill] sm:$0xff] %v11274_v37 }
 0xd63   :  { %v11280_v60 = vpop.f32.mrb[20].mxu1 }
 0xd64   :  { %7415 = vmatmul.mubr.msk.bf16.gmra.mrb[76].mxu1 %vm1214_vm1, %v11276_v0  ;;  %13746 = vst [vmem:[#allocation55_spill] sm:$0xff] %v11280_v60  ;;  %v11283_v9 = vpop.f32.mrb[21].mxu1 }
 0xd65   :  { %4613 = vmatprep.mubr.bf16.mxu1 %v13685_v19  ;;  %13747 = vst [vmem:[#allocation56_spill] sm:$0xff] %v11283_v9  ;;  %v11285_v62 = vpop.f32.mrb[22].mxu1 }
 0xd66   :  { %13748 = vst [vmem:[#allocation88_spill] sm:$0xff] %v11285_v62  ;;  %v11287_v39 = vpop.f32.mrb[23].mxu1 }
 0xd67   :  { %13749 = vst [vmem:[#allocation65_spill] sm:$0xff] %v11287_v39 }
 0xd6b   :  { %v11293_v16 = vpop.f32.mrb[24].mxu1 }
 0xd6c   :  { %7416 = vmatmul.mubr.msk.bf16.gmra.mrb[80].mxu1 %vm1214_vm1, %v11289_v56  ;;  %13750 = vst [vmem:[#allocation45_spill] sm:$0xff] %v11293_v16  ;;  %v11296_v49 = vpop.f32.mrb[25].mxu1 }
 0xd6d   :  { %4623 = vmatprep.mubr.bf16.mxu1 %v13685_v19  ;;  %13751 = vst [vmem:[#allocation46_spill] sm:$0xff] %v11296_v49  ;;  %v11298_v47 = vpop.f32.mrb[26].mxu1 }
 0xd6e   :  { %13752 = vst [vmem:[#allocation10_spill] sm:$0xff] %v11298_v47  ;;  %v11300_v33 = vpop.f32.mrb[27].mxu1 }
 0xd6f   :  { %13753 = vst [vmem:[#allocation43_spill] sm:$0xff] %v11300_v33 }
 0xd73   :  { %v11306_v8 = vpop.f32.mrb[28].mxu1 }
 0xd74   :  { %7417 = vmatmul.mubr.msk.bf16.gmra.mrb[84].mxu1 %vm1214_vm1, %v11302_v25  ;;  %13754 = vst [vmem:[#allocation44_spill] sm:$0xff] %v11306_v8  ;;  %v11309_v38 = vpop.f32.mrb[29].mxu1 }
 0xd75   :  { %4633 = vmatprep.mubr.bf16.mxu1 %v13685_v19  ;;  %13755 = vst [vmem:[#allocation3_spill] sm:$0xff] %v11309_v38  ;;  %v11311_v59 = vpop.f32.mrb[30].mxu1 }
 0xd76   :  { %13756 = vst [vmem:[#allocation87_spill] sm:$0xff] %v11311_v59  ;;  %v11313_v51 = vpop.f32.mrb[31].mxu1 }
 0xd77   :  { %13757 = vst [vmem:[#allocation4_spill] sm:$0xff] %v11313_v51 }
 0xd7c   :  { %7418 = vmatmul.mubr.msk.bf16.gmra.mrb[88].mxu1 %vm1214_vm1, %v11315_v54 }
 0xd7d   :  { %4643 = vmatprep.mubr.bf16.mxu1 %v13685_v19 }
 0xd84   :  { %7419 = vmatmul.mubr.msk.bf16.gmra.mrb[92].mxu1 %vm1214_vm1, %v11320_v40 }
 0xd85   :  { %5049 = vmatprep.mubr.bf16.mxu1 %v13677_v14 }
 0xddf   :  { %v11325_v53 = vpop.f32.mrb[32].mxu1 }
 0xde0   :  { %v11327_v59 = vpop.f32.mrb[33].mxu1 }
 0xde1   :  { %v4654_v3 = vmax.f32 %v11325_v53, %v11327_v59  ;;  %v11331_v36 = vpop.f32.mrb[34].mxu1 }
 0xde2   :  { %v11333_v51 = vpop.f32.mrb[35].mxu1 }
 0xde3   :  { %v4657_v13 = vmax.f32 %v11331_v36, %v11333_v51  ;;  %4655 = vmax.xlane.f32.xlu0 %v4654_v3 }
 0xde5   :  { %4658 = vmax.xlane.f32.xlu1 %v4657_v13 }
 0xde7   :  { %v11337_v57 = vpop.f32.mrb[36].mxu1 }
 0xde8   :  { %v11339_v38 = vpop.f32.mrb[37].mxu1 }
 0xde9   :  { %v4660_v8 = vmax.f32 %v11337_v57, %v11339_v38  ;;  %v11343_v33 = vpop.f32.mrb[38].mxu1 }
 0xdea   :  { %v11345_v47 = vpop.f32.mrb[39].mxu1 }
 0xdeb   :  { %v4663_v49 = vmax.f32 %v11343_v33, %v11345_v47  ;;  %4661 = vmax.xlane.f32.xlu0 %v4660_v8 }
 0xded   :  { %4664 = vmax.xlane.f32.xlu1 %v4663_v49 }
 0xdef   :  { %v11349_v16 = vpop.f32.mrb[40].mxu1 }
 0xdf0   :  { %v11351_v3 = vpop.f32.mrb[41].mxu1 }
 0xdf1   :  { %v4666_v13 = vmax.f32 %v11349_v16, %v11351_v3  ;;  %v11355_v39 = vpop.f32.mrb[42].mxu1 }
 0xdf2   :  { %v11357_v62 = vpop.f32.mrb[43].mxu1 }
 0xdf3   :  { %v4669_v9 = vmax.f32 %v11355_v39, %v11357_v62  ;;  %4667 = vmax.xlane.f32.xlu0 %v4666_v13 }
 0xdf5   :  { %4670 = vmax.xlane.f32.xlu1 %v4669_v9 }
 0xdf7   :  { %v11361_v60 = vpop.f32.mrb[44].mxu1 }
 0xdf8   :  { %v11363_v8 = vpop.f32.mrb[45].mxu1 }
 0xdf9   :  { %v4672_v49 = vmax.f32 %v11361_v60, %v11363_v8  ;;  %v11367_v18 = vpop.f32.mrb[46].mxu1 }
 0xdfa   :  { %v11369_v55 = vpop.f32.mrb[47].mxu1 }
 0xdfb   :  { %v4675_v37 = vmax.f32 %v11367_v18, %v11369_v55  ;;  %4673 = vmax.xlane.f32.xlu0 %v4672_v49 }
 0xdfd   :  { %4676 = vmax.xlane.f32.xlu1 %v4675_v37 }
 0xdff   :  { %v11373_v20 = vpop.f32.mrb[48].mxu1 }
 0xe00   :  { %v11375_v13 = vpop.f32.mrb[49].mxu1 }
 0xe01   :  { %v4678_v9 = vmax.f32 %v11373_v20, %v11375_v13  ;;  %v11379_v43 = vpop.f32.mrb[50].mxu1 }
 0xe02   :  { %v11381_v1 = vpop.f32.mrb[51].mxu1 }
 0xe03   :  { %v4681_v21 = vmax.f32 %v11379_v43, %v11381_v1  ;;  %4679 = vmax.xlane.f32.xlu0 %v4678_v9 }
 0xe05   :  { %4682 = vmax.xlane.f32.xlu1 %v4681_v21 }
 0xe07   :  { %v11385_v15 = vpop.f32.mrb[52].mxu1 }
 0xe08   :  { %v11387_v49 = vpop.f32.mrb[53].mxu1 }
 0xe09   :  { %v4684_v37 = vmax.f32 %v11385_v15, %v11387_v49  ;;  %v11391_v52 = vpop.f32.mrb[54].mxu1 }
 0xe0a   :  { %v11393_v63 = vpop.f32.mrb[55].mxu1 }
 0xe0b   :  { %v4687_v11 = vmax.f32 %v11391_v52, %v11393_v63  ;;  %4685 = vmax.xlane.f32.xlu0 %v4684_v37 }
 0xe0d   :  { %4688 = vmax.xlane.f32.xlu1 %v4687_v11 }
 0xe0f   :  { %v11397_v12 = vpop.f32.mrb[56].mxu1 }
 0xe10   :  { %v11399_v9 = vpop.f32.mrb[57].mxu1 }
 0xe11   :  { %v4690_v21 = vmax.f32 %v11397_v12, %v11399_v9  ;;  %v11403_v6 = vpop.f32.mrb[58].mxu1 }
 0xe12   :  { %v11405_v23 = vpop.f32.mrb[59].mxu1 }
 0xe13   :  { %v4693_v34 = vmax.f32 %v11403_v6, %v11405_v23  ;;  %4691 = vmax.xlane.f32.xlu0 %v4690_v21 }
 0xe15   :  { %4694 = vmax.xlane.f32.xlu1 %v4693_v34 }
 0xe17   :  { %v11409_v35 = vpop.f32.mrb[60].mxu1 }
 0xe18   :  { %v11411_v37 = vpop.f32.mrb[61].mxu1 }
 0xe19   :  { %v4696_v11 = vmax.f32 %v11409_v35, %v11411_v37  ;;  %v11415_v22 = vpop.f32.mrb[62].mxu1 }
 0xe1a   :  { %v11417_v7 = vpop.f32.mrb[63].mxu1 }
 0xe1b   :  { %v4699_v30 = vmax.f32 %v11415_v22, %v11417_v7  ;;  %4697 = vmax.xlane.f32.xlu0 %v4696_v11 }
 0xe1d   :  { %4700 = vmax.xlane.f32.xlu1 %v4699_v30 }
 0xe1f   :  { %v11421_v29 = vpop.f32.mrb[64].mxu1 }
 0xe20   :  { %v11423_v21 = vpop.f32.mrb[65].mxu1 }
 0xe21   :  { %v4702_v34 = vmax.f32 %v11421_v29, %v11423_v21  ;;  %v11427_v32 = vpop.f32.mrb[66].mxu1 }
 0xe22   :  { %v11429_v19 = vpop.f32.mrb[67].mxu1 }
 0xe23   :  { %v4705_v42 = vmax.f32 %v11427_v32, %v11429_v19  ;;  %4703 = vmax.xlane.f32.xlu0 %v4702_v34 }
 0xe25   :  { %4706 = vmax.xlane.f32.xlu1 %v4705_v42 }
 0xe27   :  { %v11433_v27 = vpop.f32.mrb[68].mxu1 }
 0xe28   :  { %v11435_v11 = vpop.f32.mrb[69].mxu1 }
 0xe29   :  { %13758 = vst [vmem:[#allocation68_spill] sm:$0xff] %v11435_v11  ;;  %v4708_v30 = vmax.f32 %v11433_v27, %v11435_v11  ;;  %v11439_v41 = vpop.f32.mrb[70].mxu1 }
 0xe2a   :  { %13759 = vst [vmem:[#allocation5_spill] sm:$0xff] %v11439_v41  ;;  %v11441_v46 = vpop.f32.mrb[71].mxu1 }
 0xe2b   :  { %13760 = vst [vmem:[#allocation7_spill] sm:$0xff] %v11441_v46  ;;  %v4711_v14 = vmax.f32 %v11439_v41, %v11441_v46  ;;  %4709 = vmax.xlane.f32.xlu0 %v4708_v30 }
 0xe2d   :  { %4712 = vmax.xlane.f32.xlu1 %v4711_v14 }
 0xe2f   :  { %v11445_v5 = vpop.f32.mrb[72].mxu1 }
 0xe30   :  { %13761 = vst [vmem:[#allocation6_spill] sm:$0xff] %v11445_v5  ;;  %v11447_v34 = vpop.f32.mrb[73].mxu1 }
 0xe31   :  { %13762 = vst [vmem:[#allocation50_spill] sm:$0xff] %v11447_v34  ;;  %v4714_v42 = vmax.f32 %v11445_v5, %v11447_v34  ;;  %v11451_v61 = vpop.f32.mrb[74].mxu1 }
 0xe32   :  { %13763 = vst [vmem:[#allocation51_spill] sm:$0xff] %v11451_v61  ;;  %v11453_v44 = vpop.f32.mrb[75].mxu1 }
 0xe33   :  { %13764 = vst [vmem:[#allocation9_spill] sm:$0xff] %v11453_v44  ;;  %v4717_v50 = vmax.f32 %v11451_v61, %v11453_v44  ;;  %4715 = vmax.xlane.f32.xlu0 %v4714_v42 }
 0xe35   :  { %4718 = vmax.xlane.f32.xlu1 %v4717_v50 }
 0xe37   :  { %v11457_v11 = vpop.f32.mrb[76].mxu1 }
 0xe38   :  { %13765 = vst [vmem:[#allocation12_spill] sm:$0xff] %v11457_v11  ;;  %v11459_v30 = vpop.f32.mrb[77].mxu1 }
 0xe39   :  { %13766 = vst [vmem:[#allocation8_spill] sm:$0xff] %v11459_v30  ;;  %v4720_v14 = vmax.f32 %v11457_v11, %v11459_v30  ;;  %v11463_v46 = vpop.f32.mrb[78].mxu1 }
 0xe3a   :  { %13767 = vst [vmem:[#allocation11_spill] sm:$0xff] %v11463_v46  ;;  %v11465_v41 = vpop.f32.mrb[79].mxu1 }
 0xe3b   :  { %13768 = vst [vmem:[#allocation14_spill] sm:$0xff] %v11465_v41  ;;  %v4723_v34 = vmax.f32 %v11463_v46, %v11465_v41  ;;  %4721 = vmax.xlane.f32.xlu0 %v4720_v14 }
 0xe3d   :  { %4724 = vmax.xlane.f32.xlu1 %v4723_v34 }
 0xe3f   :  { %v11469_v5 = vpop.f32.mrb[80].mxu1 }
 0xe40   :  { %13769 = vst [vmem:[#allocation13_spill] sm:$0xff] %v11469_v5  ;;  %v11471_v42 = vpop.f32.mrb[81].mxu1 }
 0xe41   :  { %13770 = vst [vmem:[#allocation49_spill] sm:$0xff] %v11471_v42  ;;  %v4726_v50 = vmax.f32 %v11469_v5, %v11471_v42  ;;  %v11475_v44 = vpop.f32.mrb[82].mxu1 }
 0xe42   :  { %13771 = vst [vmem:[#allocation48_spill] sm:$0xff] %v11475_v44  ;;  %v11477_v61 = vpop.f32.mrb[83].mxu1 }
 0xe43   :  { %13772 = vst [vmem:[#allocation69_spill] sm:$0xff] %v11477_v61  ;;  %v4729_v30 = vmax.f32 %v11475_v44, %v11477_v61  ;;  %4727 = vmax.xlane.f32.xlu0 %v4726_v50 }
 0xe45   :  { %4730 = vmax.xlane.f32.xlu1 %v4729_v30 }
 0xe47   :  { %v11481_v11 = vpop.f32.mrb[84].mxu1 }
 0xe48   :  { %13773 = vst [vmem:[#allocation70_spill] sm:$0xff] %v11481_v11  ;;  %v11483_v14 = vpop.f32.mrb[85].mxu1 }
 0xe49   :  { %13774 = vst [vmem:[#allocation30_spill] sm:$0xff] %v11483_v14  ;;  %v4732_v34 = vmax.f32 %v11481_v11, %v11483_v14  ;;  %v11487_v41 = vpop.f32.mrb[86].mxu1 }
 0xe4a   :  { %13775 = vst [vmem:[#allocation71_spill] sm:$0xff] %v11487_v41  ;;  %v11489_v46 = vpop.f32.mrb[87].mxu1 }
 0xe4b   :  { %13776 = vst [vmem:[#allocation16_spill] sm:$0xff] %v11489_v46  ;;  %v4735_v42 = vmax.f32 %v11487_v41, %v11489_v46  ;;  %4733 = vmax.xlane.f32.xlu0 %v4732_v34 }
 0xe4d   :  { %4736 = vmax.xlane.f32.xlu1 %v4735_v42 }
 0xe4f   :  { %v11493_v5 = vpop.f32.mrb[88].mxu1 }
 0xe50   :  { %v11495_v50 = vpop.f32.mrb[89].mxu1 }
 0xe51   :  { %13777 = vst [vmem:[#allocation15_spill] sm:$0xff] %v11495_v50  ;;  %v4738_v30 = vmax.f32 %v11493_v5, %v11495_v50  ;;  %v11499_v61 = vpop.f32.mrb[90].mxu1 }
 0xe52   :  { %v11501_v44 = vpop.f32.mrb[91].mxu1 }
 0xe53   :  { %13778 = vst [vmem:[#allocation18_spill] sm:$0xff] %v11501_v44  ;;  %v4741_v14 = vmax.f32 %v11499_v61, %v11501_v44  ;;  %4739 = vmax.xlane.f32.xlu0 %v4738_v30 }
 0xe55   :  { %4742 = vmax.xlane.f32.xlu1 %v4741_v14 }
 0xe57   :  { %v11505_v11 = vpop.f32.mrb[92].mxu1 }
 0xe58   :  { %13779 = vst [vmem:[#allocation17_spill] sm:$0xff] %v11505_v11  ;;  %v11507_v34 = vpop.f32.mrb[93].mxu1 }
 0xe59   :  { %13780 = vst [vmem:[#allocation19_spill] sm:$0xff] %v11507_v34  ;;  %v4744_v42 = vmax.f32 %v11505_v11, %v11507_v34  ;;  %v11511_v46 = vpop.f32.mrb[94].mxu1 }
 0xe5a   :  { %13781 = vst [vmem:[#allocation20_spill] sm:$0xff] %v11511_v46  ;;  %v11513_v41 = vpop.f32.mrb[95].mxu1 }
 0xe5b   :  { %13782 = vst [vmem:[#allocation21_spill] sm:$0xff] %v11513_v41  ;;  %v4747_v50 = vmax.f32 %v11511_v46, %v11513_v41  ;;  %4745 = vmax.xlane.f32.xlu0 %v4744_v42 }
 0xe5d   :  { %4748 = vmax.xlane.f32.xlu1 %v4747_v50 }
 0xe6e   :  { %5095 = vrot.lane.b32.xlu1 %v11218_v31, %s8649_s13 }
 0xe70   :  { %v4656_v14 = vpop.xlane.xlu0 %4655 }
 0xe71   :  { %v4750_v30 = vsub.f32 %v11325_v53, %v4656_v14  ;;  %v4751_v44 = vsub.f32 %v11327_v59, %v4656_v14  ;;  %5093 = vrot.lane.b32.xlu0 %v11213_v45, %s8649_s13 }
 0xe72   :  { %v4659_v34 = vpop.xlane.xlu1 %4658  ;;  %5097 = vrot.lane.b32.xlu1 %v11223_v24, %s8649_s13 }
 0xe73   :  { %v4814_v11 = vmul.f32 1.442695, %v4750_v30  ;;  %v4752_v41 = vsub.f32 %v11331_v36, %v4659_v34  ;;  %v4753_v50 = vsub.f32 %v11333_v51, %v4659_v34  ;;  %v4816_v42 = vmul.f32 1.442695, %v4751_v44 }
 0xe75   :  { %v4818_v46 = vmul.f32 1.442695, %v4752_v41  ;;  %v4820_v31 = vmul.f32 1.442695, %v4753_v50  ;;  %5099 = vrot.lane.b32.xlu0 %v11228_v10, %s8649_s13  ;;  %8072 = vpow2.f32 %v4814_v11 }
 0xe76   :  { %5101 = vrot.lane.b32.xlu1 %v11233_v2, %s8649_s13 }
 0xe77   :  { %8074 = vpow2.f32 %v4818_v46 }
 0xe78   :  { %8076 = vpow2.f32 %v4820_v31  ;;  %v4662_v59 = vpop.xlane.xlu0 %4661 }
 0xe79   :  { %8078 = vpow2.f32 %v4816_v42  ;;  %v4754_v53 = vsub.f32 %v11337_v57, %v4662_v59  ;;  %v4755_v36 = vsub.f32 %v11339_v38, %v4662_v59  ;;  %5103 = vrot.lane.b32.xlu0 %v11238_v48, %s8649_s13 }
 0xe7a   :  { %v4665_v41 = vpop.xlane.xlu1 %4664  ;;  %5105 = vrot.lane.b32.xlu1 %v11243_v17, %s8649_s13 }
 0xe7b   :  { %v4822_v44 = vmul.f32 1.442695, %v4754_v53  ;;  %v4756_v51 = vsub.f32 %v11343_v33, %v4665_v41  ;;  %v4757_v11 = vsub.f32 %v11345_v47, %v4665_v41  ;;  %v4824_v46 = vmul.f32 1.442695, %v4755_v36 }
 0xe7d   :  { %v4826_v31 = vmul.f32 1.442695, %v4756_v51  ;;  %v4828_v34 = vmul.f32 1.442695, %v4757_v11  ;;  %5107 = vrot.lane.b32.xlu0 %v11248_v4, %s8649_s13  ;;  %8080 = vpow2.f32 %v4822_v44 }
 0xe7e   :  { %5109 = vrot.lane.b32.xlu1 %v11253_v28, %s8649_s13 }
 0xe7f   :  { %8082 = vpow2.f32 %v4826_v31  ;;  %v8073_v38 = vpop.eup %8072 }
 0xe80   :  { %8084 = vpow2.f32 %v4828_v34  ;;  %v4668_v57 = vpop.xlane.xlu0 %4667 }
 0xe81   :  { %v8075_v14 = vpop.eup %8074  ;;  %8086 = vpow2.f32 %v4824_v46  ;;  %v4758_v33 = vsub.f32 %v11349_v16, %v4668_v57  ;;  %v4759_v47 = vsub.f32 %v11351_v3, %v4668_v57  ;;  %5111 = vrot.lane.b32.xlu0 %v11258_v58, %s8649_s13 }
 0xe82   :  { %v8077_v30 = vpop.eup %8076  ;;  %v4671_v50 = vpop.xlane.xlu1 %4670  ;;  %5113 = vrot.lane.b32.xlu1 %v11263_v26, %s8649_s13  ;;  %v4942_v42 = vpack.c.bf16 %v8075_v14, %v8073_v38 }
 0xe83   :  { %v8079_v59 = vpop.eup %8078  ;;  %v4830_v53 = vmul.f32 1.442695, %v4758_v33  ;;  %v4760_v36 = vsub.f32 %v11355_v39, %v4671_v50  ;;  %v4761_v41 = vsub.f32 %v11357_v62, %v4671_v50  ;;  %v4832_v51 = vmul.f32 1.442695, %v4759_v47 }
 0xe84   :  { %v4943_v44 = vpack.c.bf16 %v8077_v30, %v8079_v59 }
 0xe85   :  { %v4834_v16 = vmul.f32 1.442695, %v4760_v36  ;;  %v4836_v11 = vmul.f32 1.442695, %v4761_v41  ;;  %5115 = vrot.lane.b32.xlu0 %v11276_v0, %s8649_s13  ;;  %8088 = vpow2.f32 %v4830_v53 }
 0xe86   :  { %4974 = vmatprep.subr.bf16.mxu0 %v4943_v44  ;;  %5017 = vmatprep.subr.bf16.mxu1 %v4943_v44 }
 0xe87   :  { %8090 = vpow2.f32 %v4834_v16  ;;  %4975 = vmatpush1.bf16.xpose.msra.mxu0 %v4942_v42  ;;  %5018 = vmatpush1.bf16.xpose.msra.mxu1 %v4942_v42  ;;  %v8081_v3 = vpop.eup %8080 }
 0xe88   :  { %8092 = vpow2.f32 %v4836_v11  ;;  %5117 = vrot.lane.b32.xlu1 %v11289_v56, %s8649_s13  ;;  %v4674_v39 = vpop.xlane.xlu0 %4673 }
 0xe89   :  { %v8083_v62 = vpop.eup %8082  ;;  %8094 = vpow2.f32 %v4832_v51  ;;  %v4762_v46 = vsub.f32 %v11361_v60, %v4674_v39  ;;  %v4763_v31 = vsub.f32 %v11363_v8, %v4674_v39  ;;  %5119 = vrot.lane.b32.xlu0 %v11302_v25, %s8649_s13 }
 0xe8a   :  { %v8085_v34 = vpop.eup %8084  ;;  %v4677_v38 = vpop.xlane.xlu1 %4676  ;;  %v4944_v57 = vpack.c.bf16 %v8083_v62, %v8081_v3 }
 0xe8b   :  { %v8087_v14 = vpop.eup %8086  ;;  %v4838_v33 = vmul.f32 1.442695, %v4762_v46  ;;  %v4764_v47 = vsub.f32 %v11367_v18, %v4677_v38  ;;  %v4765_v30 = vsub.f32 %v11369_v55, %v4677_v38  ;;  %v4840_v42 = vmul.f32 1.442695, %v4763_v31 }
 0xe8c   :  { %5121 = vrot.lane.b32.xlu1 %v11315_v54, %s8649_s13  ;;  %v4945_v50 = vpack.c.bf16 %v8085_v34, %v8087_v14 }
 0xe8d   :  { %v4842_v60 = vmul.f32 1.442695, %v4764_v47  ;;  %v4844_v59 = vmul.f32 1.442695, %v4765_v30  ;;  %5123 = vrot.lane.b32.xlu0 %v11320_v40, %s8649_s13  ;;  %8096 = vpow2.f32 %v4838_v33 }
 0xe8e   :  { %4976 = vmatprep.subr.bf16.mxu0 %v4945_v50  ;;  %5019 = vmatprep.subr.bf16.mxu1 %v4945_v50 }
 0xe8f   :  { %8098 = vpow2.f32 %v4842_v60  ;;  %4977 = vmatpush1.bf16.xpose.msra.mxu0 %v4944_v57  ;;  %5020 = vmatpush1.bf16.xpose.msra.mxu1 %v4944_v57  ;;  %v8089_v8 = vpop.eup %8088 }
 0xe90   :  { %8100 = vpow2.f32 %v4844_v59  ;;  %v4680_v18 = vpop.xlane.xlu0 %4679 }
 0xe91   :  { %v8091_v55 = vpop.eup %8090  ;;  %8102 = vpow2.f32 %v4840_v42  ;;  %v4766_v53 = vsub.f32 %v11373_v20, %v4680_v18  ;;  %v4767_v36 = vsub.f32 %v11375_v13, %v4680_v18 }
 0xe92   :  { %v8093_v41 = vpop.eup %8092  ;;  %v4683_v44 = vpop.xlane.xlu1 %4682  ;;  %v4946_v51 = vpack.c.bf16 %v8091_v55, %v8089_v8 }
 0xe93   :  { %v8095_v16 = vpop.eup %8094  ;;  %v4846_v11 = vmul.f32 1.442695, %v4766_v53  ;;  %v4768_v3 = vsub.f32 %v11379_v43, %v4683_v44  ;;  %v4769_v39 = vsub.f32 %v11381_v1, %v4683_v44  ;;  %v4848_v46 = vmul.f32 1.442695, %v4767_v36 }
 0xe94   :  { %v4947_v62 = vpack.c.bf16 %v8093_v41, %v8095_v16 }
 0xe95   :  { %v4850_v31 = vmul.f32 1.442695, %v4768_v3  ;;  %v4852_v34 = vmul.f32 1.442695, %v4769_v39  ;;  %8104 = vpow2.f32 %v4846_v11 }
 0xe96   :  { %4978 = vmatprep.subr.bf16.mxu0 %v4947_v62  ;;  %5021 = vmatprep.subr.bf16.mxu1 %v4947_v62 }
 0xe97   :  { %8106 = vpow2.f32 %v4850_v31  ;;  %4979 = vmatpush1.bf16.xpose.msra.mxu0 %v4946_v51  ;;  %5022 = vmatpush1.bf16.xpose.msra.mxu1 %v4946_v51  ;;  %v8097_v20 = vpop.eup %8096 }
 0xe98   :  { %8108 = vpow2.f32 %v4852_v34  ;;  %v4686_v13 = vpop.xlane.xlu0 %4685 }
 0xe99   :  { %v8099_v38 = vpop.eup %8098  ;;  %8110 = vpow2.f32 %v4848_v46  ;;  %v4770_v57 = vsub.f32 %v11385_v15, %v4686_v13  ;;  %v4771_v43 = vsub.f32 %v11387_v49, %v4686_v13 }
 0xe9a   :  { %v8101_v1 = vpop.eup %8100  ;;  %v4689_v14 = vpop.xlane.xlu1 %4688  ;;  %v4948_v33 = vpack.c.bf16 %v8099_v38, %v8097_v20 }
 0xe9b   :  { %v8103_v47 = vpop.eup %8102  ;;  %v4854_v30 = vmul.f32 1.442695, %v4770_v57  ;;  %v4772_v50 = vsub.f32 %v11391_v52, %v4689_v14  ;;  %v4773_v42 = vsub.f32 %v11393_v63, %v4689_v14  ;;  %v4856_v59 = vmul.f32 1.442695, %v4771_v43 }
 0xe9c   :  { %v4949_v60 = vpack.c.bf16 %v8101_v1, %v8103_v47 }
 0xe9d   :  { %v4858_v8 = vmul.f32 1.442695, %v4772_v50  ;;  %v4860_v18 = vmul.f32 1.442695, %v4773_v42  ;;  %8112 = vpow2.f32 %v4854_v30 }
 0xe9e   :  { %4980 = vmatprep.subr.bf16.mxu0 %v4949_v60  ;;  %5023 = vmatprep.subr.bf16.mxu1 %v4949_v60 }
 0xe9f   :  { %8114 = vpow2.f32 %v4858_v8  ;;  %4981 = vmatpush1.bf16.xpose.msra.mxu0 %v4948_v33  ;;  %5024 = vmatpush1.bf16.xpose.msra.mxu1 %v4948_v33  ;;  %v8105_v15 = vpop.eup %8104 }
 0xea0   :  { %8116 = vpow2.f32 %v4860_v18  ;;  %v4692_v49 = vpop.xlane.xlu0 %4691 }
 0xea1   :  { %v8107_v55 = vpop.eup %8106  ;;  %8118 = vpow2.f32 %v4856_v59  ;;  %v4774_v53 = vsub.f32 %v11397_v12, %v4692_v49  ;;  %v4775_v52 = vsub.f32 %v11399_v9, %v4692_v49 }
 0xea2   :  { %v8109_v63 = vpop.eup %8108  ;;  %v4695_v36 = vpop.xlane.xlu1 %4694  ;;  %v4950_v41 = vpack.c.bf16 %v8107_v55, %v8105_v15 }
 0xea3   :  { %v8111_v44 = vpop.eup %8110  ;;  %v4862_v51 = vmul.f32 1.442695, %v4774_v53  ;;  %v4776_v16 = vsub.f32 %v11403_v6, %v4695_v36  ;;  %v4777_v11 = vsub.f32 %v11405_v23, %v4695_v36  ;;  %v4864_v39 = vmul.f32 1.442695, %v4775_v52 }
 0xea4   :  { %v4951_v3 = vpack.c.bf16 %v8109_v63, %v8111_v44 }
 0xea5   :  { %v4866_v62 = vmul.f32 1.442695, %v4776_v16  ;;  %v4868_v46 = vmul.f32 1.442695, %v4777_v11  ;;  %8120 = vpow2.f32 %v4862_v51 }
 0xea6   :  { %4982 = vmatprep.subr.bf16.mxu0 %v4951_v3  ;;  %5025 = vmatprep.subr.bf16.mxu1 %v4951_v3 }
 0xea7   :  { %8122 = vpow2.f32 %v4866_v62  ;;  %4983 = vmatpush1.bf16.xpose.msra.mxu0 %v4950_v41  ;;  %5026 = vmatpush1.bf16.xpose.msra.mxu1 %v4950_v41  ;;  %v8113_v12 = vpop.eup %8112 }
 0xea8   :  { %8124 = vpow2.f32 %v4868_v46  ;;  %v4698_v9 = vpop.xlane.xlu0 %4697  ;;  %v13785_v46 = vld [vmem:[#allocation7_spill] sm:$0xff] }
 0xea9   :  { %v8115_v31 = vpop.eup %8114  ;;  %8126 = vpow2.f32 %v4864_v39  ;;  %v4778_v34 = vsub.f32 %v11409_v35, %v4698_v9  ;;  %v4779_v6 = vsub.f32 %v11411_v37, %v4698_v9  ;;  %v13784_v39 = vld [vmem:[#allocation5_spill] sm:$0xff] }
 0xeaa   :  { %v8117_v23 = vpop.eup %8116  ;;  %v4701_v20 = vpop.xlane.xlu1 %4700  ;;  %v4952_v13 = vpack.c.bf16 %v8115_v31, %v8113_v12 }
 0xeab   :  { %v8119_v38 = vpop.eup %8118  ;;  %v4870_v57 = vmul.f32 1.442695, %v4778_v34  ;;  %v4780_v43 = vsub.f32 %v11415_v22, %v4701_v20  ;;  %v4781_v1 = vsub.f32 %v11417_v7, %v4701_v20  ;;  %v4872_v33 = vmul.f32 1.442695, %v4779_v6 }
 0xeac   :  { %v4953_v14 = vpack.c.bf16 %v8117_v23, %v8119_v38 }
 0xead   :  { %v4874_v47 = vmul.f32 1.442695, %v4780_v43  ;;  %v4876_v30 = vmul.f32 1.442695, %v4781_v1  ;;  %8128 = vpow2.f32 %v4870_v57  ;;  %v13787_v57 = vld [vmem:[#allocation50_spill] sm:$0xff] }
 0xeae   :  { %4984 = vmatprep.subr.bf16.mxu0 %v4953_v14  ;;  %5027 = vmatprep.subr.bf16.mxu1 %v4953_v14 }
 0xeaf   :  { %8130 = vpow2.f32 %v4874_v47  ;;  %4985 = vmatpush1.bf16.xpose.msra.mxu0 %v4952_v13  ;;  %5028 = vmatpush1.bf16.xpose.msra.mxu1 %v4952_v13  ;;  %v8121_v35 = vpop.eup %8120  ;;  %v13786_v13 = vld [vmem:[#allocation6_spill] sm:$0xff] }
 0xeb0   :  { %8132 = vpow2.f32 %v4876_v30  ;;  %v4704_v37 = vpop.xlane.xlu0 %4703 }
 0xeb1   :  { %v8123_v50 = vpop.eup %8122  ;;  %8134 = vpow2.f32 %v4872_v33  ;;  %v4782_v42 = vsub.f32 %v11421_v29, %v4704_v37  ;;  %v4783_v22 = vsub.f32 %v11423_v21, %v4704_v37 }
 0xeb2   :  { %v8125_v7 = vpop.eup %8124  ;;  %v4707_v60 = vpop.xlane.xlu1 %4706  ;;  %v4954_v59 = vpack.c.bf16 %v8123_v50, %v8121_v35  ;;  %v13788_v35 = vld [vmem:[#allocation51_spill] sm:$0xff]  ;;  %v13789_v50 = vld [vmem:[#allocation9_spill] sm:$0xff] }
 0xeb3   :  { %v8127_v8 = vpop.eup %8126  ;;  %v4878_v18 = vmul.f32 1.442695, %v4782_v42  ;;  %v4784_v15 = vsub.f32 %v11427_v32, %v4707_v60  ;;  %v4785_v49 = vsub.f32 %v11429_v19, %v4707_v60  ;;  %v4880_v53 = vmul.f32 1.442695, %v4783_v22  ;;  %v13783_v32 = vld [vmem:[#allocation68_spill] sm:$0xff] }
 0xeb4   :  { %v4955_v55 = vpack.c.bf16 %v8125_v7, %v8127_v8 }
 0xeb5   :  { %v4882_v52 = vmul.f32 1.442695, %v4784_v15  ;;  %v4884_v63 = vmul.f32 1.442695, %v4785_v49  ;;  %8136 = vpow2.f32 %v4878_v18  ;;  %v13790_v49 = vld [vmem:[#allocation12_spill] sm:$0xff] }
 0xeb6   :  { %4986 = vmatprep.subr.bf16.mxu0 %v4955_v55  ;;  %5029 = vmatprep.subr.bf16.mxu1 %v4955_v55 }
 0xeb7   :  { %8138 = vpow2.f32 %v4882_v52  ;;  %4987 = vmatpush1.bf16.xpose.msra.mxu0 %v4954_v59  ;;  %5030 = vmatpush1.bf16.xpose.msra.mxu1 %v4954_v59  ;;  %v8129_v29 = vpop.eup %8128 }
 0xeb8   :  { %8140 = vpow2.f32 %v4884_v63  ;;  %v4710_v21 = vpop.xlane.xlu0 %4709 }
 0xeb9   :  { %v8131_v36 = vpop.eup %8130  ;;  %8142 = vpow2.f32 %v4880_v53  ;;  %v4786_v41 = vsub.f32 %v11433_v27, %v4710_v21  ;;  %v4787_v44 = vsub.f32 %v13783_v32, %v4710_v21  ;;  %v13791_v53 = vld [vmem:[#allocation8_spill] sm:$0xff]  ;;  %v13792_v32 = vld [vmem:[#allocation11_spill] sm:$0xff] }
 0xeba   :  { %v8133_v19 = vpop.eup %8132  ;;  %v4713_v51 = vpop.xlane.xlu1 %4712  ;;  %v4956_v16 = vpack.c.bf16 %v8131_v36, %v8129_v29 }
 0xebb   :  { %v8135_v11 = vpop.eup %8134  ;;  %v4886_v3 = vmul.f32 1.442695, %v4786_v41  ;;  %v4788_v62 = vsub.f32 %v13784_v39, %v4713_v51  ;;  %v4789_v12 = vsub.f32 %v13785_v46, %v4713_v51  ;;  %v4888_v31 = vmul.f32 1.442695, %v4787_v44 }
 0xebc   :  { %v4957_v9 = vpack.c.bf16 %v8133_v19, %v8135_v11  ;;  %v13793_v19 = vld [vmem:[#allocation14_spill] sm:$0xff] }
 0xebd   :  { %v4890_v34 = vmul.f32 1.442695, %v4788_v62  ;;  %v4892_v6 = vmul.f32 1.442695, %v4789_v12  ;;  %8144 = vpow2.f32 %v4886_v3 }
 0xebe   :  { %4988 = vmatprep.subr.bf16.mxu0 %v4957_v9  ;;  %5031 = vmatprep.subr.bf16.mxu1 %v4957_v9  ;;  %v13794_v9 = vld [vmem:[#allocation13_spill] sm:$0xff] }
 0xebf   :  { %8146 = vpow2.f32 %v4890_v34  ;;  %4989 = vmatpush1.bf16.xpose.msra.mxu0 %v4956_v16  ;;  %5032 = vmatpush1.bf16.xpose.msra.mxu1 %v4956_v16  ;;  %v8137_v27 = vpop.eup %8136  ;;  %v13795_v34 = vld [vmem:[#allocation49_spill] sm:$0xff] }
 0xec0   :  { %8148 = vpow2.f32 %v4892_v6  ;;  %v4716_v23 = vpop.xlane.xlu0 %4715 }
 0xec1   :  { %v8139_v20 = vpop.eup %8138  ;;  %8150 = vpow2.f32 %v4888_v31  ;;  %v4790_v38 = vsub.f32 %v13786_v13, %v4716_v23  ;;  %v4791_v43 = vsub.f32 %v13787_v57, %v4716_v23  ;;  %v13796_v57 = vld [vmem:[#allocation48_spill] sm:$0xff] }
 0xec2   :  { %v8141_v1 = vpop.eup %8140  ;;  %v4719_v14 = vpop.xlane.xlu1 %4718  ;;  %v4958_v33 = vpack.c.bf16 %v8139_v20, %v8137_v27 }
 0xec3   :  { %v8143_v47 = vpop.eup %8142  ;;  %v4894_v30 = vmul.f32 1.442695, %v4790_v38  ;;  %v4792_v37 = vsub.f32 %v13788_v35, %v4719_v14  ;;  %v4793_v42 = vsub.f32 %v13789_v50, %v4719_v14  ;;  %v4896_v7 = vmul.f32 1.442695, %v4791_v43 }
 0xec4   :  { %v4959_v22 = vpack.c.bf16 %v8141_v1, %v8143_v47  ;;  %v13797_v1 = vld [vmem:[#allocation69_spill] sm:$0xff] }
 0xec5   :  { %v4898_v60 = vmul.f32 1.442695, %v4792_v37  ;;  %v4900_v59 = vmul.f32 1.442695, %v4793_v42  ;;  %8152 = vpow2.f32 %v4894_v30 }
 0xec6   :  { %4990 = vmatprep.subr.bf16.mxu0 %v4959_v22  ;;  %5033 = vmatprep.subr.bf16.mxu1 %v4959_v22  ;;  %v13798_v22 = vld [vmem:[#allocation70_spill] sm:$0xff] }
 0xec7   :  { %8154 = vpow2.f32 %v4898_v60  ;;  %4991 = vmatpush1.bf16.xpose.msra.mxu0 %v4958_v33  ;;  %5034 = vmatpush1.bf16.xpose.msra.mxu1 %v4958_v33  ;;  %v8145_v8 = vpop.eup %8144  ;;  %v13799_v60 = vld [vmem:[#allocation30_spill] sm:$0xff] }
 0xec8   :  { %8156 = vpow2.f32 %v4900_v59  ;;  %v4722_v18 = vpop.xlane.xlu0 %4721 }
 0xec9   :  { %v8147_v15 = vpop.eup %8146  ;;  %8158 = vpow2.f32 %v4896_v7  ;;  %v4794_v55 = vsub.f32 %v13790_v49, %v4722_v18  ;;  %v4795_v52 = vsub.f32 %v13791_v53, %v4722_v18  ;;  %v13800_v53 = vld [vmem:[#allocation71_spill] sm:$0xff] }
 0xeca   :  { %v8149_v63 = vpop.eup %8148  ;;  %v4725_v29 = vpop.xlane.xlu1 %4724  ;;  %v4960_v21 = vpack.c.bf16 %v8147_v15, %v8145_v8 }
 0xecb   :  { %v8151_v36 = vpop.eup %8150  ;;  %v4902_v41 = vmul.f32 1.442695, %v4794_v55  ;;  %v4796_v44 = vsub.f32 %v13792_v32, %v4725_v29  ;;  %v4797_v51 = vsub.f32 %v13793_v19, %v4725_v29  ;;  %v4904_v11 = vmul.f32 1.442695, %v4795_v52 }
 0xecc   :  { %v4961_v16 = vpack.c.bf16 %v8149_v63, %v8151_v36  ;;  %v13801_v63 = vld [vmem:[#allocation16_spill] sm:$0xff] }
 0xecd   :  { %v4906_v3 = vmul.f32 1.442695, %v4796_v44  ;;  %v4908_v39 = vmul.f32 1.442695, %v4797_v51  ;;  %8160 = vpow2.f32 %v4902_v41 }
 0xece   :  { %4992 = vmatprep.subr.bf16.mxu0 %v4961_v16  ;;  %5035 = vmatprep.subr.bf16.mxu1 %v4961_v16 }
 0xecf   :  { %8162 = vpow2.f32 %v4906_v3  ;;  %4993 = vmatpush1.bf16.xpose.msra.mxu0 %v4960_v21  ;;  %5036 = vmatpush1.bf16.xpose.msra.mxu1 %v4960_v21  ;;  %v8153_v62 = vpop.eup %8152 }
 0xed0   :  { %8164 = vpow2.f32 %v4908_v39  ;;  %v4728_v46 = vpop.xlane.xlu0 %4727 }
 0xed1   :  { %v8155_v12 = vpop.eup %8154  ;;  %8166 = vpow2.f32 %v4904_v11  ;;  %v4798_v31 = vsub.f32 %v13794_v9, %v4728_v46  ;;  %v4799_v6 = vsub.f32 %v13795_v34, %v4728_v46  ;;  %v13802_v11 = vld [vmem:[#allocation15_spill] sm:$0xff] }
 0xed2   :  { %v8157_v27 = vpop.eup %8156  ;;  %v4731_v23 = vpop.xlane.xlu1 %4730  ;;  %v4962_v20 = vpack.c.bf16 %v8155_v12, %v8153_v62 }
 0xed3   :  { %v8159_v13 = vpop.eup %8158  ;;  %v4910_v38 = vmul.f32 1.442695, %v4798_v31  ;;  %v4800_v43 = vsub.f32 %v13796_v57, %v4731_v23  ;;  %v4801_v14 = vsub.f32 %v13797_v1, %v4731_v23  ;;  %v4912_v47 = vmul.f32 1.442695, %v4799_v6  ;;  %v13803_v6 = vld [vmem:[#allocation18_spill] sm:$0xff] }
 0xed4   :  { %v4963_v33 = vpack.c.bf16 %v8157_v27, %v8159_v13 }
 0xed5   :  { %v4914_v30 = vmul.f32 1.442695, %v4800_v43  ;;  %v4916_v35 = vmul.f32 1.442695, %v4801_v14  ;;  %8168 = vpow2.f32 %v4910_v38  ;;  %v13804_v43 = vld [vmem:[#allocation17_spill] sm:$0xff]  ;;  %v13805_v14 = vld [vmem:[#allocation19_spill] sm:$0xff] }
 0xed6   :  { %4994 = vmatprep.subr.bf16.mxu0 %v4963_v33  ;;  %5037 = vmatprep.subr.bf16.mxu1 %v4963_v33 }
 0xed7   :  { %8170 = vpow2.f32 %v4914_v30  ;;  %4995 = vmatpush1.bf16.xpose.msra.mxu0 %v4962_v20  ;;  %5038 = vmatpush1.bf16.xpose.msra.mxu1 %v4962_v20  ;;  %v8161_v37 = vpop.eup %8160 }
 0xed8   :  { %8172 = vpow2.f32 %v4916_v35  ;;  %v4734_v50 = vpop.xlane.xlu0 %4733 }
 0xed9   :  { %v8163_v42 = vpop.eup %8162  ;;  %8174 = vpow2.f32 %v4912_v47  ;;  %v4802_v7 = vsub.f32 %v13798_v22, %v4734_v50  ;;  %v4803_v59 = vsub.f32 %v13799_v60, %v4734_v50 }
 0xeda   :  { %v8165_v8 = vpop.eup %8164  ;;  %v4737_v18 = vpop.xlane.xlu1 %4736  ;;  %v4964_v15 = vpack.c.bf16 %v8163_v42, %v8161_v37  ;;  %v13806_v42 = vld [vmem:[#allocation20_spill] sm:$0xff] }
 0xedb   :  { %v8167_v49 = vpop.eup %8166  ;;  %v4918_v55 = vmul.f32 1.442695, %v4802_v7  ;;  %v4804_v52 = vsub.f32 %v13800_v53, %v4737_v18  ;;  %v4805_v29 = vsub.f32 %v13801_v63, %v4737_v18  ;;  %v4920_v36 = vmul.f32 1.442695, %v4803_v59  ;;  %v13807_v7 = vld [vmem:[#allocation21_spill] sm:$0xff] }
 0xedc   :  { %v4965_v21 = vpack.c.bf16 %v8165_v8, %v8167_v49 }
 0xedd   :  { %v4922_v41 = vmul.f32 1.442695, %v4804_v52  ;;  %v4924_v32 = vmul.f32 1.442695, %v4805_v29  ;;  %8176 = vpow2.f32 %v4918_v55 }
 0xede   :  { %4996 = vmatprep.subr.bf16.mxu0 %v4965_v21  ;;  %5039 = vmatprep.subr.bf16.mxu1 %v4965_v21 }
 0xedf   :  { %8178 = vpow2.f32 %v4922_v41  ;;  %4997 = vmatpush1.bf16.xpose.msra.mxu0 %v4964_v15  ;;  %5040 = vmatpush1.bf16.xpose.msra.mxu1 %v4964_v15  ;;  %v8169_v44 = vpop.eup %8168 }
 0xee0   :  { %8180 = vpow2.f32 %v4924_v32  ;;  %v4740_v19 = vpop.xlane.xlu0 %4739 }
 0xee1   :  { %v8171_v51 = vpop.eup %8170  ;;  %8182 = vpow2.f32 %v4920_v36  ;;  %v4806_v16 = vsub.f32 %v11493_v5, %v4740_v19  ;;  %v4807_v3 = vsub.f32 %v13802_v11, %v4740_v19  ;;  %v13808_v19 = vld [vmem:[#allocation42_spill] sm:$0xff]  ;;  %v13811_v11 = vld [vmem:[#allocation79_spill] sm:$0xff] }
 0xee2   :  { %v8173_v39 = vpop.eup %8172  ;;  %v4743_v62 = vpop.xlane.xlu1 %4742  ;;  %v4966_v46 = vpack.c.bf16 %v8171_v51, %v8169_v44  ;;  %v13809_v51 = vld [vmem:[#allocation40_spill] sm:$0xff] }
 0xee3   :  { %v8175_v12 = vpop.eup %8174  ;;  %v4926_v9 = vmul.f32 1.442695, %v4806_v16  ;;  %v4928_v31 = vmul.f32 1.442695, %v4807_v3  ;;  %v4808_v34 = vsub.f32 %v11499_v61, %v4743_v62  ;;  %v4809_v27 = vsub.f32 %v13803_v6, %v4743_v62  ;;  %v13812_v3 = vld [vmem:[#allocation78_spill] sm:$0xff] }
 0xee4   :  { %v4967_v23 = vpack.c.bf16 %v8173_v39, %v8175_v12  ;;  %v13810_v16 = vpack.c.bf16 %v13808_v19, %v13809_v51  ;;  %v13813_v39 = vpack.c.bf16 %v13811_v11, %v13812_v3  ;;  %v13814_v62 = vmov 1065369472   ;;  %v13816_v12 = vld [vmem:[#allocation41_spill] sm:$0xff] }
 0xee5   :  { %8184 = vpow2.f32 %v4926_v9  ;;  %v4930_v20 = vmul.f32 1.442695, %v4808_v34  ;;  %v4932_v13 = vmul.f32 1.442695, %v4809_v27  ;;  %v13819_v34 = vld [vmem:[#allocation77_spill] sm:$0xff]  ;;  %v13821_v27 = vmov 0  }
 0xee6   :  { %8186 = vpow2.f32 %v4928_v31  ;;  %4998 = vmatprep.subr.bf16.mxu0 %v4967_v23  ;;  %5041 = vmatprep.subr.bf16.mxu1 %v4967_v23  ;;  %v13818_v31 = vld [vmem:[#allocation80_spill] sm:$0xff] }
 0xee7   :  { %8188 = vpow2.f32 %v4930_v20  ;;  %4999 = vmatpush1.bf16.xpose.msra.mxu0 %v4966_v46  ;;  %5042 = vmatpush1.bf16.xpose.msra.mxu1 %v4966_v46  ;;  %v8177_v5 = vpop.eup %8176  ;;  %v13815_v46 = vld [vmem:[#allocation39_spill] sm:$0xff]  ;;  %v13820_v6 = vpack.c.bf16 %v13818_v31, %v13819_v34 }
 0xee8   :  { %8190 = vpow2.f32 %v4932_v13  ;;  %v4746_v38 = vpop.xlane.xlu0 %4745  ;;  %v13817_v9 = vpack.c.bf16 %v13815_v46, %v13816_v12 }
 0xee9   :  { %v8179_v57 = vpop.eup %8178  ;;  %v4810_v1 = vsub.f32 %v13804_v43, %v4746_v38  ;;  %v4811_v61 = vsub.f32 %v13805_v14, %v4746_v38 }
 0xeea   :  { %v8181_v33 = vpop.eup %8180  ;;  %v4749_v47 = vpop.xlane.xlu1 %4748  ;;  %v4968_v30 = vpack.c.bf16 %v8179_v57, %v8177_v5 }
 0xeeb   :  { %v8183_v35 = vpop.eup %8182  ;;  %v4934_v37 = vmul.f32 1.442695, %v4810_v1  ;;  %v4936_v50 = vmul.f32 1.442695, %v4811_v61  ;;  %v4812_v22 = vsub.f32 %v13806_v42, %v4749_v47  ;;  %v4813_v60 = vsub.f32 %v13807_v7, %v4749_v47 }
 0xeec   :  { %v4969_v59 = vpack.c.bf16 %v8181_v33, %v8183_v35  ;;  %v5094_v23 = vpop.permute.xlu0 %5093 }
 0xeed   :  { %8192 = vpow2.f32 %v4934_v37  ;;  %v4938_v8 = vmul.f32 1.442695, %v4812_v22  ;;  %v4940_v18 = vmul.f32 1.442695, %v4813_v60 }
 0xeee   :  { %8194 = vpow2.f32 %v4936_v50  ;;  %5000 = vmatprep.subr.bf16.mxu0 %v4969_v59  ;;  %5043 = vmatprep.subr.bf16.mxu1 %v4969_v59  ;;  %v5096_v20 = vpop.permute.xlu1 %5095 }
 0xeef   :  { %v8185_v15 = vpop.eup %8184  ;;  %8196 = vpow2.f32 %v4938_v8  ;;  %5001 = vmatpush1.bf16.xpose.msra.mxu0 %v4968_v30  ;;  %5044 = vmatpush1.bf16.xpose.msra.mxu1 %v4968_v30 }
 0xef0   :  { %v8187_v49 = vpop.eup %8186  ;;  %8198 = vpow2.f32 %v4940_v18  ;;  %v5100_v5 = vpop.permute.xlu0 %5099 }
 0xef1   :  { %v8189_v55 = vpop.eup %8188 }
 0xef2   :  { %v8191_v53 = vpop.eup %8190  ;;  %v4970_v52 = vpack.c.bf16 %v8189_v55, %v8185_v15  ;;  %v5098_v13 = vpop.permute.xlu1 %5097 }
 0xef3   :  { %v4971_v63 = vpack.c.bf16 %v8191_v53, %v8187_v49 }
 0xef4   :  { %v5104_v57 = vpop.permute.xlu0 %5103 }
 0xef5   :  { %5002 = vmatprep.subr.bf16.mxu0 %v4971_v63  ;;  %5045 = vmatprep.subr.bf16.mxu1 %v4971_v63 }
 0xef6   :  { %v5102_v38 = vpop.permute.xlu1 %5101 }
 0xef7   :  { %v8193_v29 = vpop.eup %8192  ;;  %5003 = vmatpush1.bf16.xpose.msra.mxu0 %v4970_v52  ;;  %5046 = vmatpush1.bf16.xpose.msra.mxu1 %v4970_v52 }
 0xef8   :  { %v8195_v21 = vpop.eup %8194  ;;  %v5108_v1 = vpop.permute.xlu0 %5107 }
 0xef9   :  { %v8197_v36 = vpop.eup %8196 }
 0xefa   :  { %v8199_v41 = vpop.eup %8198  ;;  %v4972_v32 = vpack.c.bf16 %v8197_v36, %v8193_v29  ;;  %v5106_v43 = vpop.permute.xlu1 %5105  ;;  %v13822_v36 = vld [vmem:[#allocation47_spill] sm:$0xff] }
 0xefb   :  { %v4973_v44 = vpack.c.bf16 %v8199_v41, %v8195_v21 }
 0xefc   :  { %v5112_v61 = vpop.permute.xlu0 %5111 }
 0xefd   :  { %5004 = vmatprep.subr.bf16.mxu0 %v4973_v44  ;;  %5047 = vmatprep.subr.bf16.mxu1 %v4973_v44 }
 0xefe   :  { %v5110_v14 = vpop.permute.xlu1 %5109 }
 0xeff   :  { %5005 = vmatpush1.bf16.xpose.msra.mxu0 %v4972_v32  ;;  %5048 = vmatpush1.bf16.xpose.msra.mxu1 %v4972_v32 }
 0xf00   :  { %5173 = vmatprep.subr.bf16.mxu1 %v13810_v16  ;;  %v5116_v47 = vpop.permute.xlu0 %5115 }
 0xf02   :  { %v5114_v33 = vpop.permute.xlu1 %5113 }
 0xf04   :  { %v5120_v35 = vpop.permute.xlu0 %5119 }
 0xf06   :  { %5007 = vmatmul.mubr.bf16.vlgmr.msra.gmra.mrb[112].mxu0 %v13813_v39  ;;  %5050 = vmatmul.mubr.bf16.vlgmr.msra.gmra.mrb[96].mxu1 %v13814_v62  ;;  %v5118_v30 = vpop.permute.xlu1 %5117 }
 0xf07   :  { %5174 = vmatpush1.bf16.msra.mxu1 %v13817_v9  ;;  %5718 = vmatprep.mubr.bf16.mxu0 %v13820_v6 }
 0xf08   :  { %5205 = vmatprep.mubr.bf16.mxu1 %v13821_v27  ;;  %v5124_v50 = vpop.permute.xlu0 %5123 }
 0xf0a   :  { %v5122_v37 = vpop.permute.xlu1 %5121 }
 0xf0e   :  { %7420 = vmatmul.mubr.msk.bf16.vlgmr.msra.gmra.mrb[100].mxu1 %vm1214_vm1, %v5094_v23 }
 0xf0f   :  { %5215 = vmatprep.mubr.bf16.mxu1 %v13821_v27 }
 0xf16   :  { %7421 = vmatmul.mubr.msk.bf16.gmra.mrb[104].mxu1 %vm1214_vm1, %v5096_v20 }
 0xf17   :  { %5225 = vmatprep.mubr.bf16.mxu1 %v13821_v27 }
 0xf1e   :  { %7422 = vmatmul.mubr.msk.bf16.gmra.mrb[108].mxu1 %vm1214_vm1, %v5098_v13 }
 0xf1f   :  { %5235 = vmatprep.mubr.bf16.mxu1 %v13821_v27 }
 0xf26   :  { %7423 = vmatmul.mubr.msk.bf16.gmra.mrb[112].mxu1 %vm1214_vm1, %v5100_v5 }
 0xf27   :  { %5245 = vmatprep.mubr.bf16.mxu1 %v13821_v27 }
 0xf2e   :  { %7424 = vmatmul.mubr.msk.bf16.gmra.mrb[116].mxu1 %vm1214_vm1, %v5102_v38 }
 0xf2f   :  { %5255 = vmatprep.mubr.bf16.mxu1 %v13821_v27 }
 0xf36   :  { %7425 = vmatmul.mubr.msk.bf16.gmra.mrb[120].mxu1 %vm1214_vm1, %v5104_v57 }
 0xf37   :  { %5265 = vmatprep.mubr.bf16.mxu1 %v13821_v27 }
 0xf3e   :  { %7426 = vmatmul.mubr.msk.bf16.gmra.mrb[124].mxu1 %vm1214_vm1, %v5106_v43 }
 0xf3f   :  { %5275 = vmatprep.mubr.bf16.mxu1 %v13821_v27 }
 0xf46   :  { %7427 = vmatmul.mubr.msk.bf16.gmra.mrb[128].mxu1 %vm1214_vm1, %v5108_v1 }
 0xf47   :  { %5285 = vmatprep.mubr.bf16.mxu1 %v13821_v27 }
 0xf4e   :  { %7428 = vmatmul.mubr.msk.bf16.gmra.mrb[132].mxu1 %vm1214_vm1, %v5110_v14 }
 0xf4f   :  { %5295 = vmatprep.mubr.bf16.mxu1 %v13821_v27 }
 0xf56   :  { %7429 = vmatmul.mubr.msk.bf16.gmra.mrb[136].mxu1 %vm1214_vm1, %v5112_v61 }
 0xf57   :  { %5305 = vmatprep.mubr.bf16.mxu1 %v13821_v27 }
 0xf5e   :  { %7430 = vmatmul.mubr.msk.bf16.gmra.mrb[140].mxu1 %vm1214_vm1, %v5114_v33 }
 0xf5f   :  { %5315 = vmatprep.mubr.bf16.mxu1 %v13821_v27 }
 0xf66   :  { %7431 = vmatmul.mubr.msk.bf16.gmra.mrb[144].mxu1 %vm1214_vm1, %v5116_v47 }
 0xf67   :  { %5325 = vmatprep.mubr.bf16.mxu1 %v13821_v27 }
 0xf6e   :  { %7432 = vmatmul.mubr.msk.bf16.gmra.mrb[148].mxu1 %vm1214_vm1, %v5118_v30 }
 0xf6f   :  { %5335 = vmatprep.mubr.bf16.mxu1 %v13821_v27 }
 0xf76   :  { %7433 = vmatmul.mubr.msk.bf16.gmra.mrb[152].mxu1 %vm1214_vm1, %v5120_v35 }
 0xf77   :  { %5345 = vmatprep.mubr.bf16.mxu1 %v13821_v27 }
 0xf7e   :  { %7434 = vmatmul.mubr.msk.bf16.gmra.mrb[156].mxu1 %vm1214_vm1, %v5122_v37 }
 0xf7f   :  { %5355 = vmatprep.mubr.bf16.mxu1 %v13821_v27 }
 0xf86   :  { %7435 = vmatmul.mubr.msk.bf16.gmra.mrb[160].mxu1 %vm1214_vm1, %v5124_v50 }
 0xf87   :  { %5761 = vmatprep.mubr.bf16.mxu1 %v13814_v62 }
 0xfd9   :  { %v5008_v42 = vpop.f32.mrb[112].mxu0  ;;  %v5051_v22 = vpop.f32.mrb[96].mxu1 }
 0xfda   :  { %8200 = vrcp.f32 %v5051_v22  ;;  %v5010_v7 = vpop.f32.mrb[113].mxu0  ;;  %v5053_v60 = vpop.f32.mrb[97].mxu1 }
 0xfdb   :  { %8202 = vrcp.f32 %v5053_v60  ;;  %v5012_v59 = vpop.f32.mrb[114].mxu0  ;;  %v5055_v8 = vpop.f32.mrb[98].mxu1 }
 0xfdc   :  { %v5014_v18 = vpop.f32.mrb[115].mxu0  ;;  %v5056_v15 = vpop.f32.mrb[99].mxu1 }
 0xfe1   :  { %v11659_v49 = vpop.f32.mrb[100].mxu1 }
 0xfe2   :  { %v11661_v55 = vpop.f32.mrb[101].mxu1 }
 0xfe3   :  { %v5366_v53 = vmax.f32 %v11659_v49, %v11661_v55  ;;  %v11665_v52 = vpop.f32.mrb[102].mxu1 }
 0xfe4   :  { %v8201_v63 = vpop.eup %8200  ;;  %v11667_v29 = vpop.f32.mrb[103].mxu1 }
 0xfe5   :  { %v8203_v21 = vpop.eup %8202  ;;  %v5063_v41 = vrot.slane %v8201_v63, %v13822_v36  ;;  %v5369_v32 = vmax.f32 %v11665_v52, %v11667_v29  ;;  %5367 = vmax.xlane.f32.xlu1 %v5366_v53 }
 0xfe6   :  { %v5067_v44 = vrot.slane %v8203_v21, %v13822_v36 }
 0xfe7   :  { %v11673_v19 = vmul.f32 %v5063_v41, %v5008_v42  ;;  %v11675_v51 = vmul.f32 %v5063_v41, %v5012_v59  ;;  %5370 = vmax.xlane.f32.xlu0 %v5369_v32 }
 0xfe8   :  { %v11677_v16 = vmul.f32 %v5067_v44, %v5010_v7  ;;  %v11679_v11 = vmul.f32 %v5067_v44, %v5014_v18 }
 0xfe9   :  { %13823 = vst [vmem:[#allocation22_spill] sm:$0xff] %v11673_v19  ;;  %13824 = vst [vmem:[#allocation23_spill] sm:$0xff] %v11675_v51  ;;  %v11683_v39 = vpop.f32.mrb[104].mxu1 }
 0xfea   :  { %13825 = vst [vmem:[#allocation24_spill] sm:$0xff] %v11677_v16  ;;  %13826 = vst [vmem:[#allocation25_spill] sm:$0xff] %v11679_v11  ;;  %v11687_v12 = vpop.f32.mrb[105].mxu1 }
 0xfeb   :  { %v5372_v9 = vmax.f32 %v11683_v39, %v11687_v12  ;;  %v11691_v31 = vpop.f32.mrb[106].mxu1 }
 0xfec   :  { %v11693_v34 = vpop.f32.mrb[107].mxu1 }
 0xfed   :  { %v5375_v6 = vmax.f32 %v11691_v31, %v11693_v34  ;;  %5373 = vmax.xlane.f32.xlu0 %v5372_v9 }
 0xfef   :  { %5376 = vmax.xlane.f32.xlu1 %v5375_v6 }
 0xff1   :  { %v11697_v23 = vpop.f32.mrb[108].mxu1 }
 0xff2   :  { %v11699_v20 = vpop.f32.mrb[109].mxu1 }
 0xff3   :  { %v5378_v13 = vmax.f32 %v11697_v23, %v11699_v20  ;;  %v11703_v5 = vpop.f32.mrb[110].mxu1 }
 0xff4   :  { %v11705_v38 = vpop.f32.mrb[111].mxu1 }
 0xff5   :  { %v5381_v57 = vmax.f32 %v11703_v5, %v11705_v38  ;;  %5379 = vmax.xlane.f32.xlu0 %v5378_v13 }
 0xff7   :  { %5382 = vmax.xlane.f32.xlu1 %v5381_v57 }
 0xff9   :  { %v11709_v43 = vpop.f32.mrb[112].mxu1 }
 0xffa   :  { %v11711_v1 = vpop.f32.mrb[113].mxu1 }
 0xffb   :  { %v5384_v14 = vmax.f32 %v11709_v43, %v11711_v1  ;;  %v11715_v61 = vpop.f32.mrb[114].mxu1 }
 0xffc   :  { %v11717_v33 = vpop.f32.mrb[115].mxu1 }
 0xffd   :  { %v5387_v47 = vmax.f32 %v11715_v61, %v11717_v33  ;;  %5385 = vmax.xlane.f32.xlu0 %v5384_v14 }
 0xfff   :  { %5388 = vmax.xlane.f32.xlu1 %v5387_v47 }
0x1001   :  { %v11721_v30 = vpop.f32.mrb[116].mxu1 }
0x1002   :  { %v11723_v35 = vpop.f32.mrb[117].mxu1 }
0x1003   :  { %v5390_v37 = vmax.f32 %v11721_v30, %v11723_v35  ;;  %v11727_v50 = vpop.f32.mrb[118].mxu1 }
0x1004   :  { %v11729_v42 = vpop.f32.mrb[119].mxu1 }
0x1005   :  { %v5393_v22 = vmax.f32 %v11727_v50, %v11729_v42  ;;  %5391 = vmax.xlane.f32.xlu0 %v5390_v37 }
0x1007   :  { %5394 = vmax.xlane.f32.xlu1 %v5393_v22 }
0x1009   :  { %v11733_v7 = vpop.f32.mrb[120].mxu1 }
0x100a   :  { %v11735_v60 = vpop.f32.mrb[121].mxu1 }
0x100b   :  { %v5396_v59 = vmax.f32 %v11733_v7, %v11735_v60  ;;  %v11739_v8 = vpop.f32.mrb[122].mxu1 }
0x100c   :  { %v11741_v18 = vpop.f32.mrb[123].mxu1 }
0x100d   :  { %v5399_v15 = vmax.f32 %v11739_v8, %v11741_v18  ;;  %5397 = vmax.xlane.f32.xlu0 %v5396_v59 }
0x100f   :  { %5400 = vmax.xlane.f32.xlu1 %v5399_v15 }
0x1011   :  { %v11745_v53 = vpop.f32.mrb[124].mxu1 }
0x1012   :  { %v11747_v63 = vpop.f32.mrb[125].mxu1 }
0x1013   :  { %v5402_v21 = vmax.f32 %v11745_v53, %v11747_v63  ;;  %v11751_v41 = vpop.f32.mrb[126].mxu1 }
0x1014   :  { %v11753_v32 = vpop.f32.mrb[127].mxu1 }
0x1015   :  { %v5405_v44 = vmax.f32 %v11751_v41, %v11753_v32  ;;  %5403 = vmax.xlane.f32.xlu0 %v5402_v21 }
0x1017   :  { %5406 = vmax.xlane.f32.xlu1 %v5405_v44 }
0x1019   :  { %v11757_v9 = vpop.f32.mrb[128].mxu1 }
0x101a   :  { %v11759_v6 = vpop.f32.mrb[129].mxu1 }
0x101b   :  { %v5408_v13 = vmax.f32 %v11757_v9, %v11759_v6  ;;  %v11763_v57 = vpop.f32.mrb[130].mxu1 }
0x101c   :  { %v11765_v14 = vpop.f32.mrb[131].mxu1 }
0x101d   :  { %v5411_v47 = vmax.f32 %v11763_v57, %v11765_v14  ;;  %5409 = vmax.xlane.f32.xlu0 %v5408_v13 }
0x101f   :  { %5412 = vmax.xlane.f32.xlu1 %v5411_v47 }
0x1021   :  { %v11769_v37 = vpop.f32.mrb[132].mxu1 }
0x1022   :  { %v11771_v22 = vpop.f32.mrb[133].mxu1 }
0x1023   :  { %v5414_v59 = vmax.f32 %v11769_v37, %v11771_v22  ;;  %v11775_v15 = vpop.f32.mrb[134].mxu1 }
0x1024   :  { %v11777_v21 = vpop.f32.mrb[135].mxu1 }
0x1025   :  { %v5417_v44 = vmax.f32 %v11775_v15, %v11777_v21  ;;  %5415 = vmax.xlane.f32.xlu0 %v5414_v59 }
0x1027   :  { %5418 = vmax.xlane.f32.xlu1 %v5417_v44 }
0x1029   :  { %v11781_v3 = vpop.f32.mrb[136].mxu1 }
0x102a   :  { %v11783_v13 = vpop.f32.mrb[137].mxu1 }
0x102b   :  { %v5420_v47 = vmax.f32 %v11781_v3, %v11783_v13  ;;  %v11787_v46 = vpop.f32.mrb[138].mxu1 }
0x102c   :  { %13827 = vst [vmem:[#allocation26_spill] sm:$0xff] %v11787_v46  ;;  %v11789_v19 = vpop.f32.mrb[139].mxu1 }
0x102d   :  { %13828 = vst [vmem:[#allocation27_spill] sm:$0xff] %v11789_v19  ;;  %v5423_v51 = vmax.f32 %v11787_v46, %v11789_v19  ;;  %5421 = vmax.xlane.f32.xlu0 %v5420_v47 }
0x102f   :  { %5424 = vmax.xlane.f32.xlu1 %v5423_v51 }
0x1031   :  { %v11793_v16 = vpop.f32.mrb[140].mxu1 }
0x1032   :  { %13829 = vst [vmem:[#allocation28_spill] sm:$0xff] %v11793_v16  ;;  %v11795_v59 = vpop.f32.mrb[141].mxu1 }
0x1033   :  { %13830 = vst [vmem:[#allocation34_spill] sm:$0xff] %v11795_v59  ;;  %v5426_v44 = vmax.f32 %v11793_v16, %v11795_v59  ;;  %v11799_v11 = vpop.f32.mrb[142].mxu1 }
0x1034   :  { %13831 = vst [vmem:[#allocation33_spill] sm:$0xff] %v11799_v11  ;;  %v11801_v36 = vpop.f32.mrb[143].mxu1 }
0x1035   :  { %13832 = vst [vmem:[#allocation54_spill] sm:$0xff] %v11801_v36  ;;  %v5429_v27 = vmax.f32 %v11799_v11, %v11801_v36  ;;  %5427 = vmax.xlane.f32.xlu0 %v5426_v44 }
0x1037   :  { %5430 = vmax.xlane.f32.xlu1 %v5429_v27 }
0x1039   :  { %v11805_v62 = vpop.f32.mrb[144].mxu1 }
0x103a   :  { %13833 = vst [vmem:[#allocation53_spill] sm:$0xff] %v11805_v62  ;;  %v11807_v47 = vpop.f32.mrb[145].mxu1 }
0x103b   :  { %13834 = vst [vmem:[#allocation72_spill] sm:$0xff] %v11807_v47  ;;  %v5432_v51 = vmax.f32 %v11805_v62, %v11807_v47  ;;  %v11811_v19 = vpop.f32.mrb[146].mxu1 }
0x103c   :  { %13835 = vst [vmem:[#allocation64_spill] sm:$0xff] %v11811_v19  ;;  %v11813_v46 = vpop.f32.mrb[147].mxu1 }
0x103d   :  { %13836 = vst [vmem:[#allocation32_spill] sm:$0xff] %v11813_v46  ;;  %v5435_v59 = vmax.f32 %v11811_v19, %v11813_v46  ;;  %5433 = vmax.xlane.f32.xlu0 %v5432_v51 }
0x103f   :  { %5436 = vmax.xlane.f32.xlu1 %v5435_v59 }
0x1041   :  { %v11817_v16 = vpop.f32.mrb[148].mxu1 }
0x1042   :  { %13837 = vst [vmem:[#allocation31_spill] sm:$0xff] %v11817_v16  ;;  %v11819_v44 = vpop.f32.mrb[149].mxu1 }
0x1043   :  { %13838 = vst [vmem:[#allocation52_spill] sm:$0xff] %v11819_v44  ;;  %v5438_v27 = vmax.f32 %v11817_v16, %v11819_v44  ;;  %v11823_v36 = vpop.f32.mrb[150].mxu1 }
0x1044   :  { %13839 = vst [vmem:[#allocation29_spill] sm:$0xff] %v11823_v36  ;;  %v11825_v11 = vpop.f32.mrb[151].mxu1 }
0x1045   :  { %13840 = vst [vmem:[#allocation90_spill] sm:$0xff] %v11825_v11  ;;  %v5441_v47 = vmax.f32 %v11823_v36, %v11825_v11  ;;  %5439 = vmax.xlane.f32.xlu0 %v5438_v27 }
0x1047   :  { %5442 = vmax.xlane.f32.xlu1 %v5441_v47 }
0x1049   :  { %v11829_v62 = vpop.f32.mrb[152].mxu1 }
0x104a   :  { %13841 = vst [vmem:[#allocation89_spill] sm:$0xff] %v11829_v62  ;;  %v11831_v51 = vpop.f32.mrb[153].mxu1 }
0x104b   :  { %13842 = vst [vmem:[#allocation68_spill] sm:$0xff] %v11831_v51  ;;  %v5444_v59 = vmax.f32 %v11829_v62, %v11831_v51  ;;  %v11835_v46 = vpop.f32.mrb[154].mxu1 }
0x104c   :  { %13843 = vst [vmem:[#allocation5_spill] sm:$0xff] %v11835_v46  ;;  %v11837_v19 = vpop.f32.mrb[155].mxu1 }
0x104d   :  { %13844 = vst [vmem:[#allocation7_spill] sm:$0xff] %v11837_v19  ;;  %v5447_v44 = vmax.f32 %v11835_v46, %v11837_v19  ;;  %5445 = vmax.xlane.f32.xlu0 %v5444_v59 }
0x104f   :  { %5448 = vmax.xlane.f32.xlu1 %v5447_v44 }
0x1051   :  { %v11841_v16 = vpop.f32.mrb[156].mxu1 }
0x1052   :  { %v11843_v27 = vpop.f32.mrb[157].mxu1 }
0x1053   :  { %13845 = vst [vmem:[#allocation6_spill] sm:$0xff] %v11843_v27  ;;  %v5450_v47 = vmax.f32 %v11841_v16, %v11843_v27  ;;  %v11847_v11 = vpop.f32.mrb[158].mxu1 }
0x1054   :  { %13846 = vst [vmem:[#allocation50_spill] sm:$0xff] %v11847_v11  ;;  %v11849_v36 = vpop.f32.mrb[159].mxu1 }
0x1055   :  { %13847 = vst [vmem:[#allocation51_spill] sm:$0xff] %v11849_v36  ;;  %v5453_v51 = vmax.f32 %v11847_v11, %v11849_v36  ;;  %5451 = vmax.xlane.f32.xlu0 %v5450_v47  ;;  %v13852_v36 = vld [vmem:[#allocation61_spill] sm:$0xff] }
0x1057   :  { %5454 = vmax.xlane.f32.xlu1 %v5453_v51 }
0x1059   :  { %v11853_v62 = vpop.f32.mrb[160].mxu1 }
0x105a   :  { %13848 = vst [vmem:[#allocation9_spill] sm:$0xff] %v11853_v62  ;;  %v11855_v59 = vpop.f32.mrb[161].mxu1 }
0x105b   :  { %13849 = vst [vmem:[#allocation12_spill] sm:$0xff] %v11855_v59  ;;  %v5456_v44 = vmax.f32 %v11853_v62, %v11855_v59  ;;  %v11859_v19 = vpop.f32.mrb[162].mxu1 }
0x105c   :  { %13850 = vst [vmem:[#allocation8_spill] sm:$0xff] %v11859_v19  ;;  %v11861_v46 = vpop.f32.mrb[163].mxu1 }
0x105d   :  { %13851 = vst [vmem:[#allocation11_spill] sm:$0xff] %v11861_v46  ;;  %v5459_v27 = vmax.f32 %v11859_v19, %v11861_v46  ;;  %5457 = vmax.xlane.f32.xlu0 %v5456_v44 }
0x105f   :  { %5460 = vmax.xlane.f32.xlu1 %v5459_v27 }
0x1070   :  { %5790 = vrot.lane.b32.xlu1 %v13852_v36, %s8651_s27 }
0x1072   :  { %v5368_v51 = vpop.xlane.xlu1 %5367 }
0x1073   :  { %v5462_v47 = vsub.f32 %v11659_v49, %v5368_v51  ;;  %v5463_v11 = vsub.f32 %v11661_v55, %v5368_v51  ;;  %5788 = vrot.lane.b32.xlu0 %v11213_v45, %s8651_s27 }
0x1074   :  { %5792 = vrot.lane.b32.xlu1 %v11223_v24, %s8651_s27  ;;  %v5371_v59 = vpop.xlane.xlu0 %5370 }
0x1075   :  { %v5526_v62 = vmul.f32 1.442695, %v5462_v47  ;;  %v5464_v46 = vsub.f32 %v11665_v52, %v5371_v59  ;;  %v5465_v27 = vsub.f32 %v11667_v29, %v5371_v59  ;;  %v5528_v44 = vmul.f32 1.442695, %v5463_v11 }
0x1077   :  { %v5530_v19 = vmul.f32 1.442695, %v5464_v46  ;;  %v5532_v36 = vmul.f32 1.442695, %v5465_v27  ;;  %5794 = vrot.lane.b32.xlu0 %v11228_v10, %s8651_s27  ;;  %8204 = vpow2.f32 %v5526_v62 }
0x1078   :  { %5796 = vrot.lane.b32.xlu1 %v11233_v2, %s8651_s27 }
0x1079   :  { %8206 = vpow2.f32 %v5530_v19 }
0x107a   :  { %8208 = vpow2.f32 %v5532_v36  ;;  %v5374_v49 = vpop.xlane.xlu0 %5373 }
0x107b   :  { %8210 = vpow2.f32 %v5528_v44  ;;  %v5466_v55 = vsub.f32 %v11683_v39, %v5374_v49  ;;  %v5467_v52 = vsub.f32 %v11687_v12, %v5374_v49  ;;  %5798 = vrot.lane.b32.xlu0 %v11238_v48, %s8651_s27 }
0x107c   :  { %v5377_v29 = vpop.xlane.xlu1 %5376  ;;  %5800 = vrot.lane.b32.xlu1 %v11243_v17, %s8651_s27 }
0x107d   :  { %v5534_v11 = vmul.f32 1.442695, %v5466_v55  ;;  %v5468_v62 = vsub.f32 %v11691_v31, %v5377_v29  ;;  %v5469_v46 = vsub.f32 %v11693_v34, %v5377_v29  ;;  %v5536_v19 = vmul.f32 1.442695, %v5467_v52 }
0x107f   :  { %v5538_v36 = vmul.f32 1.442695, %v5468_v62  ;;  %v5540_v59 = vmul.f32 1.442695, %v5469_v46  ;;  %5802 = vrot.lane.b32.xlu0 %v11248_v4, %s8651_s27  ;;  %8212 = vpow2.f32 %v5534_v11 }
0x1080   :  { %5804 = vrot.lane.b32.xlu1 %v11253_v28, %s8651_s27 }
0x1081   :  { %8214 = vpow2.f32 %v5538_v36  ;;  %v8205_v39 = vpop.eup %8204 }
0x1082   :  { %8216 = vpow2.f32 %v5540_v59  ;;  %v5380_v12 = vpop.xlane.xlu0 %5379 }
0x1083   :  { %v8207_v51 = vpop.eup %8206  ;;  %8218 = vpow2.f32 %v5536_v19  ;;  %v5470_v31 = vsub.f32 %v11697_v23, %v5380_v12  ;;  %v5471_v34 = vsub.f32 %v11699_v20, %v5380_v12  ;;  %5806 = vrot.lane.b32.xlu0 %v11258_v58, %s8651_s27 }
0x1084   :  { %v8209_v47 = vpop.eup %8208  ;;  %v5383_v27 = vpop.xlane.xlu1 %5382  ;;  %5808 = vrot.lane.b32.xlu1 %v11263_v26, %s8651_s27  ;;  %v5654_v44 = vpack.c.bf16 %v8207_v51, %v8205_v39 }
0x1085   :  { %v8211_v49 = vpop.eup %8210  ;;  %v5542_v55 = vmul.f32 1.442695, %v5470_v31  ;;  %v5472_v52 = vsub.f32 %v11703_v5, %v5383_v27  ;;  %v5473_v29 = vsub.f32 %v11705_v38, %v5383_v27  ;;  %v5544_v62 = vmul.f32 1.442695, %v5471_v34 }
0x1086   :  { %v5655_v11 = vpack.c.bf16 %v8209_v47, %v8211_v49 }
0x1087   :  { %v5546_v23 = vmul.f32 1.442695, %v5472_v52  ;;  %v5548_v46 = vmul.f32 1.442695, %v5473_v29  ;;  %5810 = vrot.lane.b32.xlu0 %v11276_v0, %s8651_s27  ;;  %8220 = vpow2.f32 %v5542_v55 }
0x1088   :  { %5686 = vmatprep.subr.bf16.mxu0 %v5655_v11  ;;  %5729 = vmatprep.subr.bf16.mxu1 %v5655_v11 }
0x1089   :  { %8222 = vpow2.f32 %v5546_v23  ;;  %5687 = vmatpush1.bf16.xpose.msra.mxu0 %v5654_v44  ;;  %5730 = vmatpush1.bf16.xpose.msra.mxu1 %v5654_v44  ;;  %v8213_v20 = vpop.eup %8212 }
0x108a   :  { %8224 = vpow2.f32 %v5548_v46  ;;  %5812 = vrot.lane.b32.xlu1 %v11289_v56, %s8651_s27  ;;  %v5386_v5 = vpop.xlane.xlu0 %5385 }
0x108b   :  { %v8215_v38 = vpop.eup %8214  ;;  %8226 = vpow2.f32 %v5544_v62  ;;  %v5474_v19 = vsub.f32 %v11709_v43, %v5386_v5  ;;  %v5475_v36 = vsub.f32 %v11711_v1, %v5386_v5  ;;  %5814 = vrot.lane.b32.xlu0 %v11302_v25, %s8651_s27 }
0x108c   :  { %v8217_v59 = vpop.eup %8216  ;;  %v5389_v39 = vpop.xlane.xlu1 %5388  ;;  %v5656_v12 = vpack.c.bf16 %v8215_v38, %v8213_v20 }
0x108d   :  { %v8219_v51 = vpop.eup %8218  ;;  %v5550_v31 = vmul.f32 1.442695, %v5474_v19  ;;  %v5476_v34 = vsub.f32 %v11715_v61, %v5389_v39  ;;  %v5477_v47 = vsub.f32 %v11717_v33, %v5389_v39  ;;  %v5552_v44 = vmul.f32 1.442695, %v5475_v36 }
0x108e   :  { %5816 = vrot.lane.b32.xlu1 %v11315_v54, %s8651_s27  ;;  %v5657_v27 = vpack.c.bf16 %v8217_v59, %v8219_v51 }
0x108f   :  { %v5554_v43 = vmul.f32 1.442695, %v5476_v34  ;;  %v5556_v49 = vmul.f32 1.442695, %v5477_v47  ;;  %5818 = vrot.lane.b32.xlu0 %v11320_v40, %s8651_s27  ;;  %8228 = vpow2.f32 %v5550_v31 }
0x1090   :  { %5688 = vmatprep.subr.bf16.mxu0 %v5657_v27  ;;  %5731 = vmatprep.subr.bf16.mxu1 %v5657_v27 }
0x1091   :  { %8230 = vpow2.f32 %v5554_v43  ;;  %5689 = vmatpush1.bf16.xpose.msra.mxu0 %v5656_v12  ;;  %5732 = vmatpush1.bf16.xpose.msra.mxu1 %v5656_v12  ;;  %v8221_v1 = vpop.eup %8220 }
0x1092   :  { %8232 = vpow2.f32 %v5556_v49  ;;  %v5392_v61 = vpop.xlane.xlu0 %5391 }
0x1093   :  { %v8223_v33 = vpop.eup %8222  ;;  %8234 = vpow2.f32 %v5552_v44  ;;  %v5478_v55 = vsub.f32 %v11721_v30, %v5392_v61  ;;  %v5479_v52 = vsub.f32 %v11723_v35, %v5392_v61 }
0x1094   :  { %v8225_v29 = vpop.eup %8224  ;;  %v5395_v11 = vpop.xlane.xlu1 %5394  ;;  %v5658_v62 = vpack.c.bf16 %v8223_v33, %v8221_v1 }
0x1095   :  { %v8227_v23 = vpop.eup %8226  ;;  %v5558_v46 = vmul.f32 1.442695, %v5478_v55  ;;  %v5480_v20 = vsub.f32 %v11727_v50, %v5395_v11  ;;  %v5481_v5 = vsub.f32 %v11729_v42, %v5395_v11  ;;  %v5560_v19 = vmul.f32 1.442695, %v5479_v52 }
0x1096   :  { %v5659_v38 = vpack.c.bf16 %v8225_v29, %v8227_v23 }
0x1097   :  { %v5562_v36 = vmul.f32 1.442695, %v5480_v20  ;;  %v5564_v59 = vmul.f32 1.442695, %v5481_v5  ;;  %8236 = vpow2.f32 %v5558_v46 }
0x1098   :  { %5690 = vmatprep.subr.bf16.mxu0 %v5659_v38  ;;  %5733 = vmatprep.subr.bf16.mxu1 %v5659_v38 }
0x1099   :  { %8238 = vpow2.f32 %v5562_v36  ;;  %5691 = vmatpush1.bf16.xpose.msra.mxu0 %v5658_v62  ;;  %5734 = vmatpush1.bf16.xpose.msra.mxu1 %v5658_v62  ;;  %v8229_v30 = vpop.eup %8228 }
0x109a   :  { %8240 = vpow2.f32 %v5564_v59  ;;  %v5398_v35 = vpop.xlane.xlu0 %5397 }
0x109b   :  { %v8231_v39 = vpop.eup %8230  ;;  %8242 = vpow2.f32 %v5560_v19  ;;  %v5482_v12 = vsub.f32 %v11733_v7, %v5398_v35  ;;  %v5483_v50 = vsub.f32 %v11735_v60, %v5398_v35 }
0x109c   :  { %v8233_v42 = vpop.eup %8232  ;;  %v5401_v51 = vpop.xlane.xlu1 %5400  ;;  %v5660_v31 = vpack.c.bf16 %v8231_v39, %v8229_v30 }
0x109d   :  { %v8235_v34 = vpop.eup %8234  ;;  %v5566_v47 = vmul.f32 1.442695, %v5482_v12  ;;  %v5484_v27 = vsub.f32 %v11739_v8, %v5401_v51  ;;  %v5485_v44 = vsub.f32 %v11741_v18, %v5401_v51  ;;  %v5568_v49 = vmul.f32 1.442695, %v5483_v50 }
0x109e   :  { %v5661_v43 = vpack.c.bf16 %v8233_v42, %v8235_v34 }
0x109f   :  { %v5570_v1 = vmul.f32 1.442695, %v5484_v27  ;;  %v5572_v61 = vmul.f32 1.442695, %v5485_v44  ;;  %8244 = vpow2.f32 %v5566_v47 }
0x10a0   :  { %5692 = vmatprep.subr.bf16.mxu0 %v5661_v43  ;;  %5735 = vmatprep.subr.bf16.mxu1 %v5661_v43 }
0x10a1   :  { %8246 = vpow2.f32 %v5570_v1  ;;  %5693 = vmatpush1.bf16.xpose.msra.mxu0 %v5660_v31  ;;  %5736 = vmatpush1.bf16.xpose.msra.mxu1 %v5660_v31  ;;  %v8237_v7 = vpop.eup %8236 }
0x10a2   :  { %8248 = vpow2.f32 %v5572_v61  ;;  %v5404_v60 = vpop.xlane.xlu0 %5403 }
0x10a3   :  { %v8239_v33 = vpop.eup %8238  ;;  %8250 = vpow2.f32 %v5568_v49  ;;  %v5486_v55 = vsub.f32 %v11745_v53, %v5404_v60  ;;  %v5487_v8 = vsub.f32 %v11747_v63, %v5404_v60 }
0x10a4   :  { %v8241_v18 = vpop.eup %8240  ;;  %v5407_v52 = vpop.xlane.xlu1 %5406  ;;  %v5662_v29 = vpack.c.bf16 %v8239_v33, %v8237_v7 }
0x10a5   :  { %v8243_v11 = vpop.eup %8242  ;;  %v5574_v62 = vmul.f32 1.442695, %v5486_v55  ;;  %v5488_v23 = vsub.f32 %v11751_v41, %v5407_v52  ;;  %v5489_v46 = vsub.f32 %v11753_v32, %v5407_v52  ;;  %v5576_v5 = vmul.f32 1.442695, %v5487_v8 }
0x10a6   :  { %v5663_v20 = vpack.c.bf16 %v8241_v18, %v8243_v11 }
0x10a7   :  { %v5578_v38 = vmul.f32 1.442695, %v5488_v23  ;;  %v5580_v19 = vmul.f32 1.442695, %v5489_v46  ;;  %8252 = vpow2.f32 %v5574_v62 }
0x10a8   :  { %5694 = vmatprep.subr.bf16.mxu0 %v5663_v20  ;;  %5737 = vmatprep.subr.bf16.mxu1 %v5663_v20  ;;  %v13853_v20 = vld [vmem:[#allocation26_spill] sm:$0xff] }
0x10a9   :  { %8254 = vpow2.f32 %v5578_v38  ;;  %5695 = vmatpush1.bf16.xpose.msra.mxu0 %v5662_v29  ;;  %5738 = vmatpush1.bf16.xpose.msra.mxu1 %v5662_v29  ;;  %v8245_v53 = vpop.eup %8244  ;;  %v13854_v38 = vld [vmem:[#allocation27_spill] sm:$0xff] }
0x10aa   :  { %8256 = vpow2.f32 %v5580_v19  ;;  %v5410_v63 = vpop.xlane.xlu0 %5409 }
0x10ab   :  { %v8247_v36 = vpop.eup %8246  ;;  %8258 = vpow2.f32 %v5576_v5  ;;  %v5490_v59 = vsub.f32 %v11757_v9, %v5410_v63  ;;  %v5491_v41 = vsub.f32 %v11759_v6, %v5410_v63 }
0x10ac   :  { %v8249_v32 = vpop.eup %8248  ;;  %v5413_v30 = vpop.xlane.xlu1 %5412  ;;  %v5664_v35 = vpack.c.bf16 %v8247_v36, %v8245_v53 }
0x10ad   :  { %v8251_v39 = vpop.eup %8250  ;;  %v5582_v12 = vmul.f32 1.442695, %v5490_v59  ;;  %v5492_v50 = vsub.f32 %v11763_v57, %v5413_v30  ;;  %v5493_v42 = vsub.f32 %v11765_v14, %v5413_v30  ;;  %v5584_v31 = vmul.f32 1.442695, %v5491_v41 }
0x10ae   :  { %v5665_v51 = vpack.c.bf16 %v8249_v32, %v8251_v39  ;;  %v13855_v32 = vld [vmem:[#allocation28_spill] sm:$0xff] }
0x10af   :  { %v5586_v34 = vmul.f32 1.442695, %v5492_v50  ;;  %v5588_v47 = vmul.f32 1.442695, %v5493_v42  ;;  %8260 = vpow2.f32 %v5582_v12 }
0x10b0   :  { %5696 = vmatprep.subr.bf16.mxu0 %v5665_v51  ;;  %5739 = vmatprep.subr.bf16.mxu1 %v5665_v51 }
0x10b1   :  { %8262 = vpow2.f32 %v5586_v34  ;;  %5697 = vmatpush1.bf16.xpose.msra.mxu0 %v5664_v35  ;;  %5740 = vmatpush1.bf16.xpose.msra.mxu1 %v5664_v35  ;;  %v8253_v9 = vpop.eup %8252  ;;  %v13856_v35 = vld [vmem:[#allocation34_spill] sm:$0xff]  ;;  %v13857_v34 = vld [vmem:[#allocation33_spill] sm:$0xff] }
0x10b2   :  { %8264 = vpow2.f32 %v5588_v47  ;;  %v5416_v6 = vpop.xlane.xlu0 %5415 }
0x10b3   :  { %v8255_v27 = vpop.eup %8254  ;;  %8266 = vpow2.f32 %v5584_v31  ;;  %v5494_v44 = vsub.f32 %v11769_v37, %v5416_v6  ;;  %v5495_v57 = vsub.f32 %v11771_v22, %v5416_v6 }
0x10b4   :  { %v8257_v14 = vpop.eup %8256  ;;  %v5419_v43 = vpop.xlane.xlu1 %5418  ;;  %v5666_v49 = vpack.c.bf16 %v8255_v27, %v8253_v9  ;;  %v13858_v9 = vld [vmem:[#allocation54_spill] sm:$0xff] }
0x10b5   :  { %v8259_v1 = vpop.eup %8258  ;;  %v5590_v61 = vmul.f32 1.442695, %v5494_v44  ;;  %v5496_v7 = vsub.f32 %v11775_v15, %v5419_v43  ;;  %v5497_v60 = vsub.f32 %v11777_v21, %v5419_v43  ;;  %v5592_v55 = vmul.f32 1.442695, %v5495_v57 }
0x10b6   :  { %v5667_v33 = vpack.c.bf16 %v8257_v14, %v8259_v1 }
0x10b7   :  { %v5594_v8 = vmul.f32 1.442695, %v5496_v7  ;;  %v5596_v18 = vmul.f32 1.442695, %v5497_v60  ;;  %8268 = vpow2.f32 %v5590_v61  ;;  %v13859_v61 = vld [vmem:[#allocation53_spill] sm:$0xff]  ;;  %v13860_v60 = vld [vmem:[#allocation72_spill] sm:$0xff] }
0x10b8   :  { %5698 = vmatprep.subr.bf16.mxu0 %v5667_v33  ;;  %5741 = vmatprep.subr.bf16.mxu1 %v5667_v33 }
0x10b9   :  { %8270 = vpow2.f32 %v5594_v8  ;;  %5699 = vmatpush1.bf16.xpose.msra.mxu0 %v5666_v49  ;;  %5742 = vmatpush1.bf16.xpose.msra.mxu1 %v5666_v49  ;;  %v8261_v37 = vpop.eup %8260 }
0x10ba   :  { %8272 = vpow2.f32 %v5596_v18  ;;  %v5422_v22 = vpop.xlane.xlu0 %5421 }
0x10bb   :  { %v8263_v52 = vpop.eup %8262  ;;  %8274 = vpow2.f32 %v5592_v55  ;;  %v5498_v29 = vsub.f32 %v11781_v3, %v5422_v22  ;;  %v5499_v15 = vsub.f32 %v11783_v13, %v5422_v22 }
0x10bc   :  { %v8265_v21 = vpop.eup %8264  ;;  %v5425_v11 = vpop.xlane.xlu1 %5424  ;;  %v5668_v62 = vpack.c.bf16 %v8263_v52, %v8261_v37  ;;  %v13861_v52 = vld [vmem:[#allocation64_spill] sm:$0xff] }
0x10bd   :  { %v8267_v23 = vpop.eup %8266  ;;  %v5598_v46 = vmul.f32 1.442695, %v5498_v29  ;;  %v5500_v5 = vsub.f32 %v13853_v20, %v5425_v11  ;;  %v5501_v19 = vsub.f32 %v13854_v38, %v5425_v11  ;;  %v5600_v63 = vmul.f32 1.442695, %v5499_v15  ;;  %v13862_v15 = vld [vmem:[#allocation32_spill] sm:$0xff] }
0x10be   :  { %v5669_v53 = vpack.c.bf16 %v8265_v21, %v8267_v23 }
0x10bf   :  { %v5602_v36 = vmul.f32 1.442695, %v5500_v5  ;;  %v5604_v59 = vmul.f32 1.442695, %v5501_v19  ;;  %8276 = vpow2.f32 %v5598_v46  ;;  %v13863_v19 = vld [vmem:[#allocation31_spill] sm:$0xff] }
0x10c0   :  { %5700 = vmatprep.subr.bf16.mxu0 %v5669_v53  ;;  %5743 = vmatprep.subr.bf16.mxu1 %v5669_v53 }
0x10c1   :  { %8278 = vpow2.f32 %v5602_v36  ;;  %5701 = vmatpush1.bf16.xpose.msra.mxu0 %v5668_v62  ;;  %5744 = vmatpush1.bf16.xpose.msra.mxu1 %v5668_v62  ;;  %v8269_v3 = vpop.eup %8268 }
0x10c2   :  { %8280 = vpow2.f32 %v5604_v59  ;;  %v5428_v13 = vpop.xlane.xlu0 %5427 }
0x10c3   :  { %v8271_v41 = vpop.eup %8270  ;;  %8282 = vpow2.f32 %v5600_v63  ;;  %v5502_v30 = vsub.f32 %v13855_v32, %v5428_v13  ;;  %v5503_v39 = vsub.f32 %v13856_v35, %v5428_v13  ;;  %v13864_v63 = vld [vmem:[#allocation52_spill] sm:$0xff] }
0x10c4   :  { %v8273_v12 = vpop.eup %8272  ;;  %v5431_v50 = vpop.xlane.xlu1 %5430  ;;  %v5670_v42 = vpack.c.bf16 %v8271_v41, %v8269_v3 }
0x10c5   :  { %v8275_v51 = vpop.eup %8274  ;;  %v5606_v31 = vmul.f32 1.442695, %v5502_v30  ;;  %v5504_v47 = vsub.f32 %v13857_v34, %v5431_v50  ;;  %v5505_v6 = vsub.f32 %v13858_v9, %v5431_v50  ;;  %v5608_v44 = vmul.f32 1.442695, %v5503_v39  ;;  %v13865_v30 = vld [vmem:[#allocation29_spill] sm:$0xff]  ;;  %v13866_v39 = vld [vmem:[#allocation90_spill] sm:$0xff] }
0x10c6   :  { %v5671_v27 = vpack.c.bf16 %v8273_v12, %v8275_v51 }
0x10c7   :  { %v5610_v57 = vmul.f32 1.442695, %v5504_v47  ;;  %v5612_v14 = vmul.f32 1.442695, %v5505_v6  ;;  %8284 = vpow2.f32 %v5606_v31  ;;  %v13867_v6 = vld [vmem:[#allocation89_spill] sm:$0xff] }
0x10c8   :  { %5702 = vmatprep.subr.bf16.mxu0 %v5671_v27  ;;  %5745 = vmatprep.subr.bf16.mxu1 %v5671_v27 }
0x10c9   :  { %8286 = vpow2.f32 %v5610_v57  ;;  %5703 = vmatpush1.bf16.xpose.msra.mxu0 %v5670_v42  ;;  %5746 = vmatpush1.bf16.xpose.msra.mxu1 %v5670_v42  ;;  %v8277_v43 = vpop.eup %8276 }
0x10ca   :  { %8288 = vpow2.f32 %v5612_v14  ;;  %v5434_v49 = vpop.xlane.xlu0 %5433 }
0x10cb   :  { %v8279_v1 = vpop.eup %8278  ;;  %8290 = vpow2.f32 %v5608_v44  ;;  %v5506_v7 = vsub.f32 %v13859_v61, %v5434_v49  ;;  %v5507_v33 = vsub.f32 %v13860_v60, %v5434_v49  ;;  %v13868_v44 = vld [vmem:[#allocation68_spill] sm:$0xff] }
0x10cc   :  { %v8281_v55 = vpop.eup %8280  ;;  %v5437_v8 = vpop.xlane.xlu1 %5436  ;;  %v5672_v18 = vpack.c.bf16 %v8279_v1, %v8277_v43 }
0x10cd   :  { %v8283_v37 = vpop.eup %8282  ;;  %v5614_v22 = vmul.f32 1.442695, %v5506_v7  ;;  %v5508_v29 = vsub.f32 %v13861_v52, %v5437_v8  ;;  %v5509_v21 = vsub.f32 %v13862_v15, %v5437_v8  ;;  %v5616_v62 = vmul.f32 1.442695, %v5507_v33  ;;  %v13869_v7 = vld [vmem:[#allocation5_spill] sm:$0xff]  ;;  %v13870_v33 = vld [vmem:[#allocation7_spill] sm:$0xff] }
0x10ce   :  { %v5673_v11 = vpack.c.bf16 %v8281_v55, %v8283_v37 }
0x10cf   :  { %v5618_v23 = vmul.f32 1.442695, %v5508_v29  ;;  %v5620_v46 = vmul.f32 1.442695, %v5509_v21  ;;  %8292 = vpow2.f32 %v5614_v22 }
0x10d0   :  { %5704 = vmatprep.subr.bf16.mxu0 %v5673_v11  ;;  %5747 = vmatprep.subr.bf16.mxu1 %v5673_v11  ;;  %v13871_v11 = vld [vmem:[#allocation6_spill] sm:$0xff] }
0x10d1   :  { %8294 = vpow2.f32 %v5618_v23  ;;  %5705 = vmatpush1.bf16.xpose.msra.mxu0 %v5672_v18  ;;  %5748 = vmatpush1.bf16.xpose.msra.mxu1 %v5672_v18  ;;  %v8285_v20 = vpop.eup %8284 }
0x10d2   :  { %8296 = vpow2.f32 %v5620_v46  ;;  %v5440_v5 = vpop.xlane.xlu0 %5439 }
0x10d3   :  { %v8287_v38 = vpop.eup %8286  ;;  %8298 = vpow2.f32 %v5616_v62  ;;  %v5510_v53 = vsub.f32 %v13863_v19, %v5440_v5  ;;  %v5511_v36 = vsub.f32 %v13864_v63, %v5440_v5 }
0x10d4   :  { %v8289_v59 = vpop.eup %8288  ;;  %v5443_v3 = vpop.xlane.xlu1 %5442  ;;  %v5674_v13 = vpack.c.bf16 %v8287_v38, %v8285_v20 }
0x10d5   :  { %v8291_v41 = vpop.eup %8290  ;;  %v5622_v32 = vmul.f32 1.442695, %v5510_v53  ;;  %v5512_v35 = vsub.f32 %v13865_v30, %v5443_v3  ;;  %v5513_v12 = vsub.f32 %v13866_v39, %v5443_v3  ;;  %v5624_v42 = vmul.f32 1.442695, %v5511_v36  ;;  %v13872_v53 = vld [vmem:[#allocation50_spill] sm:$0xff]  ;;  %v13873_v36 = vld [vmem:[#allocation51_spill] sm:$0xff] }
0x10d6   :  { %v5675_v50 = vpack.c.bf16 %v8289_v59, %v8291_v41 }
0x10d7   :  { %v5626_v51 = vmul.f32 1.442695, %v5512_v35  ;;  %v5628_v31 = vmul.f32 1.442695, %v5513_v12  ;;  %8300 = vpow2.f32 %v5622_v32  ;;  %v13874_v35 = vld [vmem:[#allocation9_spill] sm:$0xff]  ;;  %v13875_v12 = vld [vmem:[#allocation12_spill] sm:$0xff] }
0x10d8   :  { %5706 = vmatprep.subr.bf16.mxu0 %v5675_v50  ;;  %5749 = vmatprep.subr.bf16.mxu1 %v5675_v50 }
0x10d9   :  { %8302 = vpow2.f32 %v5626_v51  ;;  %5707 = vmatpush1.bf16.xpose.msra.mxu0 %v5674_v13  ;;  %5750 = vmatpush1.bf16.xpose.msra.mxu1 %v5674_v13  ;;  %v8293_v34 = vpop.eup %8292 }
0x10da   :  { %8304 = vpow2.f32 %v5628_v31  ;;  %v5446_v47 = vpop.xlane.xlu0 %5445 }
0x10db   :  { %v8295_v9 = vpop.eup %8294  ;;  %8306 = vpow2.f32 %v5624_v42  ;;  %v5514_v27 = vsub.f32 %v13867_v6, %v5446_v47  ;;  %v5515_v57 = vsub.f32 %v13868_v44, %v5446_v47  ;;  %v13876_v6 = vld [vmem:[#allocation8_spill] sm:$0xff]  ;;  %v13877_v44 = vld [vmem:[#allocation11_spill] sm:$0xff] }
0x10dc   :  { %v8297_v14 = vpop.eup %8296  ;;  %v5449_v43 = vpop.xlane.xlu1 %5448  ;;  %v5676_v49 = vpack.c.bf16 %v8295_v9, %v8293_v34 }
0x10dd   :  { %v8299_v1 = vpop.eup %8298  ;;  %v5630_v61 = vmul.f32 1.442695, %v5514_v27  ;;  %v5516_v60 = vsub.f32 %v13869_v7, %v5449_v43  ;;  %v5517_v55 = vsub.f32 %v13870_v33, %v5449_v43  ;;  %v5632_v18 = vmul.f32 1.442695, %v5515_v57 }
0x10de   :  { %v5677_v8 = vpack.c.bf16 %v8297_v14, %v8299_v1 }
0x10df   :  { %v5634_v37 = vmul.f32 1.442695, %v5516_v60  ;;  %v5636_v22 = vmul.f32 1.442695, %v5517_v55  ;;  %8308 = vpow2.f32 %v5630_v61 }
0x10e0   :  { %5708 = vmatprep.subr.bf16.mxu0 %v5677_v8  ;;  %5751 = vmatprep.subr.bf16.mxu1 %v5677_v8 }
0x10e1   :  { %8310 = vpow2.f32 %v5634_v37  ;;  %5709 = vmatpush1.bf16.xpose.msra.mxu0 %v5676_v49  ;;  %5752 = vmatpush1.bf16.xpose.msra.mxu1 %v5676_v49  ;;  %v8301_v52 = vpop.eup %8300 }
0x10e2   :  { %8312 = vpow2.f32 %v5636_v22  ;;  %v5452_v29 = vpop.xlane.xlu0 %5451 }
0x10e3   :  { %v8303_v15 = vpop.eup %8302  ;;  %8314 = vpow2.f32 %v5632_v18  ;;  %v5518_v21 = vsub.f32 %v11841_v16, %v5452_v29  ;;  %v5519_v62 = vsub.f32 %v13871_v11, %v5452_v29 }
0x10e4   :  { %v8305_v23 = vpop.eup %8304  ;;  %v5455_v46 = vpop.xlane.xlu1 %5454  ;;  %v5678_v20 = vpack.c.bf16 %v8303_v15, %v8301_v52  ;;  %v13878_v15 = vld [vmem:[#allocation59_spill] sm:$0xff] }
0x10e5   :  { %v8307_v5 = vpop.eup %8306  ;;  %v5638_v38 = vmul.f32 1.442695, %v5518_v21  ;;  %v5640_v19 = vmul.f32 1.442695, %v5519_v62  ;;  %v5520_v63 = vsub.f32 %v13872_v53, %v5455_v46  ;;  %v5521_v59 = vsub.f32 %v13873_v36, %v5455_v46  ;;  %v13879_v21 = vld [vmem:[#allocation60_spill] sm:$0xff]  ;;  %v13881_v62 = vld [vmem:[#allocation82_spill] sm:$0xff] }
0x10e6   :  { %v5679_v3 = vpack.c.bf16 %v8305_v23, %v8307_v5  ;;  %v13880_v11 = vpack.c.bf16 %v13878_v15, %v13879_v21  ;;  %v13882_v23 = vld [vmem:[#allocation81_spill] sm:$0xff]  ;;  %v13885_v5 = vld [vmem:[#allocation58_spill] sm:$0xff]  ;;  %v13888_v53 = vmov 0  }
0x10e7   :  { %8316 = vpow2.f32 %v5638_v38  ;;  %v5642_v13 = vmul.f32 1.442695, %v5520_v63  ;;  %v5644_v41 = vmul.f32 1.442695, %v5521_v59  ;;  %v13883_v46 = vpack.c.bf16 %v13881_v62, %v13882_v23  ;;  %v13886_v38 = vld [vmem:[#allocation57_spill] sm:$0xff] }
0x10e8   :  { %8318 = vpow2.f32 %v5640_v19  ;;  %5710 = vmatprep.subr.bf16.mxu0 %v5679_v3  ;;  %5753 = vmatprep.subr.bf16.mxu1 %v5679_v3  ;;  %v13887_v19 = vpack.c.bf16 %v13885_v5, %v13886_v38 }
0x10e9   :  { %8320 = vpow2.f32 %v5642_v13  ;;  %5711 = vmatpush1.bf16.xpose.msra.mxu0 %v5678_v20  ;;  %5754 = vmatpush1.bf16.xpose.msra.mxu1 %v5678_v20  ;;  %v8309_v16 = vpop.eup %8308  ;;  %v13884_v20 = vmov 1065369472  }
0x10ea   :  { %8322 = vpow2.f32 %v5644_v41  ;;  %v5458_v32 = vpop.xlane.xlu0 %5457 }
0x10eb   :  { %v8311_v30 = vpop.eup %8310  ;;  %v5522_v39 = vsub.f32 %v13874_v35, %v5458_v32  ;;  %v5523_v50 = vsub.f32 %v13875_v12, %v5458_v32 }
0x10ec   :  { %v8313_v42 = vpop.eup %8312  ;;  %v5461_v51 = vpop.xlane.xlu1 %5460  ;;  %v5680_v31 = vpack.c.bf16 %v8311_v30, %v8309_v16 }
0x10ed   :  { %v8315_v34 = vpop.eup %8314  ;;  %v5646_v47 = vmul.f32 1.442695, %v5522_v39  ;;  %v5648_v9 = vmul.f32 1.442695, %v5523_v50  ;;  %v5524_v27 = vsub.f32 %v13876_v6, %v5461_v51  ;;  %v5525_v57 = vsub.f32 %v13877_v44, %v5461_v51 }
0x10ee   :  { %v5681_v14 = vpack.c.bf16 %v8313_v42, %v8315_v34  ;;  %v5789_v63 = vpop.permute.xlu0 %5788  ;;  %v13889_v34 = vld [vmem:[#allocation37_spill] sm:$0xff] }
0x10ef   :  { %8324 = vpow2.f32 %v5646_v47  ;;  %v5650_v43 = vmul.f32 1.442695, %v5524_v27  ;;  %v5652_v49 = vmul.f32 1.442695, %v5525_v57  ;;  %v13890_v47 = vld [vmem:[#allocation83_spill] sm:$0xff] }
0x10f0   :  { %8326 = vpow2.f32 %v5648_v9  ;;  %5712 = vmatprep.subr.bf16.mxu0 %v5681_v14  ;;  %5755 = vmatprep.subr.bf16.mxu1 %v5681_v14  ;;  %v5791_v36 = vpop.permute.xlu1 %5790  ;;  %v13891_v9 = vpack.c.bf16 %v13889_v34, %v13890_v47 }
0x10f1   :  { %v8317_v1 = vpop.eup %8316  ;;  %8328 = vpow2.f32 %v5650_v43  ;;  %5713 = vmatpush1.bf16.xpose.msra.mxu0 %v5680_v31  ;;  %5756 = vmatpush1.bf16.xpose.msra.mxu1 %v5680_v31 }
0x10f2   :  { %v8319_v61 = vpop.eup %8318  ;;  %8330 = vpow2.f32 %v5652_v49  ;;  %v5795_v3 = vpop.permute.xlu0 %5794 }
0x10f3   :  { %v8321_v7 = vpop.eup %8320 }
0x10f4   :  { %v8323_v60 = vpop.eup %8322  ;;  %v5682_v33 = vpack.c.bf16 %v8321_v7, %v8317_v1  ;;  %v5793_v59 = vpop.permute.xlu1 %5792 }
0x10f5   :  { %v5683_v55 = vpack.c.bf16 %v8323_v60, %v8319_v61 }
0x10f6   :  { %v5799_v41 = vpop.permute.xlu0 %5798 }
0x10f7   :  { %5714 = vmatprep.subr.bf16.mxu0 %v5683_v55  ;;  %5757 = vmatprep.subr.bf16.mxu1 %v5683_v55 }
0x10f8   :  { %v5797_v13 = vpop.permute.xlu1 %5796 }
0x10f9   :  { %v8325_v8 = vpop.eup %8324  ;;  %5715 = vmatpush1.bf16.xpose.msra.mxu0 %v5682_v33  ;;  %5758 = vmatpush1.bf16.xpose.msra.mxu1 %v5682_v33 }
0x10fa   :  { %v8327_v18 = vpop.eup %8326  ;;  %v5803_v32 = vpop.permute.xlu0 %5802 }
0x10fb   :  { %v8329_v37 = vpop.eup %8328 }
0x10fc   :  { %v8331_v22 = vpop.eup %8330  ;;  %v5684_v52 = vpack.c.bf16 %v8329_v37, %v8325_v8  ;;  %v5801_v16 = vpop.permute.xlu1 %5800  ;;  %v13892_v37 = vld [vmem:[#allocation47_spill] sm:$0xff] }
0x10fd   :  { %v5685_v29 = vpack.c.bf16 %v8331_v22, %v8327_v18 }
0x10fe   :  { %v5807_v35 = vpop.permute.xlu0 %5806 }
0x10ff   :  { %5716 = vmatprep.subr.bf16.mxu0 %v5685_v29  ;;  %5759 = vmatprep.subr.bf16.mxu1 %v5685_v29 }
0x1100   :  { %v5805_v30 = vpop.permute.xlu1 %5804 }
0x1101   :  { %5717 = vmatpush1.bf16.xpose.msra.mxu0 %v5684_v52  ;;  %5760 = vmatpush1.bf16.xpose.msra.mxu1 %v5684_v52 }
0x1102   :  { %5868 = vmatprep.subr.bf16.mxu0 %v13880_v11  ;;  %v5811_v12 = vpop.permute.xlu0 %5810 }
0x1104   :  { %v5809_v39 = vpop.permute.xlu1 %5808 }
0x1106   :  { %v5815_v42 = vpop.permute.xlu0 %5814 }
0x1108   :  { %5719 = vmatmul.mubr.bf16.vlgmr.msra.gmra.mrb[116].mxu0 %v13883_v46  ;;  %5762 = vmatmul.mubr.bf16.vlgmr.msra.gmra.mrb[164].mxu1 %v13884_v20  ;;  %v5813_v50 = vpop.permute.xlu1 %5812 }
0x1109   :  { %5869 = vmatpush1.bf16.msra.mxu0 %v13887_v19  ;;  %5900 = vmatprep.mubr.bf16.mxu0 %v13888_v53 }
0x110a   :  { %6456 = vmatprep.mubr.bf16.mxu1 %v13884_v20  ;;  %v5819_v31 = vpop.permute.xlu0 %5818 }
0x110c   :  { %v5817_v51 = vpop.permute.xlu1 %5816 }
0x1110   :  { %7436 = vmatmul.mubr.msk.bf16.vlgmr.msra.gmra.mrb[120].mxu0 %vm1214_vm1, %v5789_v63 }
0x1111   :  { %5910 = vmatprep.mubr.bf16.mxu0 %v13888_v53 }
0x1118   :  { %7437 = vmatmul.mubr.msk.bf16.gmra.mrb[124].mxu0 %vm1214_vm1, %v5791_v36 }
0x1119   :  { %5920 = vmatprep.mubr.bf16.mxu0 %v13888_v53 }
0x1120   :  { %7438 = vmatmul.mubr.msk.bf16.gmra.mrb[128].mxu0 %vm1214_vm1, %v5793_v59 }
0x1121   :  { %5930 = vmatprep.mubr.bf16.mxu0 %v13888_v53 }
0x1128   :  { %7439 = vmatmul.mubr.msk.bf16.gmra.mrb[132].mxu0 %vm1214_vm1, %v5795_v3 }
0x1129   :  { %5940 = vmatprep.mubr.bf16.mxu0 %v13888_v53 }
0x1130   :  { %7440 = vmatmul.mubr.msk.bf16.gmra.mrb[136].mxu0 %vm1214_vm1, %v5797_v13 }
0x1131   :  { %5950 = vmatprep.mubr.bf16.mxu0 %v13888_v53 }
0x1138   :  { %7441 = vmatmul.mubr.msk.bf16.gmra.mrb[140].mxu0 %vm1214_vm1, %v5799_v41 }
0x1139   :  { %5960 = vmatprep.mubr.bf16.mxu0 %v13888_v53 }
0x1140   :  { %7442 = vmatmul.mubr.msk.bf16.gmra.mrb[144].mxu0 %vm1214_vm1, %v5801_v16 }
0x1141   :  { %5970 = vmatprep.mubr.bf16.mxu0 %v13888_v53 }
0x1148   :  { %7443 = vmatmul.mubr.msk.bf16.gmra.mrb[148].mxu0 %vm1214_vm1, %v5803_v32 }
0x1149   :  { %5980 = vmatprep.mubr.bf16.mxu0 %v13888_v53 }
0x1150   :  { %7444 = vmatmul.mubr.msk.bf16.gmra.mrb[152].mxu0 %vm1214_vm1, %v5805_v30 }
0x1151   :  { %5990 = vmatprep.mubr.bf16.mxu0 %v13888_v53 }
0x1158   :  { %7445 = vmatmul.mubr.msk.bf16.gmra.mrb[156].mxu0 %vm1214_vm1, %v5807_v35 }
0x1159   :  { %6000 = vmatprep.mubr.bf16.mxu0 %v13888_v53 }
0x1160   :  { %7446 = vmatmul.mubr.msk.bf16.gmra.mrb[160].mxu0 %vm1214_vm1, %v5809_v39 }
0x1161   :  { %6010 = vmatprep.mubr.bf16.mxu0 %v13888_v53 }
0x1168   :  { %7447 = vmatmul.mubr.msk.bf16.gmra.mrb[164].mxu0 %vm1214_vm1, %v5811_v12 }
0x1169   :  { %6020 = vmatprep.mubr.bf16.mxu0 %v13888_v53 }
0x1170   :  { %7448 = vmatmul.mubr.msk.bf16.gmra.mrb[168].mxu0 %vm1214_vm1, %v5813_v50 }
0x1171   :  { %6030 = vmatprep.mubr.bf16.mxu0 %v13888_v53 }
0x1178   :  { %7449 = vmatmul.mubr.msk.bf16.gmra.mrb[172].mxu0 %vm1214_vm1, %v5815_v42 }
0x1179   :  { %6040 = vmatprep.mubr.bf16.mxu0 %v13888_v53 }
0x1180   :  { %7450 = vmatmul.mubr.msk.bf16.gmra.mrb[176].mxu0 %vm1214_vm1, %v5817_v51 }
0x1181   :  { %6050 = vmatprep.mubr.bf16.mxu0 %v13888_v53 }
0x1188   :  { %7451 = vmatmul.mubr.msk.bf16.gmra.mrb[180].mxu0 %vm1214_vm1, %v5819_v31 }
0x1189   :  { %6413 = vmatprep.mubr.bf16.mxu0 %v13891_v9 }
0x11db   :  { %v5720_v6 = vpop.f32.mrb[116].mxu0  ;;  %v5763_v27 = vpop.f32.mrb[164].mxu1 }
0x11dc   :  { %8332 = vrcp.f32 %v5763_v27  ;;  %v5722_v44 = vpop.f32.mrb[117].mxu0  ;;  %v5765_v57 = vpop.f32.mrb[165].mxu1 }
0x11dd   :  { %8334 = vrcp.f32 %v5765_v57  ;;  %v5724_v14 = vpop.f32.mrb[118].mxu0  ;;  %v5767_v43 = vpop.f32.mrb[166].mxu1 }
0x11de   :  { %v5726_v49 = vpop.f32.mrb[119].mxu0  ;;  %v5768_v1 = vpop.f32.mrb[167].mxu1 }
0x11e3   :  { %v12007_v61 = vpop.f32.mrb[120].mxu0 }
0x11e4   :  { %v12009_v7 = vpop.f32.mrb[121].mxu0 }
0x11e5   :  { %v6061_v60 = vmax.f32 %v12007_v61, %v12009_v7  ;;  %v12013_v33 = vpop.f32.mrb[122].mxu0 }
0x11e6   :  { %v8333_v55 = vpop.eup %8332  ;;  %v12015_v8 = vpop.f32.mrb[123].mxu0 }
0x11e7   :  { %v8335_v18 = vpop.eup %8334  ;;  %v5775_v22 = vrot.slane %v8333_v55, %v13892_v37  ;;  %v6064_v52 = vmax.f32 %v12013_v33, %v12015_v8  ;;  %6062 = vmax.xlane.f32.xlu1 %v6061_v60 }
0x11e8   :  { %v5779_v29 = vrot.slane %v8335_v18, %v13892_v37 }
0x11e9   :  { %v12021_v15 = vmul.f32 %v5775_v22, %v5720_v6  ;;  %v12023_v21 = vmul.f32 %v5775_v22, %v5724_v14  ;;  %6065 = vmax.xlane.f32.xlu0 %v6064_v52 }
0x11ea   :  { %v12025_v11 = vmul.f32 %v5779_v29, %v5722_v44  ;;  %v12027_v62 = vmul.f32 %v5779_v29, %v5726_v49 }
0x11eb   :  { %13893 = vst [vmem:[#allocation14_spill] sm:$0xff] %v12021_v15  ;;  %13894 = vst [vmem:[#allocation13_spill] sm:$0xff] %v12023_v21  ;;  %v12031_v46 = vpop.f32.mrb[124].mxu0 }
0x11ec   :  { %13895 = vst [vmem:[#allocation49_spill] sm:$0xff] %v12025_v11  ;;  %13896 = vst [vmem:[#allocation48_spill] sm:$0xff] %v12027_v62  ;;  %v12035_v38 = vpop.f32.mrb[125].mxu0 }
0x11ed   :  { %v6067_v19 = vmax.f32 %v12031_v46, %v12035_v38  ;;  %v12039_v63 = vpop.f32.mrb[126].mxu0 }
0x11ee   :  { %v12041_v36 = vpop.f32.mrb[127].mxu0 }
0x11ef   :  { %v6070_v59 = vmax.f32 %v12039_v63, %v12041_v36  ;;  %6068 = vmax.xlane.f32.xlu0 %v6067_v19 }
0x11f1   :  { %6071 = vmax.xlane.f32.xlu1 %v6070_v59 }
0x11f3   :  { %v12045_v3 = vpop.f32.mrb[128].mxu0 }
0x11f4   :  { %v12047_v13 = vpop.f32.mrb[129].mxu0 }
0x11f5   :  { %v6073_v41 = vmax.f32 %v12045_v3, %v12047_v13  ;;  %v12051_v16 = vpop.f32.mrb[130].mxu0 }
0x11f6   :  { %v12053_v32 = vpop.f32.mrb[131].mxu0 }
0x11f7   :  { %v6076_v30 = vmax.f32 %v12051_v16, %v12053_v32  ;;  %6074 = vmax.xlane.f32.xlu0 %v6073_v41 }
0x11f9   :  { %6077 = vmax.xlane.f32.xlu1 %v6076_v30 }
0x11fb   :  { %v12057_v35 = vpop.f32.mrb[132].mxu0 }
0x11fc   :  { %v12059_v39 = vpop.f32.mrb[133].mxu0 }
0x11fd   :  { %v6079_v12 = vmax.f32 %v12057_v35, %v12059_v39  ;;  %v12063_v50 = vpop.f32.mrb[134].mxu0 }
0x11fe   :  { %v12065_v42 = vpop.f32.mrb[135].mxu0 }
0x11ff   :  { %v6082_v51 = vmax.f32 %v12063_v50, %v12065_v42  ;;  %6080 = vmax.xlane.f32.xlu0 %v6079_v12 }
0x1201   :  { %6083 = vmax.xlane.f32.xlu1 %v6082_v51 }
0x1203   :  { %v12069_v31 = vpop.f32.mrb[136].mxu0 }
0x1204   :  { %v12071_v34 = vpop.f32.mrb[137].mxu0 }
0x1205   :  { %v6085_v47 = vmax.f32 %v12069_v31, %v12071_v34  ;;  %v12075_v9 = vpop.f32.mrb[138].mxu0 }
0x1206   :  { %v12077_v6 = vpop.f32.mrb[139].mxu0 }
0x1207   :  { %v6088_v27 = vmax.f32 %v12075_v9, %v12077_v6  ;;  %6086 = vmax.xlane.f32.xlu0 %v6085_v47 }
0x1209   :  { %6089 = vmax.xlane.f32.xlu1 %v6088_v27 }
0x120b   :  { %v12081_v44 = vpop.f32.mrb[140].mxu0 }
0x120c   :  { %v12083_v57 = vpop.f32.mrb[141].mxu0 }
0x120d   :  { %v6091_v14 = vmax.f32 %v12081_v44, %v12083_v57  ;;  %v12087_v43 = vpop.f32.mrb[142].mxu0 }
0x120e   :  { %v12089_v49 = vpop.f32.mrb[143].mxu0 }
0x120f   :  { %v6094_v1 = vmax.f32 %v12087_v43, %v12089_v49  ;;  %6092 = vmax.xlane.f32.xlu0 %v6091_v14 }
0x1211   :  { %6095 = vmax.xlane.f32.xlu1 %v6094_v1 }
0x1213   :  { %v12093_v60 = vpop.f32.mrb[144].mxu0 }
0x1214   :  { %v12095_v55 = vpop.f32.mrb[145].mxu0 }
0x1215   :  { %v6097_v18 = vmax.f32 %v12093_v60, %v12095_v55  ;;  %v12099_v22 = vpop.f32.mrb[146].mxu0 }
0x1216   :  { %v12101_v52 = vpop.f32.mrb[147].mxu0 }
0x1217   :  { %v6100_v29 = vmax.f32 %v12099_v22, %v12101_v52  ;;  %6098 = vmax.xlane.f32.xlu0 %v6097_v18 }
0x1219   :  { %6101 = vmax.xlane.f32.xlu1 %v6100_v29 }
0x121b   :  { %v12105_v19 = vpop.f32.mrb[148].mxu0 }
0x121c   :  { %v12107_v59 = vpop.f32.mrb[149].mxu0 }
0x121d   :  { %v6103_v41 = vmax.f32 %v12105_v19, %v12107_v59  ;;  %v12111_v30 = vpop.f32.mrb[150].mxu0 }
0x121e   :  { %v12113_v12 = vpop.f32.mrb[151].mxu0 }
0x121f   :  { %v6106_v51 = vmax.f32 %v12111_v30, %v12113_v12  ;;  %6104 = vmax.xlane.f32.xlu0 %v6103_v41 }
0x1221   :  { %6107 = vmax.xlane.f32.xlu1 %v6106_v51 }
0x1223   :  { %v12117_v47 = vpop.f32.mrb[152].mxu0 }
0x1224   :  { %v12119_v27 = vpop.f32.mrb[153].mxu0 }
0x1225   :  { %v6109_v14 = vmax.f32 %v12117_v47, %v12119_v27  ;;  %v12123_v1 = vpop.f32.mrb[154].mxu0 }
0x1226   :  { %v12125_v18 = vpop.f32.mrb[155].mxu0 }
0x1227   :  { %v6112_v29 = vmax.f32 %v12123_v1, %v12125_v18  ;;  %6110 = vmax.xlane.f32.xlu0 %v6109_v14 }
0x1229   :  { %6113 = vmax.xlane.f32.xlu1 %v6112_v29 }
0x122b   :  { %v12129_v23 = vpop.f32.mrb[156].mxu0 }
0x122c   :  { %v12131_v41 = vpop.f32.mrb[157].mxu0 }
0x122d   :  { %v6115_v51 = vmax.f32 %v12129_v23, %v12131_v41  ;;  %v12135_v5 = vpop.f32.mrb[158].mxu0 }
0x122e   :  { %13897 = vst [vmem:[#allocation69_spill] sm:$0xff] %v12135_v5  ;;  %v12137_v15 = vpop.f32.mrb[159].mxu0 }
0x122f   :  { %13898 = vst [vmem:[#allocation70_spill] sm:$0xff] %v12137_v15  ;;  %v6118_v21 = vmax.f32 %v12135_v5, %v12137_v15  ;;  %6116 = vmax.xlane.f32.xlu0 %v6115_v51 }
0x1231   :  { %6119 = vmax.xlane.f32.xlu1 %v6118_v21 }
0x1233   :  { %v12141_v11 = vpop.f32.mrb[160].mxu0 }
0x1234   :  { %13899 = vst [vmem:[#allocation30_spill] sm:$0xff] %v12141_v11  ;;  %v12143_v14 = vpop.f32.mrb[161].mxu0 }
0x1235   :  { %13900 = vst [vmem:[#allocation71_spill] sm:$0xff] %v12143_v14  ;;  %v6121_v29 = vmax.f32 %v12141_v11, %v12143_v14  ;;  %v12147_v62 = vpop.f32.mrb[162].mxu0 }
0x1236   :  { %13901 = vst [vmem:[#allocation16_spill] sm:$0xff] %v12147_v62  ;;  %v12149_v37 = vpop.f32.mrb[163].mxu0 }
0x1237   :  { %13902 = vst [vmem:[#allocation15_spill] sm:$0xff] %v12149_v37  ;;  %v6124_v53 = vmax.f32 %v12147_v62, %v12149_v37  ;;  %6122 = vmax.xlane.f32.xlu0 %v6121_v29 }
0x1239   :  { %6125 = vmax.xlane.f32.xlu1 %v6124_v53 }
0x123b   :  { %v12153_v20 = vpop.f32.mrb[164].mxu0 }
0x123c   :  { %13903 = vst [vmem:[#allocation18_spill] sm:$0xff] %v12153_v20  ;;  %v12155_v51 = vpop.f32.mrb[165].mxu0 }
0x123d   :  { %13904 = vst [vmem:[#allocation17_spill] sm:$0xff] %v12155_v51  ;;  %v6127_v21 = vmax.f32 %v12153_v20, %v12155_v51  ;;  %v12159_v15 = vpop.f32.mrb[166].mxu0 }
0x123e   :  { %13905 = vst [vmem:[#allocation19_spill] sm:$0xff] %v12159_v15  ;;  %v12161_v5 = vpop.f32.mrb[167].mxu0 }
0x123f   :  { %13906 = vst [vmem:[#allocation20_spill] sm:$0xff] %v12161_v5  ;;  %v6130_v14 = vmax.f32 %v12159_v15, %v12161_v5  ;;  %6128 = vmax.xlane.f32.xlu0 %v6127_v21 }
0x1241   :  { %6131 = vmax.xlane.f32.xlu1 %v6130_v14 }
0x1243   :  { %v12165_v11 = vpop.f32.mrb[168].mxu0 }
0x1244   :  { %13907 = vst [vmem:[#allocation21_spill] sm:$0xff] %v12165_v11  ;;  %v12167_v29 = vpop.f32.mrb[169].mxu0 }
0x1245   :  { %13908 = vst [vmem:[#allocation42_spill] sm:$0xff] %v12167_v29  ;;  %v6133_v53 = vmax.f32 %v12165_v11, %v12167_v29  ;;  %v12171_v37 = vpop.f32.mrb[170].mxu0 }
0x1246   :  { %13909 = vst [vmem:[#allocation40_spill] sm:$0xff] %v12171_v37  ;;  %v12173_v62 = vpop.f32.mrb[171].mxu0 }
0x1247   :  { %13910 = vst [vmem:[#allocation79_spill] sm:$0xff] %v12173_v62  ;;  %v6136_v51 = vmax.f32 %v12171_v37, %v12173_v62  ;;  %6134 = vmax.xlane.f32.xlu0 %v6133_v53 }
0x1249   :  { %6137 = vmax.xlane.f32.xlu1 %v6136_v51 }
0x124b   :  { %v12177_v20 = vpop.f32.mrb[172].mxu0 }
0x124c   :  { %13911 = vst [vmem:[#allocation78_spill] sm:$0xff] %v12177_v20  ;;  %v12179_v21 = vpop.f32.mrb[173].mxu0 }
0x124d   :  { %13912 = vst [vmem:[#allocation39_spill] sm:$0xff] %v12179_v21  ;;  %v6139_v14 = vmax.f32 %v12177_v20, %v12179_v21  ;;  %v12183_v5 = vpop.f32.mrb[174].mxu0 }
0x124e   :  { %13913 = vst [vmem:[#allocation41_spill] sm:$0xff] %v12183_v5  ;;  %v12185_v15 = vpop.f32.mrb[175].mxu0 }
0x124f   :  { %13914 = vst [vmem:[#allocation80_spill] sm:$0xff] %v12185_v15  ;;  %v6142_v29 = vmax.f32 %v12183_v5, %v12185_v15  ;;  %6140 = vmax.xlane.f32.xlu0 %v6139_v14 }
0x1251   :  { %6143 = vmax.xlane.f32.xlu1 %v6142_v29 }
0x1253   :  { %v12189_v11 = vpop.f32.mrb[176].mxu0 }
0x1254   :  { %v12191_v53 = vpop.f32.mrb[177].mxu0 }
0x1255   :  { %13915 = vst [vmem:[#allocation77_spill] sm:$0xff] %v12191_v53  ;;  %v6145_v51 = vmax.f32 %v12189_v11, %v12191_v53  ;;  %v12195_v62 = vpop.f32.mrb[178].mxu0 }
0x1256   :  { %13916 = vst [vmem:[#allocation26_spill] sm:$0xff] %v12195_v62  ;;  %v12197_v37 = vpop.f32.mrb[179].mxu0 }
0x1257   :  { %13917 = vst [vmem:[#allocation27_spill] sm:$0xff] %v12197_v37  ;;  %v6148_v21 = vmax.f32 %v12195_v62, %v12197_v37  ;;  %6146 = vmax.xlane.f32.xlu0 %v6145_v51  ;;  %v13922_v37 = vld [vmem:[#allocation61_spill] sm:$0xff] }
0x1259   :  { %6149 = vmax.xlane.f32.xlu1 %v6148_v21 }
0x125b   :  { %v12201_v20 = vpop.f32.mrb[180].mxu0 }
0x125c   :  { %13918 = vst [vmem:[#allocation28_spill] sm:$0xff] %v12201_v20  ;;  %v12203_v14 = vpop.f32.mrb[181].mxu0 }
0x125d   :  { %13919 = vst [vmem:[#allocation34_spill] sm:$0xff] %v12203_v14  ;;  %v6151_v29 = vmax.f32 %v12201_v20, %v12203_v14  ;;  %v12207_v15 = vpop.f32.mrb[182].mxu0 }
0x125e   :  { %13920 = vst [vmem:[#allocation33_spill] sm:$0xff] %v12207_v15  ;;  %v12209_v5 = vpop.f32.mrb[183].mxu0 }
0x125f   :  { %13921 = vst [vmem:[#allocation54_spill] sm:$0xff] %v12209_v5  ;;  %v6154_v53 = vmax.f32 %v12207_v15, %v12209_v5  ;;  %6152 = vmax.xlane.f32.xlu0 %v6151_v29 }
0x1261   :  { %6155 = vmax.xlane.f32.xlu1 %v6154_v53 }
0x1272   :  { %6485 = vrot.lane.b32.xlu1 %v13922_v37, %s8652_s10 }
0x1274   :  { %v6063_v21 = vpop.xlane.xlu1 %6062 }
0x1275   :  { %v6157_v51 = vsub.f32 %v12007_v61, %v6063_v21  ;;  %v6158_v62 = vsub.f32 %v12009_v7, %v6063_v21  ;;  %6483 = vrot.lane.b32.xlu0 %v11213_v45, %s8652_s10 }
0x1276   :  { %6487 = vrot.lane.b32.xlu1 %v11223_v24, %s8652_s10  ;;  %v6066_v14 = vpop.xlane.xlu0 %6065 }
0x1277   :  { %v6221_v20 = vmul.f32 1.442695, %v6157_v51  ;;  %v6159_v5 = vsub.f32 %v12013_v33, %v6066_v14  ;;  %v6160_v53 = vsub.f32 %v12015_v8, %v6066_v14  ;;  %v6223_v29 = vmul.f32 1.442695, %v6158_v62 }
0x1279   :  { %v6225_v15 = vmul.f32 1.442695, %v6159_v5  ;;  %v6227_v37 = vmul.f32 1.442695, %v6160_v53  ;;  %6489 = vrot.lane.b32.xlu0 %v11228_v10, %s8652_s10  ;;  %8336 = vpow2.f32 %v6221_v20 }
0x127a   :  { %6491 = vrot.lane.b32.xlu1 %v11233_v2, %s8652_s10 }
0x127b   :  { %8338 = vpow2.f32 %v6225_v15 }
0x127c   :  { %8340 = vpow2.f32 %v6227_v37  ;;  %v6069_v45 = vpop.xlane.xlu0 %6068 }
0x127d   :  { %8342 = vpow2.f32 %v6223_v29  ;;  %v6161_v24 = vsub.f32 %v12031_v46, %v6069_v45  ;;  %v6162_v61 = vsub.f32 %v12035_v38, %v6069_v45  ;;  %6493 = vrot.lane.b32.xlu0 %v11238_v48, %s8652_s10 }
0x127e   :  { %v6072_v7 = vpop.xlane.xlu1 %6071  ;;  %6495 = vrot.lane.b32.xlu1 %v11243_v17, %s8652_s10 }
0x127f   :  { %v6229_v10 = vmul.f32 1.442695, %v6161_v24  ;;  %v6163_v20 = vsub.f32 %v12039_v63, %v6072_v7  ;;  %v6164_v2 = vsub.f32 %v12041_v36, %v6072_v7  ;;  %v6231_v33 = vmul.f32 1.442695, %v6162_v61 }
0x1281   :  { %v6233_v8 = vmul.f32 1.442695, %v6163_v20  ;;  %v6235_v15 = vmul.f32 1.442695, %v6164_v2  ;;  %6497 = vrot.lane.b32.xlu0 %v11248_v4, %s8652_s10  ;;  %8344 = vpow2.f32 %v6229_v10 }
0x1282   :  { %6499 = vrot.lane.b32.xlu1 %v11253_v28, %s8652_s10 }
0x1283   :  { %8346 = vpow2.f32 %v6233_v8  ;;  %v8337_v48 = vpop.eup %8336 }
0x1284   :  { %8348 = vpow2.f32 %v6235_v15  ;;  %v6075_v62 = vpop.xlane.xlu0 %6074 }
0x1285   :  { %v8339_v17 = vpop.eup %8338  ;;  %8350 = vpow2.f32 %v6231_v33  ;;  %v6165_v46 = vsub.f32 %v12045_v3, %v6075_v62  ;;  %v6166_v5 = vsub.f32 %v12047_v13, %v6075_v62  ;;  %6501 = vrot.lane.b32.xlu0 %v11258_v58, %s8652_s10 }
0x1286   :  { %v8341_v38 = vpop.eup %8340  ;;  %v6078_v63 = vpop.xlane.xlu1 %6077  ;;  %6503 = vrot.lane.b32.xlu1 %v11263_v26, %s8652_s10  ;;  %v6349_v4 = vpack.c.bf16 %v8339_v17, %v8337_v48 }
0x1287   :  { %v8343_v28 = vpop.eup %8342  ;;  %v6237_v36 = vmul.f32 1.442695, %v6165_v46  ;;  %v6167_v14 = vsub.f32 %v12051_v16, %v6078_v63  ;;  %v6168_v21 = vsub.f32 %v12053_v32, %v6078_v63  ;;  %v6239_v53 = vmul.f32 1.442695, %v6166_v5 }
0x1288   :  { %v6350_v51 = vpack.c.bf16 %v8341_v38, %v8343_v28 }
0x1289   :  { %v6241_v3 = vmul.f32 1.442695, %v6167_v14  ;;  %v6243_v29 = vmul.f32 1.442695, %v6168_v21  ;;  %6505 = vrot.lane.b32.xlu0 %v11276_v0, %s8652_s10  ;;  %8352 = vpow2.f32 %v6237_v36 }
0x128a   :  { %6381 = vmatprep.subr.bf16.mxu0 %v6350_v51  ;;  %6424 = vmatprep.subr.bf16.mxu1 %v6350_v51 }
0x128b   :  { %8354 = vpow2.f32 %v6241_v3  ;;  %6382 = vmatpush1.bf16.xpose.msra.mxu0 %v6349_v4  ;;  %6425 = vmatpush1.bf16.xpose.msra.mxu1 %v6349_v4  ;;  %v8345_v58 = vpop.eup %8344 }
0x128c   :  { %8356 = vpow2.f32 %v6243_v29  ;;  %6507 = vrot.lane.b32.xlu1 %v11289_v56, %s8652_s10  ;;  %v6081_v26 = vpop.xlane.xlu0 %6080 }
0x128d   :  { %v8347_v13 = vpop.eup %8346  ;;  %8358 = vpow2.f32 %v6239_v53  ;;  %v6169_v16 = vsub.f32 %v12057_v35, %v6081_v26  ;;  %v6170_v32 = vsub.f32 %v12059_v39, %v6081_v26  ;;  %6509 = vrot.lane.b32.xlu0 %v11302_v25, %s8652_s10 }
0x128e   :  { %v8349_v0 = vpop.eup %8348  ;;  %v6084_v37 = vpop.xlane.xlu1 %6083  ;;  %v6351_v45 = vpack.c.bf16 %v8347_v13, %v8345_v58 }
0x128f   :  { %v8351_v24 = vpop.eup %8350  ;;  %v6245_v61 = vmul.f32 1.442695, %v6169_v16  ;;  %v6171_v7 = vsub.f32 %v12063_v50, %v6084_v37  ;;  %v6172_v10 = vsub.f32 %v12065_v42, %v6084_v37  ;;  %v6247_v20 = vmul.f32 1.442695, %v6170_v32 }
0x1290   :  { %6511 = vrot.lane.b32.xlu1 %v11315_v54, %s8652_s10  ;;  %v6352_v56 = vpack.c.bf16 %v8349_v0, %v8351_v24 }
0x1291   :  { %v6249_v35 = vmul.f32 1.442695, %v6171_v7  ;;  %v6251_v2 = vmul.f32 1.442695, %v6172_v10  ;;  %6513 = vrot.lane.b32.xlu0 %v11320_v40, %s8652_s10  ;;  %8360 = vpow2.f32 %v6245_v61 }
0x1292   :  { %6383 = vmatprep.subr.bf16.mxu0 %v6352_v56  ;;  %6426 = vmatprep.subr.bf16.mxu1 %v6352_v56 }
0x1293   :  { %8362 = vpow2.f32 %v6249_v35  ;;  %6384 = vmatpush1.bf16.xpose.msra.mxu0 %v6351_v45  ;;  %6427 = vmatpush1.bf16.xpose.msra.mxu1 %v6351_v45  ;;  %v8353_v25 = vpop.eup %8352 }
0x1294   :  { %8364 = vpow2.f32 %v6251_v2  ;;  %v6087_v39 = vpop.xlane.xlu0 %6086 }
0x1295   :  { %v8355_v50 = vpop.eup %8354  ;;  %8366 = vpow2.f32 %v6247_v20  ;;  %v6173_v54 = vsub.f32 %v12069_v31, %v6087_v39  ;;  %v6174_v42 = vsub.f32 %v12071_v34, %v6087_v39 }
0x1296   :  { %v8357_v33 = vpop.eup %8356  ;;  %v6090_v8 = vpop.xlane.xlu1 %6089  ;;  %v6353_v15 = vpack.c.bf16 %v8355_v50, %v8353_v25 }
0x1297   :  { %v8359_v48 = vpop.eup %8358  ;;  %v6253_v40 = vmul.f32 1.442695, %v6173_v54  ;;  %v6175_v62 = vsub.f32 %v12075_v9, %v6090_v8  ;;  %v6176_v17 = vsub.f32 %v12077_v6, %v6090_v8  ;;  %v6255_v5 = vmul.f32 1.442695, %v6174_v42 }
0x1298   :  { %v6354_v46 = vpack.c.bf16 %v8357_v33, %v8359_v48 }
0x1299   :  { %v6257_v38 = vmul.f32 1.442695, %v6175_v62  ;;  %v6259_v63 = vmul.f32 1.442695, %v6176_v17  ;;  %8368 = vpow2.f32 %v6253_v40 }
0x129a   :  { %6385 = vmatprep.subr.bf16.mxu0 %v6354_v46  ;;  %6428 = vmatprep.subr.bf16.mxu1 %v6354_v46 }
0x129b   :  { %8370 = vpow2.f32 %v6257_v38  ;;  %6386 = vmatpush1.bf16.xpose.msra.mxu0 %v6353_v15  ;;  %6429 = vmatpush1.bf16.xpose.msra.mxu1 %v6353_v15  ;;  %v8361_v31 = vpop.eup %8360 }
0x129c   :  { %8372 = vpow2.f32 %v6259_v63  ;;  %v6093_v34 = vpop.xlane.xlu0 %6092 }
0x129d   :  { %v8363_v4 = vpop.eup %8362  ;;  %8374 = vpow2.f32 %v6255_v5  ;;  %v6177_v28 = vsub.f32 %v12081_v44, %v6093_v34  ;;  %v6178_v9 = vsub.f32 %v12083_v57, %v6093_v34 }
0x129e   :  { %v8365_v6 = vpop.eup %8364  ;;  %v6096_v36 = vpop.xlane.xlu1 %6095  ;;  %v6355_v14 = vpack.c.bf16 %v8363_v4, %v8361_v31 }
0x129f   :  { %v8367_v21 = vpop.eup %8366  ;;  %v6261_v51 = vmul.f32 1.442695, %v6177_v28  ;;  %v6179_v53 = vsub.f32 %v12087_v43, %v6096_v36  ;;  %v6180_v3 = vsub.f32 %v12089_v49, %v6096_v36  ;;  %v6263_v58 = vmul.f32 1.442695, %v6178_v9 }
0x12a0   :  { %v6356_v29 = vpack.c.bf16 %v8365_v6, %v8367_v21 }
0x12a1   :  { %v6265_v26 = vmul.f32 1.442695, %v6179_v53  ;;  %v6267_v13 = vmul.f32 1.442695, %v6180_v3  ;;  %8376 = vpow2.f32 %v6261_v51 }
0x12a2   :  { %6387 = vmatprep.subr.bf16.mxu0 %v6356_v29  ;;  %6430 = vmatprep.subr.bf16.mxu1 %v6356_v29 }
0x12a3   :  { %8378 = vpow2.f32 %v6265_v26  ;;  %6388 = vmatpush1.bf16.xpose.msra.mxu0 %v6355_v14  ;;  %6431 = vmatpush1.bf16.xpose.msra.mxu1 %v6355_v14  ;;  %v8369_v44 = vpop.eup %8368 }
0x12a4   :  { %8380 = vpow2.f32 %v6267_v13  ;;  %v6099_v57 = vpop.xlane.xlu0 %6098  ;;  %v13924_v13 = vld [vmem:[#allocation70_spill] sm:$0xff] }
0x12a5   :  { %v8371_v16 = vpop.eup %8370  ;;  %8382 = vpow2.f32 %v6263_v58  ;;  %v6181_v32 = vsub.f32 %v12093_v60, %v6099_v57  ;;  %v6182_v43 = vsub.f32 %v12095_v55, %v6099_v57  ;;  %v13923_v58 = vld [vmem:[#allocation69_spill] sm:$0xff] }
0x12a6   :  { %v8373_v49 = vpop.eup %8372  ;;  %v6102_v0 = vpop.xlane.xlu1 %6101  ;;  %v6357_v37 = vpack.c.bf16 %v8371_v16, %v8369_v44 }
0x12a7   :  { %v8375_v45 = vpop.eup %8374  ;;  %v6269_v24 = vmul.f32 1.442695, %v6181_v32  ;;  %v6183_v61 = vsub.f32 %v12099_v22, %v6102_v0  ;;  %v6184_v7 = vsub.f32 %v12101_v52, %v6102_v0  ;;  %v6271_v56 = vmul.f32 1.442695, %v6182_v43  ;;  %v13925_v0 = vld [vmem:[#allocation30_spill] sm:$0xff] }
0x12a8   :  { %v6358_v10 = vpack.c.bf16 %v8373_v49, %v8375_v45  ;;  %v13926_v45 = vld [vmem:[#allocation71_spill] sm:$0xff] }
0x12a9   :  { %v6273_v20 = vmul.f32 1.442695, %v6183_v61  ;;  %v6275_v35 = vmul.f32 1.442695, %v6184_v7  ;;  %8384 = vpow2.f32 %v6269_v24 }
0x12aa   :  { %6389 = vmatprep.subr.bf16.mxu0 %v6358_v10  ;;  %6432 = vmatprep.subr.bf16.mxu1 %v6358_v10 }
0x12ab   :  { %8386 = vpow2.f32 %v6273_v20  ;;  %6390 = vmatpush1.bf16.xpose.msra.mxu0 %v6357_v37  ;;  %6433 = vmatpush1.bf16.xpose.msra.mxu1 %v6357_v37  ;;  %v8377_v60 = vpop.eup %8376 }
0x12ac   :  { %8388 = vpow2.f32 %v6275_v35  ;;  %v6105_v55 = vpop.xlane.xlu0 %6104  ;;  %v13927_v35 = vld [vmem:[#allocation16_spill] sm:$0xff] }
0x12ad   :  { %v8379_v2 = vpop.eup %8378  ;;  %8390 = vpow2.f32 %v6271_v56  ;;  %v6185_v25 = vsub.f32 %v12105_v19, %v6105_v55  ;;  %v6186_v22 = vsub.f32 %v12107_v59, %v6105_v55  ;;  %v13928_v55 = vld [vmem:[#allocation15_spill] sm:$0xff] }
0x12ae   :  { %v8381_v52 = vpop.eup %8380  ;;  %v6108_v39 = vpop.xlane.xlu1 %6107  ;;  %v6359_v50 = vpack.c.bf16 %v8379_v2, %v8377_v60 }
0x12af   :  { %v8383_v54 = vpop.eup %8382  ;;  %v6277_v42 = vmul.f32 1.442695, %v6185_v25  ;;  %v6187_v33 = vsub.f32 %v12111_v30, %v6108_v39  ;;  %v6188_v8 = vsub.f32 %v12113_v12, %v6108_v39  ;;  %v6279_v48 = vmul.f32 1.442695, %v6186_v22 }
0x12b0   :  { %v6360_v15 = vpack.c.bf16 %v8381_v52, %v8383_v54 }
0x12b1   :  { %v6281_v40 = vmul.f32 1.442695, %v6187_v33  ;;  %v6283_v62 = vmul.f32 1.442695, %v6188_v8  ;;  %8392 = vpow2.f32 %v6277_v42  ;;  %v13929_v33 = vld [vmem:[#allocation18_spill] sm:$0xff] }
0x12b2   :  { %6391 = vmatprep.subr.bf16.mxu0 %v6360_v15  ;;  %6434 = vmatprep.subr.bf16.mxu1 %v6360_v15  ;;  %v13930_v15 = vld [vmem:[#allocation17_spill] sm:$0xff] }
0x12b3   :  { %8394 = vpow2.f32 %v6281_v40  ;;  %6392 = vmatpush1.bf16.xpose.msra.mxu0 %v6359_v50  ;;  %6435 = vmatpush1.bf16.xpose.msra.mxu1 %v6359_v50  ;;  %v8385_v19 = vpop.eup %8384 }
0x12b4   :  { %8396 = vpow2.f32 %v6283_v62  ;;  %v6111_v59 = vpop.xlane.xlu0 %6110 }
0x12b5   :  { %v8387_v17 = vpop.eup %8386  ;;  %8398 = vpow2.f32 %v6279_v48  ;;  %v6189_v46 = vsub.f32 %v12117_v47, %v6111_v59  ;;  %v6190_v30 = vsub.f32 %v12119_v27, %v6111_v59 }
0x12b6   :  { %v8389_v12 = vpop.eup %8388  ;;  %v6114_v5 = vpop.xlane.xlu1 %6113  ;;  %v6361_v38 = vpack.c.bf16 %v8387_v17, %v8385_v19 }
0x12b7   :  { %v8391_v63 = vpop.eup %8390  ;;  %v6285_v31 = vmul.f32 1.442695, %v6189_v46  ;;  %v6191_v34 = vsub.f32 %v12123_v1, %v6114_v5  ;;  %v6192_v4 = vsub.f32 %v12125_v18, %v6114_v5  ;;  %v6287_v9 = vmul.f32 1.442695, %v6190_v30  ;;  %v13931_v46 = vld [vmem:[#allocation19_spill] sm:$0xff] }
0x12b8   :  { %v6362_v28 = vpack.c.bf16 %v8389_v12, %v8391_v63  ;;  %v13932_v12 = vld [vmem:[#allocation20_spill] sm:$0xff] }
0x12b9   :  { %v6289_v6 = vmul.f32 1.442695, %v6191_v34  ;;  %v6291_v36 = vmul.f32 1.442695, %v6192_v4  ;;  %8400 = vpow2.f32 %v6285_v31 }
0x12ba   :  { %6393 = vmatprep.subr.bf16.mxu0 %v6362_v28  ;;  %6436 = vmatprep.subr.bf16.mxu1 %v6362_v28 }
0x12bb   :  { %8402 = vpow2.f32 %v6289_v6  ;;  %6394 = vmatpush1.bf16.xpose.msra.mxu0 %v6361_v38  ;;  %6437 = vmatpush1.bf16.xpose.msra.mxu1 %v6361_v38  ;;  %v8393_v47 = vpop.eup %8392  ;;  %v13933_v6 = vld [vmem:[#allocation21_spill] sm:$0xff] }
0x12bc   :  { %8404 = vpow2.f32 %v6291_v36  ;;  %v6117_v27 = vpop.xlane.xlu0 %6116 }
0x12bd   :  { %v8395_v14 = vpop.eup %8394  ;;  %8406 = vpow2.f32 %v6287_v9  ;;  %v6193_v21 = vsub.f32 %v12129_v23, %v6117_v27  ;;  %v6194_v1 = vsub.f32 %v12131_v41, %v6117_v27 }
0x12be   :  { %v8397_v18 = vpop.eup %8396  ;;  %v6120_v51 = vpop.xlane.xlu1 %6119  ;;  %v6363_v53 = vpack.c.bf16 %v8395_v14, %v8393_v47  ;;  %v13934_v47 = vld [vmem:[#allocation42_spill] sm:$0xff] }
0x12bf   :  { %v8399_v3 = vpop.eup %8398  ;;  %v6293_v29 = vmul.f32 1.442695, %v6193_v21  ;;  %v6195_v26 = vsub.f32 %v13923_v58, %v6120_v51  ;;  %v6196_v44 = vsub.f32 %v13924_v13, %v6120_v51  ;;  %v6295_v16 = vmul.f32 1.442695, %v6194_v1 }
0x12c0   :  { %v6364_v57 = vpack.c.bf16 %v8397_v18, %v8399_v3 }
0x12c1   :  { %v6297_v32 = vmul.f32 1.442695, %v6195_v26  ;;  %v6299_v43 = vmul.f32 1.442695, %v6196_v44  ;;  %8408 = vpow2.f32 %v6293_v29  ;;  %v13936_v29 = vld [vmem:[#allocation79_spill] sm:$0xff] }
0x12c2   :  { %6395 = vmatprep.subr.bf16.mxu0 %v6364_v57  ;;  %6438 = vmatprep.subr.bf16.mxu1 %v6364_v57 }
0x12c3   :  { %8410 = vpow2.f32 %v6297_v32  ;;  %6396 = vmatpush1.bf16.xpose.msra.mxu0 %v6363_v53  ;;  %6439 = vmatpush1.bf16.xpose.msra.mxu1 %v6363_v53  ;;  %v8401_v23 = vpop.eup %8400  ;;  %v13935_v53 = vld [vmem:[#allocation40_spill] sm:$0xff] }
0x12c4   :  { %8412 = vpow2.f32 %v6299_v43  ;;  %v6123_v41 = vpop.xlane.xlu0 %6122 }
0x12c5   :  { %v8403_v49 = vpop.eup %8402  ;;  %8414 = vpow2.f32 %v6295_v16  ;;  %v6197_v37 = vsub.f32 %v13925_v0, %v6123_v41  ;;  %v6198_v24 = vsub.f32 %v13926_v45, %v6123_v41 }
0x12c6   :  { %v8405_v61 = vpop.eup %8404  ;;  %v6126_v7 = vpop.xlane.xlu1 %6125  ;;  %v6365_v10 = vpack.c.bf16 %v8403_v49, %v8401_v23  ;;  %v13937_v23 = vld [vmem:[#allocation78_spill] sm:$0xff]  ;;  %v13938_v49 = vld [vmem:[#allocation39_spill] sm:$0xff] }
0x12c7   :  { %v8407_v56 = vpop.eup %8406  ;;  %v6301_v20 = vmul.f32 1.442695, %v6197_v37  ;;  %v6199_v60 = vsub.f32 %v13927_v35, %v6126_v7  ;;  %v6200_v2 = vsub.f32 %v13928_v55, %v6126_v7  ;;  %v6303_v22 = vmul.f32 1.442695, %v6198_v24 }
0x12c8   :  { %v6366_v25 = vpack.c.bf16 %v8405_v61, %v8407_v56 }
0x12c9   :  { %v6305_v52 = vmul.f32 1.442695, %v6199_v60  ;;  %v6307_v39 = vmul.f32 1.442695, %v6200_v2  ;;  %8416 = vpow2.f32 %v6301_v20  ;;  %v13940_v20 = vld [vmem:[#allocation80_spill] sm:$0xff] }
0x12ca   :  { %6397 = vmatprep.subr.bf16.mxu0 %v6366_v25  ;;  %6440 = vmatprep.subr.bf16.mxu1 %v6366_v25 }
0x12cb   :  { %8418 = vpow2.f32 %v6305_v52  ;;  %6398 = vmatpush1.bf16.xpose.msra.mxu0 %v6365_v10  ;;  %6441 = vmatpush1.bf16.xpose.msra.mxu1 %v6365_v10  ;;  %v8409_v50 = vpop.eup %8408  ;;  %v13939_v10 = vld [vmem:[#allocation41_spill] sm:$0xff] }
0x12cc   :  { %8420 = vpow2.f32 %v6307_v39  ;;  %v6129_v54 = vpop.xlane.xlu0 %6128 }
0x12cd   :  { %v8411_v42 = vpop.eup %8410  ;;  %8422 = vpow2.f32 %v6303_v22  ;;  %v6201_v8 = vsub.f32 %v13929_v33, %v6129_v54  ;;  %v6202_v48 = vsub.f32 %v13930_v15, %v6129_v54  ;;  %v13941_v54 = vld [vmem:[#allocation77_spill] sm:$0xff] }
0x12ce   :  { %v8413_v40 = vpop.eup %8412  ;;  %v6132_v62 = vpop.xlane.xlu1 %6131  ;;  %v6367_v19 = vpack.c.bf16 %v8411_v42, %v8409_v50 }
0x12cf   :  { %v8415_v59 = vpop.eup %8414  ;;  %v6309_v17 = vmul.f32 1.442695, %v6201_v8  ;;  %v6203_v30 = vsub.f32 %v13931_v46, %v6132_v62  ;;  %v6204_v5 = vsub.f32 %v13932_v12, %v6132_v62  ;;  %v6311_v63 = vmul.f32 1.442695, %v6202_v48 }
0x12d0   :  { %v6368_v38 = vpack.c.bf16 %v8413_v40, %v8415_v59 }
0x12d1   :  { %v6313_v31 = vmul.f32 1.442695, %v6203_v30  ;;  %v6315_v34 = vmul.f32 1.442695, %v6204_v5  ;;  %8424 = vpow2.f32 %v6309_v17  ;;  %v13943_v17 = vld [vmem:[#allocation27_spill] sm:$0xff] }
0x12d2   :  { %6399 = vmatprep.subr.bf16.mxu0 %v6368_v38  ;;  %6442 = vmatprep.subr.bf16.mxu1 %v6368_v38 }
0x12d3   :  { %8426 = vpow2.f32 %v6313_v31  ;;  %6400 = vmatpush1.bf16.xpose.msra.mxu0 %v6367_v19  ;;  %6443 = vmatpush1.bf16.xpose.msra.mxu1 %v6367_v19  ;;  %v8417_v4 = vpop.eup %8416  ;;  %v13942_v19 = vld [vmem:[#allocation26_spill] sm:$0xff]  ;;  %v13944_v31 = vld [vmem:[#allocation28_spill] sm:$0xff] }
0x12d4   :  { %8428 = vpow2.f32 %v6315_v34  ;;  %v6135_v28 = vpop.xlane.xlu0 %6134 }
0x12d5   :  { %v8419_v9 = vpop.eup %8418  ;;  %8430 = vpow2.f32 %v6311_v63  ;;  %v6205_v36 = vsub.f32 %v13933_v6, %v6135_v28  ;;  %v6206_v27 = vsub.f32 %v13934_v47, %v6135_v28 }
0x12d6   :  { %v8421_v14 = vpop.eup %8420  ;;  %v6138_v21 = vpop.xlane.xlu1 %6137  ;;  %v6369_v1 = vpack.c.bf16 %v8419_v9, %v8417_v4  ;;  %v13945_v4 = vld [vmem:[#allocation34_spill] sm:$0xff] }
0x12d7   :  { %v8423_v18 = vpop.eup %8422  ;;  %v6317_v51 = vmul.f32 1.442695, %v6205_v36  ;;  %v6207_v3 = vsub.f32 %v13935_v53, %v6138_v21  ;;  %v6208_v58 = vsub.f32 %v13936_v29, %v6138_v21  ;;  %v6319_v13 = vmul.f32 1.442695, %v6206_v27  ;;  %v13946_v21 = vld [vmem:[#allocation33_spill] sm:$0xff] }
0x12d8   :  { %v6370_v26 = vpack.c.bf16 %v8421_v14, %v8423_v18  ;;  %v13947_v18 = vld [vmem:[#allocation54_spill] sm:$0xff] }
0x12d9   :  { %v6321_v44 = vmul.f32 1.442695, %v6207_v3  ;;  %v6323_v57 = vmul.f32 1.442695, %v6208_v58  ;;  %8432 = vpow2.f32 %v6317_v51 }
0x12da   :  { %6401 = vmatprep.subr.bf16.mxu0 %v6370_v26  ;;  %6444 = vmatprep.subr.bf16.mxu1 %v6370_v26 }
0x12db   :  { %8434 = vpow2.f32 %v6321_v44  ;;  %6402 = vmatpush1.bf16.xpose.msra.mxu0 %v6369_v1  ;;  %6445 = vmatpush1.bf16.xpose.msra.mxu1 %v6369_v1  ;;  %v8425_v16 = vpop.eup %8424 }
0x12dc   :  { %8436 = vpow2.f32 %v6323_v57  ;;  %v6141_v32 = vpop.xlane.xlu0 %6140 }
0x12dd   :  { %v8427_v43 = vpop.eup %8426  ;;  %8438 = vpow2.f32 %v6319_v13  ;;  %v6209_v41 = vsub.f32 %v13937_v23, %v6141_v32  ;;  %v6210_v0 = vsub.f32 %v13938_v49, %v6141_v32 }
0x12de   :  { %v8429_v37 = vpop.eup %8428  ;;  %v6144_v45 = vpop.xlane.xlu1 %6143  ;;  %v6371_v24 = vpack.c.bf16 %v8427_v43, %v8425_v16 }
0x12df   :  { %v8431_v61 = vpop.eup %8430  ;;  %v6325_v7 = vmul.f32 1.442695, %v6209_v41  ;;  %v6211_v56 = vsub.f32 %v13939_v10, %v6144_v45  ;;  %v6212_v35 = vsub.f32 %v13940_v20, %v6144_v45  ;;  %v6327_v55 = vmul.f32 1.442695, %v6210_v0  ;;  %v13949_v45 = vld [vmem:[#allocation75_spill] sm:$0xff]  ;;  %v13955_v20 = vld [vmem:[#allocation74_spill] sm:$0xff] }
0x12e0   :  { %v6372_v60 = vpack.c.bf16 %v8429_v37, %v8431_v61  ;;  %v13948_v37 = vld [vmem:[#allocation76_spill] sm:$0xff] }
0x12e1   :  { %v6329_v2 = vmul.f32 1.442695, %v6211_v56  ;;  %v6331_v25 = vmul.f32 1.442695, %v6212_v35  ;;  %8440 = vpow2.f32 %v6325_v7  ;;  %v13951_v61 = vld [vmem:[#allocation36_spill] sm:$0xff]  ;;  %v13952_v7 = vld [vmem:[#allocation35_spill] sm:$0xff] }
0x12e2   :  { %6403 = vmatprep.subr.bf16.mxu0 %v6372_v60  ;;  %6446 = vmatprep.subr.bf16.mxu1 %v6372_v60  ;;  %v13953_v10 = vpack.c.bf16 %v13951_v61, %v13952_v7  ;;  %v13954_v56 = vmov 1065369472   ;;  %v13956_v35 = vld [vmem:[#allocation73_spill] sm:$0xff] }
0x12e3   :  { %8442 = vpow2.f32 %v6329_v2  ;;  %6404 = vmatpush1.bf16.xpose.msra.mxu0 %v6371_v24  ;;  %6447 = vmatpush1.bf16.xpose.msra.mxu1 %v6371_v24  ;;  %v8433_v22 = vpop.eup %8432  ;;  %v13950_v24 = vpack.c.bf16 %v13948_v37, %v13949_v45  ;;  %v13957_v60 = vpack.c.bf16 %v13955_v20, %v13956_v35 }
0x12e4   :  { %8444 = vpow2.f32 %v6331_v25  ;;  %v6147_v52 = vpop.xlane.xlu0 %6146 }
0x12e5   :  { %v8435_v39 = vpop.eup %8434  ;;  %8446 = vpow2.f32 %v6327_v55  ;;  %v6213_v50 = vsub.f32 %v12189_v11, %v6147_v52  ;;  %v6214_v42 = vsub.f32 %v13941_v54, %v6147_v52  ;;  %v13958_v55 = vmov 0  }
0x12e6   :  { %v8437_v33 = vpop.eup %8436  ;;  %v6150_v8 = vpop.xlane.xlu1 %6149  ;;  %v6373_v15 = vpack.c.bf16 %v8435_v39, %v8433_v22 }
0x12e7   :  { %v8439_v48 = vpop.eup %8438  ;;  %v6333_v40 = vmul.f32 1.442695, %v6213_v50  ;;  %v6335_v62 = vmul.f32 1.442695, %v6214_v42  ;;  %v6215_v59 = vsub.f32 %v13942_v19, %v6150_v8  ;;  %v6216_v46 = vsub.f32 %v13943_v17, %v6150_v8  ;;  %v13959_v17 = vld [vmem:[#allocation84_spill] sm:$0xff] }
0x12e8   :  { %v6374_v30 = vpack.c.bf16 %v8437_v33, %v8439_v48 }
0x12e9   :  { %8448 = vpow2.f32 %v6333_v40  ;;  %v6337_v12 = vmul.f32 1.442695, %v6215_v59  ;;  %v6339_v5 = vmul.f32 1.442695, %v6216_v46  ;;  %v13960_v46 = vld [vmem:[#allocation38_spill] sm:$0xff] }
0x12ea   :  { %8450 = vpow2.f32 %v6335_v62  ;;  %6405 = vmatprep.subr.bf16.mxu0 %v6374_v30  ;;  %6448 = vmatprep.subr.bf16.mxu1 %v6374_v30  ;;  %v13961_v30 = vpack.c.bf16 %v13959_v17, %v13960_v46 }
0x12eb   :  { %8452 = vpow2.f32 %v6337_v12  ;;  %6406 = vmatpush1.bf16.xpose.msra.mxu0 %v6373_v15  ;;  %6449 = vmatpush1.bf16.xpose.msra.mxu1 %v6373_v15  ;;  %v8441_v11 = vpop.eup %8440 }
0x12ec   :  { %8454 = vpow2.f32 %v6339_v5  ;;  %v6153_v38 = vpop.xlane.xlu0 %6152 }
0x12ed   :  { %v8443_v63 = vpop.eup %8442  ;;  %v6217_v34 = vsub.f32 %v13944_v31, %v6153_v38  ;;  %v6218_v28 = vsub.f32 %v13945_v4, %v6153_v38 }
0x12ee   :  { %v8445_v9 = vpop.eup %8444  ;;  %v6156_v6 = vpop.xlane.xlu1 %6155  ;;  %v6375_v36 = vpack.c.bf16 %v8443_v63, %v8441_v11 }
0x12ef   :  { %v8447_v47 = vpop.eup %8446  ;;  %v6341_v27 = vmul.f32 1.442695, %v6217_v34  ;;  %v6343_v14 = vmul.f32 1.442695, %v6218_v28  ;;  %v6219_v1 = vsub.f32 %v13946_v21, %v6156_v6  ;;  %v6220_v51 = vsub.f32 %v13947_v18, %v6156_v6  ;;  %v13962_v21 = vld [vmem:[#allocation47_spill] sm:$0xff] }
0x12f0   :  { %v6376_v53 = vpack.c.bf16 %v8445_v9, %v8447_v47  ;;  %v6484_v2 = vpop.permute.xlu0 %6483 }
0x12f1   :  { %8456 = vpow2.f32 %v6341_v27  ;;  %v6345_v3 = vmul.f32 1.442695, %v6219_v1  ;;  %v6347_v29 = vmul.f32 1.442695, %v6220_v51 }
0x12f2   :  { %8458 = vpow2.f32 %v6343_v14  ;;  %6407 = vmatprep.subr.bf16.mxu0 %v6376_v53  ;;  %6450 = vmatprep.subr.bf16.mxu1 %v6376_v53  ;;  %v6486_v25 = vpop.permute.xlu1 %6485 }
0x12f3   :  { %v8449_v58 = vpop.eup %8448  ;;  %8460 = vpow2.f32 %v6345_v3  ;;  %6408 = vmatpush1.bf16.xpose.msra.mxu0 %v6375_v36  ;;  %6451 = vmatpush1.bf16.xpose.msra.mxu1 %v6375_v36 }
0x12f4   :  { %v8451_v26 = vpop.eup %8450  ;;  %8462 = vpow2.f32 %v6347_v29  ;;  %v6490_v52 = vpop.permute.xlu0 %6489 }
0x12f5   :  { %v8453_v13 = vpop.eup %8452 }
0x12f6   :  { %v8455_v44 = vpop.eup %8454  ;;  %v6377_v57 = vpack.c.bf16 %v8453_v13, %v8449_v58  ;;  %v6488_v22 = vpop.permute.xlu1 %6487 }
0x12f7   :  { %v6378_v16 = vpack.c.bf16 %v8455_v44, %v8451_v26 }
0x12f8   :  { %v6494_v50 = vpop.permute.xlu0 %6493 }
0x12f9   :  { %6409 = vmatprep.subr.bf16.mxu0 %v6378_v16  ;;  %6452 = vmatprep.subr.bf16.mxu1 %v6378_v16 }
0x12fa   :  { %v6492_v39 = vpop.permute.xlu1 %6491 }
0x12fb   :  { %v8457_v32 = vpop.eup %8456  ;;  %6410 = vmatpush1.bf16.xpose.msra.mxu0 %v6377_v57  ;;  %6453 = vmatpush1.bf16.xpose.msra.mxu1 %v6377_v57 }
0x12fc   :  { %v8459_v43 = vpop.eup %8458  ;;  %v6498_v42 = vpop.permute.xlu0 %6497 }
0x12fd   :  { %v8461_v23 = vpop.eup %8460 }
0x12fe   :  { %v8463_v41 = vpop.eup %8462  ;;  %v6379_v49 = vpack.c.bf16 %v8461_v23, %v8457_v32  ;;  %v6496_v54 = vpop.permute.xlu1 %6495 }
0x12ff   :  { %v6380_v0 = vpack.c.bf16 %v8463_v41, %v8459_v43 }
0x1300   :  { %v6502_v8 = vpop.permute.xlu0 %6501 }
0x1301   :  { %6411 = vmatprep.subr.bf16.mxu0 %v6380_v0  ;;  %6454 = vmatprep.subr.bf16.mxu1 %v6380_v0 }
0x1302   :  { %v6500_v33 = vpop.permute.xlu1 %6499 }
0x1303   :  { %6412 = vmatpush1.bf16.xpose.msra.mxu0 %v6379_v49  ;;  %6455 = vmatpush1.bf16.xpose.msra.mxu1 %v6379_v49 }
0x1304   :  { %6563 = vmatprep.subr.bf16.mxu0 %v13950_v24  ;;  %v6506_v48 = vpop.permute.xlu0 %6505 }
0x1306   :  { %v6504_v15 = vpop.permute.xlu1 %6503 }
0x1308   :  { %v6510_v62 = vpop.permute.xlu0 %6509 }
0x130a   :  { %6414 = vmatmul.mubr.bf16.vlgmr.msra.gmra.mrb[184].mxu0 %v13953_v10  ;;  %6457 = vmatmul.mubr.bf16.vlgmr.msra.gmra.mrb[168].mxu1 %v13954_v56  ;;  %v6508_v40 = vpop.permute.xlu1 %6507 }
0x130b   :  { %6564 = vmatpush1.bf16.msra.mxu0 %v13957_v60  ;;  %6595 = vmatprep.mubr.bf16.mxu0 %v13958_v55 }
0x130c   :  { %7151 = vmatprep.mubr.bf16.mxu1 %v13954_v56  ;;  %v6514_v59 = vpop.permute.xlu0 %6513 }
0x130e   :  { %v6512_v19 = vpop.permute.xlu1 %6511 }
0x1312   :  { %7452 = vmatmul.mubr.msk.bf16.vlgmr.msra.gmra.mrb[188].mxu0 %vm1214_vm1, %v6484_v2 }
0x1313   :  { %6605 = vmatprep.mubr.bf16.mxu0 %v13958_v55 }
0x131a   :  { %7453 = vmatmul.mubr.msk.bf16.gmra.mrb[192].mxu0 %vm1214_vm1, %v6486_v25 }
0x131b   :  { %6615 = vmatprep.mubr.bf16.mxu0 %v13958_v55 }
0x1322   :  { %7454 = vmatmul.mubr.msk.bf16.gmra.mrb[196].mxu0 %vm1214_vm1, %v6488_v22 }
0x1323   :  { %6625 = vmatprep.mubr.bf16.mxu0 %v13958_v55 }
0x132a   :  { %7455 = vmatmul.mubr.msk.bf16.gmra.mrb[200].mxu0 %vm1214_vm1, %v6490_v52 }
0x132b   :  { %6635 = vmatprep.mubr.bf16.mxu0 %v13958_v55 }
0x1332   :  { %7456 = vmatmul.mubr.msk.bf16.gmra.mrb[204].mxu0 %vm1214_vm1, %v6492_v39 }
0x1333   :  { %6645 = vmatprep.mubr.bf16.mxu0 %v13958_v55 }
0x133a   :  { %7457 = vmatmul.mubr.msk.bf16.gmra.mrb[208].mxu0 %vm1214_vm1, %v6494_v50 }
0x133b   :  { %6655 = vmatprep.mubr.bf16.mxu0 %v13958_v55 }
0x1342   :  { %7458 = vmatmul.mubr.msk.bf16.gmra.mrb[212].mxu0 %vm1214_vm1, %v6496_v54 }
0x1343   :  { %6665 = vmatprep.mubr.bf16.mxu0 %v13958_v55 }
0x134a   :  { %7459 = vmatmul.mubr.msk.bf16.gmra.mrb[216].mxu0 %vm1214_vm1, %v6498_v42 }
0x134b   :  { %6675 = vmatprep.mubr.bf16.mxu0 %v13958_v55 }
0x1352   :  { %7460 = vmatmul.mubr.msk.bf16.gmra.mrb[220].mxu0 %vm1214_vm1, %v6500_v33 }
0x1353   :  { %6685 = vmatprep.mubr.bf16.mxu0 %v13958_v55 }
0x135a   :  { %7461 = vmatmul.mubr.msk.bf16.gmra.mrb[224].mxu0 %vm1214_vm1, %v6502_v8 }
0x135b   :  { %6695 = vmatprep.mubr.bf16.mxu0 %v13958_v55 }
0x1362   :  { %7462 = vmatmul.mubr.msk.bf16.gmra.mrb[228].mxu0 %vm1214_vm1, %v6504_v15 }
0x1363   :  { %6705 = vmatprep.mubr.bf16.mxu0 %v13958_v55 }
0x136a   :  { %7463 = vmatmul.mubr.msk.bf16.gmra.mrb[232].mxu0 %vm1214_vm1, %v6506_v48 }
0x136b   :  { %6715 = vmatprep.mubr.bf16.mxu0 %v13958_v55 }
0x1372   :  { %7464 = vmatmul.mubr.msk.bf16.gmra.mrb[236].mxu0 %vm1214_vm1, %v6508_v40 }
0x1373   :  { %6725 = vmatprep.mubr.bf16.mxu0 %v13958_v55 }
0x137a   :  { %7465 = vmatmul.mubr.msk.bf16.gmra.mrb[240].mxu0 %vm1214_vm1, %v6510_v62 }
0x137b   :  { %6735 = vmatprep.mubr.bf16.mxu0 %v13958_v55 }
0x1382   :  { %7466 = vmatmul.mubr.msk.bf16.gmra.mrb[244].mxu0 %vm1214_vm1, %v6512_v19 }
0x1383   :  { %6745 = vmatprep.mubr.bf16.mxu0 %v13958_v55 }
0x138a   :  { %7467 = vmatmul.mubr.msk.bf16.gmra.mrb[248].mxu0 %vm1214_vm1, %v6514_v59 }
0x138b   :  { %7108 = vmatprep.mubr.bf16.mxu0 %v13961_v30 }
0x13dd   :  { %v6415_v12 = vpop.f32.mrb[184].mxu0  ;;  %v6458_v5 = vpop.f32.mrb[168].mxu1 }
0x13de   :  { %8464 = vrcp.f32 %v6458_v5  ;;  %v6417_v11 = vpop.f32.mrb[185].mxu0  ;;  %v6460_v38 = vpop.f32.mrb[169].mxu1 }
0x13df   :  { %8466 = vrcp.f32 %v6460_v38  ;;  %v6419_v63 = vpop.f32.mrb[186].mxu0  ;;  %v6462_v31 = vpop.f32.mrb[170].mxu1 }
0x13e0   :  { %v6421_v34 = vpop.f32.mrb[187].mxu0  ;;  %v6463_v4 = vpop.f32.mrb[171].mxu1 }
0x13e5   :  { %v12355_v28 = vpop.f32.mrb[188].mxu0 }
0x13e6   :  { %v12357_v9 = vpop.f32.mrb[189].mxu0 }
0x13e7   :  { %v6756_v6 = vmax.f32 %v12355_v28, %v12357_v9  ;;  %v12361_v36 = vpop.f32.mrb[190].mxu0 }
0x13e8   :  { %v8465_v47 = vpop.eup %8464  ;;  %v12363_v27 = vpop.f32.mrb[191].mxu0 }
0x13e9   :  { %v8467_v14 = vpop.eup %8466  ;;  %v6470_v1 = vrot.slane %v8465_v47, %v13962_v21  ;;  %v6759_v18 = vmax.f32 %v12361_v36, %v12363_v27  ;;  %6757 = vmax.xlane.f32.xlu1 %v6756_v6 }
0x13ea   :  { %v6474_v51 = vrot.slane %v8467_v14, %v13962_v21 }
0x13eb   :  { %v12369_v53 = vmul.f32 %v6470_v1, %v6415_v12  ;;  %v12371_v3 = vmul.f32 %v6470_v1, %v6419_v63  ;;  %6760 = vmax.xlane.f32.xlu0 %v6759_v18 }
0x13ec   :  { %v12373_v29 = vmul.f32 %v6474_v51, %v6417_v11  ;;  %v12375_v58 = vmul.f32 %v6474_v51, %v6421_v34 }
0x13ed   :  { %13963 = vst [vmem:[#allocation53_spill] sm:$0xff] %v12369_v53  ;;  %13964 = vst [vmem:[#allocation72_spill] sm:$0xff] %v12371_v3  ;;  %v12379_v13 = vpop.f32.mrb[192].mxu0 }
0x13ee   :  { %13965 = vst [vmem:[#allocation64_spill] sm:$0xff] %v12373_v29  ;;  %13966 = vst [vmem:[#allocation32_spill] sm:$0xff] %v12375_v58  ;;  %v12383_v57 = vpop.f32.mrb[193].mxu0 }
0x13ef   :  { %v6762_v16 = vmax.f32 %v12379_v13, %v12383_v57  ;;  %v12387_v32 = vpop.f32.mrb[194].mxu0 }
0x13f0   :  { %v12389_v43 = vpop.f32.mrb[195].mxu0 }
0x13f1   :  { %v6765_v23 = vmax.f32 %v12387_v32, %v12389_v43  ;;  %6763 = vmax.xlane.f32.xlu0 %v6762_v16 }
0x13f3   :  { %6766 = vmax.xlane.f32.xlu1 %v6765_v23 }
0x13f5   :  { %v12393_v41 = vpop.f32.mrb[196].mxu0 }
0x13f6   :  { %v12395_v49 = vpop.f32.mrb[197].mxu0 }
0x13f7   :  { %v6768_v0 = vmax.f32 %v12393_v41, %v12395_v49  ;;  %v12399_v37 = vpop.f32.mrb[198].mxu0 }
0x13f8   :  { %v12401_v45 = vpop.f32.mrb[199].mxu0 }
0x13f9   :  { %v6771_v24 = vmax.f32 %v12399_v37, %v12401_v45  ;;  %6769 = vmax.xlane.f32.xlu0 %v6768_v0 }
0x13fb   :  { %6772 = vmax.xlane.f32.xlu1 %v6771_v24 }
0x13fd   :  { %v12405_v61 = vpop.f32.mrb[200].mxu0 }
0x13fe   :  { %v12407_v7 = vpop.f32.mrb[201].mxu0 }
0x13ff   :  { %v6774_v10 = vmax.f32 %v12405_v61, %v12407_v7  ;;  %v12411_v20 = vpop.f32.mrb[202].mxu0 }
0x1400   :  { %v12413_v35 = vpop.f32.mrb[203].mxu0 }
0x1401   :  { %v6777_v60 = vmax.f32 %v12411_v20, %v12413_v35  ;;  %6775 = vmax.xlane.f32.xlu0 %v6774_v10 }
0x1403   :  { %6778 = vmax.xlane.f32.xlu1 %v6777_v60 }
0x1405   :  { %v12417_v2 = vpop.f32.mrb[204].mxu0 }
0x1406   :  { %v12419_v25 = vpop.f32.mrb[205].mxu0 }
0x1407   :  { %v6780_v22 = vmax.f32 %v12417_v2, %v12419_v25  ;;  %v12423_v52 = vpop.f32.mrb[206].mxu0 }
0x1408   :  { %v12425_v39 = vpop.f32.mrb[207].mxu0 }
0x1409   :  { %v6783_v50 = vmax.f32 %v12423_v52, %v12425_v39  ;;  %6781 = vmax.xlane.f32.xlu0 %v6780_v22 }
0x140b   :  { %6784 = vmax.xlane.f32.xlu1 %v6783_v50 }
0x140d   :  { %v12429_v54 = vpop.f32.mrb[208].mxu0 }
0x140e   :  { %v12431_v42 = vpop.f32.mrb[209].mxu0 }
0x140f   :  { %v6786_v33 = vmax.f32 %v12429_v54, %v12431_v42  ;;  %v12435_v8 = vpop.f32.mrb[210].mxu0 }
0x1410   :  { %v12437_v15 = vpop.f32.mrb[211].mxu0 }
0x1411   :  { %v6789_v48 = vmax.f32 %v12435_v8, %v12437_v15  ;;  %6787 = vmax.xlane.f32.xlu0 %v6786_v33 }
0x1413   :  { %6790 = vmax.xlane.f32.xlu1 %v6789_v48 }
0x1415   :  { %v12441_v40 = vpop.f32.mrb[212].mxu0 }
0x1416   :  { %v12443_v62 = vpop.f32.mrb[213].mxu0 }
0x1417   :  { %v6792_v19 = vmax.f32 %v12441_v40, %v12443_v62  ;;  %v12447_v59 = vpop.f32.mrb[214].mxu0 }
0x1418   :  { %v12449_v17 = vpop.f32.mrb[215].mxu0 }
0x1419   :  { %v6795_v46 = vmax.f32 %v12447_v59, %v12449_v17  ;;  %6793 = vmax.xlane.f32.xlu0 %v6792_v19 }
0x141b   :  { %6796 = vmax.xlane.f32.xlu1 %v6795_v46 }
0x141d   :  { %v12453_v30 = vpop.f32.mrb[216].mxu0 }
0x141e   :  { %v12455_v12 = vpop.f32.mrb[217].mxu0 }
0x141f   :  { %v6798_v5 = vmax.f32 %v12453_v30, %v12455_v12  ;;  %v12459_v11 = vpop.f32.mrb[218].mxu0 }
0x1420   :  { %v12461_v38 = vpop.f32.mrb[219].mxu0 }
0x1421   :  { %v6801_v63 = vmax.f32 %v12459_v11, %v12461_v38  ;;  %6799 = vmax.xlane.f32.xlu0 %v6798_v5 }
0x1423   :  { %6802 = vmax.xlane.f32.xlu1 %v6801_v63 }
0x1425   :  { %v12465_v31 = vpop.f32.mrb[220].mxu0 }
0x1426   :  { %v12467_v34 = vpop.f32.mrb[221].mxu0 }
0x1427   :  { %v6804_v4 = vmax.f32 %v12465_v31, %v12467_v34  ;;  %v12471_v6 = vpop.f32.mrb[222].mxu0 }
0x1428   :  { %v12473_v47 = vpop.f32.mrb[223].mxu0 }
0x1429   :  { %v6807_v14 = vmax.f32 %v12471_v6, %v12473_v47  ;;  %6805 = vmax.xlane.f32.xlu0 %v6804_v4 }
0x142b   :  { %6808 = vmax.xlane.f32.xlu1 %v6807_v14 }
0x142d   :  { %v12477_v1 = vpop.f32.mrb[224].mxu0 }
0x142e   :  { %v12479_v18 = vpop.f32.mrb[225].mxu0 }
0x142f   :  { %v6810_v51 = vmax.f32 %v12477_v1, %v12479_v18  ;;  %v12483_v16 = vpop.f32.mrb[226].mxu0 }
0x1430   :  { %v12485_v23 = vpop.f32.mrb[227].mxu0 }
0x1431   :  { %v6813_v0 = vmax.f32 %v12483_v16, %v12485_v23  ;;  %6811 = vmax.xlane.f32.xlu0 %v6810_v51 }
0x1433   :  { %6814 = vmax.xlane.f32.xlu1 %v6813_v0 }
0x1435   :  { %v12489_v24 = vpop.f32.mrb[228].mxu0 }
0x1436   :  { %v12491_v10 = vpop.f32.mrb[229].mxu0 }
0x1437   :  { %v6816_v60 = vmax.f32 %v12489_v24, %v12491_v10  ;;  %v12495_v22 = vpop.f32.mrb[230].mxu0 }
0x1438   :  { %v12497_v50 = vpop.f32.mrb[231].mxu0 }
0x1439   :  { %v6819_v33 = vmax.f32 %v12495_v22, %v12497_v50  ;;  %6817 = vmax.xlane.f32.xlu0 %v6816_v60 }
0x143b   :  { %6820 = vmax.xlane.f32.xlu1 %v6819_v33 }
0x143d   :  { %v12501_v48 = vpop.f32.mrb[232].mxu0 }
0x143e   :  { %v12503_v19 = vpop.f32.mrb[233].mxu0 }
0x143f   :  { %v6822_v46 = vmax.f32 %v12501_v48, %v12503_v19  ;;  %v12507_v5 = vpop.f32.mrb[234].mxu0 }
0x1440   :  { %v12509_v63 = vpop.f32.mrb[235].mxu0 }
0x1441   :  { %v6825_v4 = vmax.f32 %v12507_v5, %v12509_v63  ;;  %6823 = vmax.xlane.f32.xlu0 %v6822_v46 }
0x1443   :  { %6826 = vmax.xlane.f32.xlu1 %v6825_v4 }
0x1445   :  { %v12513_v14 = vpop.f32.mrb[236].mxu0 }
0x1446   :  { %v12515_v51 = vpop.f32.mrb[237].mxu0 }
0x1447   :  { %v6828_v0 = vmax.f32 %v12513_v14, %v12515_v51  ;;  %v12519_v60 = vpop.f32.mrb[238].mxu0 }
0x1448   :  { %v12521_v33 = vpop.f32.mrb[239].mxu0 }
0x1449   :  { %13967 = vst [vmem:[#allocation31_spill] sm:$0xff] %v12521_v33  ;;  %v6831_v26 = vmax.f32 %v12519_v60, %v12521_v33  ;;  %6829 = vmax.xlane.f32.xlu0 %v6828_v0 }
0x144b   :  { %6832 = vmax.xlane.f32.xlu1 %v6831_v26 }
0x144d   :  { %v12525_v44 = vpop.f32.mrb[240].mxu0 }
0x144e   :  { %13968 = vst [vmem:[#allocation52_spill] sm:$0xff] %v12525_v44  ;;  %v12527_v46 = vpop.f32.mrb[241].mxu0 }
0x144f   :  { %13969 = vst [vmem:[#allocation29_spill] sm:$0xff] %v12527_v46  ;;  %v6834_v4 = vmax.f32 %v12525_v44, %v12527_v46  ;;  %v12531_v21 = vpop.f32.mrb[242].mxu0 }
0x1450   :  { %13970 = vst [vmem:[#allocation90_spill] sm:$0xff] %v12531_v21  ;;  %v12533_v53 = vpop.f32.mrb[243].mxu0 }
0x1451   :  { %13971 = vst [vmem:[#allocation89_spill] sm:$0xff] %v12533_v53  ;;  %v6837_v3 = vmax.f32 %v12531_v21, %v12533_v53  ;;  %6835 = vmax.xlane.f32.xlu0 %v6834_v4 }
0x1453   :  { %6838 = vmax.xlane.f32.xlu1 %v6837_v3 }
0x1455   :  { %v12537_v29 = vpop.f32.mrb[244].mxu0 }
0x1456   :  { %13972 = vst [vmem:[#allocation68_spill] sm:$0xff] %v12537_v29  ;;  %v12539_v0 = vpop.f32.mrb[245].mxu0 }
0x1457   :  { %13973 = vst [vmem:[#allocation5_spill] sm:$0xff] %v12539_v0  ;;  %v6840_v26 = vmax.f32 %v12537_v29, %v12539_v0  ;;  %v12543_v58 = vpop.f32.mrb[246].mxu0  ;;  %v744_v29 = vld [vmem:[%s12955_s6 + $0x20] sm:$0xff] }
0x1458   :  { %13974 = vst [vmem:[#allocation7_spill] sm:$0xff] %v12543_v58  ;;  %v12545_v55 = vpop.f32.mrb[247].mxu0 }
0x1459   :  { %13975 = vst [vmem:[#allocation6_spill] sm:$0xff] %v12545_v55  ;;  %v6843_v56 = vmax.f32 %v12543_v58, %v12545_v55  ;;  %6841 = vmax.xlane.f32.xlu0 %v6840_v26  ;;  %v740_v26 = vld [vmem:[%s12955_s6] sm:$0xff] }
0x145b   :  { %6844 = vmax.xlane.f32.xlu1 %v6843_v56  ;;  %v741_v56 = vld [vmem:[%s12955_s6 + $0x8] sm:$0xff] }
0x145d   :  { %v12549_v46 = vpop.f32.mrb[248].mxu0 }
0x145e   :  { %13976 = vst [vmem:[#allocation50_spill] sm:$0xff] %v12549_v46  ;;  %v12551_v4 = vpop.f32.mrb[249].mxu0 }
0x145f   :  { %13977 = vst [vmem:[#allocation51_spill] sm:$0xff] %v12551_v4  ;;  %v6846_v3 = vmax.f32 %v12549_v46, %v12551_v4  ;;  %v12555_v53 = vpop.f32.mrb[250].mxu0  ;;  %v742_v4 = vld [vmem:[%s12955_s6 + $0x10] sm:$0xff] }
0x1460   :  { %13978 = vst [vmem:[#allocation9_spill] sm:$0xff] %v12555_v53  ;;  %v12557_v21 = vpop.f32.mrb[251].mxu0 }
0x1461   :  { %13979 = vst [vmem:[#allocation12_spill] sm:$0xff] %v12557_v21  ;;  %v6849_v0 = vmax.f32 %v12555_v53, %v12557_v21  ;;  %6847 = vmax.xlane.f32.xlu0 %v6846_v3  ;;  %v743_v3 = vld [vmem:[%s12955_s6 + $0x18] sm:$0xff] }
0x1463   :  { %6850 = vmax.xlane.f32.xlu1 %v6849_v0 }
0x1474   :  { %3994 = vperm.xlu1 %7495, %v741_v56  }
0x1476   :  { %v6758_v46 = vpop.xlane.xlu1 %6757 }
0x1477   :  { %v6852_v55 = vsub.f32 %v12355_v28, %v6758_v46  ;;  %v6853_v21 = vsub.f32 %v12357_v9, %v6758_v46  ;;  %3989 = vperm.xlu0 %7494, %v740_v26   ;;  %v745_v9 = vld [vmem:[%s12955_s6 + $0x28] sm:$0xff] }
0x1478   :  { %3999 = vperm.xlu1 %7495, %v742_v4   ;;  %v6761_v0 = vpop.xlane.xlu0 %6760 }
0x1479   :  { %v6916_v56 = vmul.f32 1.442695, %v6852_v55  ;;  %v6854_v53 = vsub.f32 %v12361_v36, %v6761_v0  ;;  %v6855_v58 = vsub.f32 %v12363_v27, %v6761_v0  ;;  %v6918_v44 = vmul.f32 1.442695, %v6853_v21  ;;  %v746_v55 = vld [vmem:[%s12955_s6 + $0x30] sm:$0xff] }
0x147b   :  { %v6920_v28 = vmul.f32 1.442695, %v6854_v53  ;;  %v6922_v33 = vmul.f32 1.442695, %v6855_v58  ;;  %4004 = vperm.xlu0 %7494, %v743_v3   ;;  %8468 = vpow2.f32 %v6916_v56 }
0x147c   :  { %4009 = vperm.xlu1 %7495, %v744_v29   ;;  %v747_v29 = vld [vmem:[%s12955_s6 + $0x38] sm:$0xff] }
0x147d   :  { %8470 = vpow2.f32 %v6920_v28 }
0x147e   :  { %8472 = vpow2.f32 %v6922_v33  ;;  %v6764_v36 = vpop.xlane.xlu0 %6763 }
0x147f   :  { %8474 = vpow2.f32 %v6918_v44  ;;  %v6856_v27 = vsub.f32 %v12379_v13, %v6764_v36  ;;  %v6857_v21 = vsub.f32 %v12383_v57, %v6764_v36  ;;  %4014 = vperm.xlu0 %7494, %v745_v9  }
0x1480   :  { %v6767_v53 = vpop.xlane.xlu1 %6766  ;;  %4019 = vperm.xlu1 %7495, %v746_v55  }
0x1481   :  { %v6924_v58 = vmul.f32 1.442695, %v6856_v27  ;;  %v6858_v46 = vsub.f32 %v12387_v32, %v6767_v53  ;;  %v6859_v4 = vsub.f32 %v12389_v43, %v6767_v53  ;;  %v6926_v26 = vmul.f32 1.442695, %v6857_v21 }
0x1483   :  { %v6928_v33 = vmul.f32 1.442695, %v6858_v46  ;;  %v6930_v0 = vmul.f32 1.442695, %v6859_v4  ;;  %4024 = vperm.xlu0 %7494, %v747_v29   ;;  %8476 = vpow2.f32 %v6924_v58 }
0x1485   :  { %8478 = vpow2.f32 %v6928_v33  ;;  %v8469_v13 = vpop.eup %8468 }
0x1486   :  { %8480 = vpow2.f32 %v6930_v0  ;;  %v6770_v44 = vpop.xlane.xlu0 %6769 }
0x1487   :  { %v8471_v57 = vpop.eup %8470  ;;  %8482 = vpow2.f32 %v6926_v26  ;;  %v6860_v3 = vsub.f32 %v12393_v41, %v6770_v44  ;;  %v6861_v56 = vsub.f32 %v12395_v49, %v6770_v44 }
0x1488   :  { %v8473_v28 = vpop.eup %8472  ;;  %v6773_v9 = vpop.xlane.xlu1 %6772  ;;  %v7044_v32 = vpack.c.bf16 %v8471_v57, %v8469_v13 }
0x1489   :  { %v8475_v55 = vpop.eup %8474  ;;  %v6932_v43 = vmul.f32 1.442695, %v6860_v3  ;;  %v6862_v36 = vsub.f32 %v12399_v37, %v6773_v9  ;;  %v6863_v27 = vsub.f32 %v12401_v45, %v6773_v9  ;;  %v6934_v53 = vmul.f32 1.442695, %v6861_v56 }
0x148a   :  { %v7045_v21 = vpack.c.bf16 %v8473_v28, %v8475_v55 }
0x148b   :  { %v6936_v29 = vmul.f32 1.442695, %v6862_v36  ;;  %v6938_v58 = vmul.f32 1.442695, %v6863_v27  ;;  %8484 = vpow2.f32 %v6932_v43 }
0x148c   :  { %7076 = vmatprep.subr.bf16.mxu0 %v7045_v21  ;;  %7119 = vmatprep.subr.bf16.mxu1 %v7045_v21 }
0x148d   :  { %8486 = vpow2.f32 %v6936_v29  ;;  %7077 = vmatpush1.bf16.xpose.msra.mxu0 %v7044_v32  ;;  %7120 = vmatpush1.bf16.xpose.msra.mxu1 %v7044_v32  ;;  %v8477_v41 = vpop.eup %8476 }
0x148e   :  { %8488 = vpow2.f32 %v6938_v58  ;;  %v6776_v49 = vpop.xlane.xlu0 %6775 }
0x148f   :  { %v8479_v46 = vpop.eup %8478  ;;  %8490 = vpow2.f32 %v6934_v53  ;;  %v6864_v4 = vsub.f32 %v12405_v61, %v6776_v49  ;;  %v6865_v37 = vsub.f32 %v12407_v7, %v6776_v49 }
0x1490   :  { %v8481_v45 = vpop.eup %8480  ;;  %v6779_v26 = vpop.xlane.xlu1 %6778  ;;  %v7046_v33 = vpack.c.bf16 %v8479_v46, %v8477_v41 }
0x1491   :  { %v8483_v0 = vpop.eup %8482  ;;  %v6940_v13 = vmul.f32 1.442695, %v6864_v4  ;;  %v6866_v44 = vsub.f32 %v12411_v20, %v6779_v26  ;;  %v6867_v57 = vsub.f32 %v12413_v35, %v6779_v26  ;;  %v6942_v56 = vmul.f32 1.442695, %v6865_v37 }
0x1492   :  { %v7047_v3 = vpack.c.bf16 %v8481_v45, %v8483_v0 }
0x1493   :  { %v6944_v28 = vmul.f32 1.442695, %v6866_v44  ;;  %v6946_v9 = vmul.f32 1.442695, %v6867_v57  ;;  %8492 = vpow2.f32 %v6940_v13 }
0x1494   :  { %7078 = vmatprep.subr.bf16.mxu0 %v7047_v3  ;;  %7121 = vmatprep.subr.bf16.mxu1 %v7047_v3 }
0x1495   :  { %8494 = vpow2.f32 %v6944_v28  ;;  %7079 = vmatpush1.bf16.xpose.msra.mxu0 %v7046_v33  ;;  %7122 = vmatpush1.bf16.xpose.msra.mxu1 %v7046_v33  ;;  %v8485_v61 = vpop.eup %8484 }
0x1496   :  { %8496 = vpow2.f32 %v6946_v9  ;;  %v6782_v7 = vpop.xlane.xlu0 %6781 }
0x1497   :  { %v8487_v32 = vpop.eup %8486  ;;  %8498 = vpow2.f32 %v6942_v56  ;;  %v6868_v55 = vsub.f32 %v12417_v2, %v6782_v7  ;;  %v6869_v20 = vsub.f32 %v12419_v25, %v6782_v7 }
0x1498   :  { %v8489_v35 = vpop.eup %8488  ;;  %v6785_v43 = vpop.xlane.xlu1 %6784  ;;  %v7048_v36 = vpack.c.bf16 %v8487_v32, %v8485_v61 }
0x1499   :  { %v8491_v27 = vpop.eup %8490  ;;  %v6948_v21 = vmul.f32 1.442695, %v6868_v55  ;;  %v6870_v53 = vsub.f32 %v12423_v52, %v6785_v43  ;;  %v6871_v29 = vsub.f32 %v12425_v39, %v6785_v43  ;;  %v6950_v41 = vmul.f32 1.442695, %v6869_v20 }
0x149a   :  { %v7049_v58 = vpack.c.bf16 %v8489_v35, %v8491_v27 }
0x149b   :  { %v6952_v49 = vmul.f32 1.442695, %v6870_v53  ;;  %v6954_v46 = vmul.f32 1.442695, %v6871_v29  ;;  %8500 = vpow2.f32 %v6948_v21 }
0x149c   :  { %7080 = vmatprep.subr.bf16.mxu0 %v7049_v58  ;;  %7123 = vmatprep.subr.bf16.mxu1 %v7049_v58 }
0x149d   :  { %8502 = vpow2.f32 %v6952_v49  ;;  %7081 = vmatpush1.bf16.xpose.msra.mxu0 %v7048_v36  ;;  %7124 = vmatpush1.bf16.xpose.msra.mxu1 %v7048_v36  ;;  %v8493_v2 = vpop.eup %8492 }
0x149e   :  { %8504 = vpow2.f32 %v6954_v46  ;;  %v6788_v25 = vpop.xlane.xlu0 %6787 }
0x149f   :  { %v8495_v4 = vpop.eup %8494  ;;  %8506 = vpow2.f32 %v6950_v41  ;;  %v6872_v37 = vsub.f32 %v12429_v54, %v6788_v25  ;;  %v6873_v52 = vsub.f32 %v12431_v42, %v6788_v25 }
0x14a0   :  { %v8497_v39 = vpop.eup %8496  ;;  %v6791_v45 = vpop.xlane.xlu1 %6790  ;;  %v7050_v26 = vpack.c.bf16 %v8495_v4, %v8493_v2 }
0x14a1   :  { %v8499_v33 = vpop.eup %8498  ;;  %v6956_v0 = vmul.f32 1.442695, %v6872_v37  ;;  %v6874_v13 = vsub.f32 %v12435_v8, %v6791_v45  ;;  %v6875_v44 = vsub.f32 %v12437_v15, %v6791_v45  ;;  %v6958_v3 = vmul.f32 1.442695, %v6873_v52 }
0x14a2   :  { %v7051_v57 = vpack.c.bf16 %v8497_v39, %v8499_v33 }
0x14a3   :  { %v6960_v56 = vmul.f32 1.442695, %v6874_v13  ;;  %v6962_v28 = vmul.f32 1.442695, %v6875_v44  ;;  %8508 = vpow2.f32 %v6956_v0 }
0x14a4   :  { %7082 = vmatprep.subr.bf16.mxu0 %v7051_v57  ;;  %7125 = vmatprep.subr.bf16.mxu1 %v7051_v57 }
0x14a5   :  { %8510 = vpow2.f32 %v6960_v56  ;;  %7083 = vmatpush1.bf16.xpose.msra.mxu0 %v7050_v26  ;;  %7126 = vmatpush1.bf16.xpose.msra.mxu1 %v7050_v26  ;;  %v8501_v54 = vpop.eup %8500 }
0x14a6   :  { %8512 = vpow2.f32 %v6962_v28  ;;  %v6794_v42 = vpop.xlane.xlu0 %6793 }
0x14a7   :  { %v8503_v9 = vpop.eup %8502  ;;  %8514 = vpow2.f32 %v6958_v3  ;;  %v6876_v61 = vsub.f32 %v12441_v40, %v6794_v42  ;;  %v6877_v8 = vsub.f32 %v12443_v62, %v6794_v42 }
0x14a8   :  { %v8505_v15 = vpop.eup %8504  ;;  %v6797_v7 = vpop.xlane.xlu1 %6796  ;;  %v7052_v32 = vpack.c.bf16 %v8503_v9, %v8501_v54 }
0x14a9   :  { %v8507_v55 = vpop.eup %8506  ;;  %v6964_v20 = vmul.f32 1.442695, %v6876_v61  ;;  %v6878_v35 = vsub.f32 %v12447_v59, %v6797_v7  ;;  %v6879_v43 = vsub.f32 %v12449_v17, %v6797_v7  ;;  %v6966_v27 = vmul.f32 1.442695, %v6877_v8 }
0x14aa   :  { %v7053_v36 = vpack.c.bf16 %v8505_v15, %v8507_v55 }
0x14ab   :  { %v6968_v21 = vmul.f32 1.442695, %v6878_v35  ;;  %v6970_v53 = vmul.f32 1.442695, %v6879_v43  ;;  %8516 = vpow2.f32 %v6964_v20 }
0x14ac   :  { %7084 = vmatprep.subr.bf16.mxu0 %v7053_v36  ;;  %7127 = vmatprep.subr.bf16.mxu1 %v7053_v36 }
0x14ad   :  { %8518 = vpow2.f32 %v6968_v21  ;;  %7085 = vmatpush1.bf16.xpose.msra.mxu0 %v7052_v32  ;;  %7128 = vmatpush1.bf16.xpose.msra.mxu1 %v7052_v32  ;;  %v8509_v40 = vpop.eup %8508 }
0x14ae   :  { %8520 = vpow2.f32 %v6970_v53  ;;  %v6800_v62 = vpop.xlane.xlu0 %6799 }
0x14af   :  { %v8511_v29 = vpop.eup %8510  ;;  %8522 = vpow2.f32 %v6966_v27  ;;  %v6880_v58 = vsub.f32 %v12453_v30, %v6800_v62  ;;  %v6881_v59 = vsub.f32 %v12455_v12, %v6800_v62 }
0x14b0   :  { %v8513_v17 = vpop.eup %8512  ;;  %v6803_v41 = vpop.xlane.xlu1 %6802  ;;  %v7054_v49 = vpack.c.bf16 %v8511_v29, %v8509_v40 }
0x14b1   :  { %v8515_v46 = vpop.eup %8514  ;;  %v6972_v2 = vmul.f32 1.442695, %v6880_v58  ;;  %v6882_v25 = vsub.f32 %v12459_v11, %v6803_v41  ;;  %v6883_v4 = vsub.f32 %v12461_v38, %v6803_v41  ;;  %v6974_v52 = vmul.f32 1.442695, %v6881_v59 }
0x14b2   :  { %v7055_v37 = vpack.c.bf16 %v8513_v17, %v8515_v46 }
0x14b3   :  { %v6976_v39 = vmul.f32 1.442695, %v6882_v25  ;;  %v6978_v45 = vmul.f32 1.442695, %v6883_v4  ;;  %8524 = vpow2.f32 %v6972_v2 }
0x14b4   :  { %7086 = vmatprep.subr.bf16.mxu0 %v7055_v37  ;;  %7129 = vmatprep.subr.bf16.mxu1 %v7055_v37 }
0x14b5   :  { %8526 = vpow2.f32 %v6976_v39  ;;  %7087 = vmatpush1.bf16.xpose.msra.mxu0 %v7054_v49  ;;  %7130 = vmatpush1.bf16.xpose.msra.mxu1 %v7054_v49  ;;  %v8517_v30 = vpop.eup %8516 }
0x14b6   :  { %8528 = vpow2.f32 %v6978_v45  ;;  %v6806_v12 = vpop.xlane.xlu0 %6805 }
0x14b7   :  { %v8519_v26 = vpop.eup %8518  ;;  %8530 = vpow2.f32 %v6974_v52  ;;  %v6884_v33 = vsub.f32 %v12465_v31, %v6806_v12  ;;  %v6885_v11 = vsub.f32 %v12467_v34, %v6806_v12 }
0x14b8   :  { %v8521_v38 = vpop.eup %8520  ;;  %v6809_v0 = vpop.xlane.xlu1 %6808  ;;  %v7056_v13 = vpack.c.bf16 %v8519_v26, %v8517_v30 }
0x14b9   :  { %v8523_v44 = vpop.eup %8522  ;;  %v6980_v57 = vmul.f32 1.442695, %v6884_v33  ;;  %v6886_v3 = vsub.f32 %v12471_v6, %v6809_v0  ;;  %v6887_v56 = vsub.f32 %v12473_v47, %v6809_v0  ;;  %v6982_v54 = vmul.f32 1.442695, %v6885_v11 }
0x14ba   :  { %v7057_v28 = vpack.c.bf16 %v8521_v38, %v8523_v44 }
0x14bb   :  { %v6984_v42 = vmul.f32 1.442695, %v6886_v3  ;;  %v6986_v9 = vmul.f32 1.442695, %v6887_v56  ;;  %8532 = vpow2.f32 %v6980_v57 }
0x14bc   :  { %7088 = vmatprep.subr.bf16.mxu0 %v7057_v28  ;;  %7131 = vmatprep.subr.bf16.mxu1 %v7057_v28 }
0x14bd   :  { %8534 = vpow2.f32 %v6984_v42  ;;  %7089 = vmatpush1.bf16.xpose.msra.mxu0 %v7056_v13  ;;  %7132 = vmatpush1.bf16.xpose.msra.mxu1 %v7056_v13  ;;  %v8525_v31 = vpop.eup %8524  ;;  %v13980_v42 = vld [vmem:[#allocation31_spill] sm:$0xff] }
0x14be   :  { %8536 = vpow2.f32 %v6986_v9  ;;  %v6812_v34 = vpop.xlane.xlu0 %6811 }
0x14bf   :  { %v8527_v61 = vpop.eup %8526  ;;  %8538 = vpow2.f32 %v6982_v54  ;;  %v6888_v8 = vsub.f32 %v12477_v1, %v6812_v34  ;;  %v6889_v6 = vsub.f32 %v12479_v18, %v6812_v34 }
0x14c0   :  { %v8529_v47 = vpop.eup %8528  ;;  %v6815_v15 = vpop.xlane.xlu1 %6814  ;;  %v7058_v7 = vpack.c.bf16 %v8527_v61, %v8525_v31 }
0x14c1   :  { %v8531_v32 = vpop.eup %8530  ;;  %v6988_v55 = vmul.f32 1.442695, %v6888_v8  ;;  %v6890_v20 = vsub.f32 %v12483_v16, %v6815_v15  ;;  %v6891_v35 = vsub.f32 %v12485_v23, %v6815_v15  ;;  %v6990_v36 = vmul.f32 1.442695, %v6889_v6 }
0x14c2   :  { %v7059_v43 = vpack.c.bf16 %v8529_v47, %v8531_v32  ;;  %v13981_v47 = vld [vmem:[#allocation52_spill] sm:$0xff] }
0x14c3   :  { %v6992_v27 = vmul.f32 1.442695, %v6890_v20  ;;  %v6994_v21 = vmul.f32 1.442695, %v6891_v35  ;;  %8540 = vpow2.f32 %v6988_v55 }
0x14c4   :  { %7090 = vmatprep.subr.bf16.mxu0 %v7059_v43  ;;  %7133 = vmatprep.subr.bf16.mxu1 %v7059_v43 }
0x14c5   :  { %8542 = vpow2.f32 %v6992_v27  ;;  %7091 = vmatpush1.bf16.xpose.msra.mxu0 %v7058_v7  ;;  %7134 = vmatpush1.bf16.xpose.msra.mxu1 %v7058_v7  ;;  %v8533_v1 = vpop.eup %8532 }
0x14c6   :  { %8544 = vpow2.f32 %v6994_v21  ;;  %v6818_v18 = vpop.xlane.xlu0 %6817  ;;  %v13984_v21 = vld [vmem:[#allocation89_spill] sm:$0xff] }
0x14c7   :  { %v8535_v53 = vpop.eup %8534  ;;  %8546 = vpow2.f32 %v6990_v36  ;;  %v6892_v40 = vsub.f32 %v12489_v24, %v6818_v18  ;;  %v6893_v16 = vsub.f32 %v12491_v10, %v6818_v18  ;;  %v13983_v36 = vld [vmem:[#allocation90_spill] sm:$0xff] }
0x14c8   :  { %v8537_v23 = vpop.eup %8536  ;;  %v6821_v62 = vpop.xlane.xlu1 %6820  ;;  %v7060_v29 = vpack.c.bf16 %v8535_v53, %v8533_v1 }
0x14c9   :  { %v8539_v58 = vpop.eup %8538  ;;  %v6996_v59 = vmul.f32 1.442695, %v6892_v40  ;;  %v6894_v17 = vsub.f32 %v12495_v22, %v6821_v62  ;;  %v6895_v41 = vsub.f32 %v12497_v50, %v6821_v62  ;;  %v6998_v46 = vmul.f32 1.442695, %v6893_v16 }
0x14ca   :  { %v7061_v49 = vpack.c.bf16 %v8537_v23, %v8539_v58  ;;  %v13985_v58 = vld [vmem:[#allocation68_spill] sm:$0xff] }
0x14cb   :  { %v7000_v2 = vmul.f32 1.442695, %v6894_v17  ;;  %v7002_v25 = vmul.f32 1.442695, %v6895_v41  ;;  %8548 = vpow2.f32 %v6996_v59  ;;  %v13986_v17 = vld [vmem:[#allocation5_spill] sm:$0xff] }
0x14cc   :  { %7092 = vmatprep.subr.bf16.mxu0 %v7061_v49  ;;  %7135 = vmatprep.subr.bf16.mxu1 %v7061_v49 }
0x14cd   :  { %8550 = vpow2.f32 %v7000_v2  ;;  %7093 = vmatpush1.bf16.xpose.msra.mxu0 %v7060_v29  ;;  %7136 = vmatpush1.bf16.xpose.msra.mxu1 %v7060_v29  ;;  %v8541_v24 = vpop.eup %8540 }
0x14ce   :  { %8552 = vpow2.f32 %v7002_v25  ;;  %v6824_v10 = vpop.xlane.xlu0 %6823 }
0x14cf   :  { %v8543_v4 = vpop.eup %8542  ;;  %8554 = vpow2.f32 %v6998_v46  ;;  %v6896_v37 = vsub.f32 %v12501_v48, %v6824_v10  ;;  %v6897_v22 = vsub.f32 %v12503_v19, %v6824_v10  ;;  %v13987_v10 = vld [vmem:[#allocation7_spill] sm:$0xff] }
0x14d0   :  { %v8545_v50 = vpop.eup %8544  ;;  %v6827_v52 = vpop.xlane.xlu1 %6826  ;;  %v7062_v39 = vpack.c.bf16 %v8543_v4, %v8541_v24 }
0x14d1   :  { %v8547_v45 = vpop.eup %8546  ;;  %v7004_v30 = vmul.f32 1.442695, %v6896_v37  ;;  %v6898_v12 = vsub.f32 %v12507_v5, %v6827_v52  ;;  %v6899_v26 = vsub.f32 %v12509_v63, %v6827_v52  ;;  %v7006_v11 = vmul.f32 1.442695, %v6897_v22  ;;  %v13988_v37 = vld [vmem:[#allocation6_spill] sm:$0xff] }
0x14d2   :  { %v7063_v33 = vpack.c.bf16 %v8545_v50, %v8547_v45 }
0x14d3   :  { %v7008_v38 = vmul.f32 1.442695, %v6898_v12  ;;  %v7010_v0 = vmul.f32 1.442695, %v6899_v26  ;;  %8556 = vpow2.f32 %v7004_v30 }
0x14d4   :  { %7094 = vmatprep.subr.bf16.mxu0 %v7063_v33  ;;  %7137 = vmatprep.subr.bf16.mxu1 %v7063_v33  ;;  %v13989_v33 = vld [vmem:[#allocation50_spill] sm:$0xff] }
0x14d5   :  { %8558 = vpow2.f32 %v7008_v38  ;;  %7095 = vmatpush1.bf16.xpose.msra.mxu0 %v7062_v39  ;;  %7138 = vmatpush1.bf16.xpose.msra.mxu1 %v7062_v39  ;;  %v8549_v48 = vpop.eup %8548  ;;  %v13990_v38 = vld [vmem:[#allocation51_spill] sm:$0xff] }
0x14d6   :  { %8560 = vpow2.f32 %v7010_v0  ;;  %v6830_v19 = vpop.xlane.xlu0 %6829 }
0x14d7   :  { %v8551_v13 = vpop.eup %8550  ;;  %8562 = vpow2.f32 %v7006_v11  ;;  %v6900_v44 = vsub.f32 %v12513_v14, %v6830_v19  ;;  %v6901_v5 = vsub.f32 %v12515_v51, %v6830_v19 }
0x14d8   :  { %v8553_v63 = vpop.eup %8552  ;;  %v6833_v57 = vpop.xlane.xlu1 %6832  ;;  %v7064_v3 = vpack.c.bf16 %v8551_v13, %v8549_v48 }
0x14d9   :  { %v8555_v56 = vpop.eup %8554  ;;  %v7012_v28 = vmul.f32 1.442695, %v6900_v44  ;;  %v6902_v54 = vsub.f32 %v12519_v60, %v6833_v57  ;;  %v6903_v9 = vsub.f32 %v13980_v42, %v6833_v57  ;;  %v7014_v34 = vmul.f32 1.442695, %v6901_v5  ;;  %v13982_v60 = vld [vmem:[#allocation29_spill] sm:$0xff] }
0x14da   :  { %v7065_v31 = vpack.c.bf16 %v8553_v63, %v8555_v56  ;;  %v13991_v57 = vld [vmem:[#allocation9_spill] sm:$0xff]  ;;  %v13992_v56 = vld [vmem:[#allocation12_spill] sm:$0xff] }
0x14db   :  { %v7016_v61 = vmul.f32 1.442695, %v6902_v54  ;;  %v7018_v8 = vmul.f32 1.442695, %v6903_v9  ;;  %8564 = vpow2.f32 %v7012_v28 }
0x14dc   :  { %7096 = vmatprep.subr.bf16.mxu0 %v7065_v31  ;;  %7139 = vmatprep.subr.bf16.mxu1 %v7065_v31 }
0x14dd   :  { %8566 = vpow2.f32 %v7016_v61  ;;  %7097 = vmatpush1.bf16.xpose.msra.mxu0 %v7064_v3  ;;  %7140 = vmatpush1.bf16.xpose.msra.mxu1 %v7064_v3  ;;  %v8557_v14 = vpop.eup %8556 }
0x14de   :  { %8568 = vpow2.f32 %v7018_v8  ;;  %v6836_v51 = vpop.xlane.xlu0 %6835  ;;  %v13994_v8 = vld [vmem:[#allocation67_spill] sm:$0xff] }
0x14df   :  { %v8559_v6 = vpop.eup %8558  ;;  %8570 = vpow2.f32 %v7014_v34  ;;  %v6904_v15 = vsub.f32 %v13981_v47, %v6836_v51  ;;  %v6905_v7 = vsub.f32 %v13982_v60, %v6836_v51  ;;  %v13993_v34 = vld [vmem:[#allocation62_spill] sm:$0xff] }
0x14e0   :  { %v8561_v32 = vpop.eup %8560  ;;  %v6839_v55 = vpop.xlane.xlu1 %6838  ;;  %v7066_v20 = vpack.c.bf16 %v8559_v6, %v8557_v14 }
0x14e1   :  { %v8563_v35 = vpop.eup %8562  ;;  %v7020_v43 = vmul.f32 1.442695, %v6904_v15  ;;  %v6906_v27 = vsub.f32 %v13983_v36, %v6839_v55  ;;  %v6907_v1 = vsub.f32 %v13984_v21, %v6839_v55  ;;  %v7022_v53 = vmul.f32 1.442695, %v6905_v7  ;;  %v8612_v15 = vld [vmem:[%s12949_s0 + $0x10] sm:$0xff]  ;;  %v8613_v7 = vld [vmem:[%s12949_s0 + $0x18] sm:$0xff] }
0x14e2   :  { %v7067_v18 = vpack.c.bf16 %v8561_v32, %v8563_v35  ;;  %v13995_v55 = vld [vmem:[#allocation66_spill] sm:$0xff] }
0x14e3   :  { %v7024_v40 = vmul.f32 1.442695, %v6906_v27  ;;  %v7026_v16 = vmul.f32 1.442695, %v6907_v1  ;;  %8572 = vpow2.f32 %v7020_v43  ;;  %v13996_v35 = vld [vmem:[#allocation86_spill] sm:$0xff] }
0x14e4   :  { %7098 = vmatprep.subr.bf16.mxu0 %v7067_v18  ;;  %7141 = vmatprep.subr.bf16.mxu1 %v7067_v18  ;;  %v8614_v18 = vld [vmem:[%s12949_s0] sm:$0xff] }
0x14e5   :  { %8574 = vpow2.f32 %v7024_v40  ;;  %7099 = vmatpush1.bf16.xpose.msra.mxu0 %v7066_v20  ;;  %7142 = vmatpush1.bf16.xpose.msra.mxu1 %v7066_v20  ;;  %v8565_v23 = vpop.eup %8564  ;;  %v8615_v40 = vld [vmem:[%s12949_s0 + $0x8] sm:$0xff] }
0x14e6   :  { %8576 = vpow2.f32 %v7026_v16  ;;  %v6842_v62 = vpop.xlane.xlu0 %6841 }
0x14e7   :  { %v8567_v29 = vpop.eup %8566  ;;  %8578 = vpow2.f32 %v7022_v53  ;;  %v6908_v59 = vsub.f32 %v13985_v58, %v6842_v62  ;;  %v6909_v41 = vsub.f32 %v13986_v17, %v6842_v62 }
0x14e8   :  { %v8569_v49 = vpop.eup %8568  ;;  %v6845_v46 = vpop.xlane.xlu1 %6844  ;;  %v7068_v2 = vpack.c.bf16 %v8567_v29, %v8565_v23  ;;  %v13997_v23 = vld [vmem:[#allocation55_spill] sm:$0xff]  ;;  %v13998_v29 = vld [vmem:[#allocation56_spill] sm:$0xff] }
0x14e9   :  { %v8571_v25 = vpop.eup %8570  ;;  %v7028_v24 = vmul.f32 1.442695, %v6908_v59  ;;  %v6910_v4 = vsub.f32 %v13987_v10, %v6845_v46  ;;  %v6911_v22 = vsub.f32 %v13988_v37, %v6845_v46  ;;  %v7030_v52 = vmul.f32 1.442695, %v6909_v41  ;;  %v8616_v41 = vld [vmem:[%s12949_s0 + $0x20] sm:$0xff]  ;;  %v8617_v46 = vld [vmem:[%s12949_s0 + $0x28] sm:$0xff] }
0x14ea   :  { %v7069_v50 = vpack.c.bf16 %v8569_v49, %v8571_v25  ;;  %v13999_v25 = vld [vmem:[#allocation88_spill] sm:$0xff]  ;;  %v14000_v10 = vld [vmem:[#allocation65_spill] sm:$0xff] }
0x14eb   :  { %v7032_v39 = vmul.f32 1.442695, %v6910_v4  ;;  %v7034_v45 = vmul.f32 1.442695, %v6911_v22  ;;  %8580 = vpow2.f32 %v7028_v24 }
0x14ec   :  { %7100 = vmatprep.subr.bf16.mxu0 %v7069_v50  ;;  %7143 = vmatprep.subr.bf16.mxu1 %v7069_v50  ;;  %v8618_v50 = vld [vmem:[%s12949_s0 + $0x30] sm:$0xff] }
0x14ed   :  { %8582 = vpow2.f32 %v7032_v39  ;;  %7101 = vmatpush1.bf16.xpose.msra.mxu0 %v7068_v2  ;;  %7144 = vmatpush1.bf16.xpose.msra.mxu1 %v7068_v2  ;;  %v8573_v30 = vpop.eup %8572  ;;  %v8619_v39 = vld [vmem:[%s12949_s0 + $0x38] sm:$0xff] }
0x14ee   :  { %8584 = vpow2.f32 %v7034_v45  ;;  %v6848_v12 = vpop.xlane.xlu0 %6847 }
0x14ef   :  { %v8575_v26 = vpop.eup %8574  ;;  %8586 = vpow2.f32 %v7030_v52  ;;  %v6912_v11 = vsub.f32 %v13989_v33, %v6848_v12  ;;  %v6913_v0 = vsub.f32 %v13990_v38, %v6848_v12  ;;  %v14002_v33 = vld [vmem:[#allocation46_spill] sm:$0xff] }
0x14f0   :  { %v8577_v48 = vpop.eup %8576  ;;  %v6851_v19 = vpop.xlane.xlu1 %6850  ;;  %v7070_v13 = vpack.c.bf16 %v8575_v26, %v8573_v30  ;;  %v14001_v30 = vld [vmem:[#allocation45_spill] sm:$0xff] }
0x14f1   :  { %v8579_v44 = vpop.eup %8578  ;;  %v7036_v5 = vmul.f32 1.442695, %v6912_v11  ;;  %v7038_v63 = vmul.f32 1.442695, %v6913_v0  ;;  %v6914_v3 = vsub.f32 %v13991_v57, %v6851_v19  ;;  %v6915_v28 = vsub.f32 %v13992_v56, %v6851_v19 }
0x14f2   :  { %v7071_v54 = vpack.c.bf16 %v8577_v48, %v8579_v44  ;;  %v8620_v48 = vld [vmem:[%s12949_s0 + $0x40] sm:$0xff] }
0x14f3   :  { %8588 = vpow2.f32 %v7036_v5  ;;  %v7040_v42 = vmul.f32 1.442695, %v6914_v3  ;;  %v7042_v9 = vmul.f32 1.442695, %v6915_v28  ;;  %v14004_v5 = vld [vmem:[#allocation43_spill] sm:$0xff]  ;;  %v8621_v3 = vld [vmem:[%s12949_s0 + $0x48] sm:$0xff] }
0x14f4   :  { %8590 = vpow2.f32 %v7038_v63  ;;  %7102 = vmatprep.subr.bf16.mxu0 %v7071_v54  ;;  %7145 = vmatprep.subr.bf16.mxu1 %v7071_v54  ;;  %v12649_v31 = vpop.permute.xlu1 %3994 }
0x14f5   :  { %8592 = vpow2.f32 %v7040_v42  ;;  %7103 = vmatpush1.bf16.xpose.msra.mxu0 %v7070_v13  ;;  %7146 = vmatpush1.bf16.xpose.msra.mxu1 %v7070_v13  ;;  %v4098_v61 = vadd.f32 %v13993_v34, %v12649_v31  ;;  %v4100_v14 = vadd.f32 %v13994_v8, %v12649_v31  ;;  %v8581_v51 = vpop.eup %8580  ;;  %v14003_v13 = vld [vmem:[#allocation10_spill] sm:$0xff]  ;;  %v8622_v42 = vld [vmem:[%s12949_s0 + $0x50] sm:$0xff]  ;;  %v14005_v8 = vld [vmem:[#allocation44_spill] sm:$0xff] }
0x14f6   :  { %8594 = vpow2.f32 %v7042_v9  ;;  %v12655_v6 = vpop.permute.xlu0 %3989  ;;  %v8623_v34 = vld [vmem:[%s12949_s0 + $0x58] sm:$0xff] }
0x14f7   :  { %v8583_v47 = vpop.eup %8582  ;;  %v4134_v60 = vadd.f32 %v8612_v15, %v4098_v61  ;;  %v4135_v32 = vadd.f32 %v8613_v7, %v4100_v14  ;;  %v4094_v20 = vadd.f32 %v13995_v55, %v12655_v6  ;;  %v4096_v43 = vadd.f32 %v13996_v35, %v12655_v6  ;;  %v8624_v7 = vld [vmem:[%s12949_s0 + $0x60] sm:$0xff]  ;;  %v8625_v55 = vld [vmem:[%s12949_s0 + $0x68] sm:$0xff] }
0x14f8   :  { %v8585_v36 = vpop.eup %8584  ;;  %v12667_v27 = vpop.permute.xlu1 %3999  ;;  %v7072_v21 = vpack.c.bf16 %v8583_v47, %v8581_v51  ;;  %v14006_v51 = vld [vmem:[#allocation3_spill] sm:$0xff] }
0x14f9   :  { %v8587_v1 = vpop.eup %8586  ;;  %4150 = vst [vmem:[%s12956_s7 + $0x10] sm:$0xff] %v4134_v60  ;;  %4151 = vst [vmem:[%s12956_s7 + $0x18] sm:$0xff] %v4135_v32  ;;  %v4132_v53 = vadd.f32 %v8614_v18, %v4094_v20  ;;  %v4133_v16 = vadd.f32 %v8615_v40, %v4096_v43  ;;  %v4104_v62 = vadd.f32 %v13997_v23, %v12667_v27  ;;  %v14007_v35 = vld [vmem:[#allocation87_spill] sm:$0xff]  ;;  %v14010_v23 = vld [vmem:[#allocation24_spill] sm:$0xff] }
0x14fa   :  { %v4106_v58 = vadd.f32 %v13998_v29, %v12667_v27  ;;  %v7073_v59 = vpack.c.bf16 %v8585_v36, %v8587_v1  ;;  %v12685_v17 = vpop.permute.xlu0 %4004  ;;  %v14008_v36 = vld [vmem:[#allocation4_spill] sm:$0xff]  ;;  %v8626_v1 = vld [vmem:[%s12949_s0 + $0x70] sm:$0xff]  ;;  %v14012_v29 = vld [vmem:[#allocation63_spill] sm:$0xff] }
0x14fb   :  { %4148 = vst [vmem:[%s12956_s7] sm:$0xff] %v4132_v53  ;;  %4149 = vst [vmem:[%s12956_s7 + $0x8] sm:$0xff] %v4133_v16  ;;  %v4136_v49 = vadd.f32 %v8616_v41, %v4104_v62  ;;  %v4108_v24 = vadd.f32 %v13999_v25, %v12685_v17  ;;  %v4110_v4 = vadd.f32 %v14000_v10, %v12685_v17  ;;  %v8627_v53 = vld [vmem:[%s12949_s0 + $0x78] sm:$0xff]  ;;  %v14009_v16 = vld [vmem:[#allocation25_spill] sm:$0xff]  ;;  %v14015_v41 = vmov 1065369472  }
0x14fc   :  { %v4137_v2 = vadd.f32 %v8617_v46, %v4106_v58  ;;  %7104 = vmatprep.subr.bf16.mxu0 %v7073_v59  ;;  %7147 = vmatprep.subr.bf16.mxu1 %v7073_v59  ;;  %v12703_v37 = vpop.permute.xlu1 %4009  ;;  %v14011_v62 = vpack.c.bf16 %v14009_v16, %v14010_v23  ;;  %v14013_v58 = vld [vmem:[#allocation85_spill] sm:$0xff]  ;;  %v14017_v46 = vld [vmem:[#allocation22_spill] sm:$0xff]  ;;  %v14019_v25 = vmov 0  }
0x14fd   :  { %v8589_v22 = vpop.eup %8588  ;;  %4152 = vst [vmem:[%s12956_s7 + $0x20] sm:$0xff] %v4136_v49  ;;  %v4138_v52 = vadd.f32 %v8618_v50, %v4108_v24  ;;  %v4139_v45 = vadd.f32 %v8619_v39, %v4110_v4  ;;  %7105 = vmatpush1.bf16.xpose.msra.mxu0 %v7072_v21  ;;  %7148 = vmatpush1.bf16.xpose.msra.mxu1 %v7072_v21  ;;  %v14016_v49 = vld [vmem:[#allocation23_spill] sm:$0xff]  ;;  %v14020_v24 = vld [vmem:[#allocation48_spill] sm:$0xff]  ;;  %v14021_v10 = vld [vmem:[#allocation49_spill] sm:$0xff] }
0x14fe   :  { %4153 = vst [vmem:[%s12956_s7 + $0x28] sm:$0xff] %v4137_v2  ;;  %v4114_v12 = vadd.f32 %v14001_v30, %v12703_v37  ;;  %v8591_v26 = vpop.eup %8590  ;;  %v4116_v11 = vadd.f32 %v14002_v33, %v12703_v37  ;;  %v12721_v38 = vpop.permute.xlu0 %4014  ;;  %v14014_v59 = vpack.c.bf16 %v14012_v29, %v14013_v58  ;;  %v14018_v2 = vpack.c.bf16 %v14016_v49, %v14017_v46  ;;  %v14024_v50 = vld [vmem:[#allocation14_spill] sm:$0xff]  ;;  %v14026_v39 = vld [vmem:[#allocation32_spill] sm:$0xff] }
0x14ff   :  { %v8593_v0 = vpop.eup %8592  ;;  %4154 = vst [vmem:[%s12956_s7 + $0x30] sm:$0xff] %v4138_v52  ;;  %4155 = vst [vmem:[%s12956_s7 + $0x38] sm:$0xff] %v4139_v45  ;;  %v4118_v44 = vadd.f32 %v14003_v13, %v12721_v38  ;;  %v4120_v63 = vadd.f32 %v14004_v5, %v12721_v38  ;;  %v14022_v4 = vpack.c.bf16 %v14020_v24, %v14021_v10  ;;  %v14027_v45 = vld [vmem:[#allocation64_spill] sm:$0xff]  ;;  %v8635_v29 = vld [vmem:[%s12949_s0 + $0x98] sm:$0xff] }
0x1500   :  { %v4140_v19 = vadd.f32 %v8620_v48, %v4114_v12  ;;  %v8595_v57 = vpop.eup %8594  ;;  %v4141_v56 = vadd.f32 %v8621_v3, %v4116_v11  ;;  %v12739_v28 = vpop.permute.xlu1 %4019  ;;  %v7074_v54 = vpack.c.bf16 %v8593_v0, %v8589_v22  ;;  %v14023_v22 = vld [vmem:[#allocation13_spill] sm:$0xff]  ;;  %v14028_v30 = vpack.c.bf16 %v14026_v39, %v14027_v45  ;;  %v14029_v12 = vld [vmem:[#allocation72_spill] sm:$0xff]  ;;  %v8639_v39 = vld [vmem:[%s12949_s0 + $0xb8] sm:$0xff] }
0x1501   :  { %v4142_v9 = vadd.f32 %v8622_v42, %v4118_v44  ;;  %v4143_v61 = vadd.f32 %v8623_v34, %v4120_v63  ;;  %v4124_v14 = vadd.f32 %v14005_v8, %v12739_v28  ;;  %v4126_v47 = vadd.f32 %v14006_v51, %v12739_v28 }
0x1502   :  { %4156 = vst [vmem:[%s12956_s7 + $0x40] sm:$0xff] %v4140_v19  ;;  %4157 = vst [vmem:[%s12956_s7 + $0x48] sm:$0xff] %v4141_v56  ;;  %v7075_v15 = vpack.c.bf16 %v8595_v57, %v8591_v26  ;;  %v12757_v60 = vpop.permute.xlu0 %4024  ;;  %v14025_v52 = vpack.c.bf16 %v14023_v22, %v14024_v50  ;;  %v14030_v26 = vld [vmem:[#allocation53_spill] sm:$0xff]  ;;  %v14032_v56 = vld [vmem:[#allocation47_spill] sm:$0xff] }
0x1503   :  { %4158 = vst [vmem:[%s12956_s7 + $0x50] sm:$0xff] %v4142_v9  ;;  %4159 = vst [vmem:[%s12956_s7 + $0x58] sm:$0xff] %v4143_v61  ;;  %v4144_v32 = vadd.f32 %v8624_v7, %v4124_v14  ;;  %v4145_v20 = vadd.f32 %v8625_v55, %v4126_v47  ;;  %v4128_v43 = vadd.f32 %v14007_v35, %v12757_v60  ;;  %v8628_v47 = vld [vmem:[%s12954_s5] sm:$0xff]   ;;  %v8630_v7 = vld [vmem:[%s12954_s5 + $0x10] sm:$0xff]  }
0x1504   :  { %v4130_v21 = vadd.f32 %v14008_v36, %v12757_v60  ;;  %7106 = vmatprep.subr.bf16.mxu0 %v7075_v15  ;;  %7149 = vmatprep.subr.bf16.mxu1 %v7075_v15  ;;  %v14031_v33 = vpack.c.bf16 %v14029_v12, %v14030_v26  ;;  %v8629_v15 = vld [vmem:[%s12954_s5 + $0x8] sm:$0xff]  }
0x1505   :  { %4160 = vst [vmem:[%s12956_s7 + $0x60] sm:$0xff] %v4144_v32  ;;  %4161 = vst [vmem:[%s12956_s7 + $0x68] sm:$0xff] %v4145_v20  ;;  %v4146_v18 = vadd.f32 %v8626_v1, %v4128_v43  ;;  %7107 = vmatpush1.bf16.xpose.msra.mxu0 %v7074_v54  ;;  %7150 = vmatpush1.bf16.xpose.msra.mxu1 %v7074_v54  ;;  %v8631_v32 = vld [vmem:[%s12954_s5 + $0x18] sm:$0xff]  }
0x1506   :  { %v4147_v40 = vadd.f32 %v8627_v53, %v4130_v21  ;;  %7186 = vmatprep.subr.bf16.mxu0 %v14011_v62  ;;  %v8632_v21 = vld [vmem:[%s12949_s0 + $0x80] sm:$0xff] }
0x1507   :  { %4162 = vst [vmem:[%s12956_s7 + $0x70] sm:$0xff] %v4146_v18 }
0x1508   :  { %4163 = vst [vmem:[%s12956_s7 + $0x78] sm:$0xff] %v4147_v40  ;;  %v8633_v40 = vld [vmem:[%s12949_s0 + $0x88] sm:$0xff] }
0x150c   :  { %7109 = vmatmul.mubr.bf16.vlgmr.msra.gmra.mrb[252].mxu0 %v14014_v59  ;;  %7152 = vmatmul.mubr.bf16.vlgmr.msra.gmra.mrb[172].mxu1 %v14015_v41 }
0x150d   :  { %7187 = vmatpush1.bf16.msra.mxu0 %v14018_v2  ;;  %7218 = vmatprep.mubr.bf16.mxu0 %v14019_v25  ;;  %v8636_v2 = vld [vmem:[%s12949_s0 + $0xa0] sm:$0xff] }
0x150e   :  { %7188 = vmatprep.subr.bf16.mxu0 %v14022_v4  ;;  %v8637_v4 = vld [vmem:[%s12949_s0 + $0xa8] sm:$0xff] }
0x1511   :  { %7189 = vmatpush1.bf16.msra.mxu0 %v14025_v52 }
0x1512   :  { %7190 = vmatprep.subr.bf16.mxu0 %v14028_v30 }
0x1515   :  { %7191 = vmatpush1.bf16.msra.mxu0 %v14031_v33 }
0x15df   :  { %v7110_v11 = vpop.f32.mrb[252].mxu0  ;;  %v7153_v0 = vpop.f32.mrb[172].mxu1 }
0x15e0   :  { %8596 = vrcp.f32 %v7153_v0  ;;  %v7112_v48 = vpop.f32.mrb[253].mxu0  ;;  %v7155_v19 = vpop.f32.mrb[173].mxu1 }
0x15e1   :  { %8598 = vrcp.f32 %v7155_v19  ;;  %v7114_v13 = vpop.f32.mrb[254].mxu0  ;;  %v7157_v44 = vpop.f32.mrb[174].mxu1 }
0x15e2   :  { %v7116_v5 = vpop.f32.mrb[255].mxu0  ;;  %v7158_v63 = vpop.f32.mrb[175].mxu1 }
0x15ea   :  { %v8597_v57 = vpop.eup %8596 }
0x15eb   :  { %v8599_v3 = vpop.eup %8598  ;;  %v7165_v54 = vrot.slane %v8597_v57, %v14032_v56  ;;  %v8643_v57 = vld [vmem:[%s12949_s0 + $0xd8] sm:$0xff] }
0x15ec   :  { %v7169_v42 = vrot.slane %v8599_v3, %v14032_v56 }
0x15ed   :  { %v7170_v9 = vmul.f32 %v7165_v54, %v7110_v11  ;;  %v7172_v34 = vmul.f32 %v7165_v54, %v7114_v13  ;;  %v8640_v11 = vld [vmem:[%s12949_s0 + $0xc0] sm:$0xff]  ;;  %v8641_v13 = vld [vmem:[%s12949_s0 + $0xc8] sm:$0xff] }
0x15ee   :  { %v7171_v61 = vmul.f32 %v7169_v42, %v7112_v48  ;;  %v7173_v8 = vmul.f32 %v7169_v42, %v7116_v5 }
0x15ef   :  { %v7174_v14 = vpack.c.bf16 %v7172_v34, %v7170_v9  ;;  %v8644_v34 = vld [vmem:[%s12949_s0 + $0xe0] sm:$0xff] }
0x15f0   :  { %v7175_v51 = vpack.c.bf16 %v7173_v8, %v7171_v61 }
0x15f2   :  { %7192 = vmatprep.subr.bf16.mxu0 %v7175_v51  ;;  %v8645_v51 = vld [vmem:[%s12949_s0 + $0xe8] sm:$0xff] }
0x15f3   :  { %7193 = vmatpush1.bf16.msra.mxu0 %v7174_v14 }
0x15f6   :  { %7468 = vmatmul.mubr.msk.bf16.vlgmr.msra.gmra.mrb[0].mxu0 %vm928_vm0, %v8628_v47 }
0x15f7   :  { %7228 = vmatprep.mubr.bf16.mxu0 %v14019_v25 }
0x15fe   :  { %7469 = vmatmul.mubr.msk.bf16.gmra.mrb[4].mxu0 %vm928_vm0, %v8629_v15 }
0x15ff   :  { %7238 = vmatprep.mubr.bf16.mxu0 %v14019_v25 }
0x1606   :  { %7470 = vmatmul.mubr.msk.bf16.gmra.mrb[8].mxu0 %vm928_vm0, %v8630_v7 }
0x1607   :  { %7248 = vmatprep.mubr.bf16.mxu0 %v14019_v25 }
0x160e   :  { %7471 = vmatmul.mubr.msk.bf16.gmra.mrb[12].mxu0 %vm928_vm0, %v8631_v32  ;;  %v8647_v32 = vld [vmem:[%s12949_s0 + $0xf8] sm:$0xff] }
0x16c9   :  { %v7220_v55 = vpop.f32.mrb[0].mxu0 }
0x16ca   :  { %v7221_v20 = vadd.f32 %v7220_v55, %v12655_v6  ;;  %v7222_v35 = vpop.f32.mrb[1].mxu0 }
0x16cb   :  { %v7223_v43 = vadd.f32 %v7222_v35, %v12655_v6  ;;  %v7224_v36 = vpop.f32.mrb[2].mxu0  ;;  %v8634_v6 = vld [vmem:[%s12949_s0 + $0x90] sm:$0xff] }
0x16cc   :  { %v7259_v1 = vadd.f32 %v8632_v21, %v7221_v20  ;;  %v7225_v18 = vadd.f32 %v7224_v36, %v12649_v31  ;;  %v7226_v53 = vpop.f32.mrb[3].mxu0 }
0x16cd   :  { %v7260_v16 = vadd.f32 %v8633_v40, %v7223_v43  ;;  %v7227_v23 = vadd.f32 %v7226_v53, %v12649_v31 }
0x16ce   :  { %7472 = vst [vmem:[%s12956_s7 + $0x80] sm:$0xff] %v7259_v1  ;;  %v7261_v62 = vadd.f32 %v8634_v6, %v7225_v18 }
0x16cf   :  { %7473 = vst [vmem:[%s12956_s7 + $0x88] sm:$0xff] %v7260_v16  ;;  %v7262_v58 = vadd.f32 %v8635_v29, %v7227_v23 }
0x16d0   :  { %7474 = vst [vmem:[%s12956_s7 + $0x90] sm:$0xff] %v7261_v62 }
0x16d1   :  { %7475 = vst [vmem:[%s12956_s7 + $0x98] sm:$0xff] %v7262_v58  ;;  %v7230_v31 = vpop.f32.mrb[4].mxu0 }
0x16d2   :  { %v7231_v59 = vadd.f32 %v7230_v31, %v12667_v27  ;;  %v7232_v41 = vpop.f32.mrb[5].mxu0 }
0x16d3   :  { %v7233_v49 = vadd.f32 %v7232_v41, %v12667_v27  ;;  %v7234_v46 = vpop.f32.mrb[6].mxu0  ;;  %v8638_v27 = vld [vmem:[%s12949_s0 + $0xb0] sm:$0xff] }
0x16d4   :  { %v7263_v25 = vadd.f32 %v8636_v2, %v7231_v59  ;;  %v7235_v24 = vadd.f32 %v7234_v46, %v12685_v17  ;;  %v7236_v10 = vpop.f32.mrb[7].mxu0 }
0x16d5   :  { %v7264_v22 = vadd.f32 %v8637_v4, %v7233_v49  ;;  %v7237_v50 = vadd.f32 %v7236_v10, %v12685_v17 }
0x16d6   :  { %7476 = vst [vmem:[%s12956_s7 + $0xa0] sm:$0xff] %v7263_v25  ;;  %v7265_v52 = vadd.f32 %v8638_v27, %v7235_v24 }
0x16d7   :  { %7477 = vst [vmem:[%s12956_s7 + $0xa8] sm:$0xff] %v7264_v22  ;;  %v7266_v45 = vadd.f32 %v8639_v39, %v7237_v50 }
0x16d8   :  { %7478 = vst [vmem:[%s12956_s7 + $0xb0] sm:$0xff] %v7265_v52 }
0x16d9   :  { %7479 = vst [vmem:[%s12956_s7 + $0xb8] sm:$0xff] %v7266_v45  ;;  %v7240_v17 = vpop.f32.mrb[8].mxu0 }
0x16da   :  { %v7241_v30 = vadd.f32 %v7240_v17, %v12703_v37  ;;  %v7242_v12 = vpop.f32.mrb[9].mxu0 }
0x16db   :  { %v7243_v26 = vadd.f32 %v7242_v12, %v12703_v37  ;;  %v7244_v33 = vpop.f32.mrb[10].mxu0  ;;  %v8642_v37 = vld [vmem:[%s12949_s0 + $0xd0] sm:$0xff] }
0x16dc   :  { %v7267_v0 = vadd.f32 %v8640_v11, %v7241_v30  ;;  %v7245_v48 = vadd.f32 %v7244_v33, %v12721_v38  ;;  %v7246_v19 = vpop.f32.mrb[11].mxu0 }
0x16dd   :  { %v7268_v44 = vadd.f32 %v8641_v13, %v7243_v26  ;;  %v7247_v5 = vadd.f32 %v7246_v19, %v12721_v38 }
0x16de   :  { %7480 = vst [vmem:[%s12956_s7 + $0xc0] sm:$0xff] %v7267_v0  ;;  %v7269_v63 = vadd.f32 %v8642_v37, %v7245_v48 }
0x16df   :  { %7481 = vst [vmem:[%s12956_s7 + $0xc8] sm:$0xff] %v7268_v44  ;;  %v7270_v3 = vadd.f32 %v8643_v57, %v7247_v5 }
0x16e0   :  { %7482 = vst [vmem:[%s12956_s7 + $0xd0] sm:$0xff] %v7269_v63 }
0x16e1   :  { %7483 = vst [vmem:[%s12956_s7 + $0xd8] sm:$0xff] %v7270_v3  ;;  %v7250_v38 = vpop.f32.mrb[12].mxu0 }
0x16e2   :  { %v7251_v56 = vadd.f32 %v7250_v38, %v12739_v28  ;;  %v7252_v54 = vpop.f32.mrb[13].mxu0 }
0x16e3   :  { %v7253_v42 = vadd.f32 %v7252_v54, %v12739_v28  ;;  %v7254_v9 = vpop.f32.mrb[14].mxu0  ;;  %v8646_v28 = vld [vmem:[%s12949_s0 + $0xf0] sm:$0xff] }
0x16e4   :  { %v7271_v61 = vadd.f32 %v8644_v34, %v7251_v56  ;;  %v7255_v8 = vadd.f32 %v7254_v9, %v12757_v60  ;;  %v7256_v14 = vpop.f32.mrb[15].mxu0 }
0x16e5   :  { %v7272_v47 = vadd.f32 %v8645_v51, %v7253_v42  ;;  %v7257_v15 = vadd.f32 %v7256_v14, %v12757_v60 }
0x16e6   :  { %7484 = vst [vmem:[%s12956_s7 + $0xe0] sm:$0xff] %v7271_v61  ;;  %v7273_v7 = vadd.f32 %v8646_v28, %v7255_v8 }
0x16e7   :  { %7485 = vst [vmem:[%s12956_s7 + $0xe8] sm:$0xff] %v7272_v47  ;;  %v7274_v55 = vadd.f32 %v8647_v32, %v7257_v15 }
0x16e8   :  { %7486 = vst [vmem:[%s12956_s7 + $0xf0] sm:$0xff] %v7273_v7 }
0x16e9   :  { %7487 = vst [vmem:[%s12956_s7 + $0xf8] sm:$0xff] %v7274_v55 }

</bundles_post_ra>
